<compile_context>
chip_gen: v6e
topology: v6e:2x2x1
jax: 0.10.0
libtpu: 0.0.40
codegen_flags: <defaults>
</compile_context>

<pallas_src>
import functools

import jax
import jax.numpy as jnp
from jax import lax
from jax.experimental import pallas as pl
from jax.experimental.pallas import tpu as pltpu

_BN_EPS = 1e-5


# ----------------------------------------------------------------------------
# Fused BasicBlock kernel (one image per grid step)
# ----------------------------------------------------------------------------
def _basic_block_kernel(x_ref, mask_ref, w1_ref, s1_ref, b1_ref,
                        w2_ref, s2_ref, b2_ref, *rest, stride, has_proj):
    # x_ref   : (1, H, W, Cin)            input tile (compute dtype)
    # mask_ref: (out_h*(out_w+2), 1) f32  1.0 for valid columns, 0.0 for junk
    # w1_ref  : (9*Cin,  Cout)            conv1 weights, tap-major rows
    # w2_ref  : (9*Cout, Cout)            conv2 weights
    # s*/b*   : (1, Cout) f32             folded BN scale / bias
    # optional wsc_ref (Cin, Cout), ssc_ref, bsc_ref : projection shortcut
    # o_ref   : (1, out_h, out_w, Cout)
    # xpad_ref: ((H+2)*(W+2)+2, Cin)      flat zero-padded input   (VMEM)
    # mpad_ref: ((out_h+2)*(out_w+2)+2, Cout) flat padded conv1 out (VMEM)
    if has_proj:
        wsc_ref, ssc_ref, bsc_ref, o_ref, xpad_ref, mpad_ref = rest
    else:
        o_ref, xpad_ref, mpad_ref = rest
        wsc_ref = ssc_ref = bsc_ref = None

    H, W, Cin = x_ref.shape[1], x_ref.shape[2], x_ref.shape[3]
    out_h, out_w, Cout = o_ref.shape[1], o_ref.shape[2], o_ref.shape[3]
    cdt = xpad_ref.dtype
    Wp = W + 2          # row pitch of the conv1 padded buffer
    Wq = out_w + 2      # row pitch of the conv2 padded buffer

    # ---- stage 0: in-kernel halo padding of x (no XLA jnp.pad round trip) ----
    # flat layout: padded pixel (r, c) lives at sublane r*Wp + c, C on lanes.
    x = x_ref[0]                                             # (H, W, Cin)
    xpad_ref[...] = jnp.zeros(xpad_ref.shape, cdt)
    for h in range(H):
        base = (h + 1) * Wp + 1
        xpad_ref[base:base + W, :] = x[h]

    # ---- stage 1: conv1 (3x3) + BN1 + ReLU as ONE deep-K MXU matmul ----------
    if stride == 1:
        M1 = H * Wp
        # every tap is a contiguous sublane-offset slice of the flat buffer;
        # each output row carries 2 junk columns (masked to zero below).
        col1 = jnp.concatenate(
            [xpad_ref[kh * Wp + kw: kh * Wp + kw + M1, :]
             for kh in range(3) for kw in range(3)], axis=-1)        # (M1, 9Cin)
        acc1 = jnp.dot(col1, w1_ref[...], preferred_element_type=jnp.float32)
        out1 = jnp.maximum(acc1 * s1_ref[...] + b1_ref[...], 0.0)    # (M1, Cout)
        # zero junk columns -> they become the left/right halo of mpad, so ONE
        # contiguous store re-pads the activation for conv2.
        out1 = out1 * mask_ref[...]
        mpad_ref[...] = jnp.zeros(mpad_ref.shape, cdt)
        mpad_ref[Wp + 1: Wp + 1 + M1, :] = out1.astype(cdt)
    else:
        # TODO(synk): strided path, not exercised by the test below.
        xp3 = xpad_ref[0:(H + 2) * Wp, :].reshape(H + 2, Wp, Cin)
        taps = []
        for kh in range(3):
            for kw in range(3):
                t = lax.slice(xp3, (kh, kw, 0),
                              (kh + (out_h - 1) * stride + 1,
                               kw + (out_w - 1) * stride + 1, Cin),
                              (stride, stride, 1))
                taps.append(t.reshape(out_h * out_w, Cin))
        col1 = jnp.concatenate(taps, axis=-1)                        # (oh*ow,9Cin)
        acc1 = jnp.dot(col1, w1_ref[...], preferred_element_type=jnp.float32)
        out1 = jnp.maximum(acc1 * s1_ref[...] + b1_ref[...], 0.0).astype(cdt)
        mpad_ref[...] = jnp.zeros(mpad_ref.shape, cdt)
        for y in range(out_h):
            base = (y + 1) * Wq + 1
            mpad_ref[base:base + out_w, :] = out1[y * out_w:(y + 1) * out_w, :]

    # ---- stage 2: conv2 (3x3, stride 1) + BN2 — same flat deep-K matmul ------
    M2 = out_h * Wq
    col2 = jnp.concatenate(
        [mpad_ref[kh * Wq + kw: kh * Wq + kw + M2, :]
         for kh in range(3) for kw in range(3)], axis=-1)            # (M2, 9Cout)
    acc2 = jnp.dot(col2, w2_ref[...], preferred_element_type=jnp.float32)
    out2 = acc2 * s2_ref[...] + b2_ref[...]                          # (M2, Cout)

    # ---- stage 3: shortcut + residual add + ReLU + store ---------------------
    # residual is read from the VMEM-resident padded input (no extra HBM pass).
    if stride == 1:
        if has_proj:
            xs = xpad_ref[Wp + 1: Wp + 1 + M2, :]                    # (M2, Cin)
            r = jnp.dot(xs, wsc_ref[...], preferred_element_type=jnp.float32)
            res = r * ssc_ref[...] + bsc_ref[...]
        else:   # identity shortcut (Cin == Cout)
            res = xpad_ref[Wp + 1: Wp + 1 + M2, :].astype(jnp.float32)
        yv = jnp.maximum(out2 + res, 0.0)                            # (M2, Cout)
        for yy in range(out_h):                                      # drop junk cols
            o_ref[0, yy, :, :] = yv[yy * Wq: yy * Wq + out_w, :].astype(o_ref.dtype)
    else:
        # projection shortcut is guaranteed when stride != 1
        xs = lax.slice(x, (0, 0, 0),
                       ((out_h - 1) * stride + 1, (out_w - 1) * stride + 1, Cin),
                       (stride, stride, 1)).reshape(out_h * out_w, Cin)
        r = jnp.dot(xs, wsc_ref[...], preferred_element_type=jnp.float32)
        res = r * ssc_ref[...] + bsc_ref[...]                        # (oh*ow, Cout)
        for yy in range(out_h):
            row = out2[yy * Wq: yy * Wq + out_w, :] + res[yy * out_w:(yy + 1) * out_w, :]
            o_ref[0, yy, :, :] = jnp.maximum(row, 0.0).astype(o_ref.dtype)


# ----------------------------------------------------------------------------
# Host-side parameter prep + pallas_call wrapper
# ----------------------------------------------------------------------------
def _fold_bn(gamma, beta, mean, var):
    scale = gamma / jnp.sqrt(var + _BN_EPS)
    bias = beta - mean * scale
    return (scale.reshape(1, -1).astype(jnp.float32),
            bias.reshape(1, -1).astype(jnp.float32))


def _conv3x3_w_to_mat(w_oihw):
    # (O, I, 3, 3) -> (9*I, O); row (kh*3+kw)*I + i multiplies tap (kh, kw), ch i.
    o, i = w_oihw.shape[0], w_oihw.shape[1]
    return jnp.transpose(w_oihw, (2, 3, 1, 0)).reshape(9 * i, o)


def basic_block_forward_nhwc(params, x_nhwc, compute_dtype=jnp.float32):
    N, H, W, Cin = x_nhwc.shape
    stride = params["stride"]
    has_proj = params["has_proj"]
    Cout = params["w1"].shape[0]
    out_h = (H - 1) // stride + 1
    out_w = (W - 1) // stride + 1
    out_dtype = x_nhwc.dtype
    if stride != 1 and not has_proj:
        raise ValueError("stride > 1 requires a projection shortcut")

    w1 = _conv3x3_w_to_mat(params["w1"]).astype(compute_dtype)
    w2 = _conv3x3_w_to_mat(params["w2"]).astype(compute_dtype)
    s1, b1 = _fold_bn(params["bn1_gamma"], params["bn1_beta"],
                      params["bn1_mean"], params["bn1_var"])
    s2, b2 = _fold_bn(params["bn2_gamma"], params["bn2_beta"],
                      params["bn2_mean"], params["bn2_var"])

    # valid-column mask for the flat (row pitch = out_w+2) conv output layout
    m_flat = out_h * (out_w + 2)
    col_ids = jnp.arange(m_flat, dtype=jnp.int32) % (out_w + 2)
    mask = (col_ids < out_w).astype(jnp.float32).reshape(m_flat, 1)

    x = x_nhwc.astype(compute_dtype)
    inputs = [x, mask, w1, s1, b1, w2, s2, b2]
    in_specs = [
        pl.BlockSpec((1, H, W, Cin), lambda n: (n, 0, 0, 0)),
        pl.BlockSpec((m_flat, 1), lambda n: (0, 0)),
        pl.BlockSpec((9 * Cin, Cout), lambda n: (0, 0)),
        pl.BlockSpec((1, Cout), lambda n: (0, 0)),
        pl.BlockSpec((1, Cout), lambda n: (0, 0)),
        pl.BlockSpec((9 * Cout, Cout), lambda n: (0, 0)),
        pl.BlockSpec((1, Cout), lambda n: (0, 0)),
        pl.BlockSpec((1, Cout), lambda n: (0, 0)),
    ]
    if has_proj:
        wsc = jnp.transpose(params["ws"][:, :, 0, 0], (1, 0)).astype(compute_dtype)
        ssc, bsc = _fold_bn(params["bns_gamma"], params["bns_beta"],
                            params["bns_mean"], params["bns_var"])
        inputs += [wsc, ssc, bsc]
        in_specs += [
            pl.BlockSpec((Cin, Cout), lambda n: (0, 0)),
            pl.BlockSpec((1, Cout), lambda n: (0, 0)),
            pl.BlockSpec((1, Cout), lambda n: (0, 0)),
        ]

    kernel = functools.partial(_basic_block_kernel, stride=stride, has_proj=has_proj)

    return pl.pallas_call(
        kernel,
        out_shape=jax.ShapeDtypeStruct((N, out_h, out_w, Cout), out_dtype),
        grid=(N,),
        in_specs=in_specs,
        out_specs=pl.BlockSpec((1, out_h, out_w, Cout), lambda n: (n, 0, 0, 0)),
        scratch_shapes=[
            # +2 rows: the flat tap slices of the last output row read 2 rows past
            # the padded image (junk columns); keep them in-bounds and zeroed.
            pltpu.VMEM(((H + 2) * (W + 2) + 2, Cin), compute_dtype),
            pltpu.VMEM(((out_h + 2) * (out_w + 2) + 2, Cout), compute_dtype),
        ],
        compiler_params=pltpu.CompilerParams(
            dimension_semantics=("parallel",),
            vmem_limit_bytes=32 * 1024 * 1024),
    )(*inputs)


def basic_block_forward(params, x_nchw, compute_dtype=jnp.float32):
    # NCHW wrapper mirroring the PyTorch module; a full network should chain
    # basic_block_forward_nhwc directly and skip these boundary transposes.
    x = jnp.transpose(x_nchw, (0, 2, 3, 1))
    y = basic_block_forward_nhwc(params, x, compute_dtype=compute_dtype)
    return jnp.transpose(y, (0, 3, 1, 2))


# ----------------------------------------------------------------------------
# Parameter init (matches the PyTorch module's parameter set, eval-mode BN)
# ----------------------------------------------------------------------------
def init_basic_block_params(key, in_planes, planes, stride):
    ks = jax.random.split(key, 12)
    p = {}
    p["w1"] = 0.1 * jax.random.normal(ks[0], (planes, in_planes, 3, 3), jnp.float32)
    p["bn1_gamma"] = jax.random.uniform(ks[1], (planes,), jnp.float32, 0.5, 1.5)
    p["bn1_beta"] = 0.1 * jax.random.normal(ks[2], (planes,), jnp.float32)
    p["bn1_mean"] = 0.1 * jax.random.normal(ks[3], (planes,), jnp.float32)
    p["bn1_var"] = jax.random.uniform(ks[4], (planes,), jnp.float32, 0.5, 1.5)
    p["w2"] = 0.1 * jax.random.normal(ks[5], (planes, planes, 3, 3), jnp.float32)
    p["bn2_gamma"] = jax.random.uniform(ks[6], (planes,), jnp.float32, 0.5, 1.5)
    p["bn2_beta"] = 0.1 * jax.random.normal(ks[7], (planes,), jnp.float32)
    p["bn2_mean"] = 0.1 * jax.random.normal(ks[8], (planes,), jnp.float32)
    p["bn2_var"] = jax.random.uniform(ks[9], (planes,), jnp.float32, 0.5, 1.5)
    p["has_proj"] = (stride != 1) or (in_planes != planes)
    if p["has_proj"]:
        p["ws"] = 0.1 * jax.random.normal(ks[10], (planes, in_planes, 1, 1), jnp.float32)
        ks2 = jax.random.split(ks[11], 4)
        p["bns_gamma"] = jax.random.uniform(ks2[0], (planes,), jnp.float32, 0.5, 1.5)
        p["bns_beta"] = 0.1 * jax.random.normal(ks2[1], (planes,), jnp.float32)
        p["bns_mean"] = 0.1 * jax.random.normal(ks2[2], (planes,), jnp.float32)
        p["bns_var"] = jax.random.uniform(ks2[3], (planes,), jnp.float32, 0.5, 1.5)
    p["stride"] = stride
    return p


# ----------------------------------------------------------------------------
# Pure-JAX reference (correctness check)
# ----------------------------------------------------------------------------
def _ref_conv(x, w, stride):
    pad = ((1, 1), (1, 1)) if w.shape[-1] == 3 else ((0, 0), (0, 0))
    return lax.conv_general_dilated(x, w, (stride, stride), pad,
                                    dimension_numbers=("NCHW", "OIHW", "NCHW"))


def _ref_bn(x, gamma, beta, mean, var):
    inv = gamma / jnp.sqrt(var + _BN_EPS)
    return x * inv[None, :, None, None] + (beta - mean * inv)[None, :, None, None]


def basic_block_reference(params, x):
    stride = params["stride"]
    out = jax.nn.relu(_ref_bn(_ref_conv(x, params["w1"], stride),
                              params["bn1_gamma"], params["bn1_beta"],
                              params["bn1_mean"], params["bn1_var"]))
    out = _ref_bn(_ref_conv(out, params["w2"], 1),
                  params["bn2_gamma"], params["bn2_beta"],
                  params["bn2_mean"], params["bn2_var"])
    if params["has_proj"]:
        sc = _ref_bn(_ref_conv(x, params["ws"], stride),
                     params["bns_gamma"], params["bns_beta"],
                     params["bns_mean"], params["bns_var"])
    else:
        sc = x
    return jax.nn.relu(out + sc)


# ----------------------------------------------------------------------------
if __name__ == "__main__":
    key = jax.random.PRNGKey(0)
    k_x, k_p1, k_p2 = jax.random.split(key, 3)

    N, C, H, W = 2, 8, 16, 16
    x = jax.random.normal(k_x, (N, C, H, W), jnp.float32)

    # Config A: identity shortcut (in_planes == planes, stride = 1)
    params_a = init_basic_block_params(k_p1, C, 8, stride=1)
    y_a = jax.block_until_ready(basic_block_forward(params_a, x))
    ref_a = jax.block_until_ready(basic_block_reference(params_a, x))
    assert y_a.shape == ref_a.shape
    assert jnp.allclose(y_a, ref_a, rtol=1e-3, atol=1e-3), "identity-block mismatch"

    # Config B: projection shortcut (in_planes != planes, stride = 1)
    params_b = init_basic_block_params(k_p2, C, 16, stride=1)
    y_b = jax.block_until_ready(basic_block_forward(params_b, x))
    ref_b = jax.block_until_ready(basic_block_reference(params_b, x))
    assert y_b.shape == ref_b.shape
    assert jnp.allclose(y_b, ref_b, rtol=1e-3, atol=1e-3), "projection-block mismatch"

    # bf16 compute path (bf16 MXU matmuls, f32 epilogue) — loose tolerance.
    y_bf = jax.block_until_ready(
        basic_block_forward(params_a, x, compute_dtype=jnp.bfloat16))
    assert jnp.allclose(y_bf, ref_a, rtol=1e-1, atol=1e-1), "bf16-path mismatch"

    print("KERNEL_OK")
</pallas_src>

<mosaic_0001>
module attributes {stable_mosaic.version = 11 : i64} {
  func.func @_basic_block_kernel(%arg0: i32, %arg1: memref<1x16x16x8xf32, #tpu.memory_space<vmem>>, %arg2: memref<288x1xf32, #tpu.memory_space<vmem>>, %arg3: memref<72x8xf32, #tpu.memory_space<vmem>>, %arg4: memref<1x8xf32, #tpu.memory_space<vmem>>, %arg5: memref<1x8xf32, #tpu.memory_space<vmem>>, %arg6: memref<72x8xf32, #tpu.memory_space<vmem>>, %arg7: memref<1x8xf32, #tpu.memory_space<vmem>>, %arg8: memref<1x8xf32, #tpu.memory_space<vmem>>, %arg9: memref<1x16x16x8xf32, #tpu.memory_space<vmem>>, %arg10: memref<326x8xf32, #tpu.memory_space<vmem>>, %arg11: memref<326x8xf32, #tpu.memory_space<vmem>>) attributes {dimension_semantics = [#tpu.dimension_semantics<parallel>], iteration_bounds = array<i64: 2>, scalar_prefetch = 0 : i64, scratch_operands = 2 : i64, tpu.core_type = #tpu.core_type<tc>, window_params = [{transform_indices = @transform_0, window_bounds = array<i64: 1, 16, 16, 8>}, {pipeline_mode = #tpu.pipeline_mode<synchronous>, transform_indices = @transform_1, window_bounds = array<i64: 288, 1>}, {pipeline_mode = #tpu.pipeline_mode<synchronous>, transform_indices = @transform_2, window_bounds = array<i64: 72, 8>}, {pipeline_mode = #tpu.pipeline_mode<synchronous>, transform_indices = @transform_3, window_bounds = array<i64: 1, 8>}, {pipeline_mode = #tpu.pipeline_mode<synchronous>, transform_indices = @transform_4, window_bounds = array<i64: 1, 8>}, {pipeline_mode = #tpu.pipeline_mode<synchronous>, transform_indices = @transform_5, window_bounds = array<i64: 72, 8>}, {pipeline_mode = #tpu.pipeline_mode<synchronous>, transform_indices = @transform_6, window_bounds = array<i64: 1, 8>}, {pipeline_mode = #tpu.pipeline_mode<synchronous>, transform_indices = @transform_7, window_bounds = array<i64: 1, 8>}, {transform_indices = @transform_8, window_bounds = array<i64: 1, 16, 16, 8>}]} {
    %c0 = arith.constant 0 : index
    %c0_0 = arith.constant 0 : index
    %c0_1 = arith.constant 0 : index
    %c0_2 = arith.constant 0 : index
    %0 = vector.load %arg1[%c0, %c0_0, %c0_1, %c0_2] : memref<1x16x16x8xf32, #tpu.memory_space<vmem>>, vector<1x16x16x8xf32>
    %1 = vector.shape_cast %0 : vector<1x16x16x8xf32> to vector<16x16x8xf32>
    %cst = arith.constant 0.000000e+00 : f32
    %2 = vector.broadcast %cst : f32 to vector<326x8xf32>
    %c0_3 = arith.constant 0 : index
    %c0_4 = arith.constant 0 : index
    %3 = vector.load %arg10[%c0_3, %c0_4] : memref<326x8xf32, #tpu.memory_space<vmem>>, vector<326x8xf32>
    tpu.vector_store %arg10[%c0_3, %c0_4], %2 {strides = array<i32>} : memref<326x8xf32, #tpu.memory_space<vmem>>, vector<326x8xf32>,
    %4 = vector.extract_strided_slice %1 {offsets = [0, 0, 0], sizes = [1, 16, 8], strides = [1, 1, 1]} : vector<16x16x8xf32> to vector<1x16x8xf32>
    %5 = vector.shape_cast %4 : vector<1x16x8xf32> to vector<16x8xf32>
    %c19 = arith.constant 19 : index
    %c0_5 = arith.constant 0 : index
    %6 = vector.load %arg10[%c19, %c0_5] : memref<326x8xf32, #tpu.memory_space<vmem>>, vector<16x8xf32>
    tpu.vector_store %arg10[%c19, %c0_5], %5 {strides = array<i32>} : memref<326x8xf32, #tpu.memory_space<vmem>>, vector<16x8xf32>,
    %7 = vector.extract_strided_slice %1 {offsets = [1, 0, 0], sizes = [1, 16, 8], strides = [1, 1, 1]} : vector<16x16x8xf32> to vector<1x16x8xf32>
    %8 = vector.shape_cast %7 : vector<1x16x8xf32> to vector<16x8xf32>
    %c37 = arith.constant 37 : index
    %c0_6 = arith.constant 0 : index
    %9 = vector.load %arg10[%c37, %c0_6] : memref<326x8xf32, #tpu.memory_space<vmem>>, vector<16x8xf32>
    tpu.vector_store %arg10[%c37, %c0_6], %8 {strides = array<i32>} : memref<326x8xf32, #tpu.memory_space<vmem>>, vector<16x8xf32>,
    %10 = vector.extract_strided_slice %1 {offsets = [2, 0, 0], sizes = [1, 16, 8], strides = [1, 1, 1]} : vector<16x16x8xf32> to vector<1x16x8xf32>
    %11 = vector.shape_cast %10 : vector<1x16x8xf32> to vector<16x8xf32>
    %c55 = arith.constant 55 : index
    %c0_7 = arith.constant 0 : index
    %12 = vector.load %arg10[%c55, %c0_7] : memref<326x8xf32, #tpu.memory_space<vmem>>, vector<16x8xf32>
    tpu.vector_store %arg10[%c55, %c0_7], %11 {strides = array<i32>} : memref<326x8xf32, #tpu.memory_space<vmem>>, vector<16x8xf32>,
    %13 = vector.extract_strided_slice %1 {offsets = [3, 0, 0], sizes = [1, 16, 8], strides = [1, 1, 1]} : vector<16x16x8xf32> to vector<1x16x8xf32>
    %14 = vector.shape_cast %13 : vector<1x16x8xf32> to vector<16x8xf32>
    %c73 = arith.constant 73 : index
    %c0_8 = arith.constant 0 : index
    %15 = vector.load %arg10[%c73, %c0_8] : memref<326x8xf32, #tpu.memory_space<vmem>>, vector<16x8xf32>
    tpu.vector_store %arg10[%c73, %c0_8], %14 {strides = array<i32>} : memref<326x8xf32, #tpu.memory_space<vmem>>, vector<16x8xf32>,
    %16 = vector.extract_strided_slice %1 {offsets = [4, 0, 0], sizes = [1, 16, 8], strides = [1, 1, 1]} : vector<16x16x8xf32> to vector<1x16x8xf32>
    %17 = vector.shape_cast %16 : vector<1x16x8xf32> to vector<16x8xf32>
    %c91 = arith.constant 91 : index
    %c0_9 = arith.constant 0 : index
    %18 = vector.load %arg10[%c91, %c0_9] : memref<326x8xf32, #tpu.memory_space<vmem>>, vector<16x8xf32>
    tpu.vector_store %arg10[%c91, %c0_9], %17 {strides = array<i32>} : memref<326x8xf32, #tpu.memory_space<vmem>>, vector<16x8xf32>,
    %19 = vector.extract_strided_slice %1 {offsets = [5, 0, 0], sizes = [1, 16, 8], strides = [1, 1, 1]} : vector<16x16x8xf32> to vector<1x16x8xf32>
    %20 = vector.shape_cast %19 : vector<1x16x8xf32> to vector<16x8xf32>
    %c109 = arith.constant 109 : index
    %c0_10 = arith.constant 0 : index
    %21 = vector.load %arg10[%c109, %c0_10] : memref<326x8xf32, #tpu.memory_space<vmem>>, vector<16x8xf32>
    tpu.vector_store %arg10[%c109, %c0_10], %20 {strides = array<i32>} : memref<326x8xf32, #tpu.memory_space<vmem>>, vector<16x8xf32>,
    %22 = vector.extract_strided_slice %1 {offsets = [6, 0, 0], sizes = [1, 16, 8], strides = [1, 1, 1]} : vector<16x16x8xf32> to vector<1x16x8xf32>
    %23 = vector.shape_cast %22 : vector<1x16x8xf32> to vector<16x8xf32>
    %c127 = arith.constant 127 : index
    %c0_11 = arith.constant 0 : index
    %24 = vector.load %arg10[%c127, %c0_11] : memref<326x8xf32, #tpu.memory_space<vmem>>, vector<16x8xf32>
    tpu.vector_store %arg10[%c127, %c0_11], %23 {strides = array<i32>} : memref<326x8xf32, #tpu.memory_space<vmem>>, vector<16x8xf32>,
    %25 = vector.extract_strided_slice %1 {offsets = [7, 0, 0], sizes = [1, 16, 8], strides = [1, 1, 1]} : vector<16x16x8xf32> to vector<1x16x8xf32>
    %26 = vector.shape_cast %25 : vector<1x16x8xf32> to vector<16x8xf32>
    %c145 = arith.constant 145 : index
    %c0_12 = arith.constant 0 : index
    %27 = vector.load %arg10[%c145, %c0_12] : memref<326x8xf32, #tpu.memory_space<vmem>>, vector<16x8xf32>
    tpu.vector_store %arg10[%c145, %c0_12], %26 {strides = array<i32>} : memref<326x8xf32, #tpu.memory_space<vmem>>, vector<16x8xf32>,
    %28 = vector.extract_strided_slice %1 {offsets = [8, 0, 0], sizes = [1, 16, 8], strides = [1, 1, 1]} : vector<16x16x8xf32> to vector<1x16x8xf32>
    %29 = vector.shape_cast %28 : vector<1x16x8xf32> to vector<16x8xf32>
    %c163 = arith.constant 163 : index
    %c0_13 = arith.constant 0 : index
    %30 = vector.load %arg10[%c163, %c0_13] : memref<326x8xf32, #tpu.memory_space<vmem>>, vector<16x8xf32>
    tpu.vector_store %arg10[%c163, %c0_13], %29 {strides = array<i32>} : memref<326x8xf32, #tpu.memory_space<vmem>>, vector<16x8xf32>,
    %31 = vector.extract_strided_slice %1 {offsets = [9, 0, 0], sizes = [1, 16, 8], strides = [1, 1, 1]} : vector<16x16x8xf32> to vector<1x16x8xf32>
    %32 = vector.shape_cast %31 : vector<1x16x8xf32> to vector<16x8xf32>
    %c181 = arith.constant 181 : index
    %c0_14 = arith.constant 0 : index
    %33 = vector.load %arg10[%c181, %c0_14] : memref<326x8xf32, #tpu.memory_space<vmem>>, vector<16x8xf32>
    tpu.vector_store %arg10[%c181, %c0_14], %32 {strides = array<i32>} : memref<326x8xf32, #tpu.memory_space<vmem>>, vector<16x8xf32>,
    %34 = vector.extract_strided_slice %1 {offsets = [10, 0, 0], sizes = [1, 16, 8], strides = [1, 1, 1]} : vector<16x16x8xf32> to vector<1x16x8xf32>
    %35 = vector.shape_cast %34 : vector<1x16x8xf32> to vector<16x8xf32>
    %c199 = arith.constant 199 : index
    %c0_15 = arith.constant 0 : index
    %36 = vector.load %arg10[%c199, %c0_15] : memref<326x8xf32, #tpu.memory_space<vmem>>, vector<16x8xf32>
    tpu.vector_store %arg10[%c199, %c0_15], %35 {strides = array<i32>} : memref<326x8xf32, #tpu.memory_space<vmem>>, vector<16x8xf32>,
    %37 = vector.extract_strided_slice %1 {offsets = [11, 0, 0], sizes = [1, 16, 8], strides = [1, 1, 1]} : vector<16x16x8xf32> to vector<1x16x8xf32>
    %38 = vector.shape_cast %37 : vector<1x16x8xf32> to vector<16x8xf32>
    %c217 = arith.constant 217 : index
    %c0_16 = arith.constant 0 : index
    %39 = vector.load %arg10[%c217, %c0_16] : memref<326x8xf32, #tpu.memory_space<vmem>>, vector<16x8xf32>
    tpu.vector_store %arg10[%c217, %c0_16], %38 {strides = array<i32>} : memref<326x8xf32, #tpu.memory_space<vmem>>, vector<16x8xf32>,
    %40 = vector.extract_strided_slice %1 {offsets = [12, 0, 0], sizes = [1, 16, 8], strides = [1, 1, 1]} : vector<16x16x8xf32> to vector<1x16x8xf32>
    %41 = vector.shape_cast %40 : vector<1x16x8xf32> to vector<16x8xf32>
    %c235 = arith.constant 235 : index
    %c0_17 = arith.constant 0 : index
    %42 = vector.load %arg10[%c235, %c0_17] : memref<326x8xf32, #tpu.memory_space<vmem>>, vector<16x8xf32>
    tpu.vector_store %arg10[%c235, %c0_17], %41 {strides = array<i32>} : memref<326x8xf32, #tpu.memory_space<vmem>>, vector<16x8xf32>,
    %43 = vector.extract_strided_slice %1 {offsets = [13, 0, 0], sizes = [1, 16, 8], strides = [1, 1, 1]} : vector<16x16x8xf32> to vector<1x16x8xf32>
    %44 = vector.shape_cast %43 : vector<1x16x8xf32> to vector<16x8xf32>
    %c253 = arith.constant 253 : index
    %c0_18 = arith.constant 0 : index
    %45 = vector.load %arg10[%c253, %c0_18] : memref<326x8xf32, #tpu.memory_space<vmem>>, vector<16x8xf32>
    tpu.vector_store %arg10[%c253, %c0_18], %44 {strides = array<i32>} : memref<326x8xf32, #tpu.memory_space<vmem>>, vector<16x8xf32>,
    %46 = vector.extract_strided_slice %1 {offsets = [14, 0, 0], sizes = [1, 16, 8], strides = [1, 1, 1]} : vector<16x16x8xf32> to vector<1x16x8xf32>
    %47 = vector.shape_cast %46 : vector<1x16x8xf32> to vector<16x8xf32>
    %c271 = arith.constant 271 : index
    %c0_19 = arith.constant 0 : index
    %48 = vector.load %arg10[%c271, %c0_19] : memref<326x8xf32, #tpu.memory_space<vmem>>, vector<16x8xf32>
    tpu.vector_store %arg10[%c271, %c0_19], %47 {strides = array<i32>} : memref<326x8xf32, #tpu.memory_space<vmem>>, vector<16x8xf32>,
    %49 = vector.extract_strided_slice %1 {offsets = [15, 0, 0], sizes = [1, 16, 8], strides = [1, 1, 1]} : vector<16x16x8xf32> to vector<1x16x8xf32>
    %50 = vector.shape_cast %49 : vector<1x16x8xf32> to vector<16x8xf32>
    %c289 = arith.constant 289 : index
    %c0_20 = arith.constant 0 : index
    %51 = vector.load %arg10[%c289, %c0_20] : memref<326x8xf32, #tpu.memory_space<vmem>>, vector<16x8xf32>
    tpu.vector_store %arg10[%c289, %c0_20], %50 {strides = array<i32>} : memref<326x8xf32, #tpu.memory_space<vmem>>, vector<16x8xf32>,
    %c0_21 = arith.constant 0 : index
    %c0_22 = arith.constant 0 : index
    %52 = vector.load %arg10[%c0_21, %c0_22] : memref<326x8xf32, #tpu.memory_space<vmem>>, vector<288x8xf32>
    %c1 = arith.constant 1 : index
    %c0_23 = arith.constant 0 : index
    %53 = vector.load %arg10[%c1, %c0_23] : memref<326x8xf32, #tpu.memory_space<vmem>>, vector<288x8xf32>
    %c2 = arith.constant 2 : index
    %c0_24 = arith.constant 0 : index
    %54 = vector.load %arg10[%c2, %c0_24] : memref<326x8xf32, #tpu.memory_space<vmem>>, vector<288x8xf32>
    %c18 = arith.constant 18 : index
    %c0_25 = arith.constant 0 : index
    %55 = vector.load %arg10[%c18, %c0_25] : memref<326x8xf32, #tpu.memory_space<vmem>>, vector<288x8xf32>
    %c19_26 = arith.constant 19 : index
    %c0_27 = arith.constant 0 : index
    %56 = vector.load %arg10[%c19_26, %c0_27] : memref<326x8xf32, #tpu.memory_space<vmem>>, vector<288x8xf32>
    %c20 = arith.constant 20 : index
    %c0_28 = arith.constant 0 : index
    %57 = vector.load %arg10[%c20, %c0_28] : memref<326x8xf32, #tpu.memory_space<vmem>>, vector<288x8xf32>
    %c36 = arith.constant 36 : index
    %c0_29 = arith.constant 0 : index
    %58 = vector.load %arg10[%c36, %c0_29] : memref<326x8xf32, #tpu.memory_space<vmem>>, vector<288x8xf32>
    %c37_30 = arith.constant 37 : index
    %c0_31 = arith.constant 0 : index
    %59 = vector.load %arg10[%c37_30, %c0_31] : memref<326x8xf32, #tpu.memory_space<vmem>>, vector<288x8xf32>
    %c38 = arith.constant 38 : index
    %c0_32 = arith.constant 0 : index
    %60 = vector.load %arg10[%c38, %c0_32] : memref<326x8xf32, #tpu.memory_space<vmem>>, vector<288x8xf32>
    %61 = tpu.concatenate %52, %53, %54, %55, %56, %57, %58, %59, %60 in 1 : vector<288x8xf32>, vector<288x8xf32>, vector<288x8xf32>, vector<288x8xf32>, vector<288x8xf32>, vector<288x8xf32>, vector<288x8xf32>, vector<288x8xf32>, vector<288x8xf32> -> vector<288x72xf32>
    %c0_33 = arith.constant 0 : index
    %c0_34 = arith.constant 0 : index
    %62 = vector.load %arg3[%c0_33, %c0_34] : memref<72x8xf32, #tpu.memory_space<vmem>>, vector<72x8xf32>
    %cst_35 = arith.constant dense<0.000000e+00> : vector<288x8xf32>
    %63 = tpu.matmul %61, %62, %cst_35 {dimension_numbers = #tpu.dot_dimension_numbers<[1], [0], [0], [1], [0, 0, 1, 1], [], []>} : vector<288x72xf32>, vector<72x8xf32>, vector<288x8xf32> -> vector<288x8xf32>
    %c0_36 = arith.constant 0 : index
    %c0_37 = arith.constant 0 : index
    %64 = vector.load %arg4[%c0_36, %c0_37] : memref<1x8xf32, #tpu.memory_space<vmem>>, vector<1x8xf32>
    %65 = vector.broadcast %64 : vector<1x8xf32> to vector<288x8xf32>
    %66 = arith.mulf %63, %65 : vector<288x8xf32>
    %c0_38 = arith.constant 0 : index
    %c0_39 = arith.constant 0 : index
    %67 = vector.load %arg5[%c0_38, %c0_39] : memref<1x8xf32, #tpu.memory_space<vmem>>, vector<1x8xf32>
    %68 = vector.broadcast %67 : vector<1x8xf32> to vector<288x8xf32>
    %69 = arith.addf %66, %68 : vector<288x8xf32>
    %cst_40 = arith.constant 0.000000e+00 : f32
    %70 = vector.broadcast %cst_40 : f32 to vector<288x8xf32>
    %71 = arith.maximumf %69, %70 : vector<288x8xf32>
    %c0_41 = arith.constant 0 : index
    %c0_42 = arith.constant 0 : index
    %72 = vector.load %arg2[%c0_41, %c0_42] : memref<288x1xf32, #tpu.memory_space<vmem>>, vector<288x1xf32>
    %73 = vector.broadcast %72 : vector<288x1xf32> to vector<288x8xf32>
    %74 = arith.mulf %71, %73 : vector<288x8xf32>
    %cst_43 = arith.constant 0.000000e+00 : f32
    %75 = vector.broadcast %cst_43 : f32 to vector<326x8xf32>
    %c0_44 = arith.constant 0 : index
    %c0_45 = arith.constant 0 : index
    %76 = vector.load %arg11[%c0_44, %c0_45] : memref<326x8xf32, #tpu.memory_space<vmem>>, vector<326x8xf32>
    tpu.vector_store %arg11[%c0_44, %c0_45], %75 {strides = array<i32>} : memref<326x8xf32, #tpu.memory_space<vmem>>, vector<326x8xf32>,
    %c19_46 = arith.constant 19 : index
    %c0_47 = arith.constant 0 : index
    %77 = vector.load %arg11[%c19_46, %c0_47] : memref<326x8xf32, #tpu.memory_space<vmem>>, vector<288x8xf32>
    tpu.vector_store %arg11[%c19_46, %c0_47], %74 {strides = array<i32>} : memref<326x8xf32, #tpu.memory_space<vmem>>, vector<288x8xf32>,
    %c0_48 = arith.constant 0 : index
    %c0_49 = arith.constant 0 : index
    %78 = vector.load %arg11[%c0_48, %c0_49] : memref<326x8xf32, #tpu.memory_space<vmem>>, vector<288x8xf32>
    %c1_50 = arith.constant 1 : index
    %c0_51 = arith.constant 0 : index
    %79 = vector.load %arg11[%c1_50, %c0_51] : memref<326x8xf32, #tpu.memory_space<vmem>>, vector<288x8xf32>
    %c2_52 = arith.constant 2 : index
    %c0_53 = arith.constant 0 : index
    %80 = vector.load %arg11[%c2_52, %c0_53] : memref<326x8xf32, #tpu.memory_space<vmem>>, vector<288x8xf32>
    %c18_54 = arith.constant 18 : index
    %c0_55 = arith.constant 0 : index
    %81 = vector.load %arg11[%c18_54, %c0_55] : memref<326x8xf32, #tpu.memory_space<vmem>>, vector<288x8xf32>
    %c19_56 = arith.constant 19 : index
    %c0_57 = arith.constant 0 : index
    %82 = vector.load %arg11[%c19_56, %c0_57] : memref<326x8xf32, #tpu.memory_space<vmem>>, vector<288x8xf32>
    %c20_58 = arith.constant 20 : index
    %c0_59 = arith.constant 0 : index
    %83 = vector.load %arg11[%c20_58, %c0_59] : memref<326x8xf32, #tpu.memory_space<vmem>>, vector<288x8xf32>
    %c36_60 = arith.constant 36 : index
    %c0_61 = arith.constant 0 : index
    %84 = vector.load %arg11[%c36_60, %c0_61] : memref<326x8xf32, #tpu.memory_space<vmem>>, vector<288x8xf32>
    %c37_62 = arith.constant 37 : index
    %c0_63 = arith.constant 0 : index
    %85 = vector.load %arg11[%c37_62, %c0_63] : memref<326x8xf32, #tpu.memory_space<vmem>>, vector<288x8xf32>
    %c38_64 = arith.constant 38 : index
    %c0_65 = arith.constant 0 : index
    %86 = vector.load %arg11[%c38_64, %c0_65] : memref<326x8xf32, #tpu.memory_space<vmem>>, vector<288x8xf32>
    %87 = tpu.concatenate %78, %79, %80, %81, %82, %83, %84, %85, %86 in 1 : vector<288x8xf32>, vector<288x8xf32>, vector<288x8xf32>, vector<288x8xf32>, vector<288x8xf32>, vector<288x8xf32>, vector<288x8xf32>, vector<288x8xf32>, vector<288x8xf32> -> vector<288x72xf32>
    %c0_66 = arith.constant 0 : index
    %c0_67 = arith.constant 0 : index
    %88 = vector.load %arg6[%c0_66, %c0_67] : memref<72x8xf32, #tpu.memory_space<vmem>>, vector<72x8xf32>
    %cst_68 = arith.constant dense<0.000000e+00> : vector<288x8xf32>
    %89 = tpu.matmul %87, %88, %cst_68 {dimension_numbers = #tpu.dot_dimension_numbers<[1], [0], [0], [1], [0, 0, 1, 1], [], []>} : vector<288x72xf32>, vector<72x8xf32>, vector<288x8xf32> -> vector<288x8xf32>
    %c0_69 = arith.constant 0 : index
    %c0_70 = arith.constant 0 : index
    %90 = vector.load %arg7[%c0_69, %c0_70] : memref<1x8xf32, #tpu.memory_space<vmem>>, vector<1x8xf32>
    %91 = vector.broadcast %90 : vector<1x8xf32> to vector<288x8xf32>
    %92 = arith.mulf %89, %91 : vector<288x8xf32>
    %c0_71 = arith.constant 0 : index
    %c0_72 = arith.constant 0 : index
    %93 = vector.load %arg8[%c0_71, %c0_72] : memref<1x8xf32, #tpu.memory_space<vmem>>, vector<1x8xf32>
    %94 = vector.broadcast %93 : vector<1x8xf32> to vector<288x8xf32>
    %95 = arith.addf %92, %94 : vector<288x8xf32>
    %c19_73 = arith.constant 19 : index
    %c0_74 = arith.constant 0 : index
    %96 = vector.load %arg10[%c19_73, %c0_74] : memref<326x8xf32, #tpu.memory_space<vmem>>, vector<288x8xf32>
    %97 = arith.addf %95, %96 : vector<288x8xf32>
    %cst_75 = arith.constant 0.000000e+00 : f32
    %98 = vector.broadcast %cst_75 : f32 to vector<288x8xf32>
    %99 = arith.maximumf %97, %98 : vector<288x8xf32>
    %100 = vector.extract_strided_slice %99 {offsets = [0, 0], sizes = [16, 8], strides = [1, 1]} : vector<288x8xf32> to vector<16x8xf32>
    %c0_76 = arith.constant 0 : index
    %c0_77 = arith.constant 0 : index
    %c0_78 = arith.constant 0 : index
    %c0_79 = arith.constant 0 : index
    %101 = vector.load %arg9[%c0_76, %c0_77, %c0_78, %c0_79] : memref<1x16x16x8xf32, #tpu.memory_space<vmem>>, vector<1x1x16x8xf32>
    %102 = vector.shape_cast %101 : vector<1x1x16x8xf32> to vector<16x8xf32>
    %103 = vector.shape_cast %100 : vector<16x8xf32> to vector<1x1x16x8xf32>
    tpu.vector_store %arg9[%c0_76, %c0_77, %c0_78, %c0_79], %103 {strides = array<i32>} : memref<1x16x16x8xf32, #tpu.memory_space<vmem>>, vector<1x1x16x8xf32>,
    %104 = vector.extract_strided_slice %99 {offsets = [18, 0], sizes = [16, 8], strides = [1, 1]} : vector<288x8xf32> to vector<16x8xf32>
    %c0_80 = arith.constant 0 : index
    %c1_81 = arith.constant 1 : index
    %c0_82 = arith.constant 0 : index
    %c0_83 = arith.constant 0 : index
    %105 = vector.load %arg9[%c0_80, %c1_81, %c0_82, %c0_83] : memref<1x16x16x8xf32, #tpu.memory_space<vmem>>, vector<1x1x16x8xf32>
    %106 = vector.shape_cast %105 : vector<1x1x16x8xf32> to vector<16x8xf32>
    %107 = vector.shape_cast %104 : vector<16x8xf32> to vector<1x1x16x8xf32>
    tpu.vector_store %arg9[%c0_80, %c1_81, %c0_82, %c0_83], %107 {strides = array<i32>} : memref<1x16x16x8xf32, #tpu.memory_space<vmem>>, vector<1x1x16x8xf32>,
    %108 = vector.extract_strided_slice %99 {offsets = [36, 0], sizes = [16, 8], strides = [1, 1]} : vector<288x8xf32> to vector<16x8xf32>
    %c0_84 = arith.constant 0 : index
    %c2_85 = arith.constant 2 : index
    %c0_86 = arith.constant 0 : index
    %c0_87 = arith.constant 0 : index
    %109 = vector.load %arg9[%c0_84, %c2_85, %c0_86, %c0_87] : memref<1x16x16x8xf32, #tpu.memory_space<vmem>>, vector<1x1x16x8xf32>
    %110 = vector.shape_cast %109 : vector<1x1x16x8xf32> to vector<16x8xf32>
    %111 = vector.shape_cast %108 : vector<16x8xf32> to vector<1x1x16x8xf32>
    tpu.vector_store %arg9[%c0_84, %c2_85, %c0_86, %c0_87], %111 {strides = array<i32>} : memref<1x16x16x8xf32, #tpu.memory_space<vmem>>, vector<1x1x16x8xf32>,
    %112 = vector.extract_strided_slice %99 {offsets = [54, 0], sizes = [16, 8], strides = [1, 1]} : vector<288x8xf32> to vector<16x8xf32>
    %c0_88 = arith.constant 0 : index
    %c3 = arith.constant 3 : index
    %c0_89 = arith.constant 0 : index
    %c0_90 = arith.constant 0 : index
    %113 = vector.load %arg9[%c0_88, %c3, %c0_89, %c0_90] : memref<1x16x16x8xf32, #tpu.memory_space<vmem>>, vector<1x1x16x8xf32>
    %114 = vector.shape_cast %113 : vector<1x1x16x8xf32> to vector<16x8xf32>
    %115 = vector.shape_cast %112 : vector<16x8xf32> to vector<1x1x16x8xf32>
    tpu.vector_store %arg9[%c0_88, %c3, %c0_89, %c0_90], %115 {strides = array<i32>} : memref<1x16x16x8xf32, #tpu.memory_space<vmem>>, vector<1x1x16x8xf32>,
    %116 = vector.extract_strided_slice %99 {offsets = [72, 0], sizes = [16, 8], strides = [1, 1]} : vector<288x8xf32> to vector<16x8xf32>
    %c0_91 = arith.constant 0 : index
    %c4 = arith.constant 4 : index
    %c0_92 = arith.constant 0 : index
    %c0_93 = arith.constant 0 : index
    %117 = vector.load %arg9[%c0_91, %c4, %c0_92, %c0_93] : memref<1x16x16x8xf32, #tpu.memory_space<vmem>>, vector<1x1x16x8xf32>
    %118 = vector.shape_cast %117 : vector<1x1x16x8xf32> to vector<16x8xf32>
    %119 = vector.shape_cast %116 : vector<16x8xf32> to vector<1x1x16x8xf32>
    tpu.vector_store %arg9[%c0_91, %c4, %c0_92, %c0_93], %119 {strides = array<i32>} : memref<1x16x16x8xf32, #tpu.memory_space<vmem>>, vector<1x1x16x8xf32>,
    %120 = vector.extract_strided_slice %99 {offsets = [90, 0], sizes = [16, 8], strides = [1, 1]} : vector<288x8xf32> to vector<16x8xf32>
    %c0_94 = arith.constant 0 : index
    %c5 = arith.constant 5 : index
    %c0_95 = arith.constant 0 : index
    %c0_96 = arith.constant 0 : index
    %121 = vector.load %arg9[%c0_94, %c5, %c0_95, %c0_96] : memref<1x16x16x8xf32, #tpu.memory_space<vmem>>, vector<1x1x16x8xf32>
    %122 = vector.shape_cast %121 : vector<1x1x16x8xf32> to vector<16x8xf32>
    %123 = vector.shape_cast %120 : vector<16x8xf32> to vector<1x1x16x8xf32>
    tpu.vector_store %arg9[%c0_94, %c5, %c0_95, %c0_96], %123 {strides = array<i32>} : memref<1x16x16x8xf32, #tpu.memory_space<vmem>>, vector<1x1x16x8xf32>,
    %124 = vector.extract_strided_slice %99 {offsets = [108, 0], sizes = [16, 8], strides = [1, 1]} : vector<288x8xf32> to vector<16x8xf32>
    %c0_97 = arith.constant 0 : index
    %c6 = arith.constant 6 : index
    %c0_98 = arith.constant 0 : index
    %c0_99 = arith.constant 0 : index
    %125 = vector.load %arg9[%c0_97, %c6, %c0_98, %c0_99] : memref<1x16x16x8xf32, #tpu.memory_space<vmem>>, vector<1x1x16x8xf32>
    %126 = vector.shape_cast %125 : vector<1x1x16x8xf32> to vector<16x8xf32>
    %127 = vector.shape_cast %124 : vector<16x8xf32> to vector<1x1x16x8xf32>
    tpu.vector_store %arg9[%c0_97, %c6, %c0_98, %c0_99], %127 {strides = array<i32>} : memref<1x16x16x8xf32, #tpu.memory_space<vmem>>, vector<1x1x16x8xf32>,
    %128 = vector.extract_strided_slice %99 {offsets = [126, 0], sizes = [16, 8], strides = [1, 1]} : vector<288x8xf32> to vector<16x8xf32>
    %c0_100 = arith.constant 0 : index
    %c7 = arith.constant 7 : index
    %c0_101 = arith.constant 0 : index
    %c0_102 = arith.constant 0 : index
    %129 = vector.load %arg9[%c0_100, %c7, %c0_101, %c0_102] : memref<1x16x16x8xf32, #tpu.memory_space<vmem>>, vector<1x1x16x8xf32>
    %130 = vector.shape_cast %129 : vector<1x1x16x8xf32> to vector<16x8xf32>
    %131 = vector.shape_cast %128 : vector<16x8xf32> to vector<1x1x16x8xf32>
    tpu.vector_store %arg9[%c0_100, %c7, %c0_101, %c0_102], %131 {strides = array<i32>} : memref<1x16x16x8xf32, #tpu.memory_space<vmem>>, vector<1x1x16x8xf32>,
    %132 = vector.extract_strided_slice %99 {offsets = [144, 0], sizes = [16, 8], strides = [1, 1]} : vector<288x8xf32> to vector<16x8xf32>
    %c0_103 = arith.constant 0 : index
    %c8 = arith.constant 8 : index
    %c0_104 = arith.constant 0 : index
    %c0_105 = arith.constant 0 : index
    %133 = vector.load %arg9[%c0_103, %c8, %c0_104, %c0_105] : memref<1x16x16x8xf32, #tpu.memory_space<vmem>>, vector<1x1x16x8xf32>
    %134 = vector.shape_cast %133 : vector<1x1x16x8xf32> to vector<16x8xf32>
    %135 = vector.shape_cast %132 : vector<16x8xf32> to vector<1x1x16x8xf32>
    tpu.vector_store %arg9[%c0_103, %c8, %c0_104, %c0_105], %135 {strides = array<i32>} : memref<1x16x16x8xf32, #tpu.memory_space<vmem>>, vector<1x1x16x8xf32>,
    %136 = vector.extract_strided_slice %99 {offsets = [162, 0], sizes = [16, 8], strides = [1, 1]} : vector<288x8xf32> to vector<16x8xf32>
    %c0_106 = arith.constant 0 : index
    %c9 = arith.constant 9 : index
    %c0_107 = arith.constant 0 : index
    %c0_108 = arith.constant 0 : index
    %137 = vector.load %arg9[%c0_106, %c9, %c0_107, %c0_108] : memref<1x16x16x8xf32, #tpu.memory_space<vmem>>, vector<1x1x16x8xf32>
    %138 = vector.shape_cast %137 : vector<1x1x16x8xf32> to vector<16x8xf32>
    %139 = vector.shape_cast %136 : vector<16x8xf32> to vector<1x1x16x8xf32>
    tpu.vector_store %arg9[%c0_106, %c9, %c0_107, %c0_108], %139 {strides = array<i32>} : memref<1x16x16x8xf32, #tpu.memory_space<vmem>>, vector<1x1x16x8xf32>,
    %140 = vector.extract_strided_slice %99 {offsets = [180, 0], sizes = [16, 8], strides = [1, 1]} : vector<288x8xf32> to vector<16x8xf32>
    %c0_109 = arith.constant 0 : index
    %c10 = arith.constant 10 : index
    %c0_110 = arith.constant 0 : index
    %c0_111 = arith.constant 0 : index
    %141 = vector.load %arg9[%c0_109, %c10, %c0_110, %c0_111] : memref<1x16x16x8xf32, #tpu.memory_space<vmem>>, vector<1x1x16x8xf32>
    %142 = vector.shape_cast %141 : vector<1x1x16x8xf32> to vector<16x8xf32>
    %143 = vector.shape_cast %140 : vector<16x8xf32> to vector<1x1x16x8xf32>
    tpu.vector_store %arg9[%c0_109, %c10, %c0_110, %c0_111], %143 {strides = array<i32>} : memref<1x16x16x8xf32, #tpu.memory_space<vmem>>, vector<1x1x16x8xf32>,
    %144 = vector.extract_strided_slice %99 {offsets = [198, 0], sizes = [16, 8], strides = [1, 1]} : vector<288x8xf32> to vector<16x8xf32>
    %c0_112 = arith.constant 0 : index
    %c11 = arith.constant 11 : index
    %c0_113 = arith.constant 0 : index
    %c0_114 = arith.constant 0 : index
    %145 = vector.load %arg9[%c0_112, %c11, %c0_113, %c0_114] : memref<1x16x16x8xf32, #tpu.memory_space<vmem>>, vector<1x1x16x8xf32>
    %146 = vector.shape_cast %145 : vector<1x1x16x8xf32> to vector<16x8xf32>
    %147 = vector.shape_cast %144 : vector<16x8xf32> to vector<1x1x16x8xf32>
    tpu.vector_store %arg9[%c0_112, %c11, %c0_113, %c0_114], %147 {strides = array<i32>} : memref<1x16x16x8xf32, #tpu.memory_space<vmem>>, vector<1x1x16x8xf32>,
    %148 = vector.extract_strided_slice %99 {offsets = [216, 0], sizes = [16, 8], strides = [1, 1]} : vector<288x8xf32> to vector<16x8xf32>
    %c0_115 = arith.constant 0 : index
    %c12 = arith.constant 12 : index
    %c0_116 = arith.constant 0 : index
    %c0_117 = arith.constant 0 : index
    %149 = vector.load %arg9[%c0_115, %c12, %c0_116, %c0_117] : memref<1x16x16x8xf32, #tpu.memory_space<vmem>>, vector<1x1x16x8xf32>
    %150 = vector.shape_cast %149 : vector<1x1x16x8xf32> to vector<16x8xf32>
    %151 = vector.shape_cast %148 : vector<16x8xf32> to vector<1x1x16x8xf32>
    tpu.vector_store %arg9[%c0_115, %c12, %c0_116, %c0_117], %151 {strides = array<i32>} : memref<1x16x16x8xf32, #tpu.memory_space<vmem>>, vector<1x1x16x8xf32>,
    %152 = vector.extract_strided_slice %99 {offsets = [234, 0], sizes = [16, 8], strides = [1, 1]} : vector<288x8xf32> to vector<16x8xf32>
    %c0_118 = arith.constant 0 : index
    %c13 = arith.constant 13 : index
    %c0_119 = arith.constant 0 : index
    %c0_120 = arith.constant 0 : index
    %153 = vector.load %arg9[%c0_118, %c13, %c0_119, %c0_120] : memref<1x16x16x8xf32, #tpu.memory_space<vmem>>, vector<1x1x16x8xf32>
    %154 = vector.shape_cast %153 : vector<1x1x16x8xf32> to vector<16x8xf32>
    %155 = vector.shape_cast %152 : vector<16x8xf32> to vector<1x1x16x8xf32>
    tpu.vector_store %arg9[%c0_118, %c13, %c0_119, %c0_120], %155 {strides = array<i32>} : memref<1x16x16x8xf32, #tpu.memory_space<vmem>>, vector<1x1x16x8xf32>,
    %156 = vector.extract_strided_slice %99 {offsets = [252, 0], sizes = [16, 8], strides = [1, 1]} : vector<288x8xf32> to vector<16x8xf32>
    %c0_121 = arith.constant 0 : index
    %c14 = arith.constant 14 : index
    %c0_122 = arith.constant 0 : index
    %c0_123 = arith.constant 0 : index
    %157 = vector.load %arg9[%c0_121, %c14, %c0_122, %c0_123] : memref<1x16x16x8xf32, #tpu.memory_space<vmem>>, vector<1x1x16x8xf32>
    %158 = vector.shape_cast %157 : vector<1x1x16x8xf32> to vector<16x8xf32>
    %159 = vector.shape_cast %156 : vector<16x8xf32> to vector<1x1x16x8xf32>
    tpu.vector_store %arg9[%c0_121, %c14, %c0_122, %c0_123], %159 {strides = array<i32>} : memref<1x16x16x8xf32, #tpu.memory_space<vmem>>, vector<1x1x16x8xf32>,
    %160 = vector.extract_strided_slice %99 {offsets = [270, 0], sizes = [16, 8], strides = [1, 1]} : vector<288x8xf32> to vector<16x8xf32>
    %c0_124 = arith.constant 0 : index
    %c15 = arith.constant 15 : index
    %c0_125 = arith.constant 0 : index
    %c0_126 = arith.constant 0 : index
    %161 = vector.load %arg9[%c0_124, %c15, %c0_125, %c0_126] : memref<1x16x16x8xf32, #tpu.memory_space<vmem>>, vector<1x1x16x8xf32>
    %162 = vector.shape_cast %161 : vector<1x1x16x8xf32> to vector<16x8xf32>
    %163 = vector.shape_cast %160 : vector<16x8xf32> to vector<1x1x16x8xf32>
    tpu.vector_store %arg9[%c0_124, %c15, %c0_125, %c0_126], %163 {strides = array<i32>} : memref<1x16x16x8xf32, #tpu.memory_space<vmem>>, vector<1x1x16x8xf32>,
    return
  }
  func.func @transform_0(%arg0: i32) -> (i32, i32, i32, i32) {
    %c0_i32 = arith.constant 0 : i32
    %c0_i32_0 = arith.constant 0 : i32
    %c0_i32_1 = arith.constant 0 : i32
    %c0_i32_2 = arith.constant 0 : i32
    return %arg0, %c0_i32, %c0_i32_0, %c0_i32_1 : i32, i32, i32, i32
  }
  func.func @transform_1(%arg0: i32) -> (i32, i32) {
    %c0_i32 = arith.constant 0 : i32
    %c0_i32_0 = arith.constant 0 : i32
    %c0_i32_1 = arith.constant 0 : i32
    return %c0_i32, %c0_i32_0 : i32, i32
  }
  func.func @transform_2(%arg0: i32) -> (i32, i32) {
    %c0_i32 = arith.constant 0 : i32
    %c0_i32_0 = arith.constant 0 : i32
    %c0_i32_1 = arith.constant 0 : i32
    return %c0_i32, %c0_i32_0 : i32, i32
  }
  func.func @transform_3(%arg0: i32) -> (i32, i32) {
    %c0_i32 = arith.constant 0 : i32
    %c0_i32_0 = arith.constant 0 : i32
    %c0_i32_1 = arith.constant 0 : i32
    return %c0_i32, %c0_i32_0 : i32, i32
  }
  func.func @transform_4(%arg0: i32) -> (i32, i32) {
    %c0_i32 = arith.constant 0 : i32
    %c0_i32_0 = arith.constant 0 : i32
    %c0_i32_1 = arith.constant 0 : i32
    return %c0_i32, %c0_i32_0 : i32, i32
  }
  func.func @transform_5(%arg0: i32) -> (i32, i32) {
    %c0_i32 = arith.constant 0 : i32
    %c0_i32_0 = arith.constant 0 : i32
    %c0_i32_1 = arith.constant 0 : i32
    return %c0_i32, %c0_i32_0 : i32, i32
  }
  func.func @transform_6(%arg0: i32) -> (i32, i32) {
    %c0_i32 = arith.constant 0 : i32
    %c0_i32_0 = arith.constant 0 : i32
    %c0_i32_1 = arith.constant 0 : i32
    return %c0_i32, %c0_i32_0 : i32, i32
  }
  func.func @transform_7(%arg0: i32) -> (i32, i32) {
    %c0_i32 = arith.constant 0 : i32
    %c0_i32_0 = arith.constant 0 : i32
    %c0_i32_1 = arith.constant 0 : i32
    return %c0_i32, %c0_i32_0 : i32, i32
  }
  func.func @transform_8(%arg0: i32) -> (i32, i32, i32, i32) {
    %c0_i32 = arith.constant 0 : i32
    %c0_i32_0 = arith.constant 0 : i32
    %c0_i32_1 = arith.constant 0 : i32
    %c0_i32_2 = arith.constant 0 : i32
    return %arg0, %c0_i32, %c0_i32_0, %c0_i32_1 : i32, i32, i32, i32
  }
}

</mosaic_0001>

<bundles_post_ra>
// kernel: tpu_custom_call.1
= control target key start
LH: loop header
LB: loop body
LE: loop exit
PB: predicated region body
PF: predicated region fallthrough
CT: control target
= control target key end

     0   :  { %s5613_s27 = smov 0   ;;  %s9143_s0 = inlined_call_operand.vmem [shape: f32[2,16,16,8], index: 0, kind: input, shape index: {}]   ;;  %s9144_s1 = inlined_call_operand.vmem [shape: f32[288,1], index: 1, kind: input, shape index: {}]   ;;  %s9145_s2 = inlined_call_operand.vmem [shape: f32[72,8], index: 2, kind: input, shape index: {}]   ;;  %s9146_s3 = inlined_call_operand.vmem [shape: f32[1,8], index: 3, kind: input, shape index: {}]   ;;  %s9147_s4 = inlined_call_operand.vmem [shape: f32[1,8], index: 4, kind: input, shape index: {}]   ;;  %s9148_s5 = inlined_call_operand.vmem [shape: f32[72,8], index: 5, kind: input, shape index: {}]   ;;  %s9149_s6 = inlined_call_operand.vmem [shape: f32[1,8], index: 6, kind: input, shape index: {}]   ;;  %s9150_s7 = inlined_call_operand.vmem [shape: f32[1,8], index: 7, kind: input, shape index: {}]   ;;  %s9151_s8 = inlined_call_operand.vmem [shape: f32[2,16,16,8], index: 8, kind: output, shape index: {}]  }
   0x1 LB: > { %s5165_s28 = sadd.s32 4294967295, %s5556_s27   ;;  %p5169_p0 = scmp.ge.s32.totalorder %s5556_s27, 1  ;;  %s5556_s27 = sphi %s5613_s27, %s18_s27  }
   0x2   : > { %p262_p1 = scmp.lt.s32.totalorder %s5556_s27, 3 }
   0x4   : > { %p263_p2 = pnand %p5169_p0, %p262_p1 }
   0x6   : > { %266 = sbr.rel (%p263_p2) target bundleno = 1788 (0x6fc), region = 52 }
   0xb   : > { %vm338_vm0 = vcmask 64512   ;;  %p5623_p3 = scmp.lt.s32.totalorder %s5165_s28, 1  ;;  %v9152_v0 = vmov 0.0   ;;  %s5559_s12 = smov 8   ;;  %vm379_vm1 = vcmask 62464   ;;  %vm1789_vm2 = vcmask 130048  }
   0xc   : > { %339 = vst.msk [vmem:[#allocation2] sm:$0xff] %vm338_vm0, %v9152_v0  ;;  %340 = vst.msk [vmem:[#allocation2 + $0x8] sm:$0xff] %vm338_vm0, %v9152_v0  ;;  %s5560_s13 = smov 16   ;;  %s5561_s14 = smov 24   ;;  %vm1826_vm3 = vcmask 195584   ;;  %vm1863_vm4 = vcmask 261120  }
   0xd   : > { %341 = vst.msk [vmem:[#allocation2 + $0x10] sm:$0xff] %vm338_vm0, %v9152_v0  ;;  %342 = vst.msk [vmem:[#allocation2 + $0x18] sm:$0xff] %vm338_vm0, %v9152_v0  ;;  %s9699_s28 = smov (!%p5623_p3, %s5165_s28), 1  ;;  %s5562_s15 = smov 32   ;;  %vm1900_vm5 = vcmask 326656   ;;  %vm1937_vm6 = vcmask 392192  }
   0xe   : > { %343 = vst.msk [vmem:[#allocation2 + $0x20] sm:$0xff] %vm338_vm0, %v9152_v0  ;;  %344 = vst.msk [vmem:[#allocation2 + $0x28] sm:$0xff] %vm338_vm0, %v9152_v0  ;;  %s5294_s30 = sshll.u32 %s9699_s28, 8  ;;  %s5563_s16 = smov 40   ;;  %vm1974_vm7 = vcmask 457728   ;;  %vm2011_vm8 = vcmask 523264  }
   0xf   : > { %345 = vst.msk [vmem:[#allocation2 + $0x30] sm:$0xff] %vm338_vm0, %v9152_v0  ;;  %346 = vst.msk [vmem:[#allocation2 + $0x38] sm:$0xff] %vm338_vm0, %v9152_v0  ;;  %s5799_s11 = scalar_lea.vmem %s9143_s0, %s5294_s30  ;;  %s5564_s17 = smov 48   ;;  %vm2057_vm9 = vcmask 588800   ;;  %vm5049_vm10 = vcmask 64514   ;;  %vm5052_vm11 = vcmask 58368  }
  0x10   : > { %347 = vst.msk [vmem:[#allocation2 + $0x40] sm:$0xff] %vm338_vm0, %v9152_v0  ;;  %348 = vst.msk [vmem:[#allocation2 + $0x48] sm:$0xff] %vm338_vm0, %v9152_v0  ;;  %v306_v1 = vld [vmem:[%s5799_s11] sm:$0xff]  ;;  %v307_v2 = vld [vmem:[%s5799_s11 + $0x8] sm:$0xff]  ;;  %s5565_s18 = smov 56   ;;  %s5566_s25 = smov 64  }
  0x11   : > { %349 = vst.msk [vmem:[#allocation2 + $0x50] sm:$0xff] %vm338_vm0, %v9152_v0  ;;  %350 = vst.msk [vmem:[#allocation2 + $0x58] sm:$0xff] %vm338_vm0, %v9152_v0  ;;  %v308_v3 = vld [vmem:[%s5799_s11 + $0x10] sm:$0xff]  ;;  %v309_v4 = vld [vmem:[%s5799_s11 + $0x18] sm:$0xff]  ;;  %vm5055_vm12 = vcmask 64516   ;;  %vm5058_vm13 = vcmask 60416  }
  0x12   : > { %351 = vst.msk [vmem:[#allocation2 + $0x60] sm:$0xff] %vm338_vm0, %v9152_v0  ;;  %352 = vst.msk [vmem:[#allocation2 + $0x68] sm:$0xff] %vm338_vm0, %v9152_v0  ;;  %v310_v5 = vld [vmem:[%s5799_s11 + $0x20] sm:$0xff]  ;;  %v311_v6 = vld [vmem:[%s5799_s11 + $0x28] sm:$0xff]  ;;  %vm5061_vm14 = vcmask 64518  }
  0x13   : > { %353 = vst.msk [vmem:[#allocation2 + $0x70] sm:$0xff] %vm338_vm0, %v9152_v0  ;;  %354 = vst.msk [vmem:[#allocation2 + $0x78] sm:$0xff] %vm338_vm0, %v9152_v0  ;;  %v449_v7 = vld [vmem:[#allocation2 + $0x1] sm:$0xff]  ;;  %v313_v9 = vld [vmem:[%s5799_s11 + $0x38] sm:$0xff] }
  0x14   : > { %355 = vst.msk [vmem:[#allocation2 + $0x80] sm:$0xff] %vm338_vm0, %v9152_v0  ;;  %356 = vst.msk [vmem:[#allocation2 + $0x88] sm:$0xff] %vm338_vm0, %v9152_v0  ;;  %v450_v8 = vld [vmem:[#allocation2 + $0x9] sm:$0xff]  ;;  %705 = vrot.lane.b32.xlu0 %v449_v7, %s5559_s12  ;;  %v314_v11 = vld [vmem:[%s5799_s11 + $0x40] sm:$0xff] }
  0x15   : > { %357 = vst.msk [vmem:[#allocation2 + $0x90] sm:$0xff] %vm338_vm0, %v9152_v0  ;;  %358 = vst.msk [vmem:[#allocation2 + $0x98] sm:$0xff] %vm338_vm0, %v9152_v0  ;;  %v312_v10 = vld [vmem:[%s5799_s11 + $0x30] sm:$0xff]  ;;  %v315_v12 = vld [vmem:[%s5799_s11 + $0x48] sm:$0xff] }
  0x16   : > { %359 = vst.msk [vmem:[#allocation2 + $0xa0] sm:$0xff] %vm338_vm0, %v9152_v0  ;;  %360 = vst.msk [vmem:[#allocation2 + $0xa8] sm:$0xff] %vm338_vm0, %v9152_v0  ;;  %v316_v13 = vld [vmem:[%s5799_s11 + $0x50] sm:$0xff]  ;;  %v317_v14 = vld [vmem:[%s5799_s11 + $0x58] sm:$0xff] }
  0x17   : > { %361 = vst.msk [vmem:[#allocation2 + $0xb0] sm:$0xff] %vm338_vm0, %v9152_v0  ;;  %362 = vst.msk [vmem:[#allocation2 + $0xb8] sm:$0xff] %vm338_vm0, %v9152_v0  ;;  %v318_v15 = vld [vmem:[%s5799_s11 + $0x60] sm:$0xff]  ;;  %v319_v16 = vld [vmem:[%s5799_s11 + $0x68] sm:$0xff] }
  0x18   : > { %363 = vst.msk [vmem:[#allocation2 + $0xc0] sm:$0xff] %vm338_vm0, %v9152_v0  ;;  %364 = vst.msk [vmem:[#allocation2 + $0xc8] sm:$0xff] %vm338_vm0, %v9152_v0  ;;  %v320_v17 = vld [vmem:[%s5799_s11 + $0x70] sm:$0xff]  ;;  %v322_v18 = vld [vmem:[%s5799_s11 + $0x80] sm:$0xff]  ;;  %707 = vrot.lane.b32.xlu0 %v450_v8, %s5559_s12 }
  0x19   : > { %365 = vst.msk [vmem:[#allocation2 + $0xd0] sm:$0xff] %vm338_vm0, %v9152_v0  ;;  %366 = vst.msk [vmem:[#allocation2 + $0xd8] sm:$0xff] %vm338_vm0, %v9152_v0  ;;  %v321_v19 = vld [vmem:[%s5799_s11 + $0x78] sm:$0xff]  ;;  %v323_v20 = vld [vmem:[%s5799_s11 + $0x88] sm:$0xff] }
  0x1a   : > { %367 = vst.msk [vmem:[#allocation2 + $0xe0] sm:$0xff] %vm338_vm0, %v9152_v0  ;;  %368 = vst.msk [vmem:[#allocation2 + $0xe8] sm:$0xff] %vm338_vm0, %v9152_v0  ;;  %v324_v21 = vld [vmem:[%s5799_s11 + $0x90] sm:$0xff]  ;;  %v325_v22 = vld [vmem:[%s5799_s11 + $0x98] sm:$0xff] }
  0x1b   : > { %369 = vst.msk [vmem:[#allocation2 + $0xf0] sm:$0xff] %vm338_vm0, %v9152_v0  ;;  %370 = vst.msk [vmem:[#allocation2 + $0xf8] sm:$0xff] %vm338_vm0, %v9152_v0  ;;  %v326_v23 = vld [vmem:[%s5799_s11 + $0xa0] sm:$0xff]  ;;  %v327_v24 = vld [vmem:[%s5799_s11 + $0xa8] sm:$0xff] }
  0x1c   : > { %371 = vst.msk [vmem:[#allocation2 + $0x100] sm:$0xff] %vm338_vm0, %v9152_v0  ;;  %372 = vst.msk [vmem:[#allocation2 + $0x108] sm:$0xff] %vm338_vm0, %v9152_v0  ;;  %v329_v28 = vld [vmem:[%s5799_s11 + $0xb8] sm:$0xff]  ;;  %v328_v32 = vld [vmem:[%s5799_s11 + $0xb0] sm:$0xff] }
  0x1d   : > { %373 = vst.msk [vmem:[#allocation2 + $0x110] sm:$0xff] %vm338_vm0, %v9152_v0  ;;  %374 = vst.msk [vmem:[#allocation2 + $0x118] sm:$0xff] %vm338_vm0, %v9152_v0  ;;  %v330_v33 = vld [vmem:[%s5799_s11 + $0xc0] sm:$0xff]  ;;  %v331_v34 = vld [vmem:[%s5799_s11 + $0xc8] sm:$0xff] }
  0x1e   : > { %375 = vst.msk [vmem:[#allocation2 + $0x120] sm:$0xff] %vm338_vm0, %v9152_v0  ;;  %376 = vst.msk [vmem:[#allocation2 + $0x128] sm:$0xff] %vm338_vm0, %v9152_v0  ;;  %v332_v35 = vld [vmem:[%s5799_s11 + $0xd0] sm:$0xff]  ;;  %v333_v37 = vld [vmem:[%s5799_s11 + $0xd8] sm:$0xff] }
  0x1f   : > { %377 = vst.msk [vmem:[#allocation2 + $0x130] sm:$0xff] %vm338_vm0, %v9152_v0  ;;  %378 = vst.msk [vmem:[#allocation2 + $0x138] sm:$0xff] %vm338_vm0, %v9152_v0  ;;  %v334_v38 = vld [vmem:[%s5799_s11 + $0xe0] sm:$0xff]  ;;  %v335_v39 = vld [vmem:[%s5799_s11 + $0xe8] sm:$0xff] }
  0x20   : > { %2785 = vst.msk [vmem:[#allocation3] sm:$0xff] %vm338_vm0, %v9152_v0  ;;  %2786 = vst.msk [vmem:[#allocation3 + $0x8] sm:$0xff] %vm338_vm0, %v9152_v0  ;;  %v336_v50 = vld [vmem:[%s5799_s11 + $0xf0] sm:$0xff]  ;;  %v337_v8 = vld [vmem:[%s5799_s11 + $0xf8] sm:$0xff] }
  0x21   : > { %2787 = vst.msk [vmem:[#allocation3 + $0x10] sm:$0xff] %vm338_vm0, %v9152_v0  ;;  %2788 = vst.msk [vmem:[#allocation3 + $0x18] sm:$0xff] %vm338_vm0, %v9152_v0  ;;  %v486_v7 = vld [vmem:[#allocation2 + $0xa] sm:$0xff] }
  0x22   : > { %2789 = vst.msk [vmem:[#allocation3 + $0x20] sm:$0xff] %vm338_vm0, %v9152_v0  ;;  %2790 = vst.msk [vmem:[#allocation3 + $0x28] sm:$0xff] %vm338_vm0, %v9152_v0 }
  0x23   : > { %2791 = vst.msk [vmem:[#allocation3 + $0x30] sm:$0xff] %vm338_vm0, %v9152_v0  ;;  %2792 = vst.msk [vmem:[#allocation3 + $0x38] sm:$0xff] %vm338_vm0, %v9152_v0 }
  0x24   : > { %2793 = vst.msk [vmem:[#allocation3 + $0x40] sm:$0xff] %vm338_vm0, %v9152_v0  ;;  %2794 = vst.msk [vmem:[#allocation3 + $0x48] sm:$0xff] %vm338_vm0, %v9152_v0 }
  0x25   : > { %2795 = vst.msk [vmem:[#allocation3 + $0x50] sm:$0xff] %vm338_vm0, %v9152_v0  ;;  %2796 = vst.msk [vmem:[#allocation3 + $0x58] sm:$0xff] %vm338_vm0, %v9152_v0 }
  0x26   : > { %2797 = vst.msk [vmem:[#allocation3 + $0x60] sm:$0xff] %vm338_vm0, %v9152_v0  ;;  %2798 = vst.msk [vmem:[#allocation3 + $0x68] sm:$0xff] %vm338_vm0, %v9152_v0 }
  0x27   : > { %2799 = vst.msk [vmem:[#allocation3 + $0x70] sm:$0xff] %vm338_vm0, %v9152_v0  ;;  %2800 = vst.msk [vmem:[#allocation3 + $0x78] sm:$0xff] %vm338_vm0, %v9152_v0 }
  0x28   : > { %2801 = vst.msk [vmem:[#allocation3 + $0x80] sm:$0xff] %vm338_vm0, %v9152_v0  ;;  %2802 = vst.msk [vmem:[#allocation3 + $0x88] sm:$0xff] %vm338_vm0, %v9152_v0 }
  0x29   : > { %2803 = vst.msk [vmem:[#allocation3 + $0x90] sm:$0xff] %vm338_vm0, %v9152_v0  ;;  %2804 = vst.msk [vmem:[#allocation3 + $0x98] sm:$0xff] %vm338_vm0, %v9152_v0 }
  0x2a   : > { %2805 = vst.msk [vmem:[#allocation3 + $0xa0] sm:$0xff] %vm338_vm0, %v9152_v0  ;;  %2806 = vst.msk [vmem:[#allocation3 + $0xa8] sm:$0xff] %vm338_vm0, %v9152_v0 }
  0x2b   : > { %2807 = vst.msk [vmem:[#allocation3 + $0xb0] sm:$0xff] %vm338_vm0, %v9152_v0  ;;  %2808 = vst.msk [vmem:[#allocation3 + $0xb8] sm:$0xff] %vm338_vm0, %v9152_v0 }
  0x2c   : > { %2809 = vst.msk [vmem:[#allocation3 + $0xc0] sm:$0xff] %vm338_vm0, %v9152_v0  ;;  %2810 = vst.msk [vmem:[#allocation3 + $0xc8] sm:$0xff] %vm338_vm0, %v9152_v0 }
  0x2d   : > { %2811 = vst.msk [vmem:[#allocation3 + $0xd0] sm:$0xff] %vm338_vm0, %v9152_v0  ;;  %2812 = vst.msk [vmem:[#allocation3 + $0xd8] sm:$0xff] %vm338_vm0, %v9152_v0 }
  0x2e   : > { %2813 = vst.msk [vmem:[#allocation3 + $0xe0] sm:$0xff] %vm338_vm0, %v9152_v0  ;;  %2814 = vst.msk [vmem:[#allocation3 + $0xe8] sm:$0xff] %vm338_vm0, %v9152_v0 }
  0x2f   : > { %2815 = vst.msk [vmem:[#allocation3 + $0xf0] sm:$0xff] %vm338_vm0, %v9152_v0  ;;  %2816 = vst.msk [vmem:[#allocation3 + $0xf8] sm:$0xff] %vm338_vm0, %v9152_v0 }
  0x30   : > { %2817 = vst.msk [vmem:[#allocation3 + $0x100] sm:$0xff] %vm338_vm0, %v9152_v0  ;;  %2818 = vst.msk [vmem:[#allocation3 + $0x108] sm:$0xff] %vm338_vm0, %v9152_v0 }
  0x31   : > { %2819 = vst.msk [vmem:[#allocation3 + $0x110] sm:$0xff] %vm338_vm0, %v9152_v0  ;;  %2820 = vst.msk [vmem:[#allocation3 + $0x118] sm:$0xff] %vm338_vm0, %v9152_v0 }
  0x32   : > { %2821 = vst.msk [vmem:[#allocation3 + $0x120] sm:$0xff] %vm338_vm0, %v9152_v0  ;;  %2822 = vst.msk [vmem:[#allocation3 + $0x128] sm:$0xff] %vm338_vm0, %v9152_v0 }
  0x33   : > { %2823 = vst.msk [vmem:[#allocation3 + $0x130] sm:$0xff] %vm338_vm0, %v9152_v0  ;;  %2824 = vst.msk [vmem:[#allocation3 + $0x138] sm:$0xff] %vm338_vm0, %v9152_v0 }
  0x34   : > { %381 = vst.msk [vmem:[#allocation2 + $0x13] sm:$0xff] %vm338_vm0, %v306_v1  ;;  %382 = vst.msk [vmem:[#allocation2 + $0x1b] sm:$0xff] %vm338_vm0, %v307_v2 }
  0x35   : > { %383 = vst.msk [vmem:[#allocation2 + $0x25] sm:$0xff] %vm338_vm0, %v308_v3  ;;  %384 = vst.msk [vmem:[#allocation2 + $0x2d] sm:$0xff] %vm338_vm0, %v309_v4  ;;  %v485_v4 = vld [vmem:[#allocation2 + $0x2] sm:$0xff] }
  0x36   : > { %385 = vst.msk [vmem:[#allocation2 + $0x37] sm:$0xff] %vm338_vm0, %v310_v5  ;;  %386 = vst.msk [vmem:[#allocation2 + $0x3f] sm:$0xff] %vm338_vm0, %v311_v6 }
  0x37   : > { %388 = vst.msk [vmem:[#allocation2 + $0x51] sm:$0xff] %vm338_vm0, %v313_v9  ;;  %387 = vst.msk [vmem:[#allocation2 + $0x49] sm:$0xff] %vm338_vm0, %v312_v10 }
  0x38   : > { %389 = vst.msk [vmem:[#allocation2 + $0x5b] sm:$0xff] %vm338_vm0, %v314_v11  ;;  %390 = vst.msk [vmem:[#allocation2 + $0x63] sm:$0xff] %vm338_vm0, %v315_v12 }
  0x39   : > { %391 = vst.msk [vmem:[#allocation2 + $0x6d] sm:$0xff] %vm338_vm0, %v316_v13  ;;  %392 = vst.msk [vmem:[#allocation2 + $0x75] sm:$0xff] %vm338_vm0, %v317_v14 }
  0x3a   : > { %393 = vst.msk [vmem:[#allocation2 + $0x7f] sm:$0xff] %vm338_vm0, %v318_v15  ;;  %394 = vst.msk [vmem:[#allocation2 + $0x87] sm:$0xff] %vm338_vm0, %v319_v16 }
  0x3b   : > { %395 = vst.msk [vmem:[#allocation2 + $0x91] sm:$0xff] %vm338_vm0, %v320_v17  ;;  %397 = vst.msk [vmem:[#allocation2 + $0xa3] sm:$0xff] %vm338_vm0, %v322_v18  ;;  %v451_v25 = vld [vmem:[#allocation2 + $0x11] sm:$0xff]  ;;  %v452_v27 = vld [vmem:[#allocation2 + $0x19] sm:$0xff] }
  0x3c   : > { %396 = vst.msk [vmem:[#allocation2 + $0x99] sm:$0xff] %vm338_vm0, %v321_v19  ;;  %398 = vst.msk [vmem:[#allocation2 + $0xab] sm:$0xff] %vm338_vm0, %v323_v20  ;;  %v453_v26 = vld [vmem:[#allocation2 + $0x21] sm:$0xff]  ;;  %709 = vrot.lane.b32.xlu1 %v451_v25, %s5559_s12  ;;  %v454_v30 = vld [vmem:[#allocation2 + $0x29] sm:$0xff] }
  0x3d   : > { %399 = vst.msk [vmem:[#allocation2 + $0xb5] sm:$0xff] %vm338_vm0, %v324_v21  ;;  %400 = vst.msk [vmem:[#allocation2 + $0xbd] sm:$0xff] %vm338_vm0, %v325_v22  ;;  %713 = vrot.lane.b32.xlu0 %v453_v26, %s5559_s12  ;;  %v455_v29 = vld [vmem:[#allocation2 + $0x31] sm:$0xff]  ;;  %v457_v31 = vld [vmem:[#allocation2 + $0x41] sm:$0xff] }
  0x3e   : > { %401 = vst.msk [vmem:[#allocation2 + $0xc7] sm:$0xff] %vm338_vm0, %v326_v23  ;;  %402 = vst.msk [vmem:[#allocation2 + $0xcf] sm:$0xff] %vm338_vm0, %v327_v24  ;;  %v456_v36 = vld [vmem:[#allocation2 + $0x39] sm:$0xff]  ;;  %v459_v40 = vld [vmem:[#allocation2 + $0x51] sm:$0xff] }
  0x3f   : > { %404 = vst.msk [vmem:[#allocation2 + $0xe1] sm:$0xff] %vm338_vm0, %v329_v28  ;;  %403 = vst.msk [vmem:[#allocation2 + $0xd9] sm:$0xff] %vm338_vm0, %v328_v32  ;;  %v458_v41 = vld [vmem:[#allocation2 + $0x49] sm:$0xff]  ;;  %v461_v42 = vld [vmem:[#allocation2 + $0x61] sm:$0xff] }
  0x40   : > { %711 = vrot.lane.b32.xlu1 %v452_v27, %s5559_s12  ;;  %405 = vst.msk [vmem:[#allocation2 + $0xeb] sm:$0xff] %vm338_vm0, %v330_v33  ;;  %406 = vst.msk [vmem:[#allocation2 + $0xf3] sm:$0xff] %vm338_vm0, %v331_v34  ;;  %v460_v43 = vld [vmem:[#allocation2 + $0x59] sm:$0xff]  ;;  %v463_v44 = vld [vmem:[#allocation2 + $0x71] sm:$0xff] }
  0x41   : > { %717 = vrot.lane.b32.xlu0 %v455_v29, %s5559_s12  ;;  %407 = vst.msk [vmem:[#allocation2 + $0xfd] sm:$0xff] %vm338_vm0, %v332_v35  ;;  %408 = vst.msk [vmem:[#allocation2 + $0x105] sm:$0xff] %vm338_vm0, %v333_v37  ;;  %v462_v45 = vld [vmem:[#allocation2 + $0x69] sm:$0xff]  ;;  %v465_v46 = vld [vmem:[#allocation2 + $0x81] sm:$0xff] }
  0x42   : > { %409 = vst.msk [vmem:[#allocation2 + $0x10f] sm:$0xff] %vm338_vm0, %v334_v38  ;;  %410 = vst.msk [vmem:[#allocation2 + $0x117] sm:$0xff] %vm338_vm0, %v335_v39  ;;  %v464_v47 = vld [vmem:[#allocation2 + $0x79] sm:$0xff]  ;;  %v467_v48 = vld [vmem:[#allocation2 + $0x91] sm:$0xff] }
  0x43   : > { %v466_v49 = vld [vmem:[#allocation2 + $0x89] sm:$0xff]  ;;  %v469_v51 = vld [vmem:[#allocation2 + $0xa1] sm:$0xff]  ;;  %411 = vst.msk [vmem:[#allocation2 + $0x121] sm:$0xff] %vm338_vm0, %v336_v50  ;;  %v468_v52 = vld [vmem:[#allocation2 + $0x99] sm:$0xff] }
  0x44   : > { %715 = vrot.lane.b32.xlu1 %v454_v30, %s5559_s12  ;;  %v471_v53 = vld [vmem:[#allocation2 + $0xb1] sm:$0xff]  ;;  %v470_v54 = vld [vmem:[#allocation2 + $0xa9] sm:$0xff]  ;;  %v472_v56 = vld [vmem:[#allocation2 + $0xb9] sm:$0xff]  ;;  %412 = vst.msk [vmem:[#allocation2 + $0x129] sm:$0xff] %vm338_vm0, %v337_v8 }
  0x45   : > { %721 = vrot.lane.b32.xlu0 %v457_v31, %s5559_s12  ;;  %v473_v55 = vld [vmem:[#allocation2 + $0xc1] sm:$0xff]  ;;  %v475_v57 = vld [vmem:[#allocation2 + $0xd1] sm:$0xff]  ;;  %v474_v58 = vld [vmem:[#allocation2 + $0xc9] sm:$0xff] }
  0x46   : > { %v477_v59 = vld [vmem:[#allocation2 + $0xe1] sm:$0xff]  ;;  %v476_v60 = vld [vmem:[#allocation2 + $0xd9] sm:$0xff]  ;;  %v5917_v12 = vld [vmem:[#allocation2 + $0x2a] sm:$0xff] }
  0x47   : > { %v479_v61 = vld [vmem:[#allocation2 + $0xf1] sm:$0xff]  ;;  %v478_v62 = vld [vmem:[#allocation2 + $0xe9] sm:$0xff]  ;;  %v5909_v10 = vld [vmem:[#allocation2 + $0x1a] sm:$0xff] }
  0x48   : > { %719 = vrot.lane.b32.xlu1 %v456_v36, %s5559_s12  ;;  %v481_v63 = vld [vmem:[#allocation2 + $0x101] sm:$0xff]  ;;  %v480_v1 = vld [vmem:[#allocation2 + $0xf9] sm:$0xff]  ;;  %v5933_v16 = vld [vmem:[#allocation2 + $0x4a] sm:$0xff] }
  0x49   : > { %725 = vrot.lane.b32.xlu0 %v459_v40, %s5559_s12  ;;  %v483_v2 = vld [vmem:[#allocation2 + $0x111] sm:$0xff]  ;;  %v482_v3 = vld [vmem:[#allocation2 + $0x109] sm:$0xff]  ;;  %v484_v5 = vld [vmem:[#allocation2 + $0x119] sm:$0xff] }
  0x4a   : > { %v5899_v6 = vld [vmem:[#allocation2 + $0x12] sm:$0xff]  ;;  %v5906_v9 = vld [vmem:[#allocation2 + $0x22] sm:$0xff]  ;;  %v5925_v14 = vld [vmem:[#allocation2 + $0x3a] sm:$0xff] }
  0x4b   : > { %v5913_v11 = vld [vmem:[#allocation2 + $0x32] sm:$0xff]  ;;  %v5921_v13 = vld [vmem:[#allocation2 + $0x42] sm:$0xff]  ;;  %v5941_v18 = vld [vmem:[#allocation2 + $0x5a] sm:$0xff] }
  0x4c   : > { %723 = vrot.lane.b32.xlu1 %v458_v41, %s5559_s12  ;;  %v5929_v15 = vld [vmem:[#allocation2 + $0x52] sm:$0xff]  ;;  %v5937_v17 = vld [vmem:[#allocation2 + $0x62] sm:$0xff]  ;;  %v5949_v20 = vld [vmem:[#allocation2 + $0x6a] sm:$0xff] }
  0x4d   : > { %729 = vrot.lane.b32.xlu0 %v461_v42, %s5559_s12  ;;  %v5945_v19 = vld [vmem:[#allocation2 + $0x72] sm:$0xff]  ;;  %v5953_v21 = vld [vmem:[#allocation2 + $0x82] sm:$0xff]  ;;  %v5957_v22 = vld [vmem:[#allocation2 + $0x7a] sm:$0xff] }
  0x4e   : > { %v5961_v23 = vld [vmem:[#allocation2 + $0x92] sm:$0xff]  ;;  %v5965_v24 = vld [vmem:[#allocation2 + $0x8a] sm:$0xff]  ;;  %v5969_v25 = vld [vmem:[#allocation2 + $0xa2] sm:$0xff] }
  0x4f   : > { %v5973_v26 = vld [vmem:[#allocation2 + $0x9a] sm:$0xff]  ;;  %v5977_v27 = vld [vmem:[#allocation2 + $0xb2] sm:$0xff]  ;;  %v5983_v29 = vld [vmem:[#allocation2 + $0xaa] sm:$0xff] }
  0x50   : > { %727 = vrot.lane.b32.xlu1 %v460_v43, %s5559_s12  ;;  %v5987_v30 = vld [vmem:[#allocation2 + $0xc2] sm:$0xff]  ;;  %v5993_v32 = vld [vmem:[#allocation2 + $0xba] sm:$0xff]  ;;  %v5999_v34 = vld [vmem:[#allocation2 + $0xd2] sm:$0xff] }
  0x51   : > { %733 = vrot.lane.b32.xlu0 %v463_v44, %s5559_s12  ;;  %v6005_v36 = vld [vmem:[#allocation2 + $0xca] sm:$0xff]  ;;  %v6011_v38 = vld [vmem:[#allocation2 + $0xe2] sm:$0xff]  ;;  %v6017_v40 = vld [vmem:[#allocation2 + $0xda] sm:$0xff] }
  0x52   : > { %v6023_v42 = vld [vmem:[#allocation2 + $0xf2] sm:$0xff]  ;;  %v6029_v44 = vld [vmem:[#allocation2 + $0xea] sm:$0xff] }
  0x53   : > { %v6047_v50 = vld [vmem:[#allocation2 + $0x112] sm:$0xff] }
  0x54   : > { %731 = vrot.lane.b32.xlu1 %v462_v45, %s5559_s12 }
  0x55   : > { %737 = vrot.lane.b32.xlu0 %v465_v46, %s5559_s12  ;;  %v6035_v46 = vld [vmem:[#allocation2 + $0x102] sm:$0xff] }
  0x58   : > { %735 = vrot.lane.b32.xlu1 %v464_v47, %s5559_s12 }
  0x59   : > { %741 = vrot.lane.b32.xlu0 %v467_v48, %s5559_s12  ;;  %v6041_v48 = vld [vmem:[#allocation2 + $0xfa] sm:$0xff] }
  0x5c   : > { %739 = vrot.lane.b32.xlu1 %v466_v49, %s5559_s12 }
  0x5d   : > { %745 = vrot.lane.b32.xlu0 %v469_v51, %s5559_s12 }
  0x60   : > { %743 = vrot.lane.b32.xlu1 %v468_v52, %s5559_s12  ;;  %v6053_v52 = vld [vmem:[#allocation2 + $0x10a] sm:$0xff] }
  0x61   : > { %749 = vrot.lane.b32.xlu0 %v471_v53, %s5559_s12 }
  0x64   : > { %747 = vrot.lane.b32.xlu1 %v470_v54, %s5559_s12 }
  0x65   : > { %753 = vrot.lane.b32.xlu0 %v473_v55, %s5559_s12  ;;  %v6063_v55 = vld [vmem:[#allocation2 + $0x11a] sm:$0xff] }
  0x68   : > { %751 = vrot.lane.b32.xlu1 %v472_v56, %s5559_s12 }
  0x69   : > { %757 = vrot.lane.b32.xlu0 %v475_v57, %s5559_s12 }
  0x6c   : > { %755 = vrot.lane.b32.xlu1 %v474_v58, %s5559_s12 }
  0x6d   : > { %761 = vrot.lane.b32.xlu0 %v477_v59, %s5559_s12 }
  0x70   : > { %759 = vrot.lane.b32.xlu1 %v476_v60, %s5559_s12 }
  0x71   : > { %765 = vrot.lane.b32.xlu0 %v479_v61, %s5559_s12 }
  0x74   : > { %763 = vrot.lane.b32.xlu1 %v478_v62, %s5559_s12 }
  0x75   : > { %769 = vrot.lane.b32.xlu0 %v481_v63, %s5559_s12 }
  0x78   : > { %767 = vrot.lane.b32.xlu1 %v480_v1, %s5559_s12 }
  0x79   : > { %773 = vrot.lane.b32.xlu0 %v483_v2, %s5559_s12 }
  0x7c   : > { %771 = vrot.lane.b32.xlu1 %v482_v3, %s5559_s12 }
  0x7d   : > { %849 = vrot.lane.b32.xlu0 %v485_v4, %s5560_s13 }
  0x80   : > { %775 = vrot.lane.b32.xlu1 %v484_v5, %s5559_s12 }
  0x81   : > { %853 = vrot.lane.b32.xlu0 %v5899_v6, %s5560_s13 }
  0x84   : > { %851 = vrot.lane.b32.xlu1 %v486_v7, %s5560_s13 }
  0x85   : > { %857 = vrot.lane.b32.xlu0 %v5906_v9, %s5560_s13 }
  0x86   : > { %v5979_v28 = vpop.permute.xlu0 %705 }
  0x88   : > { %855 = vrot.lane.b32.xlu1 %v5909_v10, %s5560_s13 }
  0x89   : > { %861 = vrot.lane.b32.xlu0 %v5913_v11, %s5560_s13 }
  0x8a   : > { %v5989_v31 = vpop.permute.xlu0 %707 }
  0x8c   : > { %859 = vrot.lane.b32.xlu1 %v5917_v12, %s5560_s13 }
  0x8d   : > { %865 = vrot.lane.b32.xlu0 %v5921_v13, %s5560_s13 }
  0x90   : > { %863 = vrot.lane.b32.xlu1 %v5925_v14, %s5560_s13 }
  0x91   : > { %869 = vrot.lane.b32.xlu0 %v5929_v15, %s5560_s13 }
  0x94   : > { %867 = vrot.lane.b32.xlu1 %v5933_v16, %s5560_s13 }
  0x95   : > { %873 = vrot.lane.b32.xlu0 %v5937_v17, %s5560_s13 }
  0x98   : > { %871 = vrot.lane.b32.xlu1 %v5941_v18, %s5560_s13 }
  0x99   : > { %877 = vrot.lane.b32.xlu0 %v5945_v19, %s5560_s13 }
  0x9c   : > { %875 = vrot.lane.b32.xlu1 %v5949_v20, %s5560_s13 }
  0x9d   : > { %881 = vrot.lane.b32.xlu0 %v5953_v21, %s5560_s13 }
  0xa0   : > { %879 = vrot.lane.b32.xlu1 %v5957_v22, %s5560_s13 }
  0xa1   : > { %885 = vrot.lane.b32.xlu0 %v5961_v23, %s5560_s13 }
  0xa4   : > { %883 = vrot.lane.b32.xlu1 %v5965_v24, %s5560_s13 }
  0xa5   : > { %889 = vrot.lane.b32.xlu0 %v5969_v25, %s5560_s13 }
  0xa8   : > { %887 = vrot.lane.b32.xlu1 %v5973_v26, %s5560_s13 }
  0xa9   : > { %893 = vrot.lane.b32.xlu0 %v5977_v27, %s5560_s13 }
  0xac   : > { %891 = vrot.lane.b32.xlu1 %v5983_v29, %s5560_s13 }
  0xad   : > { %897 = vrot.lane.b32.xlu0 %v5987_v30, %s5560_s13 }
  0xae   : > { %v5997_v33 = vpop.permute.xlu1 %709 }
  0xaf   : > { %v6001_v35 = vpop.permute.xlu0 %713 }
  0xb0   : > { %895 = vrot.lane.b32.xlu1 %v5993_v32, %s5560_s13 }
  0xb1   : > { %901 = vrot.lane.b32.xlu0 %v5999_v34, %s5560_s13 }
  0xb2   : > { %v6009_v37 = vpop.permute.xlu1 %711 }
  0xb3   : > { %v6013_v39 = vpop.permute.xlu0 %717 }
  0xb4   : > { %899 = vrot.lane.b32.xlu1 %v6005_v36, %s5560_s13 }
  0xb5   : > { %905 = vrot.lane.b32.xlu0 %v6011_v38, %s5560_s13 }
  0xb6   : > { %v6021_v41 = vpop.permute.xlu1 %715 }
  0xb7   : > { %v6025_v43 = vpop.permute.xlu0 %721 }
  0xb8   : > { %903 = vrot.lane.b32.xlu1 %v6017_v40, %s5560_s13 }
  0xb9   : > { %909 = vrot.lane.b32.xlu0 %v6023_v42, %s5560_s13 }
  0xba   : > { %v6033_v45 = vpop.permute.xlu1 %719 }
  0xbb   : > { %v6037_v47 = vpop.permute.xlu0 %725 }
  0xbc   : > { %907 = vrot.lane.b32.xlu1 %v6029_v44, %s5560_s13 }
  0xbd   : > { %913 = vrot.lane.b32.xlu0 %v6035_v46, %s5560_s13 }
  0xbe   : > { %v6045_v49 = vpop.permute.xlu1 %723 }
  0xbf   : > { %v6049_v51 = vpop.permute.xlu0 %729 }
  0xc0   : > { %911 = vrot.lane.b32.xlu1 %v6041_v48, %s5560_s13 }
  0xc1   : > { %917 = vrot.lane.b32.xlu0 %v6047_v50, %s5560_s13 }
  0xc2   : > { %v6057_v53 = vpop.permute.xlu1 %727 }
  0xc3   : > { %9155 = vst [vmem:[#allocation4_spill] sm:$0xff] %v6057_v53  ;;  %v6059_v54 = vpop.permute.xlu0 %733 }
  0xc4   : > { %9156 = vst [vmem:[#allocation5_spill] sm:$0xff] %v6059_v54  ;;  %915 = vrot.lane.b32.xlu1 %v6053_v52, %s5560_s13  ;;  %v6493_v54 = vld [vmem:[#allocation2 + $0xfc] sm:$0xff] }
  0xc5   : > { %959 = vrot.lane.b32.xlu0 %v5899_v6, %s5561_s14 }
  0xc6   : > { %v6067_v56 = vpop.permute.xlu1 %731 }
  0xc7   : > { %9157 = vst [vmem:[#allocation6_spill] sm:$0xff] %v6067_v56  ;;  %v6069_v57 = vpop.permute.xlu0 %737 }
  0xc8   : > { %9158 = vst [vmem:[#allocation7_spill] sm:$0xff] %v6069_v57  ;;  %919 = vrot.lane.b32.xlu1 %v6063_v55, %s5560_s13 }
  0xc9   : > { %963 = vrot.lane.b32.xlu0 %v5906_v9, %s5561_s14 }
  0xca   : > { %v6075_v58 = vpop.permute.xlu1 %735 }
  0xcb   : > { %9159 = vst [vmem:[#allocation8_spill] sm:$0xff] %v6075_v58  ;;  %v6077_v59 = vpop.permute.xlu0 %741 }
  0xcc   : > { %9160 = vst [vmem:[#allocation9_spill] sm:$0xff] %v6077_v59  ;;  %961 = vrot.lane.b32.xlu1 %v5909_v10, %s5561_s14 }
  0xcd   : > { %967 = vrot.lane.b32.xlu0 %v5913_v11, %s5561_s14 }
  0xce   : > { %v6083_v60 = vpop.permute.xlu1 %739 }
  0xcf   : > { %9161 = vst [vmem:[#allocation10_spill] sm:$0xff] %v6083_v60  ;;  %v6085_v61 = vpop.permute.xlu0 %745  ;;  %v6403_v60 = vld [vmem:[#allocation2 + $0x94] sm:$0xff] }
  0xd0   : > { %9162 = vst [vmem:[#allocation11_spill] sm:$0xff] %v6085_v61  ;;  %965 = vrot.lane.b32.xlu1 %v5917_v12, %s5561_s14 }
  0xd1   : > { %971 = vrot.lane.b32.xlu0 %v5921_v13, %s5561_s14 }
  0xd2   : > { %v6091_v62 = vpop.permute.xlu1 %743 }
  0xd3   : > { %9163 = vst [vmem:[#allocation12_spill] sm:$0xff] %v6091_v62  ;;  %v6093_v63 = vpop.permute.xlu0 %749  ;;  %v9225_v62 = vmov 0.0  }
  0xd4   : > { %9164 = vst [vmem:[#allocation13_spill] sm:$0xff] %v6093_v63  ;;  %969 = vrot.lane.b32.xlu1 %v5925_v14, %s5561_s14  ;;  %v6319_v63 = vld [vmem:[#allocation2 + $0x24] sm:$0xff]  ;;  %380 = vst.msk [vmem:[#allocation2 + $0x140] sm:$0x3f] %vm379_vm1, %v9225_v62 }
  0xd5   : > { %975 = vrot.lane.b32.xlu0 %v5929_v15, %s5561_s14  ;;  %2825 = vst.msk [vmem:[#allocation3 + $0x140] sm:$0x3f] %vm379_vm1, %v9225_v62 }
  0xd6   : > { %v6099_v1 = vpop.permute.xlu1 %747 }
  0xd7   : > { %9165 = vst [vmem:[#allocation14_spill] sm:$0xff] %v6099_v1  ;;  %v6101_v2 = vpop.permute.xlu0 %753 }
  0xd8   : > { %9166 = vst [vmem:[#allocation15_spill] sm:$0xff] %v6101_v2  ;;  %973 = vrot.lane.b32.xlu1 %v5933_v16, %s5561_s14  ;;  %v557_v2 = vld [vmem:[#allocation2 + $0x123] sm:$0xff] }
  0xd9   : > { %979 = vrot.lane.b32.xlu0 %v5937_v17, %s5561_s14 }
  0xda   : > { %v6107_v3 = vpop.permute.xlu1 %751 }
  0xdb   : > { %9167 = vst [vmem:[#allocation16_spill] sm:$0xff] %v6107_v3  ;;  %v6109_v4 = vpop.permute.xlu0 %757 }
  0xdc   : > { %9168 = vst [vmem:[#allocation17_spill] sm:$0xff] %v6109_v4  ;;  %977 = vrot.lane.b32.xlu1 %v5941_v18, %s5561_s14  ;;  %v553_v4 = vld [vmem:[#allocation2 + $0x103] sm:$0xff] }
  0xdd   : > { %983 = vrot.lane.b32.xlu0 %v5945_v19, %s5561_s14 }
  0xde   : > { %v6115_v5 = vpop.permute.xlu1 %755 }
  0xdf   : > { %9169 = vst [vmem:[#allocation18_spill] sm:$0xff] %v6115_v5  ;;  %v6117_v6 = vpop.permute.xlu0 %761 }
  0xe0   : > { %9170 = vst [vmem:[#allocation19_spill] sm:$0xff] %v6117_v6  ;;  %981 = vrot.lane.b32.xlu1 %v5949_v20, %s5561_s14 }
  0xe1   : > { %987 = vrot.lane.b32.xlu0 %v5953_v21, %s5561_s14 }
  0xe2   : > { %v6123_v7 = vpop.permute.xlu1 %759 }
  0xe3   : > { %9171 = vst [vmem:[#allocation20_spill] sm:$0xff] %v6123_v7  ;;  %v6125_v8 = vpop.permute.xlu0 %765  ;;  %v541_v7 = vld [vmem:[#allocation2 + $0xa3] sm:$0xff] }
  0xe4   : > { %9172 = vst [vmem:[#allocation21_spill] sm:$0xff] %v6125_v8  ;;  %985 = vrot.lane.b32.xlu1 %v5957_v22, %s5561_s14 }
  0xe5   : > { %991 = vrot.lane.b32.xlu0 %v5961_v23, %s5561_s14 }
  0xe6   : > { %v6131_v9 = vpop.permute.xlu1 %763 }
  0xe7   : > { %9173 = vst [vmem:[#allocation22_spill] sm:$0xff] %v6131_v9  ;;  %v6133_v10 = vpop.permute.xlu0 %769  ;;  %v539_v9 = vld [vmem:[#allocation2 + $0x93] sm:$0xff] }
  0xe8   : > { %9174 = vst [vmem:[#allocation23_spill] sm:$0xff] %v6133_v10  ;;  %989 = vrot.lane.b32.xlu1 %v5965_v24, %s5561_s14 }
  0xe9   : > { %995 = vrot.lane.b32.xlu0 %v5969_v25, %s5561_s14 }
  0xea   : > { %v6139_v11 = vpop.permute.xlu1 %767 }
  0xeb   : > { %9175 = vst [vmem:[#allocation24_spill] sm:$0xff] %v6139_v11  ;;  %v6141_v12 = vpop.permute.xlu0 %773  ;;  %v537_v11 = vld [vmem:[#allocation2 + $0x83] sm:$0xff] }
  0xec   : > { %9176 = vst [vmem:[#allocation25_spill] sm:$0xff] %v6141_v12  ;;  %993 = vrot.lane.b32.xlu1 %v5973_v26, %s5561_s14  ;;  %v521_v26 = vld [vmem:[#allocation2 + $0x122] sm:$0xff] }
  0xed   : > { %999 = vrot.lane.b32.xlu0 %v5977_v27, %s5561_s14 }
  0xee   : > { %v6147_v13 = vpop.permute.xlu1 %771 }
  0xef   : > { %9177 = vst [vmem:[#allocation26_spill] sm:$0xff] %v6147_v13  ;;  %v6149_v14 = vpop.permute.xlu0 %849  ;;  %v535_v13 = vld [vmem:[#allocation2 + $0x73] sm:$0xff] }
  0xf0   : > { %997 = vrot.lane.b32.xlu1 %v5983_v29, %s5561_s14 }
  0xf1   : > { %1003 = vrot.lane.b32.xlu0 %v5987_v30, %s5561_s14  ;;  %v523_v30 = vld [vmem:[#allocation2 + $0x13] sm:$0xff] }
  0xf2   : > { %v6155_v15 = vpop.permute.xlu1 %775 }
  0xf3   : > { %9178 = vst [vmem:[#allocation27_spill] sm:$0xff] %v6155_v15  ;;  %v6157_v16 = vpop.permute.xlu0 %853  ;;  %v533_v15 = vld [vmem:[#allocation2 + $0x63] sm:$0xff] }
  0xf4   : > { %1001 = vrot.lane.b32.xlu1 %v5993_v32, %s5561_s14 }
  0xf5   : > { %1007 = vrot.lane.b32.xlu0 %v5999_v34, %s5561_s14  ;;  %v522_v34 = vld [vmem:[#allocation2 + $0x12a] sm:$0xff] }
  0xf6   : > { %v6163_v17 = vpop.permute.xlu1 %851 }
  0xf7   : > { %v6165_v18 = vpop.permute.xlu0 %857 }
  0xf8   : > { %1005 = vrot.lane.b32.xlu1 %v6005_v36, %s5561_s14 }
  0xf9   : > { %1011 = vrot.lane.b32.xlu0 %v6011_v38, %s5561_s14  ;;  %v525_v38 = vld [vmem:[#allocation2 + $0x23] sm:$0xff] }
  0xfa   : > { %v6171_v19 = vpop.permute.xlu1 %855 }
  0xfb   : > { %v6173_v20 = vpop.permute.xlu0 %861 }
  0xfc   : > { %9179 = vst [vmem:[#allocation28_spill] sm:$0xff] %v6173_v20  ;;  %1009 = vrot.lane.b32.xlu1 %v6017_v40, %s5561_s14  ;;  %v6511_v20 = vld [vmem:[#allocation2 + $0x124] sm:$0xff] }
  0xfd   : > { %1015 = vrot.lane.b32.xlu0 %v6023_v42, %s5561_s14  ;;  %v524_v42 = vld [vmem:[#allocation2 + $0x1b] sm:$0xff] }
  0xfe   : > { %v6179_v21 = vpop.permute.xlu1 %859 }
  0xff   : > { %9180 = vst [vmem:[#allocation29_spill] sm:$0xff] %v6179_v21  ;;  %v6181_v22 = vpop.permute.xlu0 %865 }
 0x100   : > { %9181 = vst [vmem:[#allocation30_spill] sm:$0xff] %v6181_v22  ;;  %1013 = vrot.lane.b32.xlu1 %v6029_v44, %s5561_s14  ;;  %v6487_v22 = vld [vmem:[#allocation2 + $0x104] sm:$0xff] }
 0x101   : > { %1019 = vrot.lane.b32.xlu0 %v6035_v46, %s5561_s14  ;;  %v527_v46 = vld [vmem:[#allocation2 + $0x33] sm:$0xff] }
 0x102   : > { %v6187_v23 = vpop.permute.xlu1 %863 }
 0x103   : > { %9182 = vst [vmem:[#allocation31_spill] sm:$0xff] %v6187_v23  ;;  %v6189_v24 = vpop.permute.xlu0 %869 }
 0x104   : > { %9183 = vst [vmem:[#allocation32_spill] sm:$0xff] %v6189_v24  ;;  %1017 = vrot.lane.b32.xlu1 %v6041_v48, %s5561_s14 }
 0x105   : > { %1023 = vrot.lane.b32.xlu0 %v6047_v50, %s5561_s14  ;;  %v526_v50 = vld [vmem:[#allocation2 + $0x2b] sm:$0xff] }
 0x106   : > { %v6195_v25 = vpop.permute.xlu1 %867 }
 0x107   : > { %9184 = vst [vmem:[#allocation33_spill] sm:$0xff] %v6195_v25  ;;  %v6197_v27 = vpop.permute.xlu0 %873  ;;  %v6475_v25 = vld [vmem:[#allocation2 + $0xf4] sm:$0xff] }
 0x108   : > { %9185 = vst [vmem:[#allocation34_spill] sm:$0xff] %v6197_v27  ;;  %1021 = vrot.lane.b32.xlu1 %v6053_v52, %s5561_s14  ;;  %v6451_v27 = vld [vmem:[#allocation2 + $0xd4] sm:$0xff] }
 0x109   : > { %1027 = vrot.lane.b32.xlu0 %v521_v26, %s5561_s14 }
 0x10a   : > { %v6202_v29 = vpop.permute.xlu1 %871 }
 0x10b   : > { %9186 = vst [vmem:[#allocation35_spill] sm:$0xff] %v6202_v29  ;;  %v6204_v32 = vpop.permute.xlu0 %877 }
 0x10c   : > { %9187 = vst [vmem:[#allocation36_spill] sm:$0xff] %v6204_v32  ;;  %1025 = vrot.lane.b32.xlu1 %v6063_v55, %s5561_s14  ;;  %v529_v55 = vld [vmem:[#allocation2 + $0x43] sm:$0xff] }
 0x10d   : > { %1103 = vrot.lane.b32.xlu0 %v523_v30, %s5562_s15  ;;  %v528_v30 = vld [vmem:[#allocation2 + $0x3b] sm:$0xff] }
 0x10e   : > { %v6209_v36 = vpop.permute.xlu1 %875 }
 0x10f   : > { %9188 = vst [vmem:[#allocation37_spill] sm:$0xff] %v6209_v36  ;;  %v6211_v40 = vpop.permute.xlu0 %881  ;;  %v6427_v36 = vld [vmem:[#allocation2 + $0xb4] sm:$0xff] }
 0x110   : > { %9189 = vst [vmem:[#allocation38_spill] sm:$0xff] %v6211_v40  ;;  %1029 = vrot.lane.b32.xlu1 %v522_v34, %s5561_s14  ;;  %v6391_v40 = vld [vmem:[#allocation2 + $0x84] sm:$0xff] }
 0x111   : > { %1107 = vrot.lane.b32.xlu0 %v525_v38, %s5562_s15  ;;  %v531_v38 = vld [vmem:[#allocation2 + $0x53] sm:$0xff] }
 0x112   : > { %v6215_v44 = vpop.permute.xlu1 %879 }
 0x113   : > { %9190 = vst [vmem:[#allocation39_spill] sm:$0xff] %v6215_v44  ;;  %v6217_v48 = vpop.permute.xlu0 %885 }
 0x114   : > { %9191 = vst [vmem:[#allocation40_spill] sm:$0xff] %v6217_v48  ;;  %1105 = vrot.lane.b32.xlu1 %v524_v42, %s5562_s15  ;;  %v530_v42 = vld [vmem:[#allocation2 + $0x4b] sm:$0xff] }
 0x115   : > { %1111 = vrot.lane.b32.xlu0 %v527_v46, %s5562_s15 }
 0x116   : > { %v6221_v52 = vpop.permute.xlu1 %883 }
 0x117   : > { %9192 = vst [vmem:[#allocation41_spill] sm:$0xff] %v6221_v52  ;;  %v6223_v26 = vpop.permute.xlu0 %889  ;;  %v6367_v52 = vld [vmem:[#allocation2 + $0x64] sm:$0xff] }
 0x118   : > { %9193 = vst [vmem:[#allocation42_spill] sm:$0xff] %v6223_v26  ;;  %1109 = vrot.lane.b32.xlu1 %v526_v50, %s5562_s15  ;;  %v532_v50 = vld [vmem:[#allocation2 + $0x5b] sm:$0xff] }
 0x119   : > { %1115 = vrot.lane.b32.xlu0 %v529_v55, %s5562_s15  ;;  %v6328_v26 = vld [vmem:[#allocation2 + $0x34] sm:$0xff] }
 0x11a   : > { %v6227_v34 = vpop.permute.xlu1 %887 }
 0x11b   : > { %9194 = vst [vmem:[#allocation43_spill] sm:$0xff] %v6227_v34  ;;  %v6229_v0 = vpop.permute.xlu0 %893 }
 0x11c   : > { %9195 = vst [vmem:[#allocation44_spill] sm:$0xff] %v6229_v0  ;;  %1113 = vrot.lane.b32.xlu1 %v528_v30, %s5562_s15  ;;  %v534_v30 = vld [vmem:[#allocation2 + $0x6b] sm:$0xff]  ;;  %v559_v0 = vld [vmem:[#allocation2 + $0x14] sm:$0xff] }
 0x11d   : > { %1119 = vrot.lane.b32.xlu0 %v531_v38, %s5562_s15 }
 0x11e   : > { %v6233_v46 = vpop.permute.xlu1 %891 }
 0x11f   : > { %9196 = vst [vmem:[#allocation45_spill] sm:$0xff] %v6233_v46  ;;  %v6235_v12 = vpop.permute.xlu0 %897 }
 0x120   : > { %9197 = vst [vmem:[#allocation46_spill] sm:$0xff] %v6235_v12  ;;  %1117 = vrot.lane.b32.xlu1 %v530_v42, %s5562_s15  ;;  %v536_v42 = vld [vmem:[#allocation2 + $0x7b] sm:$0xff]  ;;  %v555_v12 = vld [vmem:[#allocation2 + $0x113] sm:$0xff] }
 0x121   : > { %1123 = vrot.lane.b32.xlu0 %v533_v15, %s5562_s15 }
 0x122   : > { %v6239_v55 = vpop.permute.xlu1 %895 }
 0x123   : > { %9198 = vst [vmem:[#allocation47_spill] sm:$0xff] %v6239_v55  ;;  %v6241_v10 = vpop.permute.xlu0 %901 }
 0x124   : > { %9199 = vst [vmem:[#allocation48_spill] sm:$0xff] %v6241_v10  ;;  %1121 = vrot.lane.b32.xlu1 %v532_v50, %s5562_s15  ;;  %v538_v50 = vld [vmem:[#allocation2 + $0x8b] sm:$0xff] }
 0x125   : > { %1127 = vrot.lane.b32.xlu0 %v535_v13, %s5562_s15 }
 0x126   : > { %v6245_v38 = vpop.permute.xlu1 %899 }
 0x127   : > { %9200 = vst [vmem:[#allocation49_spill] sm:$0xff] %v6245_v38  ;;  %v6247_v8 = vpop.permute.xlu0 %905 }
 0x128   : > { %9201 = vst [vmem:[#allocation50_spill] sm:$0xff] %v6247_v8  ;;  %1125 = vrot.lane.b32.xlu1 %v534_v30, %s5562_s15  ;;  %v540_v30 = vld [vmem:[#allocation2 + $0x9b] sm:$0xff]  ;;  %v543_v8 = vld [vmem:[#allocation2 + $0xb3] sm:$0xff] }
 0x129   : > { %1131 = vrot.lane.b32.xlu0 %v537_v11, %s5562_s15 }
 0x12a   : > { %v6251_v15 = vpop.permute.xlu1 %903 }
 0x12b   : > { %9202 = vst [vmem:[#allocation51_spill] sm:$0xff] %v6251_v15  ;;  %v6253_v6 = vpop.permute.xlu0 %909 }
 0x12c   : > { %9203 = vst [vmem:[#allocation52_spill] sm:$0xff] %v6253_v6  ;;  %1129 = vrot.lane.b32.xlu1 %v536_v42, %s5562_s15  ;;  %v542_v42 = vld [vmem:[#allocation2 + $0xab] sm:$0xff]  ;;  %v545_v6 = vld [vmem:[#allocation2 + $0xc3] sm:$0xff] }
 0x12d   : > { %1135 = vrot.lane.b32.xlu0 %v539_v9, %s5562_s15 }
 0x12e   : > { %v6257_v13 = vpop.permute.xlu1 %907 }
 0x12f   : > { %9204 = vst [vmem:[#allocation53_spill] sm:$0xff] %v6257_v13  ;;  %v6259_v10 = vpop.permute.xlu0 %913 }
 0x130   : > { %9205 = vst [vmem:[#allocation54_spill] sm:$0xff] %v6259_v10  ;;  %1133 = vrot.lane.b32.xlu1 %v538_v50, %s5562_s15  ;;  %v544_v50 = vld [vmem:[#allocation2 + $0xbb] sm:$0xff]  ;;  %v547_v10 = vld [vmem:[#allocation2 + $0xd3] sm:$0xff] }
 0x131   : > { %1139 = vrot.lane.b32.xlu0 %v541_v7, %s5562_s15 }
 0x132   : > { %v6263_v11 = vpop.permute.xlu1 %911 }
 0x133   : > { %9206 = vst [vmem:[#allocation55_spill] sm:$0xff] %v6263_v11  ;;  %v6265_v15 = vpop.permute.xlu0 %917 }
 0x134   : > { %9207 = vst [vmem:[#allocation56_spill] sm:$0xff] %v6265_v15  ;;  %1137 = vrot.lane.b32.xlu1 %v540_v30, %s5562_s15  ;;  %v546_v30 = vld [vmem:[#allocation2 + $0xcb] sm:$0xff]  ;;  %v549_v15 = vld [vmem:[#allocation2 + $0xe3] sm:$0xff] }
 0x135   : > { %1143 = vrot.lane.b32.xlu0 %v543_v8, %s5562_s15 }
 0x136   : > { %v6269_v9 = vpop.permute.xlu1 %915 }
 0x137   : > { %9208 = vst [vmem:[#allocation57_spill] sm:$0xff] %v6269_v9  ;;  %v6271_v13 = vpop.permute.xlu0 %959 }
 0x138   : > { %1141 = vrot.lane.b32.xlu1 %v542_v42, %s5562_s15  ;;  %v548_v42 = vld [vmem:[#allocation2 + $0xdb] sm:$0xff] }
 0x139   : > { %1147 = vrot.lane.b32.xlu0 %v545_v6, %s5562_s15 }
 0x13a   : > { %v6275_v7 = vpop.permute.xlu1 %919 }
 0x13b   : > { %9209 = vst [vmem:[#allocation58_spill] sm:$0xff] %v6275_v7  ;;  %v6277_v11 = vpop.permute.xlu0 %963  ;;  %v551_v7 = vld [vmem:[#allocation2 + $0xf3] sm:$0xff] }
 0x13c   : > { %1145 = vrot.lane.b32.xlu1 %v544_v50, %s5562_s15  ;;  %v550_v50 = vld [vmem:[#allocation2 + $0xeb] sm:$0xff] }
 0x13d   : > { %1151 = vrot.lane.b32.xlu0 %v547_v10, %s5562_s15 }
 0x13e   : > { %v6281_v8 = vpop.permute.xlu1 %961 }
 0x13f   : > { %v6283_v9 = vpop.permute.xlu0 %967 }
 0x140   : > { %1149 = vrot.lane.b32.xlu1 %v546_v30, %s5562_s15  ;;  %v552_v30 = vld [vmem:[#allocation2 + $0xfb] sm:$0xff] }
 0x141   : > { %1155 = vrot.lane.b32.xlu0 %v549_v15, %s5562_s15 }
 0x142   : > { %v6287_v6 = vpop.permute.xlu1 %965 }
 0x143   : > { %v6289_v38 = vpop.permute.xlu0 %971 }
 0x144   : > { %9210 = vst [vmem:[#allocation59_spill] sm:$0xff] %v6289_v38  ;;  %1153 = vrot.lane.b32.xlu1 %v548_v42, %s5562_s15  ;;  %v554_v42 = vld [vmem:[#allocation2 + $0x10b] sm:$0xff]  ;;  %v6499_v38 = vld [vmem:[#allocation2 + $0x114] sm:$0xff] }
 0x145   : > { %1159 = vrot.lane.b32.xlu0 %v551_v7, %s5562_s15 }
 0x146   : > { %v6293_v10 = vpop.permute.xlu1 %969 }
 0x147   : > { %9211 = vst [vmem:[#allocation60_spill] sm:$0xff] %v6293_v10  ;;  %v6295_v5 = vpop.permute.xlu0 %975 }
 0x148   : > { %9212 = vst [vmem:[#allocation61_spill] sm:$0xff] %v6295_v5  ;;  %1157 = vrot.lane.b32.xlu1 %v550_v50, %s5562_s15  ;;  %v556_v50 = vld [vmem:[#allocation2 + $0x11b] sm:$0xff]  ;;  %v6481_v5 = vld [vmem:[#allocation2 + $0xec] sm:$0xff] }
 0x149   : > { %1163 = vrot.lane.b32.xlu0 %v553_v4, %s5562_s15 }
 0x14a   : > { %v6299_v15 = vpop.permute.xlu1 %973 }
 0x14b   : > { %9213 = vst [vmem:[#allocation62_spill] sm:$0xff] %v6299_v15  ;;  %v6301_v55 = vpop.permute.xlu0 %979 }
 0x14c   : > { %9214 = vst [vmem:[#allocation63_spill] sm:$0xff] %v6301_v55  ;;  %1161 = vrot.lane.b32.xlu1 %v552_v30, %s5562_s15  ;;  %v558_v30 = vld [vmem:[#allocation2 + $0x12b] sm:$0xff] }
 0x14d   : > { %1167 = vrot.lane.b32.xlu0 %v555_v12, %s5562_s15  ;;  %v6463_v55 = vld [vmem:[#allocation2 + $0xe4] sm:$0xff] }
 0x14e   : > { %v6305_v7 = vpop.permute.xlu1 %977 }
 0x14f   : > { %9215 = vst [vmem:[#allocation64_spill] sm:$0xff] %v6305_v7  ;;  %v6307_v3 = vpop.permute.xlu0 %983 }
 0x150   : > { %9216 = vst [vmem:[#allocation65_spill] sm:$0xff] %v6307_v3  ;;  %1165 = vrot.lane.b32.xlu1 %v554_v42, %s5562_s15  ;;  %v6439_v3 = vld [vmem:[#allocation2 + $0xc4] sm:$0xff] }
 0x151   : > { %1171 = vrot.lane.b32.xlu0 %v557_v2, %s5562_s15  ;;  %v560_v2 = vld [vmem:[#allocation2 + $0x1c] sm:$0xff] }
 0x152   : > { %v6311_v4 = vpop.permute.xlu1 %981 }
 0x153   : > { %9217 = vst [vmem:[#allocation66_spill] sm:$0xff] %v6311_v4  ;;  %v6313_v46 = vpop.permute.xlu0 %987 }
 0x154   : > { %9218 = vst [vmem:[#allocation67_spill] sm:$0xff] %v6313_v46  ;;  %1169 = vrot.lane.b32.xlu1 %v556_v50, %s5562_s15 }
 0x155   : > { %1247 = vrot.lane.b32.xlu0 %v559_v0, %s5563_s16  ;;  %v6333_v0 = vld [vmem:[#allocation2 + $0x2c] sm:$0xff] }
 0x156   : > { %v6317_v12 = vpop.permute.xlu1 %985 }
 0x157   : > { %9219 = vst [vmem:[#allocation68_spill] sm:$0xff] %v6317_v12  ;;  %v6321_v1 = vpop.permute.xlu0 %991  ;;  %v6415_v12 = vld [vmem:[#allocation2 + $0xa4] sm:$0xff] }
 0x158   : > { %9220 = vst [vmem:[#allocation69_spill] sm:$0xff] %v6321_v1  ;;  %1173 = vrot.lane.b32.xlu1 %v558_v30, %s5562_s15  ;;  %v6339_v30 = vld [vmem:[#allocation2 + $0x44] sm:$0xff]  ;;  %v6379_v1 = vld [vmem:[#allocation2 + $0x74] sm:$0xff] }
 0x159   : > { %1251 = vrot.lane.b32.xlu0 %v6319_v63, %s5563_s16 }
 0x15a   : > { %v6326_v42 = vpop.permute.xlu1 %989 }
 0x15b   : > { %9221 = vst [vmem:[#allocation70_spill] sm:$0xff] %v6326_v42  ;;  %v6330_v50 = vpop.permute.xlu0 %995 }
 0x15c   : > { %9222 = vst [vmem:[#allocation71_spill] sm:$0xff] %v6330_v50  ;;  %1249 = vrot.lane.b32.xlu1 %v560_v2, %s5563_s16  ;;  %v6349_v2 = vld [vmem:[#allocation2 + $0x3c] sm:$0xff] }
 0x15d   : > { %1255 = vrot.lane.b32.xlu0 %v6328_v26, %s5563_s16 }
 0x15e   : > { %v6337_v34 = vpop.permute.xlu1 %993 }
 0x15f   : > { %9223 = vst [vmem:[#allocation72_spill] sm:$0xff] %v6337_v34  ;;  %v6341_v61 = vpop.permute.xlu0 %999  ;;  %v6355_v34 = vld [vmem:[#allocation2 + $0x54] sm:$0xff] }
 0x160   : > { %9224 = vst [vmem:[#allocation73_spill] sm:$0xff] %v6341_v61  ;;  %1253 = vrot.lane.b32.xlu1 %v6333_v0, %s5563_s16  ;;  %v6361_v61 = vld [vmem:[#allocation2 + $0x4c] sm:$0xff] }
 0x161   : > { %1259 = vrot.lane.b32.xlu0 %v6339_v30, %s5563_s16 }
 0x162   : > { %v6353_v50 = vpop.permute.xlu1 %997 }
 0x163   : > { %9226 = vst [vmem:[#allocation74_spill] sm:$0xff] %v6353_v50  ;;  %v6357_v48 = vpop.permute.xlu0 %1003  ;;  %v6373_v50 = vld [vmem:[#allocation2 + $0x5c] sm:$0xff] }
 0x164   : > { %9227 = vst [vmem:[#allocation75_spill] sm:$0xff] %v6357_v48  ;;  %1257 = vrot.lane.b32.xlu1 %v6349_v2, %s5563_s16 }
 0x165   : > { %1263 = vrot.lane.b32.xlu0 %v6355_v34, %s5563_s16 }
 0x166   : > { %v6365_v62 = vpop.permute.xlu1 %1001 }
 0x167   : > { %9228 = vst [vmem:[#allocation76_spill] sm:$0xff] %v6365_v62  ;;  %v6369_v59 = vpop.permute.xlu0 %1007  ;;  %v6385_v62 = vld [vmem:[#allocation2 + $0x6c] sm:$0xff] }
 0x168   : > { %9229 = vst [vmem:[#allocation77_spill] sm:$0xff] %v6369_v59  ;;  %1261 = vrot.lane.b32.xlu1 %v6361_v61, %s5563_s16 }
 0x169   : > { %1267 = vrot.lane.b32.xlu0 %v6367_v52, %s5563_s16 }
 0x16a   : > { %v6377_v48 = vpop.permute.xlu1 %1005 }
 0x16b   : > { %9230 = vst [vmem:[#allocation78_spill] sm:$0xff] %v6377_v48  ;;  %v6381_v42 = vpop.permute.xlu0 %1011  ;;  %v6397_v48 = vld [vmem:[#allocation2 + $0x7c] sm:$0xff] }
 0x16c   : > { %9231 = vst [vmem:[#allocation79_spill] sm:$0xff] %v6381_v42  ;;  %1265 = vrot.lane.b32.xlu1 %v6373_v50, %s5563_s16 }
 0x16d   : > { %1271 = vrot.lane.b32.xlu0 %v6379_v1, %s5563_s16 }
 0x16e   : > { %v6389_v59 = vpop.permute.xlu1 %1009 }
 0x16f   : > { %9232 = vst [vmem:[#allocation80_spill] sm:$0xff] %v6389_v59  ;;  %v6393_v44 = vpop.permute.xlu0 %1015  ;;  %v6409_v59 = vld [vmem:[#allocation2 + $0x8c] sm:$0xff] }
 0x170   : > { %9233 = vst [vmem:[#allocation81_spill] sm:$0xff] %v6393_v44  ;;  %1269 = vrot.lane.b32.xlu1 %v6385_v62, %s5563_s16 }
 0x171   : > { %1275 = vrot.lane.b32.xlu0 %v6391_v40, %s5563_s16 }
 0x172   : > { %v6401_v42 = vpop.permute.xlu1 %1013 }
 0x173   : > { %9234 = vst [vmem:[#allocation82_spill] sm:$0xff] %v6401_v42  ;;  %v6405_v46 = vpop.permute.xlu0 %1019  ;;  %v6421_v42 = vld [vmem:[#allocation2 + $0x9c] sm:$0xff] }
 0x174   : > { %9235 = vst [vmem:[#allocation83_spill] sm:$0xff] %v6405_v46  ;;  %1273 = vrot.lane.b32.xlu1 %v6397_v48, %s5563_s16 }
 0x175   : > { %1279 = vrot.lane.b32.xlu0 %v6403_v60, %s5563_s16 }
 0x176   : > { %v6413_v44 = vpop.permute.xlu1 %1017 }
 0x177   : > { %9236 = vst [vmem:[#allocation84_spill] sm:$0xff] %v6413_v44  ;;  %v6417_v32 = vpop.permute.xlu0 %1023  ;;  %v6433_v44 = vld [vmem:[#allocation2 + $0xac] sm:$0xff] }
 0x178   : > { %9237 = vst [vmem:[#allocation85_spill] sm:$0xff] %v6417_v32  ;;  %1277 = vrot.lane.b32.xlu1 %v6409_v59, %s5563_s16 }
 0x179   : > { %1283 = vrot.lane.b32.xlu0 %v6415_v12, %s5563_s16 }
 0x17a   : > { %v6425_v46 = vpop.permute.xlu1 %1021 }
 0x17b   : > { %9238 = vst [vmem:[#allocation86_spill] sm:$0xff] %v6425_v46  ;;  %v6429_v58 = vpop.permute.xlu0 %1027  ;;  %v6445_v46 = vld [vmem:[#allocation2 + $0xbc] sm:$0xff] }
 0x17c   : > { %9239 = vst [vmem:[#allocation87_spill] sm:$0xff] %v6429_v58  ;;  %1281 = vrot.lane.b32.xlu1 %v6421_v42, %s5563_s16 }
 0x17d   : > { %1287 = vrot.lane.b32.xlu0 %v6427_v36, %s5563_s16 }
 0x17e   : > { %v6437_v32 = vpop.permute.xlu1 %1025 }
 0x17f   : > { %9240 = vst [vmem:[#allocation88_spill] sm:$0xff] %v6437_v32  ;;  %v6441_v4 = vpop.permute.xlu0 %1103  ;;  %v6457_v32 = vld [vmem:[#allocation2 + $0xcc] sm:$0xff] }
 0x180   : > { %1285 = vrot.lane.b32.xlu1 %v6433_v44, %s5563_s16 }
 0x181   : > { %1291 = vrot.lane.b32.xlu0 %v6439_v3, %s5563_s16 }
 0x182   : > { %v6449_v58 = vpop.permute.xlu1 %1029 }
 0x183   : > { %9241 = vst [vmem:[#allocation89_spill] sm:$0xff] %v6449_v58  ;;  %v6453_v29 = vpop.permute.xlu0 %1107  ;;  %v6469_v58 = vld [vmem:[#allocation2 + $0xdc] sm:$0xff] }
 0x184   : > { %1289 = vrot.lane.b32.xlu1 %v6445_v46, %s5563_s16 }
 0x185   : > { %1295 = vrot.lane.b32.xlu0 %v6451_v27, %s5563_s16 }
 0x186   : > { %v6461_v57 = vpop.permute.xlu1 %1105 }
 0x187   : > { %v6465_v7 = vpop.permute.xlu0 %1111 }
 0x188   : > { %9242 = vst [vmem:[#allocation90_spill] sm:$0xff] %v6465_v7  ;;  %1293 = vrot.lane.b32.xlu1 %v6457_v32, %s5563_s16 }
 0x189   : > { %1299 = vrot.lane.b32.xlu0 %v6463_v55, %s5563_s16 }
 0x18a   : > { %v6473_v24 = vpop.permute.xlu1 %1109 }
 0x18b   : > { %v6477_v56 = vpop.permute.xlu0 %1115 }
 0x18c   : > { %9243 = vst [vmem:[#allocation91_spill] sm:$0xff] %v6477_v56  ;;  %1297 = vrot.lane.b32.xlu1 %v6469_v58, %s5563_s16 }
 0x18d   : > { %1303 = vrot.lane.b32.xlu0 %v6475_v25, %s5563_s16 }
 0x18e   : > { %v6485_v15 = vpop.permute.xlu1 %1113 }
 0x18f   : > { %9244 = vst [vmem:[#allocation92_spill] sm:$0xff] %v6485_v15  ;;  %v6489_v23 = vpop.permute.xlu0 %1119  ;;  %v6505_v15 = vld [vmem:[#allocation2 + $0x10c] sm:$0xff] }
 0x190   : > { %9245 = vst [vmem:[#allocation93_spill] sm:$0xff] %v6489_v23  ;;  %1301 = vrot.lane.b32.xlu1 %v6481_v5, %s5563_s16 }
 0x191   : > { %1307 = vrot.lane.b32.xlu0 %v6487_v22, %s5563_s16 }
 0x192   : > { %v6497_v56 = vpop.permute.xlu1 %1117 }
 0x193   : > { %9246 = vst [vmem:[#allocation94_spill] sm:$0xff] %v6497_v56  ;;  %v6501_v10 = vpop.permute.xlu0 %1123  ;;  %v6517_v56 = vld [vmem:[#allocation2 + $0x11c] sm:$0xff] }
 0x194   : > { %9247 = vst [vmem:[#allocation95_spill] sm:$0xff] %v6501_v10  ;;  %1305 = vrot.lane.b32.xlu1 %v6493_v54, %s5563_s16 }
 0x195   : > { %1311 = vrot.lane.b32.xlu0 %v6499_v38, %s5563_s16 }
 0x196   : > { %v6509_v23 = vpop.permute.xlu1 %1121 }
 0x197   : > { %9248 = vst [vmem:[#allocation96_spill] sm:$0xff] %v6509_v23  ;;  %v6513_v21 = vpop.permute.xlu0 %1127  ;;  %v6527_v23 = vld [vmem:[#allocation2 + $0x12c] sm:$0xff] }
 0x198   : > { %9249 = vst [vmem:[#allocation97_spill] sm:$0xff] %v6513_v21  ;;  %1309 = vrot.lane.b32.xlu1 %v6505_v15, %s5563_s16 }
 0x199   : > { %1315 = vrot.lane.b32.xlu0 %v6511_v20, %s5563_s16 }
 0x19a   : > { %v6521_v10 = vpop.permute.xlu1 %1125 }
 0x19b   : > { %9250 = vst [vmem:[#allocation98_spill] sm:$0xff] %v6521_v10  ;;  %v6523_v53 = vpop.permute.xlu0 %1131 }
 0x19c   : > { %9251 = vst [vmem:[#allocation99_spill] sm:$0xff] %v6523_v53  ;;  %1313 = vrot.lane.b32.xlu1 %v6517_v56, %s5563_s16 }
 0x19d   : > { %1357 = vrot.lane.b32.xlu0 %v6319_v63, %s5564_s17 }
 0x19e   : > { %v6531_v21 = vpop.permute.xlu1 %1129 }
 0x19f   : > { %9252 = vst [vmem:[#allocation100_spill] sm:$0xff] %v6531_v21  ;;  %v6533_v7 = vpop.permute.xlu0 %1135 }
 0x1a0   : > { %9253 = vst [vmem:[#allocation101_spill] sm:$0xff] %v6533_v7  ;;  %1317 = vrot.lane.b32.xlu1 %v6527_v23, %s5563_s16 }
 0x1a1   : > { %1361 = vrot.lane.b32.xlu0 %v6328_v26, %s5564_s17 }
 0x1a2   : > { %v6539_v53 = vpop.permute.xlu1 %1133 }
 0x1a3   : > { %9254 = vst [vmem:[#allocation102_spill] sm:$0xff] %v6539_v53  ;;  %v6541_v10 = vpop.permute.xlu0 %1139 }
 0x1a4   : > { %9255 = vst [vmem:[#allocation103_spill] sm:$0xff] %v6541_v10  ;;  %1359 = vrot.lane.b32.xlu1 %v6333_v0, %s5564_s17  ;;  %v630_v10 = vld [vmem:[#allocation2 + $0x12d] sm:$0xff] }
 0x1a5   : > { %1365 = vrot.lane.b32.xlu0 %v6339_v30, %s5564_s17 }
 0x1a6   : > { %v6547_v63 = vpop.permute.xlu1 %1137 }
 0x1a7   : > { %9256 = vst [vmem:[#allocation104_spill] sm:$0xff] %v6547_v63  ;;  %v6549_v21 = vpop.permute.xlu0 %1143 }
 0x1a8   : > { %9257 = vst [vmem:[#allocation105_spill] sm:$0xff] %v6549_v21  ;;  %1363 = vrot.lane.b32.xlu1 %v6349_v2, %s5564_s17 }
 0x1a9   : > { %1369 = vrot.lane.b32.xlu0 %v6355_v34, %s5564_s17 }
 0x1aa   : > { %v6555_v26 = vpop.permute.xlu1 %1141 }
 0x1ab   : > { %9258 = vst [vmem:[#allocation106_spill] sm:$0xff] %v6555_v26  ;;  %v6557_v7 = vpop.permute.xlu0 %1147  ;;  %v2049_v26 = vld [vmem:[%s9145_s2 + $0x8] sm:$0xff] }
 0x1ac   : > { %9259 = vst [vmem:[#allocation107_spill] sm:$0xff] %v6557_v7  ;;  %1367 = vrot.lane.b32.xlu1 %v6361_v61, %s5564_s17 }
 0x1ad   : > { %1373 = vrot.lane.b32.xlu0 %v6367_v52, %s5564_s17 }
 0x1ae   : > { %v6563_v0 = vpop.permute.xlu1 %1145 }
 0x1af   : > { %9260 = vst [vmem:[#allocation108_spill] sm:$0xff] %v6563_v0  ;;  %v6565_v30 = vpop.permute.xlu0 %1151  ;;  %v2053_v0 = vld [vmem:[%s9145_s2 + $0x28] sm:$0xff] }
 0x1b0   : > { %9261 = vst [vmem:[#allocation109_spill] sm:$0xff] %v6565_v30  ;;  %1371 = vrot.lane.b32.xlu1 %v6373_v50, %s5564_s17 }
 0x1b1   : > { %1377 = vrot.lane.b32.xlu0 %v6379_v1, %s5564_s17 }
 0x1b2   : > { %v6571_v34 = vpop.permute.xlu1 %1149 }
 0x1b3   : > { %9262 = vst [vmem:[#allocation110_spill] sm:$0xff] %v6571_v34  ;;  %v6573_v2 = vpop.permute.xlu0 %1155  ;;  %v609_v34 = vld [vmem:[#allocation2 + $0x85] sm:$0xff] }
 0x1b4   : > { %9263 = vst [vmem:[#allocation111_spill] sm:$0xff] %v6573_v2  ;;  %1375 = vrot.lane.b32.xlu1 %v6385_v62, %s5564_s17 }
 0x1b5   : > { %1381 = vrot.lane.b32.xlu0 %v6391_v40, %s5564_s17 }
 0x1b6   : > { %v6579_v61 = vpop.permute.xlu1 %1153 }
 0x1b7   : > { %9264 = vst [vmem:[#allocation112_spill] sm:$0xff] %v6579_v61  ;;  %v6581_v52 = vpop.permute.xlu0 %1159  ;;  %v607_v61 = vld [vmem:[#allocation2 + $0x75] sm:$0xff] }
 0x1b8   : > { %9265 = vst [vmem:[#allocation113_spill] sm:$0xff] %v6581_v52  ;;  %1379 = vrot.lane.b32.xlu1 %v6397_v48, %s5564_s17 }
 0x1b9   : > { %1385 = vrot.lane.b32.xlu0 %v6403_v60, %s5564_s17 }
 0x1ba   : > { %v6587_v1 = vpop.permute.xlu1 %1157 }
 0x1bb   : > { %9266 = vst [vmem:[#allocation114_spill] sm:$0xff] %v6587_v1  ;;  %v6589_v50 = vpop.permute.xlu0 %1163  ;;  %v605_v1 = vld [vmem:[#allocation2 + $0x65] sm:$0xff] }
 0x1bc   : > { %9267 = vst [vmem:[#allocation115_spill] sm:$0xff] %v6589_v50  ;;  %1383 = vrot.lane.b32.xlu1 %v6409_v59, %s5564_s17 }
 0x1bd   : > { %1389 = vrot.lane.b32.xlu0 %v6415_v12, %s5564_s17 }
 0x1be   : > { %v6595_v40 = vpop.permute.xlu1 %1161 }
 0x1bf   : > { %9268 = vst [vmem:[#allocation116_spill] sm:$0xff] %v6595_v40  ;;  %v6597_v62 = vpop.permute.xlu0 %1167  ;;  %v603_v40 = vld [vmem:[#allocation2 + $0x55] sm:$0xff] }
 0x1c0   : > { %9269 = vst [vmem:[#allocation117_spill] sm:$0xff] %v6597_v62  ;;  %1387 = vrot.lane.b32.xlu1 %v6421_v42, %s5564_s17 }
 0x1c1   : > { %1393 = vrot.lane.b32.xlu0 %v6427_v36, %s5564_s17 }
 0x1c2   : > { %v6603_v60 = vpop.permute.xlu1 %1165 }
 0x1c3   : > { %9270 = vst [vmem:[#allocation118_spill] sm:$0xff] %v6603_v60  ;;  %v6605_v48 = vpop.permute.xlu0 %1171  ;;  %v601_v60 = vld [vmem:[#allocation2 + $0x45] sm:$0xff] }
 0x1c4   : > { %9271 = vst [vmem:[#allocation119_spill] sm:$0xff] %v6605_v48  ;;  %1391 = vrot.lane.b32.xlu1 %v6433_v44, %s5564_s17 }
 0x1c5   : > { %1397 = vrot.lane.b32.xlu0 %v6439_v3, %s5564_s17 }
 0x1c6   : > { %v6611_v59 = vpop.permute.xlu1 %1169 }
 0x1c7   : > { %9272 = vst [vmem:[#allocation120_spill] sm:$0xff] %v6611_v59  ;;  %v6613_v12 = vpop.permute.xlu0 %1247  ;;  %v599_v59 = vld [vmem:[#allocation2 + $0x35] sm:$0xff] }
 0x1c8   : > { %1395 = vrot.lane.b32.xlu1 %v6445_v46, %s5564_s17 }
 0x1c9   : > { %1401 = vrot.lane.b32.xlu0 %v6451_v27, %s5564_s17 }
 0x1ca   : > { %v6619_v36 = vpop.permute.xlu1 %1173 }
 0x1cb   : > { %9273 = vst [vmem:[#allocation121_spill] sm:$0xff] %v6619_v36  ;;  %v6621_v42 = vpop.permute.xlu0 %1251 }
 0x1cc   : > { %1399 = vrot.lane.b32.xlu1 %v6457_v32, %s5564_s17 }
 0x1cd   : > { %1405 = vrot.lane.b32.xlu0 %v6463_v55, %s5564_s17 }
 0x1ce   : > { %v6627_v3 = vpop.permute.xlu1 %1249 }
 0x1cf   : > { %v6629_v44 = vpop.permute.xlu0 %1255 }
 0x1d0   : > { %1403 = vrot.lane.b32.xlu1 %v6469_v58, %s5564_s17 }
 0x1d1   : > { %1409 = vrot.lane.b32.xlu0 %v6475_v25, %s5564_s17 }
 0x1d2   : > { %v6635_v27 = vpop.permute.xlu1 %1253 }
 0x1d3   : > { %v6637_v46 = vpop.permute.xlu0 %1259 }
 0x1d4   : > { %1407 = vrot.lane.b32.xlu1 %v6481_v5, %s5564_s17 }
 0x1d5   : > { %1413 = vrot.lane.b32.xlu0 %v6487_v22, %s5564_s17  ;;  %v595_v22 = vld [vmem:[#allocation2 + $0x134] sm:$0xff] }
 0x1d6   : > { %v6643_v32 = vpop.permute.xlu1 %1257 }
 0x1d7   : > { %v6645_v55 = vpop.permute.xlu0 %1263 }
 0x1d8   : > { %1411 = vrot.lane.b32.xlu1 %v6493_v54, %s5564_s17 }
 0x1d9   : > { %1417 = vrot.lane.b32.xlu0 %v6499_v38, %s5564_s17  ;;  %v597_v38 = vld [vmem:[#allocation2 + $0x25] sm:$0xff] }
 0x1da   : > { %v6651_v58 = vpop.permute.xlu1 %1261 }
 0x1db   : > { %v6653_v25 = vpop.permute.xlu0 %1267 }
 0x1dc   : > { %9274 = vst [vmem:[#allocation122_spill] sm:$0xff] %v6653_v25  ;;  %1415 = vrot.lane.b32.xlu1 %v6505_v15, %s5564_s17  ;;  %v596_v15 = vld [vmem:[#allocation2 + $0x13c] sm:$0xff] }
 0x1dd   : > { %1421 = vrot.lane.b32.xlu0 %v6511_v20, %s5564_s17 }
 0x1de   : > { %v6659_v5 = vpop.permute.xlu1 %1265 }
 0x1df   : > { %9275 = vst [vmem:[#allocation123_spill] sm:$0xff] %v6659_v5  ;;  %v6661_v36 = vpop.permute.xlu0 %1271 }
 0x1e0   : > { %9276 = vst [vmem:[#allocation124_spill] sm:$0xff] %v6661_v36  ;;  %1419 = vrot.lane.b32.xlu1 %v6517_v56, %s5564_s17  ;;  %v598_v56 = vld [vmem:[#allocation2 + $0x2d] sm:$0xff] }
 0x1e1   : > { %1425 = vrot.lane.b32.xlu0 %v595_v22, %s5564_s17  ;;  %v665_v36 = vld [vmem:[#allocation2 + $0x126] sm:$0xff] }
 0x1e2   : > { %v6666_v54 = vpop.permute.xlu1 %1269 }
 0x1e3   : > { %9277 = vst [vmem:[#allocation125_spill] sm:$0xff] %v6666_v54  ;;  %v6668_v48 = vpop.permute.xlu0 %1275 }
 0x1e4   : > { %9278 = vst [vmem:[#allocation126_spill] sm:$0xff] %v6668_v48  ;;  %1423 = vrot.lane.b32.xlu1 %v6527_v23, %s5564_s17  ;;  %v600_v23 = vld [vmem:[#allocation2 + $0x3d] sm:$0xff] }
 0x1e5   : > { %1501 = vrot.lane.b32.xlu0 %v597_v38, %s5565_s18 }
 0x1e6   : > { %v6673_v20 = vpop.permute.xlu1 %1273 }
 0x1e7   : > { %9279 = vst [vmem:[#allocation127_spill] sm:$0xff] %v6673_v20  ;;  %v6675_v62 = vpop.permute.xlu0 %1279 }
 0x1e8   : > { %9280 = vst [vmem:[#allocation128_spill] sm:$0xff] %v6675_v62  ;;  %1427 = vrot.lane.b32.xlu1 %v596_v15, %s5564_s17  ;;  %v602_v15 = vld [vmem:[#allocation2 + $0x4d] sm:$0xff] }
 0x1e9   : > { %1505 = vrot.lane.b32.xlu0 %v599_v59, %s5565_s18 }
 0x1ea   : > { %v6679_v22 = vpop.permute.xlu1 %1277 }
 0x1eb   : > { %9281 = vst [vmem:[#allocation129_spill] sm:$0xff] %v6679_v22  ;;  %v6681_v50 = vpop.permute.xlu0 %1283 }
 0x1ec   : > { %9282 = vst [vmem:[#allocation130_spill] sm:$0xff] %v6681_v50  ;;  %1503 = vrot.lane.b32.xlu1 %v598_v56, %s5565_s18  ;;  %v604_v56 = vld [vmem:[#allocation2 + $0x5d] sm:$0xff] }
 0x1ed   : > { %1509 = vrot.lane.b32.xlu0 %v601_v60, %s5565_s18 }
 0x1ee   : > { %v6685_v38 = vpop.permute.xlu1 %1281 }
 0x1ef   : > { %9283 = vst [vmem:[#allocation131_spill] sm:$0xff] %v6685_v38  ;;  %v6687_v52 = vpop.permute.xlu0 %1287 }
 0x1f0   : > { %9284 = vst [vmem:[#allocation132_spill] sm:$0xff] %v6687_v52  ;;  %1507 = vrot.lane.b32.xlu1 %v600_v23, %s5565_s18  ;;  %v606_v23 = vld [vmem:[#allocation2 + $0x6d] sm:$0xff] }
 0x1f1   : > { %1513 = vrot.lane.b32.xlu0 %v603_v40, %s5565_s18 }
 0x1f2   : > { %v6691_v59 = vpop.permute.xlu1 %1285 }
 0x1f3   : > { %9285 = vst [vmem:[#allocation133_spill] sm:$0xff] %v6691_v59  ;;  %v6693_v2 = vpop.permute.xlu0 %1291  ;;  %v2051_v59 = vld [vmem:[%s9145_s2 + $0x18] sm:$0xff] }
 0x1f4   : > { %9286 = vst [vmem:[#allocation134_spill] sm:$0xff] %v6693_v2  ;;  %1511 = vrot.lane.b32.xlu1 %v602_v15, %s5565_s18  ;;  %v608_v15 = vld [vmem:[#allocation2 + $0x7d] sm:$0xff]  ;;  %v611_v2 = vld [vmem:[#allocation2 + $0x95] sm:$0xff] }
 0x1f5   : > { %1517 = vrot.lane.b32.xlu0 %v605_v1, %s5565_s18 }
 0x1f6   : > { %v6697_v60 = vpop.permute.xlu1 %1289 }
 0x1f7   : > { %9287 = vst [vmem:[#allocation135_spill] sm:$0xff] %v6697_v60  ;;  %v6699_v30 = vpop.permute.xlu0 %1295 }
 0x1f8   : > { %9288 = vst [vmem:[#allocation136_spill] sm:$0xff] %v6699_v30  ;;  %1515 = vrot.lane.b32.xlu1 %v604_v56, %s5565_s18  ;;  %v610_v56 = vld [vmem:[#allocation2 + $0x8d] sm:$0xff]  ;;  %v613_v30 = vld [vmem:[#allocation2 + $0xa5] sm:$0xff] }
 0x1f9   : > { %1521 = vrot.lane.b32.xlu0 %v607_v61, %s5565_s18 }
 0x1fa   : > { %v6703_v40 = vpop.permute.xlu1 %1293 }
 0x1fb   : > { %9289 = vst [vmem:[#allocation137_spill] sm:$0xff] %v6703_v40  ;;  %v6705_v7 = vpop.permute.xlu0 %1299 }
 0x1fc   : > { %9290 = vst [vmem:[#allocation138_spill] sm:$0xff] %v6705_v7  ;;  %1519 = vrot.lane.b32.xlu1 %v606_v23, %s5565_s18  ;;  %v612_v23 = vld [vmem:[#allocation2 + $0x9d] sm:$0xff]  ;;  %v615_v7 = vld [vmem:[#allocation2 + $0xb5] sm:$0xff] }
 0x1fd   : > { %1525 = vrot.lane.b32.xlu0 %v609_v34, %s5565_s18 }
 0x1fe   : > { %v6709_v1 = vpop.permute.xlu1 %1297 }
 0x1ff   : > { %9291 = vst [vmem:[#allocation139_spill] sm:$0xff] %v6709_v1  ;;  %v6711_v60 = vpop.permute.xlu0 %1303 }
 0x200   : > { %9292 = vst [vmem:[#allocation140_spill] sm:$0xff] %v6711_v60  ;;  %1523 = vrot.lane.b32.xlu1 %v608_v15, %s5565_s18  ;;  %v614_v15 = vld [vmem:[#allocation2 + $0xad] sm:$0xff]  ;;  %v617_v60 = vld [vmem:[#allocation2 + $0xc5] sm:$0xff] }
 0x201   : > { %1529 = vrot.lane.b32.xlu0 %v611_v2, %s5565_s18 }
 0x202   : > { %v6715_v61 = vpop.permute.xlu1 %1301 }
 0x203   : > { %9293 = vst [vmem:[#allocation141_spill] sm:$0xff] %v6715_v61  ;;  %v6717_v40 = vpop.permute.xlu0 %1307 }
 0x204   : > { %9294 = vst [vmem:[#allocation142_spill] sm:$0xff] %v6717_v40  ;;  %1527 = vrot.lane.b32.xlu1 %v610_v56, %s5565_s18  ;;  %v616_v56 = vld [vmem:[#allocation2 + $0xbd] sm:$0xff]  ;;  %v619_v40 = vld [vmem:[#allocation2 + $0xd5] sm:$0xff] }
 0x205   : > { %1533 = vrot.lane.b32.xlu0 %v613_v30, %s5565_s18 }
 0x206   : > { %v6721_v34 = vpop.permute.xlu1 %1305 }
 0x207   : > { %9295 = vst [vmem:[#allocation143_spill] sm:$0xff] %v6721_v34  ;;  %v6723_v1 = vpop.permute.xlu0 %1311 }
 0x208   : > { %9296 = vst [vmem:[#allocation144_spill] sm:$0xff] %v6723_v1  ;;  %1531 = vrot.lane.b32.xlu1 %v612_v23, %s5565_s18  ;;  %v618_v23 = vld [vmem:[#allocation2 + $0xcd] sm:$0xff]  ;;  %v621_v1 = vld [vmem:[#allocation2 + $0xe5] sm:$0xff] }
 0x209   : > { %1537 = vrot.lane.b32.xlu0 %v615_v7, %s5565_s18 }
 0x20a   : > { %v6727_v2 = vpop.permute.xlu1 %1309 }
 0x20b   : > { %9297 = vst [vmem:[#allocation145_spill] sm:$0xff] %v6727_v2  ;;  %v6729_v61 = vpop.permute.xlu0 %1315 }
 0x20c   : > { %9298 = vst [vmem:[#allocation146_spill] sm:$0xff] %v6729_v61  ;;  %1535 = vrot.lane.b32.xlu1 %v614_v15, %s5565_s18  ;;  %v620_v15 = vld [vmem:[#allocation2 + $0xdd] sm:$0xff] }
 0x20d   : > { %1541 = vrot.lane.b32.xlu0 %v617_v60, %s5565_s18  ;;  %v2056_v60 = vld [vmem:[%s9145_s2 + $0x40] sm:$0xff] }
 0x20e   : > { %v6733_v30 = vpop.permute.xlu1 %1313  ;;  %5386 = vmatprep.subr.mxu0 %v2056_v60 }
 0x20f   : > { %9299 = vst [vmem:[#allocation147_spill] sm:$0xff] %v6733_v30  ;;  %v6735_v34 = vpop.permute.xlu0 %1357  ;;  %5387 = vmatpush3.msra.mxu0 %v2056_v60  ;;  %v625_v60 = vld [vmem:[#allocation2 + $0x105] sm:$0xff] }
 0x210   : > { %1539 = vrot.lane.b32.xlu1 %v616_v56, %s5565_s18  ;;  %v623_v56 = vld [vmem:[#allocation2 + $0xf5] sm:$0xff] }
 0x211   : > { %1545 = vrot.lane.b32.xlu0 %v619_v40, %s5565_s18  ;;  %v2055_v40 = vld [vmem:[%s9145_s2 + $0x38] sm:$0xff] }
 0x212   : > { %v6739_v7 = vpop.permute.xlu1 %1317  ;;  %5388 = vmatprep.subr.mxu0 %v2055_v40 }
 0x213   : > { %9300 = vst [vmem:[#allocation148_spill] sm:$0xff] %v6739_v7  ;;  %v6741_v2 = vpop.permute.xlu0 %1361  ;;  %5389 = vmatpush3.msra.mxu0 %v2055_v40 }
 0x214   : > { %1543 = vrot.lane.b32.xlu1 %v618_v23, %s5565_s18  ;;  %v622_v23 = vld [vmem:[#allocation2 + $0xed] sm:$0xff] }
 0x215   : > { %1549 = vrot.lane.b32.xlu0 %v621_v1, %s5565_s18  ;;  %v2054_v1 = vld [vmem:[%s9145_s2 + $0x30] sm:$0xff] }
 0x216   : > { %v6748_v61 = vpop.permute.xlu1 %1359  ;;  %5390 = vmatprep.subr.mxu0 %v2054_v1 }
 0x217   : > { %v6753_v7 = vpop.permute.xlu0 %1365  ;;  %5391 = vmatpush3.msra.mxu0 %v2054_v1  ;;  %v627_v1 = vld [vmem:[#allocation2 + $0x115] sm:$0xff] }
 0x218   : > { %1547 = vrot.lane.b32.xlu1 %v620_v15, %s5565_s18  ;;  %5392 = vmatprep.subr.mxu0 %v2053_v0  ;;  %v624_v15 = vld [vmem:[#allocation2 + $0xfd] sm:$0xff] }
 0x219   : > { %1553 = vrot.lane.b32.xlu0 %v623_v56, %s5565_s18  ;;  %5393 = vmatpush3.msra.mxu0 %v2053_v0  ;;  %v2052_v56 = vld [vmem:[%s9145_s2 + $0x20] sm:$0xff]  ;;  %v2050_v0 = vld [vmem:[%s9145_s2 + $0x10] sm:$0xff] }
 0x21a   : > { %v6760_v30 = vpop.permute.xlu1 %1363  ;;  %5394 = vmatprep.subr.mxu0 %v2052_v56 }
 0x21b   : > { %v6765_v52 = vpop.permute.xlu0 %1369  ;;  %5395 = vmatpush3.msra.mxu0 %v2052_v56  ;;  %v629_v56 = vld [vmem:[#allocation2 + $0x125] sm:$0xff] }
 0x21c   : > { %1551 = vrot.lane.b32.xlu1 %v622_v23, %s5565_s18  ;;  %5396 = vmatprep.subr.mxu0 %v2051_v59  ;;  %v626_v23 = vld [vmem:[#allocation2 + $0x10d] sm:$0xff] }
 0x21d   : > { %1557 = vrot.lane.b32.xlu0 %v625_v60, %s5565_s18  ;;  %5397 = vmatpush3.msra.mxu0 %v2051_v59  ;;  %v2048_v59 = vld [vmem:[%s9145_s2] sm:$0xff] }
 0x21e   : > { %v6772_v40 = vpop.permute.xlu1 %1367  ;;  %5398 = vmatprep.subr.mxu0 %v2050_v0 }
 0x21f   : > { %v6777_v21 = vpop.permute.xlu0 %1373  ;;  %5399 = vmatpush3.msra.mxu0 %v2050_v0  ;;  %v631_v0 = vld [vmem:[#allocation2 + $0x135] sm:$0xff] }
 0x220   : > { %1555 = vrot.lane.b32.xlu1 %v624_v15, %s5565_s18  ;;  %5400 = vmatprep.subr.mxu0 %v2049_v26  ;;  %v628_v15 = vld [vmem:[#allocation2 + $0x11d] sm:$0xff] }
 0x221   : > { %1561 = vrot.lane.b32.xlu0 %v627_v1, %s5565_s18  ;;  %5401 = vmatpush3.msra.mxu0 %v2049_v26  ;;  %v633_v26 = vld [vmem:[#allocation2 + $0x26] sm:$0xff] }
 0x222   : > { %v6784_v60 = vpop.permute.xlu1 %1371  ;;  %5402 = vmatprep.subr.mxu0 %v2048_v59 }
 0x223   : > { %v6789_v50 = vpop.permute.xlu0 %1377  ;;  %5403 = vmatpush3.msra.mxu0 %v2048_v59  ;;  %v635_v59 = vld [vmem:[#allocation2 + $0x36] sm:$0xff] }
 0x224   : > { %9301 = vst [vmem:[#allocation149_spill] sm:$0xff] %v6789_v50  ;;  %1559 = vrot.lane.b32.xlu1 %v626_v23, %s5565_s18  ;;  %v667_v50 = vld [vmem:[#allocation2 + $0x136] sm:$0xff] }
 0x225   : > { %1565 = vrot.lane.b32.xlu0 %v629_v56, %s5565_s18  ;;  %v632_v56 = vld [vmem:[#allocation2 + $0x13d] sm:$0xff] }
 0x226   : > { %v6796_v1 = vpop.permute.xlu1 %1375 }
 0x227   : > { %9302 = vst [vmem:[#allocation150_spill] sm:$0xff] %v6796_v1  ;;  %v6798_v38 = vpop.permute.xlu0 %1381 }
 0x228   : > { %9303 = vst [vmem:[#allocation151_spill] sm:$0xff] %v6798_v38  ;;  %1563 = vrot.lane.b32.xlu1 %v628_v15, %s5565_s18  ;;  %v5567_v15 = vmov 0   ;;  %v663_v38 = vld [vmem:[#allocation2 + $0x116] sm:$0xff] }
 0x229   : > { %1569 = vrot.lane.b32.xlu0 %v631_v0, %s5565_s18  ;;  %v634_v0 = vld [vmem:[#allocation2 + $0x2e] sm:$0xff]  ;;  %5549 = vset.pattern.permute.xlu1 %v5567_v15 }
 0x22a   : > { %v6802_v23 = vpop.permute.xlu1 %1379  ;;  %5548 = vset.pattern.permute.xlu0 %v5567_v15  ;;  %v638_v15 = vld [vmem:[#allocation2 + $0x4e] sm:$0xff] }
 0x22b   : > { %9304 = vst [vmem:[#allocation152_spill] sm:$0xff] %v6802_v23  ;;  %v6804_v63 = vpop.permute.xlu0 %1385 }
 0x22c   : > { %9305 = vst [vmem:[#allocation153_spill] sm:$0xff] %v6804_v63  ;;  %1567 = vrot.lane.b32.xlu1 %v630_v10, %s5565_s18  ;;  %v637_v10 = vld [vmem:[#allocation2 + $0x46] sm:$0xff] }
 0x22d   : > { %1645 = vrot.lane.b32.xlu0 %v633_v26, %s5566_s25  ;;  %v636_v26 = vld [vmem:[#allocation2 + $0x3e] sm:$0xff] }
 0x22e   : > { %v6808_v62 = vpop.permute.xlu1 %1383 }
 0x22f   : > { %9306 = vst [vmem:[#allocation154_spill] sm:$0xff] %v6808_v62  ;;  %v6810_v22 = vpop.permute.xlu0 %1389 }
 0x230   : > { %9307 = vst [vmem:[#allocation155_spill] sm:$0xff] %v6810_v22  ;;  %1571 = vrot.lane.b32.xlu1 %v632_v56, %s5565_s18  ;;  %v639_v22 = vld [vmem:[#allocation2 + $0x56] sm:$0xff] }
 0x231   : > { %1649 = vrot.lane.b32.xlu0 %v635_v59, %s5566_s25 }
 0x232   : > { %v6814_v53 = vpop.permute.xlu1 %1387 }
 0x233   : > { %9308 = vst [vmem:[#allocation156_spill] sm:$0xff] %v6814_v53  ;;  %v6816_v63 = vpop.permute.xlu0 %1393  ;;  %v641_v53 = vld [vmem:[#allocation2 + $0x66] sm:$0xff] }
 0x234   : > { %9309 = vst [vmem:[#allocation157_spill] sm:$0xff] %v6816_v63  ;;  %1647 = vrot.lane.b32.xlu1 %v634_v0, %s5566_s25  ;;  %v640_v0 = vld [vmem:[#allocation2 + $0x5e] sm:$0xff]  ;;  %v643_v63 = vld [vmem:[#allocation2 + $0x76] sm:$0xff] }
 0x235   : > { %1653 = vrot.lane.b32.xlu0 %v637_v10, %s5566_s25 }
 0x236   : > { %v6820_v62 = vpop.permute.xlu1 %1391 }
 0x237   : > { %9310 = vst [vmem:[#allocation158_spill] sm:$0xff] %v6820_v62  ;;  %v6822_v56 = vpop.permute.xlu0 %1397 }
 0x238   : > { %9311 = vst [vmem:[#allocation159_spill] sm:$0xff] %v6822_v56  ;;  %1651 = vrot.lane.b32.xlu1 %v636_v26, %s5566_s25  ;;  %v642_v26 = vld [vmem:[#allocation2 + $0x6e] sm:$0xff]  ;;  %v645_v56 = vld [vmem:[#allocation2 + $0x86] sm:$0xff] }
 0x239   : > { %1657 = vrot.lane.b32.xlu0 %v639_v22, %s5566_s25 }
 0x23a   : > { %v6826_v59 = vpop.permute.xlu1 %1395 }
 0x23b   : > { %9312 = vst [vmem:[#allocation160_spill] sm:$0xff] %v6826_v59  ;;  %v6828_v48 = vpop.permute.xlu0 %1401 }
 0x23c   : > { %9313 = vst [vmem:[#allocation161_spill] sm:$0xff] %v6828_v48  ;;  %1655 = vrot.lane.b32.xlu1 %v638_v15, %s5566_s25  ;;  %v644_v15 = vld [vmem:[#allocation2 + $0x7e] sm:$0xff]  ;;  %v647_v48 = vld [vmem:[#allocation2 + $0x96] sm:$0xff] }
 0x23d   : > { %1661 = vrot.lane.b32.xlu0 %v641_v53, %s5566_s25 }
 0x23e   : > { %v6832_v10 = vpop.permute.xlu1 %1399 }
 0x23f   : > { %9314 = vst [vmem:[#allocation162_spill] sm:$0xff] %v6832_v10  ;;  %v6834_v62 = vpop.permute.xlu0 %1405 }
 0x240   : > { %9315 = vst [vmem:[#allocation163_spill] sm:$0xff] %v6834_v62  ;;  %1659 = vrot.lane.b32.xlu1 %v640_v0, %s5566_s25  ;;  %v646_v0 = vld [vmem:[#allocation2 + $0x8e] sm:$0xff]  ;;  %v649_v62 = vld [vmem:[#allocation2 + $0xa6] sm:$0xff] }
 0x241   : > { %1665 = vrot.lane.b32.xlu0 %v643_v63, %s5566_s25 }
 0x242   : > { %v6838_v22 = vpop.permute.xlu1 %1403 }
 0x243   : > { %9316 = vst [vmem:[#allocation164_spill] sm:$0xff] %v6838_v22  ;;  %v6840_v59 = vpop.permute.xlu0 %1409 }
 0x244   : > { %9317 = vst [vmem:[#allocation165_spill] sm:$0xff] %v6840_v59  ;;  %1663 = vrot.lane.b32.xlu1 %v642_v26, %s5566_s25  ;;  %v648_v26 = vld [vmem:[#allocation2 + $0x9e] sm:$0xff]  ;;  %v651_v59 = vld [vmem:[#allocation2 + $0xb6] sm:$0xff] }
 0x245   : > { %1669 = vrot.lane.b32.xlu0 %v645_v56, %s5566_s25 }
 0x246   : > { %v6844_v53 = vpop.permute.xlu1 %1407 }
 0x247   : > { %9318 = vst [vmem:[#allocation166_spill] sm:$0xff] %v6844_v53  ;;  %v6846_v10 = vpop.permute.xlu0 %1413 }
 0x248   : > { %9319 = vst [vmem:[#allocation167_spill] sm:$0xff] %v6846_v10  ;;  %1667 = vrot.lane.b32.xlu1 %v644_v15, %s5566_s25  ;;  %v650_v15 = vld [vmem:[#allocation2 + $0xae] sm:$0xff]  ;;  %v653_v10 = vld [vmem:[#allocation2 + $0xc6] sm:$0xff] }
 0x249   : > { %1673 = vrot.lane.b32.xlu0 %v647_v48, %s5566_s25 }
 0x24a   : > { %v6850_v63 = vpop.permute.xlu1 %1411 }
 0x24b   : > { %9320 = vst [vmem:[#allocation168_spill] sm:$0xff] %v6850_v63  ;;  %v6852_v22 = vpop.permute.xlu0 %1417 }
 0x24c   : > { %9321 = vst [vmem:[#allocation169_spill] sm:$0xff] %v6852_v22  ;;  %1671 = vrot.lane.b32.xlu1 %v646_v0, %s5566_s25  ;;  %v652_v0 = vld [vmem:[#allocation2 + $0xbe] sm:$0xff]  ;;  %v655_v22 = vld [vmem:[#allocation2 + $0xd6] sm:$0xff] }
 0x24d   : > { %1677 = vrot.lane.b32.xlu0 %v649_v62, %s5566_s25 }
 0x24e   : > { %v6856_v56 = vpop.permute.xlu1 %1415 }
 0x24f   : > { %9322 = vst [vmem:[#allocation170_spill] sm:$0xff] %v6856_v56  ;;  %v6858_v53 = vpop.permute.xlu0 %1421 }
 0x250   : > { %9323 = vst [vmem:[#allocation171_spill] sm:$0xff] %v6858_v53  ;;  %1675 = vrot.lane.b32.xlu1 %v648_v26, %s5566_s25  ;;  %v654_v26 = vld [vmem:[#allocation2 + $0xce] sm:$0xff]  ;;  %v657_v53 = vld [vmem:[#allocation2 + $0xe6] sm:$0xff] }
 0x251   : > { %1681 = vrot.lane.b32.xlu0 %v651_v59, %s5566_s25 }
 0x252   : > { %v6862_v48 = vpop.permute.xlu1 %1419 }
 0x253   : > { %9324 = vst [vmem:[#allocation172_spill] sm:$0xff] %v6862_v48  ;;  %v6864_v63 = vpop.permute.xlu0 %1425 }
 0x254   : > { %9325 = vst [vmem:[#allocation173_spill] sm:$0xff] %v6864_v63  ;;  %1679 = vrot.lane.b32.xlu1 %v650_v15, %s5566_s25  ;;  %v656_v15 = vld [vmem:[#allocation2 + $0xde] sm:$0xff]  ;;  %v659_v63 = vld [vmem:[#allocation2 + $0xf6] sm:$0xff] }
 0x255   : > { %1685 = vrot.lane.b32.xlu0 %v653_v10, %s5566_s25 }
 0x256   : > { %v6868_v62 = vpop.permute.xlu1 %1423 }
 0x257   : > { %9326 = vst [vmem:[#allocation174_spill] sm:$0xff] %v6868_v62  ;;  %v6870_v56 = vpop.permute.xlu0 %1501 }
 0x258   : > { %1683 = vrot.lane.b32.xlu1 %v652_v0, %s5566_s25  ;;  %v658_v0 = vld [vmem:[#allocation2 + $0xee] sm:$0xff] }
 0x259   : > { %1689 = vrot.lane.b32.xlu0 %v655_v22, %s5566_s25 }
 0x25a   : > { %v6874_v59 = vpop.permute.xlu1 %1427 }
 0x25b   : > { %9327 = vst [vmem:[#allocation175_spill] sm:$0xff] %v6874_v59  ;;  %v6876_v48 = vpop.permute.xlu0 %1505  ;;  %v661_v59 = vld [vmem:[#allocation2 + $0x106] sm:$0xff] }
 0x25c   : > { %1687 = vrot.lane.b32.xlu1 %v654_v26, %s5566_s25  ;;  %v660_v26 = vld [vmem:[#allocation2 + $0xfe] sm:$0xff] }
 0x25d   : > { %1693 = vrot.lane.b32.xlu0 %v657_v53, %s5566_s25 }
 0x25e   : > { %v6880_v10 = vpop.permute.xlu1 %1503 }
 0x25f   : > { %v6882_v62 = vpop.permute.xlu0 %1509 }
 0x260   : > { %1691 = vrot.lane.b32.xlu1 %v656_v15, %s5566_s25  ;;  %v662_v15 = vld [vmem:[#allocation2 + $0x10e] sm:$0xff] }
 0x261   : > { %1697 = vrot.lane.b32.xlu0 %v659_v63, %s5566_s25 }
 0x262   : > { %v6886_v22 = vpop.permute.xlu1 %1507 }
 0x263   : > { %v6888_v20 = vpop.permute.xlu0 %1513 }
 0x264   : > { %1695 = vrot.lane.b32.xlu1 %v658_v0, %s5566_s25  ;;  %v664_v0 = vld [vmem:[#allocation2 + $0x11e] sm:$0xff] }
 0x265   : > { %1701 = vrot.lane.b32.xlu0 %v661_v59, %s5566_s25 }
 0x266   : > { %v6892_v53 = vpop.permute.xlu1 %1511 }
 0x267   : > { %v6894_v23 = vpop.permute.xlu0 %1517 }
 0x268   : > { %9328 = vst [vmem:[#allocation176_spill] sm:$0xff] %v6894_v23  ;;  %1699 = vrot.lane.b32.xlu1 %v660_v26, %s5566_s25  ;;  %v666_v26 = vld [vmem:[#allocation2 + $0x12e] sm:$0xff] }
 0x269   : > { %1705 = vrot.lane.b32.xlu0 %v663_v38, %s5566_s25 }
 0x26a   : > { %v6898_v63 = vpop.permute.xlu1 %1515 }
 0x26b   : > { %v6900_v54 = vpop.permute.xlu0 %1521 }
 0x26c   : > { %9329 = vst [vmem:[#allocation177_spill] sm:$0xff] %v6900_v54  ;;  %1703 = vrot.lane.b32.xlu1 %v662_v15, %s5566_s25  ;;  %v2533_v54 = vld [vmem:[%s9144_s1] sm:$0xff] }
 0x26d   : > { %1709 = vrot.lane.b32.xlu0 %v665_v36, %s5566_s25  ;;  %v668_v36 = vld [vmem:[#allocation2 + $0x13e] sm:$0xff] }
 0x26e   : > { %v6904_v59 = vpop.permute.xlu1 %1519 }
 0x26f   : > { %9330 = vst [vmem:[#allocation178_spill] sm:$0xff] %v6904_v59  ;;  %v6906_v1 = vpop.permute.xlu0 %1525 }
 0x270   : > { %9331 = vst [vmem:[#allocation179_spill] sm:$0xff] %v6906_v1  ;;  %1707 = vrot.lane.b32.xlu1 %v664_v0, %s5566_s25  ;;  %v2536_v0 = vld [vmem:[%s9144_s1 + $0x18] sm:$0xff] }
 0x271   : > { %1713 = vrot.lane.b32.xlu0 %v667_v50, %s5566_s25  ;;  %v2534_v50 = vld [vmem:[%s9144_s1 + $0x8] sm:$0xff] }
 0x272   : > { %v6910_v38 = vpop.permute.xlu1 %1523 }
 0x273   : > { %9332 = vst [vmem:[#allocation180_spill] sm:$0xff] %v6910_v38  ;;  %v6915_v15 = vpop.permute.xlu0 %1529 }
 0x274   : > { %9333 = vst [vmem:[#allocation181_spill] sm:$0xff] %v6915_v15  ;;  %1711 = vrot.lane.b32.xlu1 %v666_v26, %s5566_s25  ;;  %v2538_v26 = vld [vmem:[%s9144_s1 + $0x28] sm:$0xff] }
 0x275   : > { %2571 = vperm.xlu0 %5548, %v2533_v54  }
 0x276   : > { %v6918_v59 = vpop.permute.xlu1 %1527 }
 0x277   : > { %9334 = vst [vmem:[#allocation182_spill] sm:$0xff] %v6918_v59  ;;  %v6923_v1 = vpop.permute.xlu0 %1533 }
 0x278   : > { %9335 = vst [vmem:[#allocation183_spill] sm:$0xff] %v6923_v1  ;;  %1715 = vrot.lane.b32.xlu1 %v668_v36, %s5566_s25  ;;  %v2535_v1 = vld [vmem:[%s9144_s1 + $0x10] sm:$0xff]  ;;  %v2540_v36 = vld [vmem:[%s9144_s1 + $0x38] sm:$0xff] }
 0x279   : > { %2586 = vperm.xlu0 %5548, %v2536_v0   ;;  %v2537_v0 = vld [vmem:[%s9144_s1 + $0x20] sm:$0xff] }
 0x27a   : > { %v6929_v38 = vpop.permute.xlu1 %1531 }
 0x27b   : > { %9336 = vst [vmem:[#allocation184_spill] sm:$0xff] %v6929_v38  ;;  %v6934_v54 = vpop.permute.xlu0 %1537 }
 0x27c   : > { %9337 = vst [vmem:[#allocation185_spill] sm:$0xff] %v6934_v54  ;;  %2576 = vperm.xlu1 %5549, %v2534_v50   ;;  %v2542_v50 = vld [vmem:[%s9144_s1 + $0x48] sm:$0xff] }
 0x27d   : > { %2596 = vperm.xlu0 %5548, %v2538_v26   ;;  %v2539_v26 = vld [vmem:[%s9144_s1 + $0x30] sm:$0xff] }
 0x27e   : > { %v6939_v15 = vpop.permute.xlu1 %1535 }
 0x27f   : > { %9338 = vst [vmem:[#allocation186_spill] sm:$0xff] %v6939_v15  ;;  %v6944_v38 = vpop.permute.xlu0 %1541 }
 0x280   : > { %9339 = vst [vmem:[#allocation187_spill] sm:$0xff] %v6944_v38  ;;  %2581 = vperm.xlu1 %5549, %v2535_v1   ;;  %v2544_v1 = vld [vmem:[%s9144_s1 + $0x58] sm:$0xff] }
 0x281   : > { %2606 = vperm.xlu0 %5548, %v2540_v36   ;;  %v2541_v36 = vld [vmem:[%s9144_s1 + $0x40] sm:$0xff] }
 0x282   : > { %v6949_v54 = vpop.permute.xlu1 %1539 }
 0x283   : > { %9340 = vst [vmem:[#allocation188_spill] sm:$0xff] %v6949_v54  ;;  %v6954_v15 = vpop.permute.xlu0 %1545 }
 0x284   : > { %9341 = vst [vmem:[#allocation189_spill] sm:$0xff] %v6954_v15  ;;  %2591 = vperm.xlu1 %5549, %v2537_v0   ;;  %v2546_v0 = vld [vmem:[%s9144_s1 + $0x68] sm:$0xff] }
 0x285   : > { %2616 = vperm.xlu0 %5548, %v2542_v50   ;;  %v2543_v50 = vld [vmem:[%s9144_s1 + $0x50] sm:$0xff] }
 0x286   : > { %v6959_v38 = vpop.permute.xlu1 %1543 }
 0x287   : > { %9342 = vst [vmem:[#allocation190_spill] sm:$0xff] %v6959_v38  ;;  %v6964_v54 = vpop.permute.xlu0 %1549 }
 0x288   : > { %9343 = vst [vmem:[#allocation191_spill] sm:$0xff] %v6964_v54  ;;  %2601 = vperm.xlu1 %5549, %v2539_v26   ;;  %v2548_v26 = vld [vmem:[%s9144_s1 + $0x78] sm:$0xff] }
 0x289   : > { %2626 = vperm.xlu0 %5548, %v2544_v1   ;;  %v2545_v1 = vld [vmem:[%s9144_s1 + $0x60] sm:$0xff] }
 0x28a   : > { %v6969_v15 = vpop.permute.xlu1 %1547 }
 0x28b   : > { %9344 = vst [vmem:[#allocation192_spill] sm:$0xff] %v6969_v15  ;;  %v6974_v38 = vpop.permute.xlu0 %1553 }
 0x28c   : > { %9345 = vst [vmem:[#allocation193_spill] sm:$0xff] %v6974_v38  ;;  %2611 = vperm.xlu1 %5549, %v2541_v36   ;;  %v2550_v36 = vld [vmem:[%s9144_s1 + $0x88] sm:$0xff] }
 0x28d   : > { %2636 = vperm.xlu0 %5548, %v2546_v0   ;;  %v2547_v0 = vld [vmem:[%s9144_s1 + $0x70] sm:$0xff] }
 0x28e   : > { %v6979_v54 = vpop.permute.xlu1 %1551 }
 0x28f   : > { %9346 = vst [vmem:[#allocation194_spill] sm:$0xff] %v6979_v54  ;;  %v6984_v15 = vpop.permute.xlu0 %1557 }
 0x290   : > { %9347 = vst [vmem:[#allocation195_spill] sm:$0xff] %v6984_v15  ;;  %2621 = vperm.xlu1 %5549, %v2543_v50   ;;  %v413_v50 = vld [vmem:[#allocation2] sm:$0xff] }
 0x291   : > { %2646 = vperm.xlu0 %5548, %v2548_v26  }
 0x292   : > { %v6989_v38 = vpop.permute.xlu1 %1555 }
 0x293   : > { %9348 = vst [vmem:[#allocation196_spill] sm:$0xff] %v6989_v38  ;;  %v6994_v54 = vpop.permute.xlu0 %1561  ;;  %v2552_v38 = vld [vmem:[%s9144_s1 + $0x98] sm:$0xff] }
 0x294   : > { %9349 = vst [vmem:[#allocation197_spill] sm:$0xff] %v6994_v54  ;;  %2631 = vperm.xlu1 %5549, %v2545_v1   ;;  %v2549_v1 = vld [vmem:[%s9144_s1 + $0x80] sm:$0xff]  ;;  %v1753_v54 = vsel %vm338_vm0, %v413_v50, %v5979_v28  ;;  %v415_v28 = vld [vmem:[#allocation2 + $0x10] sm:$0xff] }
 0x295   : > { %2656 = vperm.xlu0 %5548, %v2550_v36   ;;  %v1790_v36 = vsel %vm1789_vm2, %v1753_v54, %v6149_v14  ;;  %v417_v50 = vld [vmem:[#allocation2 + $0x20] sm:$0xff]  ;;  %v2551_v14 = vld [vmem:[%s9144_s1 + $0x90] sm:$0xff]  ;;  %v416_v54 = vld [vmem:[#allocation2 + $0x18] sm:$0xff] }
 0x296   : > { %v6999_v15 = vpop.permute.xlu1 %1559  ;;  %v1827_v59 = vsel %vm1826_vm3, %v1790_v36, %v6271_v13 }
 0x297   : > { %9350 = vst [vmem:[#allocation198_spill] sm:$0xff] %v6999_v15  ;;  %v7004_v26 = vpop.permute.xlu0 %1565 }
 0x298   : > { %9351 = vst [vmem:[#allocation199_spill] sm:$0xff] %v7004_v26  ;;  %2641 = vperm.xlu1 %5549, %v2547_v0   ;;  %v2554_v0 = vld [vmem:[%s9144_s1 + $0xa8] sm:$0xff] }
 0x299   : > { %2666 = vperm.xlu0 %5548, %v2552_v38   ;;  %v414_v26 = vld [vmem:[#allocation2 + $0x8] sm:$0xff]  ;;  %v1864_v38 = vsel %vm1863_vm4, %v1827_v59, %v6441_v4  ;;  %v2556_v4 = vld [vmem:[%s9144_s1 + $0xb8] sm:$0xff] }
 0x29a   : > { %v7011_v15 = vpop.permute.xlu1 %1563  ;;  %v1901_v5 = vsel %vm1900_vm5, %v1864_v38, %v6613_v12  ;;  %v1754_v59 = vsel %vm338_vm0, %v414_v26, %v5989_v31  ;;  %v1757_v12 = vsel %vm338_vm0, %v417_v50, %v6001_v35  ;;  %v421_v38 = vld [vmem:[#allocation2 + $0x40] sm:$0xff]  ;;  %v423_v31 = vld [vmem:[#allocation2 + $0x50] sm:$0xff]  ;;  %v422_v26 = vld [vmem:[#allocation2 + $0x48] sm:$0xff] }
 0x29b   : > { %9352 = vst [vmem:[#allocation200_spill] sm:$0xff] %v7011_v15  ;;  %v7020_v25 = vpop.permute.xlu0 %1569  ;;  %v419_v15 = vld [vmem:[#allocation2 + $0x30] sm:$0xff]  ;;  %v1938_v36 = vsel %vm1937_vm6, %v1901_v5, %v6735_v34  ;;  %v1756_v34 = vsel %vm338_vm0, %v416_v54, %v6009_v37  ;;  %v425_v50 = vld [vmem:[#allocation2 + $0x60] sm:$0xff] }
 0x29c   : > { %9353 = vst [vmem:[#allocation201_spill] sm:$0xff] %v7020_v25  ;;  %2651 = vperm.xlu1 %5549, %v2549_v1   ;;  %v418_v1 = vld [vmem:[#allocation2 + $0x28] sm:$0xff]  ;;  %v1755_v25 = vsel %vm338_vm0, %v415_v28, %v5997_v33  ;;  %v1759_v23 = vsel %vm338_vm0, %v419_v15, %v6013_v39  ;;  %v1791_v33 = vsel %vm1789_vm2, %v1754_v59, %v6163_v17  ;;  %v2553_v28 = vld [vmem:[%s9144_s1 + $0xa0] sm:$0xff] }
 0x29d   : > { %2676 = vperm.xlu0 %5548, %v2554_v0   ;;  %v420_v0 = vld [vmem:[#allocation2 + $0x38] sm:$0xff]  ;;  %v1792_v37 = vsel %vm1789_vm2, %v1755_v25, %v6157_v16  ;;  %v1828_v39 = vsel %vm1826_vm3, %v1791_v33, %v6281_v8  ;;  %v7065_v17 = vsel %vm338_vm0, %v421_v38, %v6025_v43  ;;  %v2558_v8 = vld [vmem:[%s9144_s1 + $0xc8] sm:$0xff]  ;;  %v7078_v25 = vsel %vm338_vm0, %v423_v31, %v6037_v47  ;;  %v9358_v33 = vld [vmem:[#allocation28_spill] sm:$0xff] }
 0x29e   : > { %v7029_v13 = vpop.permute.xlu1 %1567  ;;  %v1865_v16 = vsel %vm1863_vm4, %v1828_v39, %v6461_v57  ;;  %v7082_v43 = vsel %vm338_vm0, %v422_v26, %v6045_v49  ;;  %v7090_v57 = vsel %vm338_vm0, %v425_v50, %v6049_v51  ;;  %v1793_v47 = vsel %vm1789_vm2, %v1756_v34, %v6171_v19  ;;  %v427_v26 = vld [vmem:[#allocation2 + $0x70] sm:$0xff] }
 0x29f   : > { %9354 = vst [vmem:[#allocation202_spill] sm:$0xff] %v7029_v13  ;;  %v1975_v13 = vsel %vm1974_vm7, %v1938_v36, %v6870_v56  ;;  %v1646_v5 = vpop.permute.xlu0 %1645  ;;  %v1758_v56 = vsel %vm338_vm0, %v418_v1, %v6021_v41  ;;  %v1829_v41 = vsel %vm1826_vm3, %v1792_v37, %v6277_v11  ;;  %v1902_v11 = vsel %vm1900_vm5, %v1865_v16, %v6627_v3  ;;  %v424_v3 = vld [vmem:[#allocation2 + $0x58] sm:$0xff]  ;;  %v9360_v37 = vld [vmem:[#allocation59_spill] sm:$0xff] }
 0x2a0   : > { %2661 = vperm.xlu1 %5549, %v2551_v14   ;;  %v2012_v35 = vsel %vm2011_vm8, %v1975_v13, %v1646_v5  ;;  %v1760_v14 = vsel %vm338_vm0, %v420_v0, %v6033_v45  ;;  %v1866_v45 = vsel %vm1863_vm4, %v1829_v41, %v6453_v29  ;;  %v1939_v49 = vsel %vm1937_vm6, %v1902_v11, %v6748_v61  ;;  %v2555_v29 = vld [vmem:[%s9144_s1 + $0xb0] sm:$0xff]  ;;  %v9357_v0 = vld [vmem:[#allocation29_spill] sm:$0xff] }
 0x2a1   : > { %5404 = vmatprep.mubr.msk.f32.mxu0 %vm2057_vm9, %v2012_v35  ;;  %2686 = vperm.xlu0 %5548, %v2556_v4   ;;  %v1903_v13 = vsel %vm1900_vm5, %v1866_v45, %v6621_v42  ;;  %v1794_v1 = vsel %vm1789_vm2, %v1757_v12, %v6165_v18  ;;  %v1830_v51 = vsel %vm1826_vm3, %v1793_v47, %v6287_v6  ;;  %v2560_v6 = vld [vmem:[%s9144_s1 + $0xd8] sm:$0xff]  ;;  %v9361_v41 = vld [vmem:[#allocation92_spill] sm:$0xff]  ;;  %v9362_v45 = vld [vmem:[#allocation91_spill] sm:$0xff] }
 0x2a2   : > { %v7061_v15 = vpop.permute.xlu1 %1571  ;;  %v1940_v19 = vsel %vm1937_vm6, %v1903_v13, %v6741_v2  ;;  %v1976_v42 = vsel %vm1974_vm7, %v1939_v49, %v6880_v10  ;;  %v1831_v61 = vsel %vm1826_vm3, %v1794_v1, %v6283_v9  ;;  %v1867_v4 = vsel %vm1863_vm4, %v1830_v51, %v6473_v24  ;;  %v9355_v2 = vld [vmem:[#allocation90_spill] sm:$0xff]  ;;  %v9356_v24 = vld [vmem:[#allocation4_spill] sm:$0xff]  ;;  %v9363_v13 = vld [vmem:[#allocation5_spill] sm:$0xff] }
 0x2a3   : > { %v1650_v54 = vpop.permute.xlu0 %1649  ;;  %v1977_v18 = vsel %vm1974_vm7, %v1940_v19, %v6876_v48  ;;  %v1868_v10 = vsel %vm1863_vm4, %v1831_v61, %v9355_v2  ;;  %v1904_v12 = vsel %vm1900_vm5, %v1867_v4, %v6635_v27  ;;  %v7127_v48 = vsel %vm338_vm0, %v424_v3, %v9356_v24  ;;  %v2557_v27 = vld [vmem:[%s9144_s1 + $0xc0] sm:$0xff]  ;;  %v9364_v49 = vld [vmem:[#allocation31_spill] sm:$0xff]  ;;  %v9367_v4 = vld [vmem:[#allocation61_spill] sm:$0xff] }
 0x2a4   : > { %2671 = vperm.xlu1 %5549, %v2553_v28   ;;  %v2014_v9 = vsel %vm2011_vm8, %v1977_v18, %v1650_v54  ;;  %v1795_v5 = vsel %vm1789_vm2, %v1758_v56, %v9357_v0  ;;  %v1905_v34 = vsel %vm1900_vm5, %v1868_v10, %v6629_v44  ;;  %v1941_v31 = vsel %vm1937_vm6, %v1904_v12, %v6760_v30  ;;  %v9359_v28 = vld [vmem:[#allocation60_spill] sm:$0xff]  ;;  %v426_v51 = vld [vmem:[#allocation2 + $0x68] sm:$0xff]  ;;  %v9365_v19 = vld [vmem:[#allocation30_spill] sm:$0xff] }
 0x2a5   : > { %2696 = vperm.xlu0 %5548, %v2558_v8   ;;  %v1796_v35 = vsel %vm1789_vm2, %v1759_v23, %v9358_v33  ;;  %v1832_v50 = vsel %vm1826_vm3, %v1795_v5, %v9359_v28  ;;  %v1942_v56 = vsel %vm1937_vm6, %v1905_v34, %v6753_v7  ;;  %v1978_v44 = vsel %vm1974_vm7, %v1941_v31, %v6886_v22  ;;  %v2562_v7 = vld [vmem:[%s9144_s1 + $0xe8] sm:$0xff]  ;;  %v9369_v10 = vld [vmem:[#allocation93_spill] sm:$0xff]  ;;  %v9370_v24 = vld [vmem:[#allocation6_spill] sm:$0xff] }
 0x2a6   : > { %v1648_v36 = vpop.permute.xlu1 %1647  ;;  %v1833_v39 = vsel %vm1826_vm3, %v1796_v35, %v9360_v37  ;;  %v1869_v16 = vsel %vm1863_vm4, %v1832_v50, %v9361_v41  ;;  %v1979_v23 = vsel %vm1974_vm7, %v1942_v56, %v6882_v62  ;;  %v7165_v62 = vsel %vm338_vm0, %v427_v26, %v9363_v13  ;;  %v9371_v0 = vld [vmem:[#allocation33_spill] sm:$0xff]  ;;  %v9372_v26 = vld [vmem:[#allocation32_spill] sm:$0xff]  ;;  %v9374_v50 = vld [vmem:[#allocation63_spill] sm:$0xff] }
 0x2a7   : > { %v2013_v59 = vsel %vm2011_vm8, %v1976_v42, %v1648_v36  ;;  %v1654_v38 = vpop.permute.xlu0 %1653  ;;  %v1870_v22 = vsel %vm1863_vm4, %v1833_v39, %v9362_v45  ;;  %v1906_v11 = vsel %vm1900_vm5, %v1869_v16, %v6643_v32  ;;  %v2559_v32 = vld [vmem:[%s9144_s1 + $0xd0] sm:$0xff]  ;;  %v1798_v42 = vsel %vm1789_vm2, %v7065_v17, %v9365_v19  ;;  %v9366_v36 = vld [vmem:[#allocation62_spill] sm:$0xff]  ;;  %v9377_v41 = vld [vmem:[#allocation95_spill] sm:$0xff] }
 0x2a8   : > { %5405 = vmatmul.mubr.msk.f32.vlgmr.msra.gmra.mxu0 %vm2057_vm9, %v2013_v59  ;;  %2681 = vperm.xlu1 %5549, %v2555_v29   ;;  %v2016_v54 = vsel %vm2011_vm8, %v1979_v23, %v1654_v38  ;;  %v1797_v29 = vsel %vm1789_vm2, %v1760_v14, %v9364_v49  ;;  %v1907_v3 = vsel %vm1900_vm5, %v1870_v22, %v6637_v46  ;;  %v9368_v59 = vld [vmem:[#allocation94_spill] sm:$0xff]  ;;  %v9373_v35 = vld [vmem:[#allocation64_spill] sm:$0xff]  ;;  %v9378_v16 = vld [vmem:[#allocation123_spill] sm:$0xff] }
 0x2a9   : > { %5407 = vmatprep.mubr.msk.f32.mxu0 %vm2057_vm9, %v2014_v9  ;;  %2706 = vperm.xlu0 %5548, %v2560_v6   ;;  %v1943_v1 = vsel %vm1937_vm6, %v1906_v11, %v6772_v40  ;;  %v1834_v14 = vsel %vm1826_vm3, %v1797_v29, %v9366_v36  ;;  %v1944_v46 = vsel %vm1937_vm6, %v1907_v3, %v6765_v52  ;;  %v2564_v52 = vld [vmem:[%s9144_s1 + $0xf8] sm:$0xff]  ;;  %v9376_v37 = vld [vmem:[#allocation176_spill] sm:$0xff]  ;;  %v9379_v45 = vld [vmem:[#allocation7_spill] sm:$0xff] }
 0x2aa   : > { %v1652_v30 = vpop.permute.xlu1 %1651  ;;  %v1980_v40 = vsel %vm1974_vm7, %v1943_v1, %v6892_v53  ;;  %v1835_v18 = vsel %vm1826_vm3, %v1798_v42, %v9367_v4  ;;  %v1871_v6 = vsel %vm1863_vm4, %v1834_v14, %v9368_v59  ;;  %v1981_v17 = vsel %vm1974_vm7, %v1944_v46, %v6888_v20  ;;  %v9380_v11 = vld [vmem:[#allocation35_spill] sm:$0xff]  ;;  %v9382_v49 = vld [vmem:[#allocation150_spill] sm:$0xff]  ;;  %v2563_v3 = vld [vmem:[%s9144_s1 + $0xf0] sm:$0xff] }
 0x2ab   : > { %v2015_v8 = vsel %vm2011_vm8, %v1978_v44, %v1652_v30  ;;  %v1658_v47 = vpop.permute.xlu0 %1657  ;;  %v1872_v53 = vsel %vm1863_vm4, %v1835_v18, %v9369_v10  ;;  %v1908_v12 = vsel %vm1900_vm5, %v1871_v6, %v6651_v58  ;;  %v1766_v20 = vsel %vm338_vm0, %v426_v51, %v9370_v24  ;;  %v2561_v58 = vld [vmem:[%s9144_s1 + $0xe0] sm:$0xff]  ;;  %v9375_v44 = vld [vmem:[#allocation96_spill] sm:$0xff]  ;;  %v428_v1 = vld [vmem:[#allocation2 + $0x78] sm:$0xff] }
 0x2ac   : > { %5408 = vmatmul.mubr.msk.f32.gmra.mxu0 %vm2057_vm9, %v2015_v8  ;;  %2691 = vperm.xlu1 %5549, %v2557_v27   ;;  %v2018_v9 = vsel %vm2011_vm8, %v1981_v17, %v1658_v47  ;;  %v1799_v5 = vsel %vm1789_vm2, %v7082_v43, %v9371_v0  ;;  %v1909_v34 = vsel %vm1900_vm5, %v1872_v53, %v6645_v55  ;;  %v429_v27 = vld [vmem:[#allocation2 + $0x80] sm:$0xff]  ;;  %v9385_v42 = vld [vmem:[#allocation149_spill] sm:$0xff]  ;;  %v9392_v24 = vld [vmem:[#allocation8_spill] sm:$0xff] }
 0x2ad   : > { %5410 = vmatprep.mubr.msk.f32.mxu0 %vm2057_vm9, %v2016_v54  ;;  %2716 = vperm.xlu0 %5548, %v2562_v7   ;;  %v1945_v31 = vsel %vm1937_vm6, %v1908_v12, %v6784_v60  ;;  %v1800_v33 = vsel %vm1789_vm2, %v7078_v25, %v9372_v26  ;;  %v1836_v43 = vsel %vm1826_vm3, %v1799_v5, %v9373_v35  ;;  %v9381_v47 = vld [vmem:[#allocation122_spill] sm:$0xff]  ;;  %v9389_v6 = vld [vmem:[#allocation177_spill] sm:$0xff]  ;;  %v430_v35 = vld [vmem:[#allocation2 + $0x88] sm:$0xff] }
 0x2ae   : > { %v1656_v61 = vpop.permute.xlu1 %1655  ;;  %v1946_v55 = vsel %vm1937_vm6, %v1909_v34, %v6777_v21  ;;  %v1982_v60 = vsel %vm1974_vm7, %v1945_v31, %v6898_v63  ;;  %v1837_v56 = vsel %vm1826_vm3, %v1800_v33, %v9374_v50  ;;  %v1873_v30 = vsel %vm1863_vm4, %v1836_v43, %v9375_v44  ;;  %v2566_v21 = vld [vmem:[%s9144_s1 + $0x108] sm:$0xff]  ;;  %v9384_v19 = vld [vmem:[#allocation66_spill] sm:$0xff]  ;;  %v9391_v53 = vld [vmem:[#allocation125_spill] sm:$0xff] }
 0x2af   : > { %v2017_v2 = vsel %vm2011_vm8, %v1980_v40, %v1656_v61  ;;  %v1662_v38 = vpop.permute.xlu0 %1661  ;;  %v1983_v25 = vsel %vm1974_vm7, %v1946_v55, %v9376_v37  ;;  %v1874_v63 = vsel %vm1863_vm4, %v1837_v56, %v9377_v41  ;;  %v1910_v23 = vsel %vm1900_vm5, %v1873_v30, %v9378_v16  ;;  %v9386_v14 = vld [vmem:[#allocation178_spill] sm:$0xff]  ;;  %v9387_v61 = vld [vmem:[#allocation65_spill] sm:$0xff]  ;;  %v9394_v31 = vld [vmem:[#allocation124_spill] sm:$0xff] }
 0x2b0   : > { %5411 = vmatmul.mubr.msk.f32.gmra.mxu0 %vm2057_vm9, %v2017_v2  ;;  %2701 = vperm.xlu1 %5549, %v2559_v32   ;;  %v2020_v8 = vsel %vm2011_vm8, %v1983_v25, %v1662_v38  ;;  %v1769_v22 = vsel %vm338_vm0, %v429_v27, %v9379_v45  ;;  %v1801_v54 = vsel %vm1789_vm2, %v7127_v48, %v9380_v11  ;;  %v9383_v32 = vld [vmem:[#allocation34_spill] sm:$0xff]  ;;  %v2568_v2 = vld [vmem:[%s9144_s1 + $0x118] sm:$0xff]  ;;  %v9395_v27 = vld [vmem:[#allocation152_spill] sm:$0xff] }
 0x2b1   : > { %5413 = vmatprep.mubr.msk.f32.mxu0 %vm2057_vm9, %v2018_v9  ;;  %2726 = vperm.xlu0 %5548, %v2564_v52   ;;  %v1911_v13 = vsel %vm1900_vm5, %v1874_v63, %v9381_v47  ;;  %v1947_v29 = vsel %vm1937_vm6, %v1910_v23, %v9382_v49  ;;  %v1802_v51 = vsel %vm1789_vm2, %v7090_v57, %v9383_v32  ;;  %v9388_v18 = vld [vmem:[#allocation98_spill] sm:$0xff]  ;;  %v9390_v52 = vld [vmem:[#allocation97_spill] sm:$0xff]  ;;  %v9396_v43 = vld [vmem:[#allocation36_spill] sm:$0xff] }
 0x2b2   : > { %v1660_v28 = vpop.permute.xlu1 %1659  ;;  %v1838_v48 = vsel %vm1826_vm3, %v1801_v54, %v9384_v19  ;;  %v1948_v36 = vsel %vm1937_vm6, %v1911_v13, %v9385_v42  ;;  %v1984_v46 = vsel %vm1974_vm7, %v1947_v29, %v9386_v14  ;;  %v1839_v4 = vsel %vm1826_vm3, %v1802_v51, %v9387_v61  ;;  %v9393_v5 = vld [vmem:[#allocation37_spill] sm:$0xff]  ;;  %v2565_v33 = vld [vmem:[%s9144_s1 + $0x100] sm:$0xff]  ;;  %v9399_v56 = vld [vmem:[#allocation180_spill] sm:$0xff] }
 0x2b3   : > { %v2019_v39 = vsel %vm2011_vm8, %v1982_v60, %v1660_v28  ;;  %v1666_v7 = vpop.permute.xlu0 %1665  ;;  %v1875_v59 = vsel %vm1863_vm4, %v1838_v48, %v9388_v18  ;;  %v1985_v57 = vsel %vm1974_vm7, %v1948_v36, %v9389_v6  ;;  %v1876_v10 = vsel %vm1863_vm4, %v1839_v4, %v9390_v52  ;;  %v9397_v60 = vld [vmem:[#allocation68_spill] sm:$0xff]  ;;  %v9398_v28 = vld [vmem:[#allocation151_spill] sm:$0xff]  ;;  %v9405_v54 = vld [vmem:[#allocation10_spill] sm:$0xff] }
 0x2b4   : > { %5414 = vmatmul.mubr.msk.f32.gmra.mxu0 %vm2057_vm9, %v2019_v39  ;;  %2711 = vperm.xlu1 %5549, %v2561_v58   ;;  %v1912_v12 = vsel %vm1900_vm5, %v1875_v59, %v9391_v53  ;;  %v2022_v9 = vsel %vm2011_vm8, %v1985_v57, %v1666_v7  ;;  %v1768_v0 = vsel %vm338_vm0, %v428_v1, %v9392_v24  ;;  %v9400_v37 = vld [vmem:[#allocation67_spill] sm:$0xff]  ;;  %v9401_v39 = vld [vmem:[#allocation100_spill] sm:$0xff]  ;;  %v9407_v29 = vld [vmem:[#allocation126_spill] sm:$0xff] }
 0x2b5   : > { %5416 = vmatprep.mubr.msk.f32.mxu0 %vm2057_vm9, %v2020_v8  ;;  %2736 = vperm.xlu0 %5548, %v2566_v21   ;;  %v1803_v34 = vsel %vm1789_vm2, %v1766_v20, %v9393_v5  ;;  %v1913_v58 = vsel %vm1900_vm5, %v1876_v10, %v9394_v31  ;;  %v1949_v26 = vsel %vm1937_vm6, %v1912_v12, %v9395_v27  ;;  %v9402_v41 = vld [vmem:[#allocation179_spill] sm:$0xff]  ;;  %v9408_v1 = vld [vmem:[#allocation154_spill] sm:$0xff]  ;;  %v2567_v51 = vld [vmem:[%s9144_s1 + $0x110] sm:$0xff] }
 0x2b6   : > { %v1664_v40 = vpop.permute.xlu1 %1663  ;;  %v1804_v55 = vsel %vm1789_vm2, %v7165_v62, %v9396_v43  ;;  %v1840_v20 = vsel %vm1826_vm3, %v1803_v34, %v9397_v60  ;;  %v1950_v50 = vsel %vm1937_vm6, %v1913_v58, %v9398_v28  ;;  %v1986_v44 = vsel %vm1974_vm7, %v1949_v26, %v9399_v56  ;;  %v9403_v16 = vld [vmem:[#allocation99_spill] sm:$0xff]  ;;  %v431_v19 = vld [vmem:[#allocation2 + $0x90] sm:$0xff]  ;;  %v9409_v48 = vld [vmem:[#allocation38_spill] sm:$0xff] }
 0x2b7   : > { %v2021_v17 = vsel %vm2011_vm8, %v1984_v46, %v1664_v40  ;;  %v1670_v38 = vpop.permute.xlu0 %1669  ;;  %v1841_v25 = vsel %vm1826_vm3, %v1804_v55, %v9400_v37  ;;  %v1877_v21 = vsel %vm1863_vm4, %v1840_v20, %v9401_v39  ;;  %v1987_v62 = vsel %vm1974_vm7, %v1950_v50, %v9402_v41  ;;  %v9404_v8 = vld [vmem:[#allocation127_spill] sm:$0xff]  ;;  %v9410_v36 = vld [vmem:[#allocation70_spill] sm:$0xff]  ;;  %v9411_v46 = vld [vmem:[#allocation153_spill] sm:$0xff] }
 0x2b8   : > { %5417 = vmatmul.mubr.msk.f32.gmra.mxu0 %vm2057_vm9, %v2021_v17  ;;  %2721 = vperm.xlu1 %5549, %v2563_v3   ;;  %v1878_v23 = vsel %vm1863_vm4, %v1841_v25, %v9403_v16  ;;  %v1914_v7 = vsel %vm1900_vm5, %v1877_v21, %v9404_v8  ;;  %v2024_v45 = vsel %vm2011_vm8, %v1987_v62, %v1670_v38  ;;  %v9406_v13 = vld [vmem:[#allocation39_spill] sm:$0xff]  ;;  %v9412_v61 = vld [vmem:[#allocation182_spill] sm:$0xff]  ;;  %v9413_v59 = vld [vmem:[#allocation69_spill] sm:$0xff] }
 0x2b9   : > { %5419 = vmatprep.mubr.msk.f32.mxu0 %vm2057_vm9, %v2022_v9  ;;  %2746 = vperm.xlu0 %5548, %v2568_v2   ;;  %v1770_v47 = vsel %vm338_vm0, %v430_v35, %v9405_v54  ;;  %v1805_v49 = vsel %vm1789_vm2, %v1768_v0, %v9406_v13  ;;  %v1915_v3 = vsel %vm1900_vm5, %v1878_v23, %v9407_v29  ;;  %v9414_v57 = vld [vmem:[#allocation102_spill] sm:$0xff]  ;;  %v9415_v2 = vld [vmem:[#allocation181_spill] sm:$0xff]  ;;  %v9420_v27 = vld [vmem:[#allocation128_spill] sm:$0xff] }
 0x2ba   : > { %v1668_v30 = vpop.permute.xlu1 %1667  ;;  %v1951_v32 = vsel %vm1937_vm6, %v1914_v7, %v9408_v1  ;;  %v1806_v42 = vsel %vm1789_vm2, %v1769_v22, %v9409_v48  ;;  %v1842_v14 = vsel %vm1826_vm3, %v1805_v49, %v9410_v36  ;;  %v1952_v40 = vsel %vm1937_vm6, %v1915_v3, %v9411_v46  ;;  %v9416_v10 = vld [vmem:[#allocation101_spill] sm:$0xff]  ;;  %v433_v43 = vld [vmem:[#allocation2 + $0xa0] sm:$0xff]  ;;  %v9422_v55 = vld [vmem:[#allocation40_spill] sm:$0xff] }
 0x2bb   : > { %v2023_v63 = vsel %vm2011_vm8, %v1986_v44, %v1668_v30  ;;  %v1674_v11 = vpop.permute.xlu0 %1673  ;;  %v1988_v4 = vsel %vm1974_vm7, %v1951_v32, %v9412_v61  ;;  %v1843_v6 = vsel %vm1826_vm3, %v1806_v42, %v9413_v59  ;;  %v1879_v17 = vsel %vm1863_vm4, %v1842_v14, %v9414_v57  ;;  %v9417_v12 = vld [vmem:[#allocation129_spill] sm:$0xff]  ;;  %v9423_v20 = vld [vmem:[#allocation72_spill] sm:$0xff]  ;;  %v9424_v50 = vld [vmem:[#allocation155_spill] sm:$0xff] }
 0x2bc   : > { %5420 = vmatmul.mubr.msk.f32.gmra.mxu0 %vm2057_vm9, %v2023_v63  ;;  %2731 = vperm.xlu1 %5549, %v2565_v33   ;;  %v1989_v52 = vsel %vm1974_vm7, %v1952_v40, %v9415_v2  ;;  %v1880_v53 = vsel %vm1863_vm4, %v1843_v6, %v9416_v10  ;;  %v1916_v9 = vsel %vm1900_vm5, %v1879_v17, %v9417_v12  ;;  %v9418_v0 = vld [vmem:[#allocation9_spill] sm:$0xff]  ;;  %v9421_v33 = vld [vmem:[#allocation156_spill] sm:$0xff]  ;;  %v9426_v25 = vld [vmem:[#allocation71_spill] sm:$0xff] }
 0x2bd   : > { %5422 = vmatprep.mubr.msk.f32.mxu0 %vm2057_vm9, %v2024_v45  ;;  %v2026_v38 = vsel %vm2011_vm8, %v1989_v52, %v1674_v11  ;;  %v1771_v5 = vsel %vm338_vm0, %v431_v19, %v9418_v0  ;;  %v432_v34 = vld [vmem:[#allocation2 + $0x98] sm:$0xff]  ;;  %v1917_v26 = vsel %vm1900_vm5, %v1880_v53, %v9420_v27  ;;  %v1953_v35 = vsel %vm1937_vm6, %v1916_v9, %v9421_v33  ;;  %v9425_v44 = vld [vmem:[#allocation184_spill] sm:$0xff]  ;;  %v9428_v62 = vld [vmem:[#allocation183_spill] sm:$0xff] }
 0x2be   : > { %v1672_v18 = vpop.permute.xlu1 %1671  ;;  %v9419_v31 = vld [vmem:[#allocation41_spill] sm:$0xff]  ;;  %v1808_v60 = vsel %vm1789_vm2, %v1771_v5, %v9422_v55  ;;  %v1954_v56 = vsel %vm1937_vm6, %v1917_v26, %v9424_v50  ;;  %v1990_v30 = vsel %vm1974_vm7, %v1953_v35, %v9425_v44  ;;  %v9427_v21 = vld [vmem:[#allocation104_spill] sm:$0xff]  ;;  %v9430_v7 = vld [vmem:[#allocation103_spill] sm:$0xff] }
 0x2bf   : > { %v2025_v22 = vsel %vm2011_vm8, %v1988_v4, %v1672_v18  ;;  %v1678_v24 = vpop.permute.xlu0 %1677  ;;  %v1807_v58 = vsel %vm1789_vm2, %v1770_v47, %v9419_v31  ;;  %v1845_v39 = vsel %vm1826_vm3, %v1808_v60, %v9426_v25  ;;  %v1991_v63 = vsel %vm1974_vm7, %v1954_v56, %v9428_v62  ;;  %v9429_v23 = vld [vmem:[#allocation12_spill] sm:$0xff]  ;;  %v9431_v11 = vld [vmem:[#allocation131_spill] sm:$0xff]  ;;  %v9435_v48 = vld [vmem:[#allocation158_spill] sm:$0xff] }
 0x2c0   : > { %5423 = vmatmul.mubr.msk.f32.gmra.mxu0 %vm2057_vm9, %v2025_v22  ;;  %2741 = vperm.xlu1 %5549, %v2567_v51   ;;  %v1844_v28 = vsel %vm1826_vm3, %v1807_v58, %v9423_v20  ;;  %v1772_v8 = vsel %vm338_vm0, %v432_v34, %v9429_v23  ;;  %v1882_v45 = vsel %vm1863_vm4, %v1845_v39, %v9430_v7  ;;  %v9432_v49 = vld [vmem:[#allocation11_spill] sm:$0xff]  ;;  %v9434_v51 = vld [vmem:[#allocation130_spill] sm:$0xff]  ;;  %v435_v36 = vld [vmem:[#allocation2 + $0xb0] sm:$0xff] }
 0x2c1   : > { %5425 = vmatprep.mubr.msk.f32.mxu0 %vm2057_vm9, %v2026_v38  ;;  %v1881_v41 = vsel %vm1863_vm4, %v1844_v28, %v9427_v21  ;;  %v2028_v47 = vsel %vm2011_vm8, %v1991_v63, %v1678_v24  ;;  %v1773_v29 = vsel %vm338_vm0, %v433_v43, %v9432_v49  ;;  %v434_v3 = vld [vmem:[#allocation2 + $0xa8] sm:$0xff]  ;;  %v1919_v19 = vsel %vm1900_vm5, %v1882_v45, %v9434_v51  ;;  %v9436_v14 = vld [vmem:[#allocation42_spill] sm:$0xff]  ;;  %v9438_v4 = vld [vmem:[#allocation157_spill] sm:$0xff] }
 0x2c2   : > { %v1676_v37 = vpop.permute.xlu1 %1675  ;;  %v1918_v54 = vsel %vm1900_vm5, %v1881_v41, %v9431_v11  ;;  %v9433_v1 = vld [vmem:[#allocation43_spill] sm:$0xff]  ;;  %v1810_v46 = vsel %vm1789_vm2, %v1773_v29, %v9436_v14  ;;  %v9437_v40 = vld [vmem:[#allocation74_spill] sm:$0xff]  ;;  %v1956_v18 = vsel %vm1937_vm6, %v1919_v19, %v9438_v4  ;;  %v9440_v17 = vld [vmem:[#allocation73_spill] sm:$0xff] }
 0x2c3   : > { %v2027_v16 = vsel %vm2011_vm8, %v1990_v30, %v1676_v37  ;;  %v1682_v13 = vpop.permute.xlu0 %1681  ;;  %v1809_v32 = vsel %vm1789_vm2, %v1772_v8, %v9433_v1  ;;  %v1955_v42 = vsel %vm1937_vm6, %v1918_v54, %v9435_v48  ;;  %v9439_v59 = vld [vmem:[#allocation186_spill] sm:$0xff]  ;;  %v1847_v2 = vsel %vm1826_vm3, %v1810_v46, %v9440_v17  ;;  %v9442_v10 = vld [vmem:[#allocation185_spill] sm:$0xff]  ;;  %v9448_v55 = vld [vmem:[#allocation132_spill] sm:$0xff] }
 0x2c4   : > { %5426 = vmatmul.mubr.msk.f32.gmra.mxu0 %vm2057_vm9, %v2027_v16  ;;  %v1846_v61 = vsel %vm1826_vm3, %v1809_v32, %v9437_v40  ;;  %v1992_v6 = vsel %vm1974_vm7, %v1955_v42, %v9439_v59  ;;  %v9441_v52 = vld [vmem:[#allocation106_spill] sm:$0xff]  ;;  %v1993_v53 = vsel %vm1974_vm7, %v1956_v18, %v9442_v10  ;;  %v9444_v24 = vld [vmem:[#allocation105_spill] sm:$0xff]  ;;  %v9449_v20 = vld [vmem:[#allocation160_spill] sm:$0xff] }
 0x2c5   : > { %5428 = vmatprep.mubr.msk.f32.mxu0 %vm2057_vm9, %v2028_v47  ;;  %v1883_v22 = vsel %vm1863_vm4, %v1846_v61, %v9441_v52  ;;  %v9443_v9 = vld [vmem:[#allocation14_spill] sm:$0xff]  ;;  %v1884_v0 = vsel %vm1863_vm4, %v1847_v2, %v9444_v24  ;;  %v9445_v5 = vld [vmem:[#allocation133_spill] sm:$0xff]  ;;  %v2030_v31 = vsel %vm2011_vm8, %v1993_v53, %v1682_v13  ;;  %v9450_v56 = vld [vmem:[#allocation44_spill] sm:$0xff] }
 0x2c6   : > { %v1680_v57 = vpop.permute.xlu1 %1679  ;;  %v1774_v38 = vsel %vm338_vm0, %v434_v3, %v9443_v9  ;;  %v1920_v34 = vsel %vm1900_vm5, %v1883_v22, %v9445_v5  ;;  %v9446_v27 = vld [vmem:[#allocation13_spill] sm:$0xff]  ;;  %v1921_v60 = vsel %vm1900_vm5, %v1884_v0, %v9448_v55  ;;  %v437_v50 = vld [vmem:[#allocation2 + $0xc0] sm:$0xff]  ;;  %v9451_v30 = vld [vmem:[#allocation76_spill] sm:$0xff] }
 0x2c7   : > { %v2029_v12 = vsel %vm2011_vm8, %v1992_v6, %v1680_v57  ;;  %v1686_v58 = vpop.permute.xlu0 %1685  ;;  %v1775_v26 = vsel %vm338_vm0, %v435_v36, %v9446_v27  ;;  %v436_v33 = vld [vmem:[#allocation2 + $0xb8] sm:$0xff]  ;;  %v1957_v28 = vsel %vm1937_vm6, %v1920_v34, %v9449_v20  ;;  %v9452_v25 = vld [vmem:[#allocation159_spill] sm:$0xff]  ;;  %v9453_v21 = vld [vmem:[#allocation188_spill] sm:$0xff] }
 0x2c8   : > { %5429 = vmatmul.mubr.msk.f32.gmra.mxu0 %vm2057_vm9, %v2029_v12  ;;  %v9447_v35 = vld [vmem:[#allocation45_spill] sm:$0xff]  ;;  %v1812_v44 = vsel %vm1789_vm2, %v1775_v26, %v9450_v56  ;;  %v1958_v39 = vsel %vm1937_vm6, %v1921_v60, %v9452_v25  ;;  %v1994_v41 = vsel %vm1974_vm7, %v1957_v28, %v9453_v21  ;;  %v9454_v63 = vld [vmem:[#allocation75_spill] sm:$0xff]  ;;  %v9455_v23 = vld [vmem:[#allocation108_spill] sm:$0xff] }
 0x2c9   : > { %v1811_v43 = vsel %vm1789_vm2, %v1774_v38, %v9447_v35  ;;  %5431 = vmatprep.mubr.msk.f32.mxu0 %vm2057_vm9, %v2030_v31  ;;  %v1849_v16 = vsel %vm1826_vm3, %v1812_v44, %v9454_v63  ;;  %v9456_v7 = vld [vmem:[#allocation187_spill] sm:$0xff]  ;;  %v9457_v54 = vld [vmem:[#allocation16_spill] sm:$0xff]  ;;  %v9462_v14 = vld [vmem:[#allocation134_spill] sm:$0xff] }
 0x2ca   : > { %v1848_v37 = vsel %vm1826_vm3, %v1811_v43, %v9451_v30  ;;  %v1684_v62 = vpop.permute.xlu1 %1683  ;;  %v1995_v45 = vsel %vm1974_vm7, %v1958_v39, %v9456_v7  ;;  %v1776_v47 = vsel %vm338_vm0, %v436_v33, %v9457_v54  ;;  %v9458_v13 = vld [vmem:[#allocation107_spill] sm:$0xff]  ;;  %v9463_v40 = vld [vmem:[#allocation162_spill] sm:$0xff]  ;;  %v439_v4 = vld [vmem:[#allocation2 + $0xd0] sm:$0xff] }
 0x2cb   : > { %v1885_v8 = vsel %vm1863_vm4, %v1848_v37, %v9455_v23  ;;  %v2031_v11 = vsel %vm2011_vm8, %v1994_v41, %v1684_v62  ;;  %v1886_v49 = vsel %vm1863_vm4, %v1849_v16, %v9458_v13  ;;  %v9459_v29 = vld [vmem:[#allocation135_spill] sm:$0xff]  ;;  %v2032_v1 = vsel %vm2011_vm8, %v1995_v45, %v1686_v58  ;;  %v1690_v32 = vpop.permute.xlu0 %1689  ;;  %v9464_v18 = vld [vmem:[#allocation46_spill] sm:$0xff]  ;;  %v9466_v17 = vld [vmem:[#allocation161_spill] sm:$0xff] }
 0x2cc   : > { %v1922_v3 = vsel %vm1900_vm5, %v1885_v8, %v9459_v29  ;;  %5432 = vmatmul.mubr.msk.f32.gmra.mxu0 %vm2057_vm9, %v2031_v11  ;;  %v9460_v51 = vld [vmem:[#allocation15_spill] sm:$0xff]  ;;  %v1923_v46 = vsel %vm1900_vm5, %v1886_v49, %v9462_v14  ;;  %v9465_v6 = vld [vmem:[#allocation78_spill] sm:$0xff]  ;;  %v9468_v53 = vld [vmem:[#allocation77_spill] sm:$0xff] }
 0x2cd   : > { %v1777_v19 = vsel %vm338_vm0, %v437_v50, %v9460_v51  ;;  %v438_v48 = vld [vmem:[#allocation2 + $0xc8] sm:$0xff]  ;;  %v1959_v61 = vsel %vm1937_vm6, %v1922_v3, %v9463_v40  ;;  %5434 = vmatprep.mubr.msk.f32.mxu0 %vm2057_vm9, %v2032_v1  ;;  %v1960_v2 = vsel %vm1937_vm6, %v1923_v46, %v9466_v17  ;;  %v9467_v52 = vld [vmem:[#allocation190_spill] sm:$0xff]  ;;  %v9470_v24 = vld [vmem:[#allocation189_spill] sm:$0xff] }
 0x2ce   : > { %v9461_v42 = vld [vmem:[#allocation47_spill] sm:$0xff]  ;;  %v1814_v59 = vsel %vm1789_vm2, %v1777_v19, %v9464_v18  ;;  %v1996_v22 = vsel %vm1974_vm7, %v1959_v61, %v9467_v52  ;;  %v1688_v10 = vpop.permute.xlu1 %1687  ;;  %v9469_v9 = vld [vmem:[#allocation110_spill] sm:$0xff]  ;;  %v1997_v0 = vsel %vm1974_vm7, %v1960_v2, %v9470_v24  ;;  %v9472_v58 = vld [vmem:[#allocation109_spill] sm:$0xff] }
 0x2cf   : > { %v1813_v36 = vsel %vm1789_vm2, %v1776_v47, %v9461_v42  ;;  %v1851_v12 = vsel %vm1826_vm3, %v1814_v59, %v9468_v53  ;;  %v2033_v5 = vsel %vm2011_vm8, %v1996_v22, %v1688_v10  ;;  %v9471_v34 = vld [vmem:[#allocation18_spill] sm:$0xff]  ;;  %v9473_v26 = vld [vmem:[#allocation137_spill] sm:$0xff]  ;;  %v2034_v35 = vsel %vm2011_vm8, %v1997_v0, %v1690_v32  ;;  %v1694_v43 = vpop.permute.xlu0 %1693  ;;  %v9476_v56 = vld [vmem:[#allocation136_spill] sm:$0xff] }
 0x2d0   : > { %v1850_v57 = vsel %vm1826_vm3, %v1813_v36, %v9465_v6  ;;  %v1778_v31 = vsel %vm338_vm0, %v438_v48, %v9471_v34  ;;  %v1888_v27 = vsel %vm1863_vm4, %v1851_v12, %v9472_v58  ;;  %5435 = vmatmul.mubr.msk.f32.gmra.mxu0 %vm2057_vm9, %v2033_v5  ;;  %v9474_v55 = vld [vmem:[#allocation17_spill] sm:$0xff]  ;;  %v9477_v30 = vld [vmem:[#allocation164_spill] sm:$0xff]  ;;  %v441_v25 = vld [vmem:[#allocation2 + $0xe0] sm:$0xff] }
 0x2d1   : > { %v1887_v38 = vsel %vm1863_vm4, %v1850_v57, %v9469_v9  ;;  %v1779_v60 = vsel %vm338_vm0, %v439_v4, %v9474_v55  ;;  %v440_v20 = vld [vmem:[#allocation2 + $0xd8] sm:$0xff]  ;;  %v1925_v44 = vsel %vm1900_vm5, %v1888_v27, %v9476_v56  ;;  %5437 = vmatprep.mubr.msk.f32.mxu0 %vm2057_vm9, %v2034_v35  ;;  %v9478_v39 = vld [vmem:[#allocation48_spill] sm:$0xff]  ;;  %v9480_v63 = vld [vmem:[#allocation163_spill] sm:$0xff] }
 0x2d2   : > { %v1924_v33 = vsel %vm1900_vm5, %v1887_v38, %v9473_v26  ;;  %v9475_v28 = vld [vmem:[#allocation49_spill] sm:$0xff]  ;;  %v1816_v21 = vsel %vm1789_vm2, %v1779_v60, %v9478_v39  ;;  %v9479_v41 = vld [vmem:[#allocation80_spill] sm:$0xff]  ;;  %v1962_v16 = vsel %vm1937_vm6, %v1925_v44, %v9480_v63  ;;  %v1692_v7 = vpop.permute.xlu1 %1691  ;;  %v9482_v45 = vld [vmem:[#allocation79_spill] sm:$0xff] }
 0x2d3   : > { %v1815_v50 = vsel %vm1789_vm2, %v1778_v31, %v9475_v28  ;;  %v1961_v37 = vsel %vm1937_vm6, %v1924_v33, %v9477_v30  ;;  %v9481_v23 = vld [vmem:[#allocation192_spill] sm:$0xff]  ;;  %v1853_v11 = vsel %vm1826_vm3, %v1816_v21, %v9482_v45  ;;  %v9484_v13 = vld [vmem:[#allocation191_spill] sm:$0xff]  ;;  %v1698_v36 = vpop.permute.xlu0 %1697  ;;  %v9490_v18 = vld [vmem:[#allocation138_spill] sm:$0xff] }
 0x2d4   : > { %v1852_v62 = vsel %vm1826_vm3, %v1815_v50, %v9479_v41  ;;  %v1998_v8 = vsel %vm1974_vm7, %v1961_v37, %v9481_v23  ;;  %v9483_v54 = vld [vmem:[#allocation112_spill] sm:$0xff]  ;;  %v1999_v49 = vsel %vm1974_vm7, %v1962_v16, %v9484_v13  ;;  %v9486_v32 = vld [vmem:[#allocation111_spill] sm:$0xff]  ;;  %v9491_v6 = vld [vmem:[#allocation166_spill] sm:$0xff] }
 0x2d5   : > { %v1889_v47 = vsel %vm1863_vm4, %v1852_v62, %v9483_v54  ;;  %v2035_v29 = vsel %vm2011_vm8, %v1998_v8, %v1692_v7  ;;  %v9485_v3 = vld [vmem:[#allocation20_spill] sm:$0xff]  ;;  %v1890_v51 = vsel %vm1863_vm4, %v1853_v11, %v9486_v32  ;;  %v9487_v19 = vld [vmem:[#allocation139_spill] sm:$0xff]  ;;  %v2036_v42 = vsel %vm2011_vm8, %v1999_v49, %v1694_v43  ;;  %v9492_v2 = vld [vmem:[#allocation50_spill] sm:$0xff] }
 0x2d6   : > { %v1780_v1 = vsel %vm338_vm0, %v440_v20, %v9485_v3  ;;  %v1926_v48 = vsel %vm1900_vm5, %v1889_v47, %v9487_v19  ;;  %5438 = vmatmul.mubr.msk.f32.gmra.mxu0 %vm2057_vm9, %v2035_v29  ;;  %v9488_v14 = vld [vmem:[#allocation19_spill] sm:$0xff]  ;;  %v1927_v59 = vsel %vm1900_vm5, %v1890_v51, %v9490_v18  ;;  %v443_v17 = vld [vmem:[#allocation2 + $0xf0] sm:$0xff]  ;;  %v9493_v22 = vld [vmem:[#allocation82_spill] sm:$0xff]  ;;  %v1696_v24 = vpop.permute.xlu1 %1695 }
 0x2d7   : > { %v1781_v46 = vsel %vm338_vm0, %v441_v25, %v9488_v14  ;;  %v442_v40 = vld [vmem:[#allocation2 + $0xe8] sm:$0xff]  ;;  %v1963_v57 = vsel %vm1937_vm6, %v1926_v48, %v9491_v6  ;;  %5440 = vmatprep.mubr.msk.f32.mxu0 %vm2057_vm9, %v2036_v42  ;;  %v9494_v53 = vld [vmem:[#allocation165_spill] sm:$0xff]  ;;  %v9495_v9 = vld [vmem:[#allocation194_spill] sm:$0xff]  ;;  %v1702_v50 = vpop.permute.xlu0 %1701 }
 0x2d8   : > { %v9489_v61 = vld [vmem:[#allocation51_spill] sm:$0xff]  ;;  %v1818_v52 = vsel %vm1789_vm2, %v1781_v46, %v9492_v2  ;;  %v1964_v12 = vsel %vm1937_vm6, %v1927_v59, %v9494_v53  ;;  %v2000_v38 = vsel %vm1974_vm7, %v1963_v57, %v9495_v9  ;;  %v9496_v0 = vld [vmem:[#allocation81_spill] sm:$0xff]  ;;  %v9497_v34 = vld [vmem:[#allocation114_spill] sm:$0xff] }
 0x2d9   : > { %v1817_v4 = vsel %vm1789_vm2, %v1780_v1, %v9489_v61  ;;  %v1855_v5 = vsel %vm1826_vm3, %v1818_v52, %v9496_v0  ;;  %v9498_v58 = vld [vmem:[#allocation193_spill] sm:$0xff]  ;;  %v2037_v26 = vsel %vm2011_vm8, %v2000_v38, %v1696_v24  ;;  %v9499_v33 = vld [vmem:[#allocation22_spill] sm:$0xff]  ;;  %v9504_v39 = vld [vmem:[#allocation140_spill] sm:$0xff] }
 0x2da   : > { %v1854_v10 = vsel %vm1826_vm3, %v1817_v4, %v9493_v22  ;;  %v2001_v27 = vsel %vm1974_vm7, %v1964_v12, %v9498_v58  ;;  %v1782_v35 = vsel %vm338_vm0, %v442_v40, %v9499_v33  ;;  %v9500_v43 = vld [vmem:[#allocation113_spill] sm:$0xff]  ;;  %5441 = vmatmul.mubr.msk.f32.gmra.mxu0 %vm2057_vm9, %v2037_v26  ;;  %v9505_v41 = vld [vmem:[#allocation168_spill] sm:$0xff]  ;;  %v445_v63 = vld [vmem:[#allocation2 + $0x100] sm:$0xff]  ;;  %v1700_v13 = vpop.permute.xlu1 %1699 }
 0x2db   : > { %v1891_v31 = vsel %vm1863_vm4, %v1854_v10, %v9497_v34  ;;  %v1892_v55 = vsel %vm1863_vm4, %v1855_v5, %v9500_v43  ;;  %v9501_v60 = vld [vmem:[#allocation141_spill] sm:$0xff]  ;;  %v2038_v28 = vsel %vm2011_vm8, %v2001_v27, %v1698_v36  ;;  %v9506_v16 = vld [vmem:[#allocation52_spill] sm:$0xff]  ;;  %v9508_v45 = vld [vmem:[#allocation167_spill] sm:$0xff]  ;;  %v1706_v4 = vpop.permute.xlu0 %1705 }
 0x2dc   : > { %v1928_v20 = vsel %vm1900_vm5, %v1891_v31, %v9501_v60  ;;  %v9502_v56 = vld [vmem:[#allocation21_spill] sm:$0xff]  ;;  %v1929_v21 = vsel %vm1900_vm5, %v1892_v55, %v9504_v39  ;;  %5443 = vmatprep.mubr.msk.f32.mxu0 %vm2057_vm9, %v2038_v28  ;;  %v9507_v8 = vld [vmem:[#allocation84_spill] sm:$0xff]  ;;  %v9510_v49 = vld [vmem:[#allocation83_spill] sm:$0xff] }
 0x2dd   : > { %v1783_v44 = vsel %vm338_vm0, %v443_v17, %v9502_v56  ;;  %v444_v30 = vld [vmem:[#allocation2 + $0xf8] sm:$0xff]  ;;  %v1965_v62 = vsel %vm1937_vm6, %v1928_v20, %v9505_v41  ;;  %v1966_v11 = vsel %vm1937_vm6, %v1929_v21, %v9508_v45  ;;  %v9509_v54 = vld [vmem:[#allocation196_spill] sm:$0xff]  ;;  %v9512_v32 = vld [vmem:[#allocation195_spill] sm:$0xff] }
 0x2de   : > { %v9503_v37 = vld [vmem:[#allocation53_spill] sm:$0xff]  ;;  %v1820_v23 = vsel %vm1789_vm2, %v1783_v44, %v9506_v16  ;;  %v2002_v47 = vsel %vm1974_vm7, %v1965_v62, %v9509_v54  ;;  %v9511_v3 = vld [vmem:[#allocation116_spill] sm:$0xff]  ;;  %v2003_v51 = vsel %vm1974_vm7, %v1966_v11, %v9512_v32  ;;  %v9514_v36 = vld [vmem:[#allocation115_spill] sm:$0xff]  ;;  %v1704_v58 = vpop.permute.xlu1 %1703 }
 0x2df   : > { %v1819_v25 = vsel %vm1789_vm2, %v1782_v35, %v9503_v37  ;;  %v1857_v29 = vsel %vm1826_vm3, %v1820_v23, %v9510_v49  ;;  %v2039_v19 = vsel %vm2011_vm8, %v2002_v47, %v1700_v13  ;;  %v9513_v48 = vld [vmem:[#allocation24_spill] sm:$0xff]  ;;  %v9515_v46 = vld [vmem:[#allocation143_spill] sm:$0xff]  ;;  %v2040_v61 = vsel %vm2011_vm8, %v2003_v51, %v1702_v50  ;;  %v9518_v2 = vld [vmem:[#allocation142_spill] sm:$0xff] }
 0x2e0   : > { %v1856_v7 = vsel %vm1826_vm3, %v1819_v25, %v9507_v8  ;;  %v1784_v42 = vsel %vm338_vm0, %v444_v30, %v9513_v48  ;;  %v1894_v14 = vsel %vm1863_vm4, %v1857_v29, %v9514_v36  ;;  %5444 = vmatmul.mubr.msk.f32.gmra.mxu0 %vm2057_vm9, %v2039_v19  ;;  %v9516_v18 = vld [vmem:[#allocation23_spill] sm:$0xff]  ;;  %v9519_v22 = vld [vmem:[#allocation170_spill] sm:$0xff]  ;;  %v447_v53 = vld [vmem:[#allocation2 + $0x110] sm:$0xff]  ;;  %v1710_v25 = vpop.permute.xlu0 %1709 }
 0x2e1   : > { %v1893_v1 = vsel %vm1863_vm4, %v1856_v7, %v9511_v3  ;;  %v1785_v59 = vsel %vm338_vm0, %v445_v63, %v9516_v18  ;;  %v446_v6 = vld [vmem:[#allocation2 + $0x108] sm:$0xff]  ;;  %v1931_v52 = vsel %vm1900_vm5, %v1894_v14, %v9518_v2  ;;  %5446 = vmatprep.mubr.msk.f32.mxu0 %vm2057_vm9, %v2040_v61  ;;  %v9520_v12 = vld [vmem:[#allocation54_spill] sm:$0xff]  ;;  %v9522_v0 = vld [vmem:[#allocation169_spill] sm:$0xff] }
 0x2e2   : > { %v1930_v40 = vsel %vm1900_vm5, %v1893_v1, %v9515_v46  ;;  %v9517_v57 = vld [vmem:[#allocation55_spill] sm:$0xff]  ;;  %v1822_v9 = vsel %vm1789_vm2, %v1785_v59, %v9520_v12  ;;  %v9521_v38 = vld [vmem:[#allocation86_spill] sm:$0xff]  ;;  %v1968_v5 = vsel %vm1937_vm6, %v1931_v52, %v9522_v0  ;;  %v9524_v27 = vld [vmem:[#allocation85_spill] sm:$0xff]  ;;  %v1708_v1 = vpop.permute.xlu1 %1707 }
 0x2e3   : > { %v1821_v17 = vsel %vm1789_vm2, %v1784_v42, %v9517_v57  ;;  %v1967_v10 = vsel %vm1937_vm6, %v1930_v40, %v9519_v22  ;;  %v9523_v34 = vld [vmem:[#allocation198_spill] sm:$0xff]  ;;  %v1859_v26 = vsel %vm1826_vm3, %v1822_v9, %v9524_v27  ;;  %v9526_v43 = vld [vmem:[#allocation197_spill] sm:$0xff]  ;;  %v9532_v16 = vld [vmem:[#allocation144_spill] sm:$0xff] }
 0x2e4   : > { %v1858_v24 = vsel %vm1826_vm3, %v1821_v17, %v9521_v38  ;;  %v2004_v31 = vsel %vm1974_vm7, %v1967_v10, %v9523_v34  ;;  %v9525_v33 = vld [vmem:[#allocation118_spill] sm:$0xff]  ;;  %v2005_v55 = vsel %vm1974_vm7, %v1968_v5, %v9526_v43  ;;  %v9528_v50 = vld [vmem:[#allocation117_spill] sm:$0xff]  ;;  %v9533_v8 = vld [vmem:[#allocation172_spill] sm:$0xff] }
 0x2e5   : > { %v1895_v35 = vsel %vm1863_vm4, %v1858_v24, %v9525_v33  ;;  %v2041_v60 = vsel %vm2011_vm8, %v2004_v31, %v1704_v58  ;;  %v9527_v20 = vld [vmem:[#allocation26_spill] sm:$0xff]  ;;  %v1896_v56 = vsel %vm1863_vm4, %v1859_v26, %v9528_v50  ;;  %v9529_v44 = vld [vmem:[#allocation145_spill] sm:$0xff]  ;;  %v2042_v37 = vsel %vm2011_vm8, %v2005_v55, %v1706_v4  ;;  %v9534_v45 = vld [vmem:[#allocation56_spill] sm:$0xff] }
 0x2e6   : > { %v1786_v28 = vsel %vm338_vm0, %v446_v6, %v9527_v20  ;;  %v1932_v30 = vsel %vm1900_vm5, %v1895_v35, %v9529_v44  ;;  %5447 = vmatmul.mubr.msk.f32.gmra.mxu0 %vm2057_vm9, %v2041_v60  ;;  %v9530_v39 = vld [vmem:[#allocation25_spill] sm:$0xff]  ;;  %v1933_v23 = vsel %vm1900_vm5, %v1896_v56, %v9532_v16  ;;  %v9535_v54 = vld [vmem:[#allocation88_spill] sm:$0xff]  ;;  %v9536_v13 = vld [vmem:[#allocation171_spill] sm:$0xff]  ;;  %v1712_v34 = vpop.permute.xlu1 %1711 }
 0x2e7   : > { %v1787_v21 = vsel %vm338_vm0, %v447_v53, %v9530_v39  ;;  %v448_v41 = vld [vmem:[#allocation2 + $0x118] sm:$0xff]  ;;  %v1969_v7 = vsel %vm1937_vm6, %v1932_v30, %v9533_v8  ;;  %5449 = vmatprep.mubr.msk.f32.mxu0 %vm2057_vm9, %v2042_v37  ;;  %v1970_v49 = vsel %vm1937_vm6, %v1933_v23, %v9536_v13  ;;  %v9537_v29 = vld [vmem:[#allocation200_spill] sm:$0xff]  ;;  %v9538_v32 = vld [vmem:[#allocation87_spill] sm:$0xff]  ;;  %v1714_v53 = vpop.permute.xlu0 %1713 }
 0x2e8   : > { %v9531_v62 = vld [vmem:[#allocation57_spill] sm:$0xff]  ;;  %v1824_v11 = vsel %vm1789_vm2, %v1787_v21, %v9534_v45  ;;  %v2006_v3 = vsel %vm1974_vm7, %v1969_v7, %v9537_v29  ;;  %v9539_v19 = vld [vmem:[#allocation120_spill] sm:$0xff]  ;;  %v9540_v42 = vld [vmem:[#allocation199_spill] sm:$0xff] }
 0x2e9   : > { %v1823_v63 = vsel %vm1789_vm2, %v1786_v28, %v9531_v62  ;;  %v1861_v51 = vsel %vm1826_vm3, %v1824_v11, %v9538_v32  ;;  %v2007_v36 = vsel %vm1974_vm7, %v1970_v49, %v9540_v42  ;;  %v2043_v14 = vsel %vm2011_vm8, %v2006_v3, %v1708_v1  ;;  %v9541_v46 = vld [vmem:[#allocation27_spill] sm:$0xff]  ;;  %v9544_v57 = vld [vmem:[#allocation58_spill] sm:$0xff]  ;;  %v9547_v12 = vld [vmem:[#allocation89_spill] sm:$0xff] }
 0x2ea   : > { %v1860_v47 = vsel %vm1826_vm3, %v1823_v63, %v9535_v54  ;;  %v1788_v40 = vsel %vm338_vm0, %v448_v41, %v9541_v46  ;;  %v9542_v61 = vld [vmem:[#allocation119_spill] sm:$0xff]  ;;  %v2044_v6 = vsel %vm2011_vm8, %v2007_v36, %v1710_v25  ;;  %5450 = vmatmul.mubr.msk.f32.gmra.mxu0 %vm2057_vm9, %v2043_v14  ;;  %v9545_v2 = vld [vmem:[#allocation146_spill] sm:$0xff]  ;;  %v9548_v38 = vld [vmem:[#allocation173_spill] sm:$0xff]  ;;  %v1716_v50 = vpop.permute.xlu1 %1715 }
 0x2eb   : > { %v1897_v48 = vsel %vm1863_vm4, %v1860_v47, %v9539_v19  ;;  %v1898_v4 = vsel %vm1863_vm4, %v1861_v51, %v9542_v61  ;;  %v9543_v18 = vld [vmem:[#allocation147_spill] sm:$0xff]  ;;  %v1825_v17 = vsel %vm1789_vm2, %v1788_v40, %v9544_v57  ;;  %v9546_v22 = vld [vmem:[#allocation174_spill] sm:$0xff]  ;;  %5452 = vmatprep.mubr.msk.f32.mxu0 %vm2057_vm9, %v2044_v6  ;;  %v9550_v31 = vld [vmem:[#allocation121_spill] sm:$0xff] }
 0x2ec   : > { %v1934_v59 = vsel %vm1900_vm5, %v1897_v48, %v9543_v18  ;;  %v1935_v52 = vsel %vm1900_vm5, %v1898_v4, %v9545_v2  ;;  %v1862_v9 = vsel %vm1826_vm3, %v1825_v17, %v9547_v12  ;;  %v9549_v0 = vld [vmem:[#allocation202_spill] sm:$0xff]  ;;  %v9551_v27 = vld [vmem:[#allocation201_spill] sm:$0xff]  ;;  %v9552_v35 = vld [vmem:[#allocation148_spill] sm:$0xff] }
 0x2ed   : > { %v1971_v10 = vsel %vm1937_vm6, %v1934_v59, %v9546_v22  ;;  %v1972_v24 = vsel %vm1937_vm6, %v1935_v52, %v9548_v38  ;;  %v1899_v58 = vsel %vm1863_vm4, %v1862_v9, %v9550_v31  ;;  %v9553_v60 = vld [vmem:[#allocation175_spill] sm:$0xff]  ;;  %v2899_v44 = vld [vmem:[#allocation3 + $0x9] sm:$0xff]  ;;  %v7673_v8 = vld [vmem:[%s9146_s3] ss:$0 sm:$0xff] }
 0x2ee   : > { %v2008_v5 = vsel %vm1974_vm7, %v1971_v10, %v9549_v0  ;;  %v2009_v26 = vsel %vm1974_vm7, %v1972_v24, %v9551_v27  ;;  %v1936_v43 = vsel %vm1900_vm5, %v1899_v58, %v9552_v35  ;;  %v2898_v30 = vld [vmem:[#allocation3 + $0x1] sm:$0xff]  ;;  %3156 = vrot.lane.b32.xlu0 %v2899_v44, %s5559_s12  ;;  %v7678_v45 = vld [vmem:[%s9147_s4] ss:$0 sm:$0xff] }
 0x2ef   : > { %v2045_v33 = vsel %vm2011_vm8, %v2008_v5, %v1712_v34  ;;  %v2046_v55 = vsel %vm2011_vm8, %v2009_v26, %v1714_v53  ;;  %v1973_v20 = vsel %vm1937_vm6, %v1936_v43, %v9553_v60  ;;  %3154 = vrot.lane.b32.xlu1 %v2898_v30, %s5559_s12 }
 0x2f0   : > { %5453 = vmatmul.mubr.msk.f32.gmra.mxu0 %vm2057_vm9, %v2045_v33  ;;  %v2010_v28 = vsel %vm1974_vm7, %v1973_v20, %v7061_v15  ;;  %v2572_v37 = vpop.permute.xlu0 %2571 }
 0x2f1   : > { %5455 = vmatprep.mubr.msk.f32.mxu0 %vm2057_vm9, %v2046_v55  ;;  %v2047_v56 = vsel %vm2011_vm8, %v2010_v28, %v1716_v50 }
 0x2f4   : > { %5456 = vmatmul.mubr.msk.f32.gmra.mxu0 %vm2057_vm9, %v2047_v56  ;;  %v2587_v39 = vpop.permute.xlu0 %2586 }
 0x2f7   : > { %v2577_v25 = vpop.permute.xlu1 %2576 }
 0x2f8   : > { %v2597_v41 = vpop.permute.xlu0 %2596 }
 0x2fb   : > { %v2582_v21 = vpop.permute.xlu1 %2581 }
 0x2fc   : > { %v2607_v63 = vpop.permute.xlu0 %2606 }
 0x2ff   : > { %v2592_v62 = vpop.permute.xlu1 %2591 }
 0x300   : > { %v7666_v15 = vpop.permute.xlu0 %2616 }
 0x303   : > { %v7664_v16 = vpop.permute.xlu1 %2601 }
 0x304   : > { %v7681_v54 = vpop.permute.xlu0 %2626 }
 0x307   : > { %v7668_v23 = vpop.permute.xlu1 %2611 }
 0x308   : > { %v7691_v46 = vpop.permute.xlu0 %2636 }
 0x30b   : > { %v7685_v29 = vpop.permute.xlu1 %2621 }
 0x30c   : > { %v7704_v24 = vpop.permute.xlu0 %2646 }
 0x30f   : > { %v7696_v6 = vpop.permute.xlu1 %2631 }
 0x313   : > { %v7709_v27 = vpop.permute.xlu1 %2641 }
 0x368   : > { %v5406_v7 = vpop.f32.mrf.mxu0 }
 0x369   : > { %v2419_v11 = vmul.f32 %v5406_v7, %v7673_v8 }
 0x36a   : > { %v2232_v47 = vpop.f32.mrf.mxu0 }
 0x36b   : > { %v2462_v13 = vadd.f32 %v7678_v45, %v2419_v11  ;;  %v2418_v49 = vmul.f32 %v7673_v8, %v2232_v47 }
 0x36c   : > { %v5409_v3 = vpop.f32.mrf.mxu0 }
 0x36d   : > { %v2498_v1 = vmax.f32 %v2462_v13, 0.0  ;;  %v2461_v32 = vadd.f32 %v7678_v45, %v2418_v49  ;;  %v2421_v51 = vmul.f32 %v5409_v3, %v7673_v8 }
 0x36e   : > { %v2242_v19 = vpop.f32.mrf.mxu0 }
 0x36f   : > { %v2750_v48 = vmul.f32 %v2577_v25, %v2498_v1  ;;  %v2497_v42 = vmax.f32 %v2461_v32, 0.0  ;;  %v2464_v36 = vadd.f32 %v7678_v45, %v2421_v51  ;;  %v2420_v14 = vmul.f32 %v7673_v8, %v2242_v19 }
 0x370   : > { %v5412_v40 = vpop.f32.mrf.mxu0 }
 0x371   : > { %2827 = vst.msk [vmem:[#allocation3 + $0x1b] sm:$0xff] %vm338_vm0, %v2750_v48  ;;  %v2749_v61 = vmul.f32 %v2572_v37, %v2497_v42  ;;  %v2500_v4 = vmax.f32 %v2464_v36, 0.0  ;;  %v2463_v18 = vadd.f32 %v7678_v45, %v2420_v14  ;;  %v2423_v59 = vmul.f32 %v5412_v40, %v7673_v8  ;;  %v7719_v37 = vpop.permute.xlu0 %2656 }
 0x372   : > { %v2252_v57 = vpop.f32.mrf.mxu0 }
 0x373   : > { %2826 = vst.msk [vmem:[#allocation3 + $0x13] sm:$0xff] %vm338_vm0, %v2749_v61  ;;  %v2752_v17 = vmul.f32 %v2587_v39, %v2500_v4  ;;  %v2499_v2 = vmax.f32 %v2463_v18, 0.0  ;;  %v2466_v52 = vadd.f32 %v7678_v45, %v2423_v59  ;;  %v2422_v22 = vmul.f32 %v7673_v8, %v2252_v57 }
 0x374   : > { %v5415_v10 = vpop.f32.mrf.mxu0 }
 0x375   : > { %2829 = vst.msk [vmem:[#allocation3 + $0x2b] sm:$0xff] %vm338_vm0, %v2752_v17  ;;  %v2751_v53 = vmul.f32 %v2582_v21, %v2499_v2  ;;  %v2502_v12 = vmax.f32 %v2466_v52, 0.0  ;;  %v2465_v9 = vadd.f32 %v7678_v45, %v2422_v22  ;;  %v2425_v38 = vmul.f32 %v5415_v10, %v7673_v8 }
 0x376   : > { %v2262_v0 = vpop.f32.mrf.mxu0 }
 0x377   : > { %2828 = vst.msk [vmem:[#allocation3 + $0x23] sm:$0xff] %vm338_vm0, %v2751_v53  ;;  %v2754_v5 = vmul.f32 %v2597_v41, %v2502_v12  ;;  %v2501_v34 = vmax.f32 %v2465_v9, 0.0  ;;  %v2468_v31 = vadd.f32 %v7678_v45, %v2425_v38  ;;  %v2424_v58 = vmul.f32 %v7673_v8, %v2262_v0 }
 0x378   : > { %v5418_v26 = vpop.f32.mrf.mxu0 }
 0x379   : > { %2831 = vst.msk [vmem:[#allocation3 + $0x3b] sm:$0xff] %vm338_vm0, %v2754_v5  ;;  %v2753_v33 = vmul.f32 %v2592_v62, %v2501_v34  ;;  %v2504_v35 = vmax.f32 %v2468_v31, 0.0  ;;  %v2467_v43 = vadd.f32 %v7678_v45, %v2424_v58  ;;  %v2427_v55 = vmul.f32 %v5418_v26, %v7673_v8 }
 0x37a   : > { %v2272_v60 = vpop.f32.mrf.mxu0  ;;  %v2900_v20 = vld [vmem:[#allocation3 + $0x11] sm:$0xff]  ;;  %v2901_v28 = vld [vmem:[#allocation3 + $0x19] sm:$0xff] }
 0x37b   : > { %2830 = vst.msk [vmem:[#allocation3 + $0x33] sm:$0xff] %vm338_vm0, %v2753_v33  ;;  %v2756_v50 = vmul.f32 %v2607_v63, %v2504_v35  ;;  %v2503_v56 = vmax.f32 %v2467_v43, 0.0  ;;  %v2470_v44 = vadd.f32 %v7678_v45, %v2427_v55  ;;  %v2426_v30 = vmul.f32 %v7673_v8, %v2272_v60  ;;  %3158 = vrot.lane.b32.xlu1 %v2900_v20, %s5559_s12  ;;  %v7725_v63 = vpop.permute.xlu1 %2651 }
 0x37c   : > { %3160 = vrot.lane.b32.xlu0 %v2901_v28, %s5559_s12  ;;  %v5421_v25 = vpop.f32.mrf.mxu0 }
 0x37d   : > { %2833 = vst.msk [vmem:[#allocation3 + $0x4b] sm:$0xff] %vm338_vm0, %v2756_v50  ;;  %v2755_v39 = vmul.f32 %v7664_v16, %v2503_v56  ;;  %v2506_v21 = vmax.f32 %v2470_v44, 0.0  ;;  %v2469_v41 = vadd.f32 %v7678_v45, %v2426_v30  ;;  %v2429_v62 = vmul.f32 %v5421_v25, %v7673_v8 }
 0x37e   : > { %v2282_v7 = vpop.f32.mrf.mxu0  ;;  %v2903_v11 = vld [vmem:[#allocation3 + $0x29] sm:$0xff]  ;;  %v2902_v47 = vld [vmem:[#allocation3 + $0x21] sm:$0xff] }
 0x37f   : > { %2832 = vst.msk [vmem:[#allocation3 + $0x43] sm:$0xff] %vm338_vm0, %v2755_v39  ;;  %v2758_v13 = vmul.f32 %v7666_v15, %v2506_v21  ;;  %v2505_v49 = vmax.f32 %v2469_v41, 0.0  ;;  %v2472_v3 = vadd.f32 %v7678_v45, %v2429_v62  ;;  %v2428_v1 = vmul.f32 %v7673_v8, %v2282_v7  ;;  %3162 = vrot.lane.b32.xlu1 %v2902_v47, %s5559_s12  ;;  %v7737_v15 = vpop.permute.xlu0 %2666 }
 0x380   : > { %3164 = vrot.lane.b32.xlu0 %v2903_v11, %s5559_s12  ;;  %v5424_v16 = vpop.f32.mrf.mxu0 }
 0x381   : > { %2835 = vst.msk [vmem:[#allocation3 + $0x5b] sm:$0xff] %vm338_vm0, %v2758_v13  ;;  %v2757_v32 = vmul.f32 %v7668_v23, %v2505_v49  ;;  %v2508_v51 = vmax.f32 %v2472_v3, 0.0  ;;  %v2471_v19 = vadd.f32 %v7678_v45, %v2428_v1  ;;  %v2431_v48 = vmul.f32 %v5424_v16, %v7673_v8  ;;  %v7745_v23 = vpop.permute.xlu1 %2661 }
 0x382   : > { %v2292_v42 = vpop.f32.mrf.mxu0  ;;  %v2905_v36 = vld [vmem:[#allocation3 + $0x39] sm:$0xff]  ;;  %v2904_v14 = vld [vmem:[#allocation3 + $0x31] sm:$0xff] }
 0x383   : > { %2834 = vst.msk [vmem:[#allocation3 + $0x53] sm:$0xff] %vm338_vm0, %v2757_v32  ;;  %v2760_v40 = vmul.f32 %v7681_v54, %v2508_v51  ;;  %v2507_v61 = vmax.f32 %v2471_v19, 0.0  ;;  %v2474_v4 = vadd.f32 %v7678_v45, %v2431_v48  ;;  %v2430_v18 = vmul.f32 %v7673_v8, %v2292_v42  ;;  %3166 = vrot.lane.b32.xlu1 %v2904_v14, %s5559_s12 }
 0x384   : > { %3168 = vrot.lane.b32.xlu0 %v2905_v36, %s5559_s12  ;;  %v5427_v59 = vpop.f32.mrf.mxu0 }
 0x385   : > { %2837 = vst.msk [vmem:[#allocation3 + $0x6b] sm:$0xff] %vm338_vm0, %v2760_v40  ;;  %v2759_v57 = vmul.f32 %v7685_v29, %v2507_v61  ;;  %v2510_v17 = vmax.f32 %v2474_v4, 0.0  ;;  %v2473_v2 = vadd.f32 %v7678_v45, %v2430_v18  ;;  %v2433_v54 = vmul.f32 %v5427_v59, %v7673_v8  ;;  %v7757_v29 = vpop.permute.xlu0 %2676  ;;  %v7763_v58 = vpop.permute.xlu1 %2671 }
 0x386   : > { %v2302_v52 = vpop.f32.mrf.mxu0  ;;  %v2907_v22 = vld [vmem:[#allocation3 + $0x49] sm:$0xff]  ;;  %v2906_v10 = vld [vmem:[#allocation3 + $0x41] sm:$0xff] }
 0x387   : > { %2836 = vst.msk [vmem:[#allocation3 + $0x63] sm:$0xff] %vm338_vm0, %v2759_v57  ;;  %v2762_v53 = vmul.f32 %v7691_v46, %v2510_v17  ;;  %v2509_v12 = vmax.f32 %v2473_v2, 0.0  ;;  %v2476_v9 = vadd.f32 %v7678_v45, %v2433_v54  ;;  %v2432_v38 = vmul.f32 %v7673_v8, %v2302_v52  ;;  %3170 = vrot.lane.b32.xlu1 %v2906_v10, %s5559_s12 }
 0x388   : > { %3172 = vrot.lane.b32.xlu0 %v2907_v22, %s5559_s12  ;;  %v5430_v0 = vpop.f32.mrf.mxu0 }
 0x389   : > { %2839 = vst.msk [vmem:[#allocation3 + $0x7b] sm:$0xff] %vm338_vm0, %v2762_v53  ;;  %v2761_v5 = vmul.f32 %v7696_v6, %v2509_v12  ;;  %v2512_v34 = vmax.f32 %v2476_v9, 0.0  ;;  %v2475_v31 = vadd.f32 %v7678_v45, %v2432_v38  ;;  %v2435_v46 = vmul.f32 %v5430_v0, %v7673_v8 }
 0x38a   : > { %v2312_v26 = vpop.f32.mrf.mxu0  ;;  %v2909_v33 = vld [vmem:[#allocation3 + $0x59] sm:$0xff]  ;;  %v2908_v35 = vld [vmem:[#allocation3 + $0x51] sm:$0xff] }
 0x38b   : > { %2838 = vst.msk [vmem:[#allocation3 + $0x73] sm:$0xff] %vm338_vm0, %v2761_v5  ;;  %v2764_v43 = vmul.f32 %v7704_v24, %v2512_v34  ;;  %v2511_v55 = vmax.f32 %v2475_v31, 0.0  ;;  %v2478_v60 = vadd.f32 %v7678_v45, %v2435_v46  ;;  %v2434_v20 = vmul.f32 %v7673_v8, %v2312_v26  ;;  %3174 = vrot.lane.b32.xlu1 %v2908_v35, %s5559_s12  ;;  %v2687_v24 = vpop.permute.xlu0 %2686 }
 0x38c   : > { %3176 = vrot.lane.b32.xlu0 %v2909_v33, %s5559_s12  ;;  %v5433_v6 = vpop.f32.mrf.mxu0 }
 0x38d   : > { %2841 = vst.msk [vmem:[#allocation3 + $0x8b] sm:$0xff] %vm338_vm0, %v2764_v43  ;;  %v2763_v28 = vmul.f32 %v7709_v27, %v2511_v55  ;;  %v2514_v50 = vmax.f32 %v2478_v60, 0.0  ;;  %v2477_v56 = vadd.f32 %v7678_v45, %v2434_v20  ;;  %v2437_v44 = vmul.f32 %v5433_v6, %v7673_v8  ;;  %v2682_v27 = vpop.permute.xlu1 %2681 }
 0x38e   : > { %v2322_v30 = vpop.f32.mrf.mxu0  ;;  %v2911_v25 = vld [vmem:[#allocation3 + $0x69] sm:$0xff]  ;;  %v2910_v39 = vld [vmem:[#allocation3 + $0x61] sm:$0xff] }
 0x38f   : > { %2840 = vst.msk [vmem:[#allocation3 + $0x83] sm:$0xff] %vm338_vm0, %v2763_v28  ;;  %v2766_v21 = vmul.f32 %v7719_v37, %v2514_v50  ;;  %v2513_v41 = vmax.f32 %v2477_v56, 0.0  ;;  %v2480_v62 = vadd.f32 %v7678_v45, %v2437_v44  ;;  %v2436_v7 = vmul.f32 %v7673_v8, %v2322_v30  ;;  %3178 = vrot.lane.b32.xlu1 %v2910_v39, %s5559_s12 }
 0x390   : > { %3180 = vrot.lane.b32.xlu0 %v2911_v25, %s5559_s12  ;;  %v5436_v11 = vpop.f32.mrf.mxu0 }
 0x391   : > { %2843 = vst.msk [vmem:[#allocation3 + $0x9b] sm:$0xff] %vm338_vm0, %v2766_v21  ;;  %v2765_v47 = vmul.f32 %v7725_v63, %v2513_v41  ;;  %v2516_v13 = vmax.f32 %v2480_v62, 0.0  ;;  %v2479_v49 = vadd.f32 %v7678_v45, %v2436_v7  ;;  %v2439_v37 = vmul.f32 %v5436_v11, %v7673_v8  ;;  %v2697_v63 = vpop.permute.xlu0 %2696  ;;  %v2692_v61 = vpop.permute.xlu1 %2691 }
 0x392   : > { %v2332_v3 = vpop.f32.mrf.mxu0  ;;  %v2913_v1 = vld [vmem:[#allocation3 + $0x79] sm:$0xff]  ;;  %v2912_v16 = vld [vmem:[#allocation3 + $0x71] sm:$0xff] }
 0x393   : > { %2842 = vst.msk [vmem:[#allocation3 + $0x93] sm:$0xff] %vm338_vm0, %v2765_v47  ;;  %v2768_v32 = vmul.f32 %v7737_v15, %v2516_v13  ;;  %v2515_v51 = vmax.f32 %v2479_v49, 0.0  ;;  %v2482_v19 = vadd.f32 %v7678_v45, %v2439_v37  ;;  %v2438_v48 = vmul.f32 %v7673_v8, %v2332_v3  ;;  %3182 = vrot.lane.b32.xlu1 %v2912_v16, %s5559_s12 }
 0x394   : > { %3184 = vrot.lane.b32.xlu0 %v2913_v1, %s5559_s12 }
 0x395   : > { %2845 = vst.msk [vmem:[#allocation3 + $0xab] sm:$0xff] %vm338_vm0, %v2768_v32  ;;  %v2767_v36 = vmul.f32 %v7745_v23, %v2515_v51  ;;  %v2518_v14 = vmax.f32 %v2482_v19, 0.0  ;;  %v2481_v40 = vadd.f32 %v7678_v45, %v2438_v48  ;;  %v2707_v12 = vpop.permute.xlu0 %2706  ;;  %v2702_v46 = vpop.permute.xlu1 %2701 }
 0x396   : > { %v5439_v42 = vpop.f32.mrf.mxu0  ;;  %v2915_v18 = vld [vmem:[#allocation3 + $0x89] sm:$0xff]  ;;  %v2914_v59 = vld [vmem:[#allocation3 + $0x81] sm:$0xff] }
 0x397   : > { %v2441_v15 = vmul.f32 %v5439_v42, %v7673_v8  ;;  %2844 = vst.msk [vmem:[#allocation3 + $0xa3] sm:$0xff] %vm338_vm0, %v2767_v36  ;;  %v2770_v57 = vmul.f32 %v7757_v29, %v2518_v14  ;;  %v2517_v17 = vmax.f32 %v2481_v40, 0.0  ;;  %3186 = vrot.lane.b32.xlu1 %v2914_v59, %s5559_s12 }
 0x398   : > { %v2342_v4 = vpop.f32.mrf.mxu0  ;;  %3188 = vrot.lane.b32.xlu0 %v2915_v18, %s5559_s12 }
 0x399   : > { %v2484_v2 = vadd.f32 %v7678_v45, %v2441_v15  ;;  %v2440_v54 = vmul.f32 %v7673_v8, %v2342_v4  ;;  %2847 = vst.msk [vmem:[#allocation3 + $0xbb] sm:$0xff] %vm338_vm0, %v2770_v57  ;;  %v2769_v52 = vmul.f32 %v7763_v58, %v2517_v17  ;;  %v2717_v44 = vpop.permute.xlu0 %2716  ;;  %v2712_v41 = vpop.permute.xlu1 %2711 }
 0x39a   : > { %v5442_v23 = vpop.f32.mrf.mxu0  ;;  %v2917_v38 = vld [vmem:[#allocation3 + $0x99] sm:$0xff]  ;;  %v2916_v29 = vld [vmem:[#allocation3 + $0x91] sm:$0xff] }
 0x39b   : > { %v2520_v22 = vmax.f32 %v2484_v2, 0.0  ;;  %v2483_v10 = vadd.f32 %v7678_v45, %v2440_v54  ;;  %v2443_v53 = vmul.f32 %v5442_v23, %v7673_v8  ;;  %2846 = vst.msk [vmem:[#allocation3 + $0xb3] sm:$0xff] %vm338_vm0, %v2769_v52  ;;  %3190 = vrot.lane.b32.xlu1 %v2916_v29, %s5559_s12 }
 0x39c   : > { %v2352_v9 = vpop.f32.mrf.mxu0  ;;  %3192 = vrot.lane.b32.xlu0 %v2917_v38, %s5559_s12 }
 0x39d   : > { %v2772_v0 = vmul.f32 %v2687_v24, %v2520_v22  ;;  %v2519_v5 = vmax.f32 %v2483_v10, 0.0  ;;  %v2486_v34 = vadd.f32 %v7678_v45, %v2443_v53  ;;  %v2442_v31 = vmul.f32 %v7673_v8, %v2352_v9  ;;  %v2727_v51 = vpop.permute.xlu0 %2726  ;;  %v2722_v15 = vpop.permute.xlu1 %2721 }
 0x39e   : > { %v2919_v60 = vld [vmem:[#allocation3 + $0xa9] sm:$0xff]  ;;  %v2918_v20 = vld [vmem:[#allocation3 + $0xa1] sm:$0xff] }
 0x39f   : > { %2849 = vst.msk [vmem:[#allocation3 + $0xcb] sm:$0xff] %vm338_vm0, %v2772_v0  ;;  %v2771_v26 = vmul.f32 %v2682_v27, %v2519_v5  ;;  %v2522_v33 = vmax.f32 %v2486_v34, 0.0  ;;  %v2485_v35 = vadd.f32 %v7678_v45, %v2442_v31  ;;  %3194 = vrot.lane.b32.xlu1 %v2918_v20, %s5559_s12 }
 0x3a0   : > { %v5445_v58 = vpop.f32.mrf.mxu0  ;;  %3196 = vrot.lane.b32.xlu0 %v2919_v60, %s5559_s12 }
 0x3a1   : > { %v2445_v43 = vmul.f32 %v5445_v58, %v7673_v8  ;;  %2848 = vst.msk [vmem:[#allocation3 + $0xc3] sm:$0xff] %vm338_vm0, %v2771_v26  ;;  %v2774_v6 = vmul.f32 %v2697_v63, %v2522_v33  ;;  %v2521_v28 = vmax.f32 %v2485_v35, 0.0  ;;  %v2737_v53 = vpop.permute.xlu0 %2736  ;;  %v2732_v5 = vpop.permute.xlu1 %2731 }
 0x3a2   : > { %v2362_v55 = vpop.f32.mrf.mxu0  ;;  %v2921_v7 = vld [vmem:[#allocation3 + $0xb9] sm:$0xff]  ;;  %v2920_v27 = vld [vmem:[#allocation3 + $0xb1] sm:$0xff] }
 0x3a3   : > { %v2488_v50 = vadd.f32 %v7678_v45, %v2445_v43  ;;  %v2444_v56 = vmul.f32 %v7673_v8, %v2362_v55  ;;  %2851 = vst.msk [vmem:[#allocation3 + $0xdb] sm:$0xff] %vm338_vm0, %v2774_v6  ;;  %v2773_v30 = vmul.f32 %v2692_v61, %v2521_v28  ;;  %3198 = vrot.lane.b32.xlu1 %v2920_v27, %s5559_s12  ;;  %v7873_v27 = vld [vmem:[#allocation3 + $0x22] sm:$0xff] }
 0x3a4   : > { %3200 = vrot.lane.b32.xlu0 %v2921_v7, %s5559_s12  ;;  %v7871_v7 = vld [vmem:[#allocation3 + $0x2a] sm:$0xff] }
 0x3a5   : > { %v2524_v25 = vmax.f32 %v2488_v50, 0.0  ;;  %v2487_v39 = vadd.f32 %v7678_v45, %v2444_v56  ;;  %2850 = vst.msk [vmem:[#allocation3 + $0xd3] sm:$0xff] %vm338_vm0, %v2773_v30  ;;  %v2747_v20 = vpop.permute.xlu0 %2746 }
 0x3a6   : > { %v5448_v24 = vpop.f32.mrf.mxu0 }
 0x3a7   : > { %v2447_v21 = vmul.f32 %v5448_v24, %v7673_v8  ;;  %v2776_v11 = vmul.f32 %v2707_v12, %v2524_v25  ;;  %v2523_v47 = vmax.f32 %v2487_v39, 0.0  ;;  %v2935_v39 = vld [vmem:[#allocation3 + $0xa] sm:$0xff] }
 0x3a8   : > { %v2372_v62 = vpop.f32.mrf.mxu0  ;;  %v2923_v48 = vld [vmem:[#allocation3 + $0xc9] sm:$0xff]  ;;  %v2922_v63 = vld [vmem:[#allocation3 + $0xc1] sm:$0xff] }
 0x3a9   : > { %v2490_v13 = vadd.f32 %v7678_v45, %v2447_v21  ;;  %v2446_v49 = vmul.f32 %v7673_v8, %v2372_v62  ;;  %2853 = vst.msk [vmem:[#allocation3 + $0xeb] sm:$0xff] %vm338_vm0, %v2776_v11  ;;  %v2775_v3 = vmul.f32 %v2702_v46, %v2523_v47  ;;  %3204 = vrot.lane.b32.xlu0 %v2923_v48, %s5559_s12  ;;  %v2934_v21 = vld [vmem:[#allocation3 + $0x2] sm:$0xff]  ;;  %v7865_v62 = vld [vmem:[#allocation3 + $0x12] sm:$0xff]  ;;  %v7879_v11 = vld [vmem:[#allocation3 + $0x3a] sm:$0xff] }
 0x3aa   : > { %v5451_v37 = vpop.f32.mrf.mxu0  ;;  %3202 = vrot.lane.b32.xlu1 %v2922_v63, %s5559_s12  ;;  %v7881_v47 = vld [vmem:[#allocation3 + $0x32] sm:$0xff]  ;;  %v7921_v48 = vld [vmem:[#allocation3 + $0x82] sm:$0xff]  ;;  %v7927_v63 = vld [vmem:[#allocation3 + $0x9a] sm:$0xff] }
 0x3ab   : > { %v2526_v1 = vmax.f32 %v2490_v13, 0.0  ;;  %v2489_v16 = vadd.f32 %v7678_v45, %v2446_v49  ;;  %v2449_v32 = vmul.f32 %v5451_v37, %v7673_v8  ;;  %2852 = vst.msk [vmem:[#allocation3 + $0xe3] sm:$0xff] %vm338_vm0, %v2775_v3  ;;  %v7887_v13 = vld [vmem:[#allocation3 + $0x4a] sm:$0xff]  ;;  %v7889_v49 = vld [vmem:[#allocation3 + $0x42] sm:$0xff]  ;;  %v7895_v37 = vld [vmem:[#allocation3 + $0x5a] sm:$0xff] }
 0x3ac   : > { %v2382_v19 = vpop.f32.mrf.mxu0  ;;  %v2925_v2 = vld [vmem:[#allocation3 + $0xd9] sm:$0xff]  ;;  %v2924_v54 = vld [vmem:[#allocation3 + $0xd1] sm:$0xff] }
 0x3ad   : > { %v2778_v42 = vmul.f32 %v2717_v44, %v2526_v1  ;;  %v2525_v36 = vmax.f32 %v2489_v16, 0.0  ;;  %v2492_v14 = vadd.f32 %v7678_v45, %v2449_v32  ;;  %v2448_v40 = vmul.f32 %v7673_v8, %v2382_v19  ;;  %3208 = vrot.lane.b32.xlu0 %v2925_v2, %s5559_s12  ;;  %v7897_v3 = vld [vmem:[#allocation3 + $0x52] sm:$0xff]  ;;  %v7903_v1 = vld [vmem:[#allocation3 + $0x6a] sm:$0xff]  ;;  %v7905_v16 = vld [vmem:[#allocation3 + $0x62] sm:$0xff] }
 0x3ae   : > { %3206 = vrot.lane.b32.xlu1 %v2924_v54, %s5559_s12  ;;  %v7911_v32 = vld [vmem:[#allocation3 + $0x7a] sm:$0xff]  ;;  %v7919_v19 = vld [vmem:[#allocation3 + $0x8a] sm:$0xff] }
 0x3af   : > { %2855 = vst.msk [vmem:[#allocation3 + $0xfb] sm:$0xff] %vm338_vm0, %v2778_v42  ;;  %v2777_v4 = vmul.f32 %v2712_v41, %v2525_v36  ;;  %v2528_v18 = vmax.f32 %v2492_v14, 0.0  ;;  %v2491_v59 = vadd.f32 %v7678_v45, %v2448_v40  ;;  %v7863_v41 = vld [vmem:[#allocation3 + $0x1a] sm:$0xff]  ;;  %v7929_v42 = vld [vmem:[#allocation3 + $0x92] sm:$0xff]  ;;  %v7935_v36 = vld [vmem:[#allocation3 + $0xaa] sm:$0xff]  ;;  %v7943_v40 = vpop.permute.xlu0 %3156 }
 0x3b0   : > { %v5454_v61 = vpop.f32.mrf.mxu0  ;;  %v7937_v14 = vld [vmem:[#allocation3 + $0xa2] sm:$0xff] }
 0x3b1   : > { %v2451_v57 = vmul.f32 %v5454_v61, %v7673_v8  ;;  %2854 = vst.msk [vmem:[#allocation3 + $0xf3] sm:$0xff] %vm338_vm0, %v2777_v4  ;;  %v2780_v23 = vmul.f32 %v2727_v51, %v2528_v18  ;;  %v2527_v52 = vmax.f32 %v2491_v59, 0.0  ;;  %v7913_v51 = vld [vmem:[#allocation3 + $0x72] sm:$0xff]  ;;  %v7947_v61 = vld [vmem:[#allocation3 + $0xba] sm:$0xff] }
 0x3b2   : > { %v2392_v17 = vpop.f32.mrf.mxu0  ;;  %v2927_v31 = vld [vmem:[#allocation3 + $0xe9] sm:$0xff]  ;;  %v2926_v46 = vld [vmem:[#allocation3 + $0xe1] sm:$0xff]  ;;  %v7949_v4 = vld [vmem:[#allocation3 + $0xb2] sm:$0xff] }
 0x3b3   : > { %v2494_v22 = vadd.f32 %v7678_v45, %v2451_v57  ;;  %v2450_v10 = vmul.f32 %v7673_v8, %v2392_v17  ;;  %2857 = vst.msk [vmem:[#allocation3 + $0x10b] sm:$0xff] %vm338_vm0, %v2780_v23  ;;  %v2779_v9 = vmul.f32 %v2722_v15, %v2527_v52  ;;  %3212 = vrot.lane.b32.xlu0 %v2927_v31, %s5559_s12  ;;  %v7959_v57 = vld [vmem:[#allocation3 + $0xca] sm:$0xff]  ;;  %v7961_v17 = vld [vmem:[#allocation3 + $0xc2] sm:$0xff]  ;;  %v7971_v23 = vld [vmem:[#allocation3 + $0xda] sm:$0xff] }
 0x3b4   : > { %v5457_v12 = vpop.f32.mrf.mxu0  ;;  %3210 = vrot.lane.b32.xlu1 %v2926_v46, %s5559_s12  ;;  %v7973_v52 = vld [vmem:[#allocation3 + $0xd2] sm:$0xff] }
 0x3b5   : > { %v2530_v38 = vmax.f32 %v2494_v22, 0.0  ;;  %v2493_v29 = vadd.f32 %v7678_v45, %v2450_v10  ;;  %v2453_v0 = vmul.f32 %v5457_v12, %v7673_v8  ;;  %2856 = vst.msk [vmem:[#allocation3 + $0x103] sm:$0xff] %vm338_vm0, %v2779_v9  ;;  %v7985_v12 = vld [vmem:[#allocation3 + $0xe2] sm:$0xff] }
 0x3b6   : > { %v2402_v34 = vpop.f32.mrf.mxu0 }
 0x3b7   : > { %v2782_v58 = vmul.f32 %v2737_v53, %v2530_v38  ;;  %v2529_v26 = vmax.f32 %v2493_v29, 0.0  ;;  %v2496_v33 = vadd.f32 %v7678_v45, %v2453_v0  ;;  %v2452_v35 = vmul.f32 %v7673_v8, %v2402_v34  ;;  %v2742_v8 = vpop.permute.xlu1 %2741  ;;  %v7983_v53 = vld [vmem:[#allocation3 + $0xea] sm:$0xff] }
 0x3b8   : > { %v2929_v6 = vld [vmem:[#allocation3 + $0xf9] sm:$0xff]  ;;  %v2928_v28 = vld [vmem:[#allocation3 + $0xf1] sm:$0xff] }
 0x3b9   : > { %2859 = vst.msk [vmem:[#allocation3 + $0x11b] sm:$0xff] %vm338_vm0, %v2782_v58  ;;  %v2781_v43 = vmul.f32 %v2732_v5, %v2529_v26  ;;  %v2532_v55 = vmax.f32 %v2496_v33, 0.0  ;;  %v2495_v60 = vadd.f32 %v7678_v45, %v2452_v35  ;;  %3216 = vrot.lane.b32.xlu0 %v2929_v6, %s5559_s12  ;;  %3214 = vrot.lane.b32.xlu1 %v2928_v28, %s5559_s12  ;;  %v7995_v29 = vld [vmem:[#allocation3 + $0xfa] sm:$0xff]  ;;  %v7997_v0 = vld [vmem:[#allocation3 + $0xf2] sm:$0xff] }
 0x3bb   : > { %2858 = vst.msk [vmem:[#allocation3 + $0x113] sm:$0xff] %vm338_vm0, %v2781_v43  ;;  %v2784_v50 = vmul.f32 %v2747_v20, %v2532_v55  ;;  %v2531_v56 = vmax.f32 %v2495_v60, 0.0  ;;  %v7945_v15 = vpop.permute.xlu1 %3154 }
 0x3bc   : > { %v2931_v24 = vld [vmem:[#allocation3 + $0x109] sm:$0xff]  ;;  %v2930_v30 = vld [vmem:[#allocation3 + $0x101] sm:$0xff] }
 0x3bd   : > { %2861 = vst.msk [vmem:[#allocation3 + $0x12b] sm:$0xff] %vm338_vm0, %v2784_v50  ;;  %v2783_v44 = vmul.f32 %v2742_v8, %v2531_v56  ;;  %3220 = vrot.lane.b32.xlu0 %v2931_v24, %s5559_s12  ;;  %3218 = vrot.lane.b32.xlu1 %v2930_v30, %s5559_s12  ;;  %v8007_v31 = vld [vmem:[#allocation3 + $0x10a] sm:$0xff]  ;;  %v8009_v46 = vld [vmem:[#allocation3 + $0x102] sm:$0xff] }
 0x3bf   : > { %2860 = vst.msk [vmem:[#allocation3 + $0x123] sm:$0xff] %vm338_vm0, %v2783_v44 }
 0x3c2   : > { %v2933_v45 = vld [vmem:[#allocation3 + $0x119] sm:$0xff]  ;;  %v2932_v25 = vld [vmem:[#allocation3 + $0x111] sm:$0xff] }
 0x3c3   : > { %3224 = vrot.lane.b32.xlu0 %v2933_v45, %s5559_s12  ;;  %3222 = vrot.lane.b32.xlu1 %v2932_v25, %s5559_s12  ;;  %v8019_v33 = vld [vmem:[#allocation3 + $0x11a] sm:$0xff]  ;;  %v8021_v35 = vld [vmem:[#allocation3 + $0x112] sm:$0xff] }
 0x3c7   : > { %3300 = vrot.lane.b32.xlu0 %v2935_v39, %s5560_s13  ;;  %3298 = vrot.lane.b32.xlu1 %v2934_v21, %s5560_s13 }
 0x3cb   : > { %3304 = vrot.lane.b32.xlu0 %v7863_v41, %s5560_s13  ;;  %3302 = vrot.lane.b32.xlu1 %v7865_v62, %s5560_s13 }
 0x3cf   : > { %3308 = vrot.lane.b32.xlu0 %v7871_v7, %s5560_s13  ;;  %3306 = vrot.lane.b32.xlu1 %v7873_v27, %s5560_s13 }
 0x3d3   : > { %3312 = vrot.lane.b32.xlu0 %v7879_v11, %s5560_s13  ;;  %3310 = vrot.lane.b32.xlu1 %v7881_v47, %s5560_s13 }
 0x3d7   : > { %3316 = vrot.lane.b32.xlu0 %v7887_v13, %s5560_s13  ;;  %3314 = vrot.lane.b32.xlu1 %v7889_v49, %s5560_s13 }
 0x3db   : > { %3320 = vrot.lane.b32.xlu0 %v7895_v37, %s5560_s13  ;;  %3318 = vrot.lane.b32.xlu1 %v7897_v3, %s5560_s13 }
 0x3df   : > { %3324 = vrot.lane.b32.xlu0 %v7903_v1, %s5560_s13  ;;  %3322 = vrot.lane.b32.xlu1 %v7905_v16, %s5560_s13 }
 0x3e3   : > { %3328 = vrot.lane.b32.xlu0 %v7911_v32, %s5560_s13  ;;  %3326 = vrot.lane.b32.xlu1 %v7913_v51, %s5560_s13 }
 0x3e7   : > { %3332 = vrot.lane.b32.xlu0 %v7919_v19, %s5560_s13  ;;  %3330 = vrot.lane.b32.xlu1 %v7921_v48, %s5560_s13 }
 0x3eb   : > { %3336 = vrot.lane.b32.xlu0 %v7927_v63, %s5560_s13  ;;  %3334 = vrot.lane.b32.xlu1 %v7929_v42, %s5560_s13 }
 0x3ed   : > { %v7957_v59 = vpop.permute.xlu1 %3158 }
 0x3ee   : > { %v7955_v18 = vpop.permute.xlu0 %3160 }
 0x3ef   : > { %3340 = vrot.lane.b32.xlu0 %v7935_v36, %s5560_s13  ;;  %3338 = vrot.lane.b32.xlu1 %v7937_v14, %s5560_s13 }
 0x3f1   : > { %v7969_v54 = vpop.permute.xlu1 %3162 }
 0x3f2   : > { %v7967_v2 = vpop.permute.xlu0 %3164 }
 0x3f3   : > { %3344 = vrot.lane.b32.xlu0 %v7947_v61, %s5560_s13  ;;  %3342 = vrot.lane.b32.xlu1 %v7949_v4, %s5560_s13 }
 0x3f5   : > { %v7981_v10 = vpop.permute.xlu1 %3166 }
 0x3f6   : > { %v7979_v22 = vpop.permute.xlu0 %3168 }
 0x3f7   : > { %3348 = vrot.lane.b32.xlu0 %v7959_v57, %s5560_s13  ;;  %3346 = vrot.lane.b32.xlu1 %v7961_v17, %s5560_s13 }
 0x3f9   : > { %v7993_v38 = vpop.permute.xlu1 %3170 }
 0x3fa   : > { %v7991_v9 = vpop.permute.xlu0 %3172 }
 0x3fb   : > { %3352 = vrot.lane.b32.xlu0 %v7971_v23, %s5560_s13  ;;  %3350 = vrot.lane.b32.xlu1 %v7973_v52, %s5560_s13 }
 0x3fd   : > { %v8005_v34 = vpop.permute.xlu1 %3174 }
 0x3fe   : > { %v8003_v5 = vpop.permute.xlu0 %3176 }
 0x3ff   : > { %3356 = vrot.lane.b32.xlu0 %v7983_v53, %s5560_s13  ;;  %3354 = vrot.lane.b32.xlu1 %v7985_v12, %s5560_s13 }
 0x401   : > { %v8017_v26 = vpop.permute.xlu1 %3178 }
 0x402   : > { %v8015_v58 = vpop.permute.xlu0 %3180 }
 0x403   : > { %3360 = vrot.lane.b32.xlu0 %v7995_v29, %s5560_s13  ;;  %3358 = vrot.lane.b32.xlu1 %v7997_v0, %s5560_s13  ;;  %9554 = vst [vmem:[#allocation90_spill] sm:$0xff] %v8015_v58 }
 0x405   : > { %v8029_v55 = vpop.permute.xlu1 %3182 }
 0x406   : > { %v8027_v43 = vpop.permute.xlu0 %3184  ;;  %9556 = vst [vmem:[#allocation29_spill] sm:$0xff] %v8029_v55 }
 0x407   : > { %3364 = vrot.lane.b32.xlu0 %v8007_v31, %s5560_s13  ;;  %3362 = vrot.lane.b32.xlu1 %v8009_v46, %s5560_s13  ;;  %9555 = vst [vmem:[#allocation4_spill] sm:$0xff] %v8027_v43 }
 0x409   : > { %v8037_v20 = vpop.permute.xlu1 %3186 }
 0x40a   : > { %v8035_v60 = vpop.permute.xlu0 %3188  ;;  %9558 = vst [vmem:[#allocation60_spill] sm:$0xff] %v8037_v20  ;;  %v3058_v20 = vld [vmem:[#allocation3 + $0x85] sm:$0xff] }
 0x40b   : > { %3368 = vrot.lane.b32.xlu0 %v8019_v33, %s5560_s13  ;;  %3366 = vrot.lane.b32.xlu1 %v8021_v35, %s5560_s13  ;;  %9557 = vst [vmem:[#allocation28_spill] sm:$0xff] %v8035_v60  ;;  %v3023_v60 = vld [vmem:[#allocation3 + $0x8c] sm:$0xff] }
 0x40d   : > { %v8045_v28 = vpop.permute.xlu1 %3190 }
 0x40e   : > { %v8043_v6 = vpop.permute.xlu0 %3192  ;;  %9560 = vst [vmem:[#allocation92_spill] sm:$0xff] %v8045_v28  ;;  %v3053_v28 = vld [vmem:[#allocation3 + $0x5d] sm:$0xff] }
 0x40f   : > { %3410 = vrot.lane.b32.xlu0 %v7863_v41, %s5561_s14  ;;  %3408 = vrot.lane.b32.xlu1 %v7865_v62, %s5561_s14  ;;  %9559 = vst [vmem:[#allocation59_spill] sm:$0xff] %v8043_v6  ;;  %v3017_v6 = vld [vmem:[#allocation3 + $0x5c] sm:$0xff] }
 0x411   : > { %v8053_v56 = vpop.permute.xlu1 %3194 }
 0x412   : > { %v8051_v50 = vpop.permute.xlu0 %3196  ;;  %9562 = vst [vmem:[#allocation5_spill] sm:$0xff] %v8053_v56  ;;  %v3016_v56 = vld [vmem:[#allocation3 + $0x54] sm:$0xff] }
 0x413   : > { %3414 = vrot.lane.b32.xlu0 %v7871_v7, %s5561_s14  ;;  %3412 = vrot.lane.b32.xlu1 %v7873_v27, %s5561_s14  ;;  %9561 = vst [vmem:[#allocation91_spill] sm:$0xff] %v8051_v50  ;;  %v3087_v50 = vld [vmem:[#allocation3 + $0x4e] sm:$0xff] }
 0x415   : > { %v8061_v44 = vpop.permute.xlu1 %3198 }
 0x416   : > { %v8059_v8 = vpop.permute.xlu0 %3200  ;;  %9564 = vst [vmem:[#allocation30_spill] sm:$0xff] %v8061_v44  ;;  %v3051_v44 = vld [vmem:[#allocation3 + $0x4d] sm:$0xff] }
 0x417   : > { %3418 = vrot.lane.b32.xlu0 %v7879_v11, %s5561_s14  ;;  %3416 = vrot.lane.b32.xlu1 %v7881_v47, %s5561_s14  ;;  %9563 = vst [vmem:[#allocation31_spill] sm:$0xff] %v8059_v8  ;;  %v3015_v8 = vld [vmem:[#allocation3 + $0x4c] sm:$0xff] }
 0x41b   : > { %3422 = vrot.lane.b32.xlu0 %v7887_v13, %s5561_s14  ;;  %3420 = vrot.lane.b32.xlu1 %v7889_v49, %s5561_s14  ;;  %v8067_v24 = vpop.permute.xlu0 %3204 }
 0x41c   : > { %9565 = vst [vmem:[#allocation62_spill] sm:$0xff] %v8067_v24  ;;  %v8069_v30 = vpop.permute.xlu1 %3202  ;;  %v3085_v24 = vld [vmem:[#allocation3 + $0x3e] sm:$0xff] }
 0x41d   : > { %9566 = vst [vmem:[#allocation61_spill] sm:$0xff] %v8069_v30  ;;  %v3014_v30 = vld [vmem:[#allocation3 + $0x44] sm:$0xff] }
 0x41f   : > { %3426 = vrot.lane.b32.xlu0 %v7895_v37, %s5561_s14  ;;  %3424 = vrot.lane.b32.xlu1 %v7897_v3, %s5561_s14  ;;  %v8075_v45 = vpop.permute.xlu0 %3208 }
 0x420   : > { %9567 = vst [vmem:[#allocation94_spill] sm:$0xff] %v8075_v45  ;;  %v8077_v25 = vpop.permute.xlu1 %3206  ;;  %v3082_v45 = vld [vmem:[#allocation3 + $0x26] sm:$0xff] }
 0x421   : > { %9568 = vst [vmem:[#allocation93_spill] sm:$0xff] %v8077_v25  ;;  %v3049_v25 = vld [vmem:[#allocation3 + $0x3d] sm:$0xff] }
 0x423   : > { %3430 = vrot.lane.b32.xlu0 %v7903_v1, %s5561_s14  ;;  %3428 = vrot.lane.b32.xlu1 %v7905_v16, %s5561_s14 }
 0x425   : > { %v8083_v39 = vpop.permute.xlu0 %3212 }
 0x426   : > { %9569 = vst [vmem:[#allocation6_spill] sm:$0xff] %v8083_v39  ;;  %v8085_v21 = vpop.permute.xlu1 %3210  ;;  %v2984_v39 = vld [vmem:[#allocation3 + $0x73] sm:$0xff] }
 0x427   : > { %3434 = vrot.lane.b32.xlu0 %v7911_v32, %s5561_s14  ;;  %3432 = vrot.lane.b32.xlu1 %v7913_v51, %s5561_s14  ;;  %9570 = vst [vmem:[#allocation33_spill] sm:$0xff] %v8085_v21  ;;  %v3010_v21 = vld [vmem:[#allocation3 + $0x24] sm:$0xff] }
 0x42b   : > { %3438 = vrot.lane.b32.xlu0 %v7919_v19, %s5561_s14  ;;  %3436 = vrot.lane.b32.xlu1 %v7921_v48, %s5561_s14  ;;  %v8091_v41 = vpop.permute.xlu0 %3216  ;;  %v8093_v62 = vpop.permute.xlu1 %3214 }
 0x42c   : > { %9571 = vst [vmem:[#allocation32_spill] sm:$0xff] %v8091_v41  ;;  %9572 = vst [vmem:[#allocation64_spill] sm:$0xff] %v8093_v62  ;;  %v2982_v41 = vld [vmem:[#allocation3 + $0x63] sm:$0xff]  ;;  %v3008_v62 = vld [vmem:[#allocation3 + $0x14] sm:$0xff] }
 0x42f   : > { %3442 = vrot.lane.b32.xlu0 %v7927_v63, %s5561_s14  ;;  %3440 = vrot.lane.b32.xlu1 %v7929_v42, %s5561_s14  ;;  %v8099_v7 = vpop.permute.xlu0 %3220  ;;  %v8101_v27 = vpop.permute.xlu1 %3218 }
 0x430   : > { %9573 = vst [vmem:[#allocation63_spill] sm:$0xff] %v8099_v7  ;;  %9574 = vst [vmem:[#allocation96_spill] sm:$0xff] %v8101_v27  ;;  %v4495_v7 = vld [vmem:[%s9148_s5 + $0x28] sm:$0xff]  ;;  %v2983_v27 = vld [vmem:[#allocation3 + $0x6b] sm:$0xff] }
 0x433   : > { %3446 = vrot.lane.b32.xlu0 %v7935_v36, %s5561_s14  ;;  %3444 = vrot.lane.b32.xlu1 %v7937_v14, %s5561_s14 }
 0x435   : > { %v8107_v11 = vpop.permute.xlu0 %3224  ;;  %v8109_v47 = vpop.permute.xlu1 %3222 }
 0x436   : > { %9575 = vst [vmem:[#allocation176_spill] sm:$0xff] %v8107_v11  ;;  %9576 = vst [vmem:[#allocation95_spill] sm:$0xff] %v8109_v47  ;;  %v2980_v11 = vld [vmem:[#allocation3 + $0x53] sm:$0xff] }
 0x437   : > { %3450 = vrot.lane.b32.xlu0 %v7947_v61, %s5561_s14  ;;  %3448 = vrot.lane.b32.xlu1 %v7949_v4, %s5561_s14  ;;  %v2971_v61 = vld [vmem:[#allocation3 + $0x12a] sm:$0xff]  ;;  %v2970_v4 = vld [vmem:[#allocation3 + $0x122] sm:$0xff] }
 0x439   : > { %v8115_v13 = vpop.permute.xlu0 %3300  ;;  %v8117_v49 = vpop.permute.xlu1 %3298 }
 0x43b   : > { %3454 = vrot.lane.b32.xlu0 %v7959_v57, %s5561_s14  ;;  %3452 = vrot.lane.b32.xlu1 %v7961_v17, %s5561_s14 }
 0x43d   : > { %v8123_v37 = vpop.permute.xlu0 %3304  ;;  %v8125_v3 = vpop.permute.xlu1 %3302 }
 0x43f   : > { %3458 = vrot.lane.b32.xlu0 %v7971_v23, %s5561_s14  ;;  %3456 = vrot.lane.b32.xlu1 %v7973_v52, %s5561_s14  ;;  %v2973_v23 = vld [vmem:[#allocation3 + $0x1b] sm:$0xff]  ;;  %v2972_v52 = vld [vmem:[#allocation3 + $0x13] sm:$0xff] }
 0x441   : > { %v8131_v1 = vpop.permute.xlu0 %3308  ;;  %v8133_v16 = vpop.permute.xlu1 %3306 }
 0x443   : > { %3462 = vrot.lane.b32.xlu0 %v7983_v53, %s5561_s14  ;;  %3460 = vrot.lane.b32.xlu1 %v7985_v12, %s5561_s14 }
 0x445   : > { %v8139_v32 = vpop.permute.xlu0 %3312  ;;  %v8141_v51 = vpop.permute.xlu1 %3310 }
 0x447   : > { %3466 = vrot.lane.b32.xlu0 %v7995_v29, %s5561_s14  ;;  %3464 = vrot.lane.b32.xlu1 %v7997_v0, %s5561_s14  ;;  %v2975_v29 = vld [vmem:[#allocation3 + $0x2b] sm:$0xff]  ;;  %v2974_v0 = vld [vmem:[#allocation3 + $0x23] sm:$0xff] }
 0x449   : > { %v8147_v19 = vpop.permute.xlu0 %3316  ;;  %v8149_v48 = vpop.permute.xlu1 %3314 }
 0x44b   : > { %3470 = vrot.lane.b32.xlu0 %v8007_v31, %s5561_s14  ;;  %3468 = vrot.lane.b32.xlu1 %v8009_v46, %s5561_s14 }
 0x44d   : > { %v8155_v63 = vpop.permute.xlu0 %3320  ;;  %v8157_v42 = vpop.permute.xlu1 %3318 }
 0x44f   : > { %3474 = vrot.lane.b32.xlu0 %v8019_v33, %s5561_s14  ;;  %3472 = vrot.lane.b32.xlu1 %v8021_v35, %s5561_s14  ;;  %v2977_v33 = vld [vmem:[#allocation3 + $0x3b] sm:$0xff]  ;;  %v2976_v35 = vld [vmem:[#allocation3 + $0x33] sm:$0xff] }
 0x451   : > { %v8163_v36 = vpop.permute.xlu0 %3324  ;;  %v8165_v14 = vpop.permute.xlu1 %3322 }
 0x452   : > { %9577 = vst [vmem:[#allocation123_spill] sm:$0xff] %v8163_v36  ;;  %9578 = vst [vmem:[#allocation7_spill] sm:$0xff] %v8165_v14  ;;  %v3024_v14 = vld [vmem:[#allocation3 + $0x94] sm:$0xff] }
 0x453   : > { %3478 = vrot.lane.b32.xlu0 %v2971_v61, %s5561_s14  ;;  %3476 = vrot.lane.b32.xlu1 %v2970_v4, %s5561_s14  ;;  %v4498_v61 = vld [vmem:[%s9148_s5 + $0x40] sm:$0xff] }
 0x454   : > { %5458 = vmatprep.subr.mxu1 %v4498_v61 }
 0x455   : > { %v8169_v57 = vpop.permute.xlu0 %3328  ;;  %v8171_v17 = vpop.permute.xlu1 %3326  ;;  %5459 = vmatpush3.msra.mxu1 %v4498_v61  ;;  %v2981_v61 = vld [vmem:[#allocation3 + $0x5b] sm:$0xff] }
 0x456   : > { %9579 = vst [vmem:[#allocation35_spill] sm:$0xff] %v8169_v57  ;;  %9580 = vst [vmem:[#allocation122_spill] sm:$0xff] %v8171_v17  ;;  %v3059_v57 = vld [vmem:[#allocation3 + $0x8d] sm:$0xff] }
 0x457   : > { %3554 = vrot.lane.b32.xlu0 %v2973_v23, %s5562_s15  ;;  %3552 = vrot.lane.b32.xlu1 %v2972_v52, %s5562_s15  ;;  %v2979_v52 = vld [vmem:[#allocation3 + $0x4b] sm:$0xff] }
 0x458   : > { %v2987_v17 = vld [vmem:[#allocation3 + $0x8b] sm:$0xff] }
 0x459   : > { %v8175_v53 = vpop.permute.xlu0 %3332  ;;  %v8177_v12 = vpop.permute.xlu1 %3330 }
 0x45a   : > { %9581 = vst [vmem:[#allocation150_spill] sm:$0xff] %v8175_v53  ;;  %9582 = vst [vmem:[#allocation34_spill] sm:$0xff] %v8177_v12  ;;  %v3093_v53 = vld [vmem:[#allocation3 + $0x7e] sm:$0xff] }
 0x45b   : > { %3558 = vrot.lane.b32.xlu0 %v2975_v29, %s5562_s15  ;;  %3556 = vrot.lane.b32.xlu1 %v2974_v0, %s5562_s15  ;;  %v2978_v29 = vld [vmem:[#allocation3 + $0x43] sm:$0xff]  ;;  %v4497_v0 = vld [vmem:[%s9148_s5 + $0x38] sm:$0xff] }
 0x45c   : > { %5460 = vmatprep.subr.mxu1 %v4497_v0  ;;  %v2986_v12 = vld [vmem:[#allocation3 + $0x83] sm:$0xff] }
 0x45d   : > { %v8181_v31 = vpop.permute.xlu0 %3336  ;;  %v8183_v46 = vpop.permute.xlu1 %3334  ;;  %5461 = vmatpush3.msra.mxu1 %v4497_v0  ;;  %v4494_v0 = vld [vmem:[%s9148_s5 + $0x20] sm:$0xff] }
 0x45e   : > { %9583 = vst [vmem:[#allocation66_spill] sm:$0xff] %v8181_v31  ;;  %9584 = vst [vmem:[#allocation149_spill] sm:$0xff] %v8183_v46  ;;  %v3052_v31 = vld [vmem:[#allocation3 + $0x55] sm:$0xff] }
 0x45f   : > { %3562 = vrot.lane.b32.xlu0 %v2977_v33, %s5562_s15  ;;  %3560 = vrot.lane.b32.xlu1 %v2976_v35, %s5562_s15  ;;  %v4496_v33 = vld [vmem:[%s9148_s5 + $0x30] sm:$0xff]  ;;  %v3088_v46 = vld [vmem:[#allocation3 + $0x56] sm:$0xff] }
 0x460   : > { %5462 = vmatprep.subr.mxu1 %v4496_v33 }
 0x461   : > { %v8190_v4 = vpop.permute.xlu0 %3340  ;;  %v8192_v23 = vpop.permute.xlu1 %3338  ;;  %5463 = vmatpush3.msra.mxu1 %v4496_v33 }
 0x462   : > { %9585 = vst [vmem:[#allocation178_spill] sm:$0xff] %v8190_v4  ;;  %9586 = vst [vmem:[#allocation65_spill] sm:$0xff] %v8192_v23  ;;  %5464 = vmatprep.subr.mxu1 %v4495_v7 }
 0x463   : > { %3566 = vrot.lane.b32.xlu0 %v2979_v52, %s5562_s15  ;;  %3564 = vrot.lane.b32.xlu1 %v2978_v29, %s5562_s15 }
 0x464   : > { %5465 = vmatpush3.msra.mxu1 %v4495_v7  ;;  %v4492_v7 = vld [vmem:[%s9148_s5 + $0x10] sm:$0xff] }
 0x465   : > { %v8202_v35 = vpop.permute.xlu0 %3344  ;;  %v8204_v47 = vpop.permute.xlu1 %3342  ;;  %5466 = vmatprep.subr.mxu1 %v4494_v0 }
 0x466   : > { %9587 = vst [vmem:[#allocation98_spill] sm:$0xff] %v8202_v35  ;;  %9588 = vst [vmem:[#allocation177_spill] sm:$0xff] %v8204_v47  ;;  %5467 = vmatpush3.msra.mxu1 %v4494_v0  ;;  %v4491_v0 = vld [vmem:[%s9148_s5 + $0x8] sm:$0xff] }
 0x467   : > { %3570 = vrot.lane.b32.xlu0 %v2981_v61, %s5562_s15  ;;  %3568 = vrot.lane.b32.xlu1 %v2980_v11, %s5562_s15  ;;  %v4493_v11 = vld [vmem:[%s9148_s5 + $0x18] sm:$0xff]  ;;  %v3050_v35 = vld [vmem:[#allocation3 + $0x45] sm:$0xff] }
 0x468   : > { %5468 = vmatprep.subr.mxu1 %v4493_v11  ;;  %v3086_v47 = vld [vmem:[#allocation3 + $0x46] sm:$0xff] }
 0x469   : > { %v8211_v52 = vpop.permute.xlu0 %3348  ;;  %v8213_v29 = vpop.permute.xlu1 %3346  ;;  %5469 = vmatpush3.msra.mxu1 %v4493_v11 }
 0x46a   : > { %9589 = vst [vmem:[#allocation97_spill] sm:$0xff] %v8211_v52  ;;  %9590 = vst [vmem:[#allocation125_spill] sm:$0xff] %v8213_v29  ;;  %5470 = vmatprep.subr.mxu1 %v4492_v7 }
 0x46b   : > { %3574 = vrot.lane.b32.xlu0 %v2983_v27, %s5562_s15  ;;  %3572 = vrot.lane.b32.xlu1 %v2982_v41, %s5562_s15 }
 0x46c   : > { %5471 = vmatpush3.msra.mxu1 %v4492_v7 }
 0x46d   : > { %v8223_v33 = vpop.permute.xlu0 %3352  ;;  %v8225_v61 = vpop.permute.xlu1 %3350  ;;  %5472 = vmatprep.subr.mxu1 %v4491_v0 }
 0x46e   : > { %9591 = vst [vmem:[#allocation8_spill] sm:$0xff] %v8223_v33  ;;  %9592 = vst [vmem:[#allocation37_spill] sm:$0xff] %v8225_v61  ;;  %v3009_v33 = vld [vmem:[#allocation3 + $0x1c] sm:$0xff]  ;;  %5473 = vmatpush3.msra.mxu1 %v4491_v0  ;;  %v3047_v61 = vld [vmem:[#allocation3 + $0x2d] sm:$0xff] }
 0x46f   : > { %3696 = vrot.lane.b32.xlu0 %v3008_v62, %s5563_s16  ;;  %3576 = vrot.lane.b32.xlu1 %v2984_v39, %s5562_s15  ;;  %v4490_v39 = vld [vmem:[%s9148_s5] sm:$0xff] }
 0x470   : > { %5474 = vmatprep.subr.mxu1 %v4490_v39 }
 0x471   : > { %v8232_v41 = vpop.permute.xlu0 %3356  ;;  %v8234_v27 = vpop.permute.xlu1 %3354  ;;  %5475 = vmatpush3.msra.mxu1 %v4490_v39 }
 0x472   : > { %9593 = vst [vmem:[#allocation124_spill] sm:$0xff] %v8232_v41  ;;  %9594 = vst [vmem:[#allocation152_spill] sm:$0xff] %v8234_v27  ;;  %v3046_v41 = vld [vmem:[#allocation3 + $0x25] sm:$0xff] }
 0x473   : > { %3806 = vrot.lane.b32.xlu0 %v3010_v21, %s5564_s17  ;;  %3698 = vrot.lane.b32.xlu1 %v3009_v33, %s5563_s16  ;;  %v3011_v27 = vld [vmem:[#allocation3 + $0x2c] sm:$0xff] }
 0x475   : > { %v8244_v62 = vpop.permute.xlu0 %3360  ;;  %v8246_v11 = vpop.permute.xlu1 %3358 }
 0x476   : > { %9595 = vst [vmem:[#allocation36_spill] sm:$0xff] %v8244_v62  ;;  %9596 = vst [vmem:[#allocation68_spill] sm:$0xff] %v8246_v11  ;;  %v3083_v11 = vld [vmem:[#allocation3 + $0x2e] sm:$0xff] }
 0x477   : > { %3950 = vrot.lane.b32.xlu0 %v3046_v41, %s5565_s18  ;;  %3808 = vrot.lane.b32.xlu1 %v3011_v27, %s5564_s17 }
 0x479   : > { %v8250_v7 = vpop.permute.xlu0 %3364  ;;  %v8252_v33 = vpop.permute.xlu1 %3362 }
 0x47a   : > { %9597 = vst [vmem:[#allocation151_spill] sm:$0xff] %v8250_v7  ;;  %9598 = vst [vmem:[#allocation180_spill] sm:$0xff] %v8252_v33  ;;  %v3012_v7 = vld [vmem:[#allocation3 + $0x34] sm:$0xff] }
 0x47b   : > { %4094 = vrot.lane.b32.xlu0 %v3082_v45, %s5566_s25  ;;  %3952 = vrot.lane.b32.xlu1 %v3047_v61, %s5565_s18  ;;  %v3084_v33 = vld [vmem:[#allocation3 + $0x36] sm:$0xff] }
 0x47d   : > { %v8256_v62 = vpop.permute.xlu0 %3368  ;;  %v8258_v0 = vpop.permute.xlu1 %3366 }
 0x47e   : > { %9599 = vst [vmem:[#allocation67_spill] sm:$0xff] %v8256_v62  ;;  %9600 = vst [vmem:[#allocation100_spill] sm:$0xff] %v8258_v0  ;;  %v3048_v62 = vld [vmem:[#allocation3 + $0x35] sm:$0xff] }
 0x47f   : > { %4096 = vrot.lane.b32.xlu0 %v3083_v11, %s5566_s25  ;;  %3700 = vrot.lane.b32.xlu1 %v3010_v21, %s5563_s16  ;;  %v3013_v0 = vld [vmem:[#allocation3 + $0x3c] sm:$0xff] }
 0x481   : > { %v8262_v41 = vpop.permute.xlu0 %3410  ;;  %v8264_v39 = vpop.permute.xlu1 %3408 }
 0x483   : > { %3810 = vrot.lane.b32.xlu0 %v3012_v7, %s5564_s17  ;;  %3702 = vrot.lane.b32.xlu1 %v3011_v27, %s5563_s16 }
 0x485   : > { %v8268_v45 = vpop.permute.xlu0 %3414  ;;  %v8270_v61 = vpop.permute.xlu1 %3412 }
 0x487   : > { %3954 = vrot.lane.b32.xlu0 %v3048_v62, %s5565_s18  ;;  %3812 = vrot.lane.b32.xlu1 %v3013_v0, %s5564_s17 }
 0x489   : > { %v8274_v21 = vpop.permute.xlu0 %3418  ;;  %v8276_v11 = vpop.permute.xlu1 %3416 }
 0x48b   : > { %4098 = vrot.lane.b32.xlu0 %v3084_v33, %s5566_s25  ;;  %3956 = vrot.lane.b32.xlu1 %v3049_v25, %s5565_s18 }
 0x48d   : > { %v8280_v27 = vpop.permute.xlu0 %3422  ;;  %v8282_v52 = vpop.permute.xlu1 %3420 }
 0x48f   : > { %4100 = vrot.lane.b32.xlu0 %v3085_v24, %s5566_s25  ;;  %3704 = vrot.lane.b32.xlu1 %v3012_v7, %s5563_s16 }
 0x491   : > { %v8286_v62 = vpop.permute.xlu0 %3426  ;;  %v8288_v29 = vpop.permute.xlu1 %3424 }
 0x493   : > { %3814 = vrot.lane.b32.xlu0 %v3014_v30, %s5564_s17  ;;  %3706 = vrot.lane.b32.xlu1 %v3013_v0, %s5563_s16 }
 0x495   : > { %v8292_v33 = vpop.permute.xlu0 %3430  ;;  %v8294_v25 = vpop.permute.xlu1 %3428 }
 0x497   : > { %3958 = vrot.lane.b32.xlu0 %v3050_v35, %s5565_s18  ;;  %3816 = vrot.lane.b32.xlu1 %v3015_v8, %s5564_s17 }
 0x499   : > { %v8298_v24 = vpop.permute.xlu0 %3434  ;;  %v8300_v7 = vpop.permute.xlu1 %3432 }
 0x49a   : > { %9601 = vst [vmem:[#allocation179_spill] sm:$0xff] %v8298_v24  ;;  %9602 = vst [vmem:[#allocation99_spill] sm:$0xff] %v8300_v7  ;;  %v3095_v24 = vld [vmem:[#allocation3 + $0x8e] sm:$0xff]  ;;  %v3025_v7 = vld [vmem:[#allocation3 + $0x9c] sm:$0xff] }
 0x49b   : > { %4102 = vrot.lane.b32.xlu0 %v3086_v47, %s5566_s25  ;;  %3960 = vrot.lane.b32.xlu1 %v3051_v44, %s5565_s18 }
 0x49d   : > { %v8304_v0 = vpop.permute.xlu0 %3438  ;;  %v8306_v4 = vpop.permute.xlu1 %3436 }
 0x49e   : > { %9603 = vst [vmem:[#allocation127_spill] sm:$0xff] %v8304_v0  ;;  %9604 = vst [vmem:[#allocation10_spill] sm:$0xff] %v8306_v4  ;;  %v3094_v0 = vld [vmem:[#allocation3 + $0x86] sm:$0xff] }
 0x49f   : > { %4104 = vrot.lane.b32.xlu0 %v3087_v50, %s5566_s25  ;;  %3708 = vrot.lane.b32.xlu1 %v3014_v30, %s5563_s16 }
 0x4a1   : > { %v8310_v35 = vpop.permute.xlu0 %3442  ;;  %v8312_v23 = vpop.permute.xlu1 %3440 }
 0x4a2   : > { %9605 = vst [vmem:[#allocation39_spill] sm:$0xff] %v8310_v35  ;;  %9606 = vst [vmem:[#allocation126_spill] sm:$0xff] %v8312_v23  ;;  %v3022_v23 = vld [vmem:[#allocation3 + $0x84] sm:$0xff] }
 0x4a3   : > { %3818 = vrot.lane.b32.xlu0 %v3016_v56, %s5564_s17  ;;  %3710 = vrot.lane.b32.xlu1 %v3015_v8, %s5563_s16 }
 0x4a5   : > { %v8316_v47 = vpop.permute.xlu0 %3446  ;;  %v8318_v44 = vpop.permute.xlu1 %3444 }
 0x4a6   : > { %9607 = vst [vmem:[#allocation154_spill] sm:$0xff] %v8316_v47  ;;  %9608 = vst [vmem:[#allocation38_spill] sm:$0xff] %v8318_v44  ;;  %v3089_v44 = vld [vmem:[#allocation3 + $0x5e] sm:$0xff] }
 0x4a7   : > { %3962 = vrot.lane.b32.xlu0 %v3052_v31, %s5565_s18  ;;  %3820 = vrot.lane.b32.xlu1 %v3017_v6, %s5564_s17 }
 0x4a9   : > { %v8322_v50 = vpop.permute.xlu0 %3450  ;;  %v8324_v30 = vpop.permute.xlu1 %3448 }
 0x4aa   : > { %9609 = vst [vmem:[#allocation70_spill] sm:$0xff] %v8322_v50  ;;  %9610 = vst [vmem:[#allocation153_spill] sm:$0xff] %v8324_v30  ;;  %v3018_v30 = vld [vmem:[#allocation3 + $0x64] sm:$0xff] }
 0x4ab   : > { %4106 = vrot.lane.b32.xlu0 %v3088_v46, %s5566_s25  ;;  %3964 = vrot.lane.b32.xlu1 %v3053_v28, %s5565_s18 }
 0x4ad   : > { %v8328_v8 = vpop.permute.xlu0 %3454  ;;  %v8330_v47 = vpop.permute.xlu1 %3452 }
 0x4ae   : > { %9611 = vst [vmem:[#allocation182_spill] sm:$0xff] %v8328_v8  ;;  %9612 = vst [vmem:[#allocation69_spill] sm:$0xff] %v8330_v47  ;;  %v3054_v8 = vld [vmem:[#allocation3 + $0x65] sm:$0xff] }
 0x4af   : > { %4108 = vrot.lane.b32.xlu0 %v3089_v44, %s5566_s25  ;;  %3712 = vrot.lane.b32.xlu1 %v3016_v56, %s5563_s16  ;;  %v3019_v47 = vld [vmem:[#allocation3 + $0x6c] sm:$0xff] }
 0x4b1   : > { %v8334_v31 = vpop.permute.xlu0 %3458  ;;  %v8336_v50 = vpop.permute.xlu1 %3456 }
 0x4b2   : > { %9613 = vst [vmem:[#allocation102_spill] sm:$0xff] %v8334_v31  ;;  %9614 = vst [vmem:[#allocation181_spill] sm:$0xff] %v8336_v50  ;;  %v3090_v31 = vld [vmem:[#allocation3 + $0x66] sm:$0xff] }
 0x4b3   : > { %3822 = vrot.lane.b32.xlu0 %v3018_v30, %s5564_s17  ;;  %3714 = vrot.lane.b32.xlu1 %v3017_v6, %s5563_s16  ;;  %v3055_v50 = vld [vmem:[#allocation3 + $0x6d] sm:$0xff] }
 0x4b5   : > { %v8340_v46 = vpop.permute.xlu0 %3462  ;;  %v8342_v28 = vpop.permute.xlu1 %3460 }
 0x4b6   : > { %9615 = vst [vmem:[#allocation101_spill] sm:$0xff] %v8340_v46  ;;  %9616 = vst [vmem:[#allocation129_spill] sm:$0xff] %v8342_v28  ;;  %v3091_v28 = vld [vmem:[#allocation3 + $0x6e] sm:$0xff] }
 0x4b7   : > { %3966 = vrot.lane.b32.xlu0 %v3054_v8, %s5565_s18  ;;  %3824 = vrot.lane.b32.xlu1 %v3019_v47, %s5564_s17 }
 0x4b9   : > { %v8346_v56 = vpop.permute.xlu0 %3466  ;;  %v8348_v44 = vpop.permute.xlu1 %3464 }
 0x4ba   : > { %9617 = vst [vmem:[#allocation9_spill] sm:$0xff] %v8346_v56  ;;  %9618 = vst [vmem:[#allocation41_spill] sm:$0xff] %v8348_v44  ;;  %v3020_v44 = vld [vmem:[#allocation3 + $0x74] sm:$0xff] }
 0x4bb   : > { %4110 = vrot.lane.b32.xlu0 %v3090_v31, %s5566_s25  ;;  %3968 = vrot.lane.b32.xlu1 %v3055_v50, %s5565_s18 }
 0x4bd   : > { %v8352_v6 = vpop.permute.xlu0 %3470  ;;  %v8354_v46 = vpop.permute.xlu1 %3468 }
 0x4be   : > { %9619 = vst [vmem:[#allocation128_spill] sm:$0xff] %v8352_v6  ;;  %9620 = vst [vmem:[#allocation156_spill] sm:$0xff] %v8354_v46  ;;  %v3056_v6 = vld [vmem:[#allocation3 + $0x75] sm:$0xff] }
 0x4bf   : > { %4112 = vrot.lane.b32.xlu0 %v3091_v28, %s5566_s25  ;;  %3716 = vrot.lane.b32.xlu1 %v3018_v30, %s5563_s16  ;;  %v3021_v46 = vld [vmem:[#allocation3 + $0x7c] sm:$0xff] }
 0x4c1   : > { %v8358_v8 = vpop.permute.xlu0 %3474  ;;  %v8360_v56 = vpop.permute.xlu1 %3472 }
 0x4c2   : > { %9621 = vst [vmem:[#allocation40_spill] sm:$0xff] %v8358_v8  ;;  %9622 = vst [vmem:[#allocation72_spill] sm:$0xff] %v8360_v56  ;;  %v3092_v8 = vld [vmem:[#allocation3 + $0x76] sm:$0xff] }
 0x4c3   : > { %3826 = vrot.lane.b32.xlu0 %v3020_v44, %s5564_s17  ;;  %3718 = vrot.lane.b32.xlu1 %v3019_v47, %s5563_s16  ;;  %v3057_v56 = vld [vmem:[#allocation3 + $0x7d] sm:$0xff] }
 0x4c5   : > { %v8364_v31 = vpop.permute.xlu0 %3478  ;;  %v8366_v50 = vpop.permute.xlu1 %3476 }
 0x4c6   : > { %9623 = vst [vmem:[#allocation155_spill] sm:$0xff] %v8364_v31  ;;  %9624 = vst [vmem:[#allocation184_spill] sm:$0xff] %v8366_v50  ;;  %v2985_v50 = vld [vmem:[#allocation3 + $0x7b] sm:$0xff] }
 0x4c7   : > { %3970 = vrot.lane.b32.xlu0 %v3056_v6, %s5565_s18  ;;  %3828 = vrot.lane.b32.xlu1 %v3021_v46, %s5564_s17 }
 0x4c9   : > { %v8370_v30 = vpop.permute.xlu0 %3554  ;;  %v3553_v28 = vpop.permute.xlu1 %3552 }
 0x4cb   : > { %4114 = vrot.lane.b32.xlu0 %v3092_v8, %s5566_s25  ;;  %3972 = vrot.lane.b32.xlu1 %v3057_v56, %s5565_s18 }
 0x4cd   : > { %v8374_v47 = vpop.permute.xlu0 %3558  ;;  %v8376_v31 = vpop.permute.xlu1 %3556 }
 0x4cf   : > { %3720 = vrot.lane.b32.xlu0 %v3020_v44, %s5563_s16  ;;  %3578 = vrot.lane.b32.xlu1 %v2985_v50, %s5562_s15 }
 0x4d1   : > { %v8380_v6 = vpop.permute.xlu0 %3562  ;;  %v8382_v35 = vpop.permute.xlu1 %3560 }
 0x4d3   : > { %3722 = vrot.lane.b32.xlu0 %v3021_v46, %s5563_s16  ;;  %4116 = vrot.lane.b32.xlu1 %v3093_v53, %s5566_s25 }
 0x4d5   : > { %v8386_v8 = vpop.permute.xlu0 %3566  ;;  %v8388_v56 = vpop.permute.xlu1 %3564 }
 0x4d7   : > { %3832 = vrot.lane.b32.xlu0 %v3023_v60, %s5564_s17  ;;  %3830 = vrot.lane.b32.xlu1 %v3022_v23, %s5564_s17 }
 0x4d9   : > { %v8392_v44 = vpop.permute.xlu0 %3570  ;;  %v8394_v50 = vpop.permute.xlu1 %3568 }
 0x4db   : > { %3580 = vrot.lane.b32.xlu0 %v2986_v12, %s5562_s15  ;;  %3974 = vrot.lane.b32.xlu1 %v3058_v20, %s5565_s18  ;;  %v2862_v12 = vld [vmem:[#allocation3] sm:$0xff] }
 0x4dc   : > { %v4202_v36 = vsel %vm338_vm0, %v2862_v12, %v7945_v15 }
 0x4dd   : > { %v8398_v53 = vpop.permute.xlu0 %3574  ;;  %v8400_v46 = vpop.permute.xlu1 %3572 }
 0x4df   : > { %4118 = vrot.lane.b32.xlu0 %v3094_v0, %s5566_s25  ;;  %3976 = vrot.lane.b32.xlu1 %v3059_v57, %s5565_s18  ;;  %v2863_v57 = vld [vmem:[#allocation3 + $0x8] sm:$0xff]  ;;  %v4238_v0 = vsel %vm1789_vm2, %v4202_v36, %v8117_v49 }
 0x4e0   : > { %v4203_v15 = vsel %vm338_vm0, %v2863_v57, %v7943_v40 }
 0x4e1   : > { %v3697_v43 = vpop.permute.xlu0 %3696  ;;  %v8404_v4 = vpop.permute.xlu1 %3576  ;;  %v4239_v49 = vsel %vm1789_vm2, %v4203_v15, %v8115_v13  ;;  %v3061_v15 = vld [vmem:[#allocation3 + $0x9d] sm:$0xff] }
 0x4e2   : > { %9625 = vst [vmem:[#allocation71_spill] sm:$0xff] %v8404_v4 }
 0x4e3   : > { %3724 = vrot.lane.b32.xlu0 %v3022_v23, %s5563_s16  ;;  %3582 = vrot.lane.b32.xlu1 %v2987_v17, %s5562_s15  ;;  %v4274_v23 = vsel %vm1826_vm3, %v4238_v0, %v8264_v39  ;;  %v4275_v39 = vsel %vm1826_vm3, %v4239_v49, %v8262_v41  ;;  %v2864_v49 = vld [vmem:[#allocation3 + $0x10] sm:$0xff] }
 0x4e4   : > { %v4310_v4 = vsel %vm1863_vm4, %v4274_v23, %v3553_v28  ;;  %v4311_v40 = vsel %vm1863_vm4, %v4275_v39, %v8370_v30  ;;  %v3096_v23 = vld [vmem:[#allocation3 + $0x96] sm:$0xff] }
 0x4e5   : > { %v3807_v20 = vpop.permute.xlu0 %3806  ;;  %v3699_v55 = vpop.permute.xlu1 %3698 }
 0x4e6   : > { %v4347_v0 = vsel %vm1900_vm5, %v4311_v40, %v3699_v55  ;;  %v2865_v40 = vld [vmem:[#allocation3 + $0x18] sm:$0xff] }
 0x4e7   : > { %3726 = vrot.lane.b32.xlu0 %v3023_v60, %s5563_s16  ;;  %4120 = vrot.lane.b32.xlu1 %v3095_v24, %s5566_s25  ;;  %v4346_v60 = vsel %vm1900_vm5, %v4310_v4, %v3697_v43  ;;  %v2988_v43 = vld [vmem:[#allocation3 + $0x93] sm:$0xff] }
 0x4e8   : > { %v4382_v36 = vsel %vm1937_vm6, %v4346_v60, %v3807_v20  ;;  %v3060_v4 = vld [vmem:[#allocation3 + $0x95] sm:$0xff] }
 0x4e9   : > { %v3951_v58 = vpop.permute.xlu0 %3950  ;;  %v3809_v17 = vpop.permute.xlu1 %3808 }
 0x4ea   : > { %v4418_v24 = vsel %vm1974_vm7, %v4382_v36, %v3951_v58  ;;  %v4383_v13 = vsel %vm1937_vm6, %v4347_v0, %v3809_v17  ;;  %v2989_v17 = vld [vmem:[#allocation3 + $0x9b] sm:$0xff]  ;;  %v4204_v36 = vsel %vm338_vm0, %v2864_v49, %v7957_v59  ;;  %v4205_v59 = vsel %vm338_vm0, %v2865_v40, %v7955_v18 }
 0x4eb   : > { %3836 = vrot.lane.b32.xlu0 %v3025_v7, %s5564_s17  ;;  %3834 = vrot.lane.b32.xlu1 %v3024_v14, %s5564_s17  ;;  %v4240_v39 = vsel %vm1789_vm2, %v4204_v36, %v8125_v3  ;;  %v4241_v3 = vsel %vm1789_vm2, %v4205_v59, %v8123_v37  ;;  %v3098_v36 = vld [vmem:[#allocation3 + $0xa6] sm:$0xff] }
 0x4ed   : > { %v4095_v28 = vpop.permute.xlu0 %4094  ;;  %v3953_v12 = vpop.permute.xlu1 %3952 }
 0x4ee   : > { %v4454_v57 = vsel %vm2011_vm8, %v4418_v24, %v4095_v28  ;;  %v4419_v58 = vsel %vm1974_vm7, %v4383_v13, %v3953_v12  ;;  %v4276_v24 = vsel %vm1826_vm3, %v4240_v39, %v8270_v61  ;;  %v3063_v39 = vld [vmem:[#allocation3 + $0xad] sm:$0xff] }
 0x4ef   : > { %3584 = vrot.lane.b32.xlu0 %v2988_v43, %s5562_s15  ;;  %3978 = vrot.lane.b32.xlu1 %v3060_v4, %s5565_s18  ;;  %v4312_v43 = vsel %vm1863_vm4, %v4276_v24, %v8376_v31  ;;  %v3097_v4 = vld [vmem:[#allocation3 + $0x9e] sm:$0xff] }
 0x4f0   : > { %5476 = vmatprep.mubr.msk.f32.mxu1 %vm2057_vm9, %v4454_v57  ;;  %v4277_v57 = vsel %vm1826_vm3, %v4241_v3, %v8268_v45 }
 0x4f1   : > { %v4097_v41 = vpop.permute.xlu0 %4096  ;;  %v3701_v20 = vpop.permute.xlu1 %3700  ;;  %v4313_v18 = vsel %vm1863_vm4, %v4277_v57, %v8374_v47 }
 0x4f2   : > { %v4455_v30 = vsel %vm2011_vm8, %v4419_v58, %v4097_v41  ;;  %v3026_v41 = vld [vmem:[#allocation3 + $0xa4] sm:$0xff] }
 0x4f3   : > { %4122 = vrot.lane.b32.xlu0 %v3096_v23, %s5566_s25  ;;  %3980 = vrot.lane.b32.xlu1 %v3061_v15, %s5565_s18  ;;  %v2990_v15 = vld [vmem:[#allocation3 + $0xa3] sm:$0xff] }
 0x4f4   : > { %5477 = vmatmul.mubr.msk.f32.vlgmr.msra.gmra.mxu1 %vm2057_vm9, %v4455_v30 }
 0x4f5   : > { %v3811_v55 = vpop.permute.xlu0 %3810  ;;  %v3703_v60 = vpop.permute.xlu1 %3702 }
 0x4f7   : > { %3728 = vrot.lane.b32.xlu0 %v3024_v14, %s5563_s16  ;;  %3586 = vrot.lane.b32.xlu1 %v2989_v17, %s5562_s15  ;;  %v4348_v14 = vsel %vm1900_vm5, %v4312_v43, %v3701_v20  ;;  %v4349_v20 = vsel %vm1900_vm5, %v4313_v18, %v3703_v60  ;;  %v2866_v17 = vld [vmem:[#allocation3 + $0x20] sm:$0xff] }
 0x4f8   : > { %v4384_v61 = vsel %vm1937_vm6, %v4348_v14, %v3811_v55  ;;  %v3062_v55 = vld [vmem:[#allocation3 + $0xa5] sm:$0xff]  ;;  %v4206_v24 = vsel %vm338_vm0, %v2866_v17, %v7969_v54 }
 0x4f9   : > { %v3955_v28 = vpop.permute.xlu0 %3954  ;;  %v3813_v12 = vpop.permute.xlu1 %3812  ;;  %v2991_v14 = vld [vmem:[#allocation3 + $0xab] sm:$0xff] }
 0x4fa   : > { %v4420_v31 = vsel %vm1974_vm7, %v4384_v61, %v3955_v28  ;;  %v4385_v37 = vsel %vm1937_vm6, %v4349_v20, %v3813_v12  ;;  %v4242_v28 = vsel %vm1789_vm2, %v4206_v24, %v8133_v16  ;;  %v3100_v24 = vld [vmem:[#allocation3 + $0xb6] sm:$0xff] }
 0x4fb   : > { %3730 = vrot.lane.b32.xlu0 %v3025_v7, %s5563_s16  ;;  %4124 = vrot.lane.b32.xlu1 %v3097_v4, %s5566_s25  ;;  %v3027_v7 = vld [vmem:[#allocation3 + $0xac] sm:$0xff]  ;;  %v4278_v12 = vsel %vm1826_vm3, %v4242_v28, %v8276_v11  ;;  %v3065_v28 = vld [vmem:[#allocation3 + $0xbd] sm:$0xff] }
 0x4fc   : > { %v2867_v4 = vld [vmem:[#allocation3 + $0x28] sm:$0xff]  ;;  %v4314_v59 = vsel %vm1863_vm4, %v4278_v12, %v8382_v35 }
 0x4fd   : > { %v4099_v0 = vpop.permute.xlu0 %4098  ;;  %v3957_v13 = vpop.permute.xlu1 %3956  ;;  %v4207_v54 = vsel %vm338_vm0, %v2867_v4, %v7967_v2 }
 0x4fe   : > { %v4456_v58 = vsel %vm2011_vm8, %v4420_v31, %v4099_v0  ;;  %v4421_v45 = vsel %vm1974_vm7, %v4385_v37, %v3957_v13  ;;  %v4243_v16 = vsel %vm1789_vm2, %v4207_v54, %v8131_v1  ;;  %v3099_v13 = vld [vmem:[#allocation3 + $0xae] sm:$0xff] }
 0x4ff   : > { %3840 = vrot.lane.b32.xlu0 %v3027_v7, %s5564_s17  ;;  %3838 = vrot.lane.b32.xlu1 %v3026_v41, %s5564_s17  ;;  %v4279_v61 = vsel %vm1826_vm3, %v4243_v16, %v8274_v21  ;;  %v3028_v37 = vld [vmem:[#allocation3 + $0xb4] sm:$0xff] }
 0x500   : > { %5479 = vmatprep.mubr.msk.f32.mxu1 %vm2057_vm9, %v4456_v58  ;;  %v4315_v2 = vsel %vm1863_vm4, %v4279_v61, %v8380_v6  ;;  %v3029_v6 = vld [vmem:[#allocation3 + $0xbc] sm:$0xff] }
 0x501   : > { %v4101_v30 = vpop.permute.xlu0 %4100  ;;  %v3705_v23 = vpop.permute.xlu1 %3704 }
 0x502   : > { %v4457_v47 = vsel %vm2011_vm8, %v4421_v45, %v4101_v30  ;;  %v4350_v3 = vsel %vm1900_vm5, %v4314_v59, %v3705_v23  ;;  %v2868_v30 = vld [vmem:[#allocation3 + $0x30] sm:$0xff] }
 0x503   : > { %3588 = vrot.lane.b32.xlu0 %v2990_v15, %s5562_s15  ;;  %3982 = vrot.lane.b32.xlu1 %v3062_v55, %s5565_s18  ;;  %v2992_v23 = vld [vmem:[#allocation3 + $0xb3] sm:$0xff]  ;;  %v4208_v15 = vsel %vm338_vm0, %v2868_v30, %v7981_v10 }
 0x504   : > { %5480 = vmatmul.mubr.msk.f32.gmra.mxu1 %vm2057_vm9, %v4457_v47  ;;  %v3064_v47 = vld [vmem:[#allocation3 + $0xb5] sm:$0xff]  ;;  %v4244_v55 = vsel %vm1789_vm2, %v4208_v15, %v8141_v51  ;;  %v3067_v15 = vld [vmem:[#allocation3 + $0xcd] sm:$0xff] }
 0x505   : > { %v3815_v60 = vpop.permute.xlu0 %3814  ;;  %v3707_v49 = vpop.permute.xlu1 %3706 }
 0x506   : > { %v4386_v11 = vsel %vm1937_vm6, %v4350_v3, %v3815_v60  ;;  %v4351_v18 = vsel %vm1900_vm5, %v4315_v2, %v3707_v49  ;;  %v4280_v60 = vsel %vm1826_vm3, %v4244_v55, %v8282_v52  ;;  %v3030_v2 = vld [vmem:[#allocation3 + $0xc4] sm:$0xff] }
 0x507   : > { %4126 = vrot.lane.b32.xlu0 %v3098_v36, %s5566_s25  ;;  %3984 = vrot.lane.b32.xlu1 %v3063_v39, %s5565_s18  ;;  %v2869_v36 = vld [vmem:[#allocation3 + $0x38] sm:$0xff]  ;;  %v4316_v39 = vsel %vm1863_vm4, %v4280_v60, %v8388_v56 }
 0x508   : > { %v4209_v10 = vsel %vm338_vm0, %v2869_v36, %v7979_v22 }
 0x509   : > { %v3959_v40 = vpop.permute.xlu0 %3958  ;;  %v3817_v43 = vpop.permute.xlu1 %3816  ;;  %v4245_v51 = vsel %vm1789_vm2, %v4209_v10, %v8139_v32 }
 0x50a   : > { %v4422_v35 = vsel %vm1974_vm7, %v4386_v11, %v3959_v40  ;;  %v4387_v1 = vsel %vm1937_vm6, %v4351_v18, %v3817_v43  ;;  %v4281_v40 = vsel %vm1826_vm3, %v4245_v51, %v8280_v27 }
 0x50b   : > { %3732 = vrot.lane.b32.xlu0 %v3026_v41, %s5563_s16  ;;  %3590 = vrot.lane.b32.xlu1 %v2991_v14, %s5562_s15  ;;  %v4317_v22 = vsel %vm1863_vm4, %v4281_v40, %v8386_v8  ;;  %v2993_v14 = vld [vmem:[#allocation3 + $0xbb] sm:$0xff] }
 0x50c   : > { %v3101_v8 = vld [vmem:[#allocation3 + $0xbe] sm:$0xff] }
 0x50d   : > { %v4103_v57 = vpop.permute.xlu0 %4102  ;;  %v3961_v31 = vpop.permute.xlu1 %3960 }
 0x50e   : > { %v4458_v0 = vsel %vm2011_vm8, %v4422_v35, %v4103_v57  ;;  %v4423_v21 = vsel %vm1974_vm7, %v4387_v1, %v3961_v31  ;;  %v2870_v57 = vld [vmem:[#allocation3 + $0x40] sm:$0xff]  ;;  %v3031_v31 = vld [vmem:[#allocation3 + $0xcc] sm:$0xff] }
 0x50f   : > { %3734 = vrot.lane.b32.xlu0 %v3027_v7, %s5563_s16  ;;  %4128 = vrot.lane.b32.xlu1 %v3099_v13, %s5566_s25 }
 0x510   : > { %5482 = vmatprep.mubr.msk.f32.mxu1 %vm2057_vm9, %v4458_v0  ;;  %v4210_v0 = vsel %vm338_vm0, %v2870_v57, %v7993_v38  ;;  %v3069_v57 = vld [vmem:[#allocation3 + $0xdd] sm:$0xff] }
 0x511   : > { %v4105_v58 = vpop.permute.xlu0 %4104  ;;  %v3709_v41 = vpop.permute.xlu1 %3708  ;;  %v4246_v13 = vsel %vm1789_vm2, %v4210_v0, %v8149_v48 }
 0x512   : > { %v4459_v20 = vsel %vm2011_vm8, %v4423_v21, %v4105_v58  ;;  %v4352_v12 = vsel %vm1900_vm5, %v4316_v39, %v3709_v41  ;;  %v4282_v18 = vsel %vm1826_vm3, %v4246_v13, %v8288_v29  ;;  %v2871_v58 = vld [vmem:[#allocation3 + $0x48] sm:$0xff]  ;;  %v2997_v13 = vld [vmem:[#allocation3 + $0xdb] sm:$0xff] }
 0x513   : > { %3844 = vrot.lane.b32.xlu0 %v3029_v6, %s5564_s17  ;;  %3842 = vrot.lane.b32.xlu1 %v3028_v37, %s5564_s17  ;;  %v4318_v41 = vsel %vm1863_vm4, %v4282_v18, %v8394_v50  ;;  %v4211_v38 = vsel %vm338_vm0, %v2871_v58, %v7991_v9 }
 0x514   : > { %5483 = vmatmul.mubr.msk.f32.gmra.mxu1 %vm2057_vm9, %v4459_v20  ;;  %v2994_v20 = vld [vmem:[#allocation3 + $0xc3] sm:$0xff]  ;;  %v4247_v48 = vsel %vm1789_vm2, %v4211_v38, %v8147_v19 }
 0x515   : > { %v3819_v7 = vpop.permute.xlu0 %3818  ;;  %v3711_v45 = vpop.permute.xlu1 %3710 }
 0x516   : > { %v4388_v52 = vsel %vm1937_vm6, %v4352_v12, %v3819_v7  ;;  %v4353_v54 = vsel %vm1900_vm5, %v4317_v22, %v3711_v45  ;;  %v4283_v7 = vsel %vm1826_vm3, %v4247_v48, %v8286_v62 }
 0x517   : > { %3592 = vrot.lane.b32.xlu0 %v2992_v23, %s5562_s15  ;;  %3986 = vrot.lane.b32.xlu1 %v3064_v47, %s5565_s18  ;;  %v4319_v9 = vsel %vm1863_vm4, %v4283_v7, %v8392_v44  ;;  %v3102_v47 = vld [vmem:[#allocation3 + $0xc6] sm:$0xff] }
 0x519   : > { %v3963_v49 = vpop.permute.xlu0 %3962  ;;  %v3821_v17 = vpop.permute.xlu1 %3820 }
 0x51a   : > { %v4424_v56 = vsel %vm1974_vm7, %v4388_v52, %v3963_v49  ;;  %v4389_v32 = vsel %vm1937_vm6, %v4353_v54, %v3821_v17  ;;  %v2995_v17 = vld [vmem:[#allocation3 + $0xcb] sm:$0xff] }
 0x51b   : > { %4130 = vrot.lane.b32.xlu0 %v3100_v24, %s5566_s25  ;;  %3988 = vrot.lane.b32.xlu1 %v3065_v28, %s5565_s18  ;;  %v2872_v24 = vld [vmem:[#allocation3 + $0x50] sm:$0xff] }
 0x51c   : > { %v3103_v28 = vld [vmem:[#allocation3 + $0xce] sm:$0xff]  ;;  %v4212_v10 = vsel %vm338_vm0, %v2872_v24, %v8005_v34 }
 0x51d   : > { %v4107_v43 = vpop.permute.xlu0 %4106  ;;  %v3965_v4 = vpop.permute.xlu1 %3964  ;;  %v4248_v12 = vsel %vm1789_vm2, %v4212_v10, %v8157_v42 }
 0x51e   : > { %v4460_v59 = vsel %vm2011_vm8, %v4424_v56, %v4107_v43  ;;  %v4425_v27 = vsel %vm1974_vm7, %v4389_v32, %v3965_v4  ;;  %v4284_v51 = vsel %vm1826_vm3, %v4248_v12, %v8294_v25  ;;  %v3033_v43 = vld [vmem:[#allocation3 + $0xdc] sm:$0xff]  ;;  %v3032_v4 = vld [vmem:[#allocation3 + $0xd4] sm:$0xff]  ;;  %v3106_v12 = vld [vmem:[#allocation3 + $0xe6] sm:$0xff] }
 0x51f   : > { %3736 = vrot.lane.b32.xlu0 %v3028_v37, %s5563_s16  ;;  %3594 = vrot.lane.b32.xlu1 %v2993_v14, %s5562_s15  ;;  %v4320_v56 = vsel %vm1863_vm4, %v4284_v51, %v8400_v46  ;;  %v2873_v25 = vld [vmem:[#allocation3 + $0x58] sm:$0xff]  ;;  %v3071_v51 = vld [vmem:[#allocation3 + $0xed] sm:$0xff] }
 0x520   : > { %5485 = vmatprep.mubr.msk.f32.mxu1 %vm2057_vm9, %v4460_v59  ;;  %v2996_v32 = vld [vmem:[#allocation3 + $0xd3] sm:$0xff]  ;;  %v4213_v46 = vsel %vm338_vm0, %v2873_v25, %v8003_v5 }
 0x521   : > { %v4109_v3 = vpop.permute.xlu0 %4108  ;;  %v3713_v16 = vpop.permute.xlu1 %3712  ;;  %v3107_v25 = vld [vmem:[#allocation3 + $0xee] sm:$0xff] }
 0x522   : > { %v4461_v11 = vsel %vm2011_vm8, %v4425_v27, %v4109_v3  ;;  %v4354_v37 = vsel %vm1900_vm5, %v4318_v41, %v3713_v16  ;;  %v3068_v27 = vld [vmem:[#allocation3 + $0xd5] sm:$0xff]  ;;  %v4249_v3 = vsel %vm1789_vm2, %v4213_v46, %v8155_v63  ;;  %v9626_v41 = vld [vmem:[#allocation7_spill] sm:$0xff] }
 0x523   : > { %3738 = vrot.lane.b32.xlu0 %v3029_v6, %s5563_s16  ;;  %4132 = vrot.lane.b32.xlu1 %v3101_v8, %s5566_s25  ;;  %v3066_v6 = vld [vmem:[#allocation3 + $0xc5] sm:$0xff]  ;;  %v4285_v16 = vsel %vm1826_vm3, %v4249_v3, %v8292_v33  ;;  %v9634_v3 = vld [vmem:[#allocation10_spill] sm:$0xff] }
 0x524   : > { %5486 = vmatmul.mubr.msk.f32.gmra.mxu1 %vm2057_vm9, %v4461_v11 }
 0x525   : > { %v3823_v61 = vpop.permute.xlu0 %3822  ;;  %v3715_v35 = vpop.permute.xlu1 %3714 }
 0x526   : > { %v4390_v29 = vsel %vm1937_vm6, %v4354_v37, %v3823_v61  ;;  %v4355_v55 = vsel %vm1900_vm5, %v4319_v9, %v3715_v35  ;;  %v4321_v61 = vsel %vm1863_vm4, %v4285_v16, %v8398_v53  ;;  %v3104_v35 = vld [vmem:[#allocation3 + $0xd6] sm:$0xff] }
 0x527   : > { %3848 = vrot.lane.b32.xlu0 %v3031_v31, %s5564_s17  ;;  %3846 = vrot.lane.b32.xlu1 %v3030_v2, %s5564_s17 }
 0x529   : > { %v3967_v1 = vpop.permute.xlu0 %3966  ;;  %v3825_v21 = vpop.permute.xlu1 %3824 }
 0x52a   : > { %v4426_v50 = vsel %vm1974_vm7, %v4390_v29, %v3967_v1  ;;  %v4391_v19 = vsel %vm1937_vm6, %v4355_v55, %v3825_v21  ;;  %v2874_v1 = vld [vmem:[#allocation3 + $0x60] sm:$0xff] }
 0x52b   : > { %3596 = vrot.lane.b32.xlu0 %v2994_v20, %s5562_s15  ;;  %3990 = vrot.lane.b32.xlu1 %v3066_v6, %s5565_s18  ;;  %v3105_v21 = vld [vmem:[#allocation3 + $0xde] sm:$0xff]  ;;  %v4214_v58 = vsel %vm338_vm0, %v2874_v1, %v8017_v26  ;;  %v9635_v1 = vld [vmem:[#allocation4_spill] sm:$0xff] }
 0x52c   : > { %v4250_v20 = vsel %vm1789_vm2, %v4214_v58, %v9626_v41  ;;  %v9627_v6 = vld [vmem:[#allocation99_spill] sm:$0xff] }
 0x52d   : > { %v4111_v45 = vpop.permute.xlu0 %4110  ;;  %v3969_v30 = vpop.permute.xlu1 %3968  ;;  %v4286_v38 = vsel %vm1826_vm3, %v4250_v20, %v9627_v6  ;;  %v9628_v29 = vld [vmem:[#allocation71_spill] sm:$0xff] }
 0x52e   : > { %v4462_v23 = vsel %vm2011_vm8, %v4426_v50, %v4111_v45  ;;  %v4427_v62 = vsel %vm1974_vm7, %v4391_v19, %v3969_v30  ;;  %v4322_v7 = vsel %vm1863_vm4, %v4286_v38, %v9628_v29  ;;  %v3035_v50 = vld [vmem:[#allocation3 + $0xec] sm:$0xff]  ;;  %v3034_v45 = vld [vmem:[#allocation3 + $0xe4] sm:$0xff]  ;;  %v3108_v29 = vld [vmem:[#allocation3 + $0xf6] sm:$0xff] }
 0x52f   : > { %4134 = vrot.lane.b32.xlu0 %v3102_v47, %s5566_s25  ;;  %3992 = vrot.lane.b32.xlu1 %v3067_v15, %s5565_s18  ;;  %v2875_v15 = vld [vmem:[#allocation3 + $0x68] sm:$0xff]  ;;  %v9636_v58 = vld [vmem:[#allocation35_spill] sm:$0xff] }
 0x530   : > { %5488 = vmatprep.mubr.msk.f32.mxu1 %vm2057_vm9, %v4462_v23  ;;  %v2998_v19 = vld [vmem:[#allocation3 + $0xe3] sm:$0xff] }
 0x531   : > { %v4113_v60 = vpop.permute.xlu0 %4112  ;;  %v3717_v49 = vpop.permute.xlu1 %3716  ;;  %v9637_v20 = vld [vmem:[#allocation127_spill] sm:$0xff] }
 0x532   : > { %v4463_v44 = vsel %vm2011_vm8, %v4427_v62, %v4113_v60  ;;  %v4356_v22 = vsel %vm1900_vm5, %v4320_v56, %v3717_v49  ;;  %v3070_v62 = vld [vmem:[#allocation3 + $0xe5] sm:$0xff]  ;;  %v9629_v60 = vld [vmem:[#allocation90_spill] sm:$0xff] }
 0x533   : > { %3740 = vrot.lane.b32.xlu0 %v3030_v2, %s5563_s16  ;;  %3598 = vrot.lane.b32.xlu1 %v2995_v17, %s5562_s15  ;;  %v4215_v49 = vsel %vm338_vm0, %v2875_v15, %v9629_v60  ;;  %v9638_v60 = vld [vmem:[#allocation60_spill] sm:$0xff] }
 0x534   : > { %5489 = vmatmul.mubr.msk.f32.gmra.mxu1 %vm2057_vm9, %v4463_v44  ;;  %v9630_v44 = vld [vmem:[#allocation123_spill] sm:$0xff] }
 0x535   : > { %v3827_v36 = vpop.permute.xlu0 %3826  ;;  %v3719_v39 = vpop.permute.xlu1 %3718  ;;  %v4251_v17 = vsel %vm1789_vm2, %v4215_v49, %v9630_v44  ;;  %v9639_v44 = vld [vmem:[#allocation34_spill] sm:$0xff] }
 0x536   : > { %v4392_v34 = vsel %vm1937_vm6, %v4356_v22, %v3827_v36  ;;  %v4357_v5 = vsel %vm1900_vm5, %v4321_v61, %v3719_v39  ;;  %v9631_v36 = vld [vmem:[#allocation179_spill] sm:$0xff] }
 0x537   : > { %3742 = vrot.lane.b32.xlu0 %v3031_v31, %s5563_s16  ;;  %4136 = vrot.lane.b32.xlu1 %v3103_v28, %s5566_s25  ;;  %v4287_v39 = vsel %vm1826_vm3, %v4251_v17, %v9631_v36  ;;  %v9640_v36 = vld [vmem:[#allocation126_spill] sm:$0xff] }
 0x539   : > { %v3971_v52 = vpop.permute.xlu0 %3970  ;;  %v3829_v40 = vpop.permute.xlu1 %3828 }
 0x53a   : > { %v4428_v42 = vsel %vm1974_vm7, %v4392_v34, %v3971_v52  ;;  %v4393_v63 = vsel %vm1937_vm6, %v4357_v5, %v3829_v40  ;;  %v2999_v34 = vld [vmem:[#allocation3 + $0xeb] sm:$0xff] }
 0x53b   : > { %3852 = vrot.lane.b32.xlu0 %v3033_v43, %s5564_s17  ;;  %3850 = vrot.lane.b32.xlu1 %v3032_v4, %s5564_s17 }
 0x53d   : > { %v4115_v59 = vpop.permute.xlu0 %4114  ;;  %v3973_v14 = vpop.permute.xlu1 %3972 }
 0x53e   : > { %v4464_v54 = vsel %vm2011_vm8, %v4428_v42, %v4115_v59  ;;  %v4429_v31 = vsel %vm1974_vm7, %v4393_v63, %v3973_v14  ;;  %v2876_v14 = vld [vmem:[#allocation3 + $0x70] sm:$0xff] }
 0x53f   : > { %3600 = vrot.lane.b32.xlu0 %v2996_v32, %s5562_s15  ;;  %3994 = vrot.lane.b32.xlu1 %v3068_v27, %s5565_s18  ;;  %v9633_v27 = vld [vmem:[#allocation122_spill] sm:$0xff] }
 0x540   : > { %5491 = vmatprep.mubr.msk.f32.mxu1 %vm2057_vm9, %v4464_v54  ;;  %v9632_v54 = vld [vmem:[#allocation29_spill] sm:$0xff] }
 0x541   : > { %v3721_v11 = vpop.permute.xlu0 %3720  ;;  %v3579_v8 = vpop.permute.xlu1 %3578  ;;  %v4216_v32 = vsel %vm338_vm0, %v2876_v14, %v9632_v54  ;;  %v9641_v14 = vld [vmem:[#allocation28_spill] sm:$0xff]  ;;  %v9642_v54 = vld [vmem:[#allocation150_spill] sm:$0xff] }
 0x542   : > { %v4358_v30 = vsel %vm1900_vm5, %v4322_v7, %v3721_v11  ;;  %v4323_v10 = vsel %vm1863_vm4, %v4287_v39, %v3579_v8  ;;  %v4252_v46 = vsel %vm1789_vm2, %v4216_v32, %v9633_v27  ;;  %v3073_v7 = vld [vmem:[#allocation3 + $0xfd] sm:$0xff] }
 0x543   : > { %4138 = vrot.lane.b32.xlu0 %v3104_v35, %s5566_s25  ;;  %3996 = vrot.lane.b32.xlu1 %v3069_v57, %s5565_s18  ;;  %v4288_v16 = vsel %vm1826_vm3, %v4252_v46, %v9634_v3  ;;  %v3037_v35 = vld [vmem:[#allocation3 + $0xfc] sm:$0xff]  ;;  %v3036_v57 = vld [vmem:[#allocation3 + $0xf4] sm:$0xff] }
 0x544   : > { %v9643_v27 = vld [vmem:[#allocation39_spill] sm:$0xff] }
 0x545   : > { %v3723_v2 = vpop.permute.xlu0 %3722  ;;  %v4117_v0 = vpop.permute.xlu1 %4116 }
 0x546   : > { %v4465_v33 = vsel %vm2011_vm8, %v4429_v31, %v4117_v0  ;;  %v4359_v52 = vsel %vm1900_vm5, %v4323_v10, %v3723_v2 }
 0x547   : > { %3744 = vrot.lane.b32.xlu0 %v3032_v4, %s5563_s16  ;;  %3602 = vrot.lane.b32.xlu1 %v2997_v13, %s5562_s15 }
 0x548   : > { %5492 = vmatmul.mubr.msk.f32.gmra.mxu1 %vm2057_vm9, %v4465_v33  ;;  %v2877_v33 = vld [vmem:[#allocation3 + $0x78] sm:$0xff] }
 0x549   : > { %v3833_v53 = vpop.permute.xlu0 %3832  ;;  %v3831_v18 = vpop.permute.xlu1 %3830 }
 0x54a   : > { %v4394_v26 = vsel %vm1937_vm6, %v4358_v30, %v3831_v18  ;;  %v4395_v40 = vsel %vm1937_vm6, %v4359_v52, %v3833_v53  ;;  %v3000_v53 = vld [vmem:[#allocation3 + $0xf3] sm:$0xff] }
 0x54b   : > { %3746 = vrot.lane.b32.xlu0 %v3033_v43, %s5563_s16  ;;  %4140 = vrot.lane.b32.xlu1 %v3105_v21, %s5566_s25  ;;  %v3072_v18 = vld [vmem:[#allocation3 + $0xf5] sm:$0xff]  ;;  %v4217_v21 = vsel %vm338_vm0, %v2877_v33, %v9635_v1  ;;  %v9644_v1 = vld [vmem:[#allocation92_spill] sm:$0xff] }
 0x54c   : > { %v4253_v41 = vsel %vm1789_vm2, %v4217_v21, %v9636_v58  ;;  %v9645_v58 = vld [vmem:[#allocation149_spill] sm:$0xff] }
 0x54d   : > { %v3581_v37 = vpop.permute.xlu0 %3580  ;;  %v3975_v48 = vpop.permute.xlu1 %3974  ;;  %v4289_v6 = vsel %vm1826_vm3, %v4253_v41, %v9637_v20  ;;  %v9646_v20 = vld [vmem:[#allocation38_spill] sm:$0xff] }
 0x54e   : > { %v4430_v9 = vsel %vm1974_vm7, %v4394_v26, %v3975_v48  ;;  %v4324_v61 = vsel %vm1863_vm4, %v4288_v16, %v3581_v37 }
 0x54f   : > { %3856 = vrot.lane.b32.xlu0 %v3035_v50, %s5564_s17  ;;  %3854 = vrot.lane.b32.xlu1 %v3034_v45, %s5564_s17 }
 0x551   : > { %v4119_v23 = vpop.permute.xlu0 %4118  ;;  %v3977_v47 = vpop.permute.xlu1 %3976 }
 0x552   : > { %v4466_v55 = vsel %vm2011_vm8, %v4430_v9, %v4119_v23  ;;  %v4431_v56 = vsel %vm1974_vm7, %v4395_v40, %v3977_v47  ;;  %v3001_v47 = vld [vmem:[#allocation3 + $0xfb] sm:$0xff] }
 0x553   : > { %3604 = vrot.lane.b32.xlu0 %v2998_v19, %s5562_s15  ;;  %3998 = vrot.lane.b32.xlu1 %v3070_v62, %s5565_s18  ;;  %v2878_v19 = vld [vmem:[#allocation3 + $0x80] sm:$0xff] }
 0x554   : > { %5494 = vmatprep.mubr.msk.f32.mxu1 %vm2057_vm9, %v4466_v55  ;;  %v3109_v62 = vld [vmem:[#allocation3 + $0xfe] sm:$0xff]  ;;  %v4218_v49 = vsel %vm338_vm0, %v2878_v19, %v9638_v60 }
 0x555   : > { %v3725_v24 = vpop.permute.xlu0 %3724  ;;  %v3583_v28 = vpop.permute.xlu1 %3582  ;;  %v4254_v17 = vsel %vm1789_vm2, %v4218_v49, %v9639_v44  ;;  %v9647_v19 = vld [vmem:[#allocation59_spill] sm:$0xff]  ;;  %v9648_v60 = vld [vmem:[#allocation66_spill] sm:$0xff] }
 0x556   : > { %v4360_v5 = vsel %vm1900_vm5, %v4324_v61, %v3725_v24  ;;  %v4325_v48 = vsel %vm1863_vm4, %v4289_v6, %v3583_v28  ;;  %v4290_v39 = vsel %vm1826_vm3, %v4254_v17, %v9640_v36  ;;  %v3075_v61 = vld [vmem:[#allocation3 + $0x10d] sm:$0xff]  ;;  %v9649_v44 = vld [vmem:[#allocation154_spill] sm:$0xff] }
 0x557   : > { %4142 = vrot.lane.b32.xlu0 %v3106_v12, %s5566_s25  ;;  %4000 = vrot.lane.b32.xlu1 %v3071_v51, %s5565_s18  ;;  %v3039_v12 = vld [vmem:[#allocation3 + $0x10c] sm:$0xff]  ;;  %v3038_v51 = vld [vmem:[#allocation3 + $0x104] sm:$0xff] }
 0x559   : > { %v3727_v43 = vpop.permute.xlu0 %3726  ;;  %v4121_v4 = vpop.permute.xlu1 %4120 }
 0x55a   : > { %v4467_v22 = vsel %vm2011_vm8, %v4431_v56, %v4121_v4 }
 0x55b   : > { %3748 = vrot.lane.b32.xlu0 %v3034_v45, %s5563_s16  ;;  %3606 = vrot.lane.b32.xlu1 %v2999_v34, %s5562_s15 }
 0x55c   : > { %5495 = vmatmul.mubr.msk.f32.gmra.mxu1 %vm2057_vm9, %v4467_v22  ;;  %v2879_v22 = vld [vmem:[#allocation3 + $0x88] sm:$0xff] }
 0x55d   : > { %v3837_v42 = vpop.permute.xlu0 %3836  ;;  %v3835_v59 = vpop.permute.xlu1 %3834 }
 0x55e   : > { %v4396_v63 = vsel %vm1937_vm6, %v4360_v5, %v3835_v59  ;;  %v3074_v59 = vld [vmem:[#allocation3 + $0x105] sm:$0xff] }
 0x55f   : > { %3750 = vrot.lane.b32.xlu0 %v3035_v50, %s5563_s16  ;;  %4144 = vrot.lane.b32.xlu1 %v3107_v25, %s5566_s25  ;;  %v4361_v50 = vsel %vm1900_vm5, %v4325_v48, %v3727_v43  ;;  %v4219_v25 = vsel %vm338_vm0, %v2879_v22, %v9641_v14  ;;  %v9650_v14 = vld [vmem:[#allocation5_spill] sm:$0xff] }
 0x560   : > { %v4397_v45 = vsel %vm1937_vm6, %v4361_v50, %v3837_v42  ;;  %v3002_v42 = vld [vmem:[#allocation3 + $0x103] sm:$0xff]  ;;  %v4255_v32 = vsel %vm1789_vm2, %v4219_v25, %v9642_v54  ;;  %v9651_v54 = vld [vmem:[#allocation65_spill] sm:$0xff] }
 0x561   : > { %v3585_v11 = vpop.permute.xlu0 %3584  ;;  %v3979_v8 = vpop.permute.xlu1 %3978  ;;  %v4291_v46 = vsel %vm1826_vm3, %v4255_v32, %v9643_v27  ;;  %v9652_v27 = vld [vmem:[#allocation153_spill] sm:$0xff] }
 0x562   : > { %v4432_v31 = vsel %vm1974_vm7, %v4396_v63, %v3979_v8  ;;  %v4326_v10 = vsel %vm1863_vm4, %v4290_v39, %v3585_v11  ;;  %v3110_v8 = vld [vmem:[#allocation3 + $0x106] sm:$0xff] }
 0x563   : > { %3860 = vrot.lane.b32.xlu0 %v3037_v35, %s5564_s17  ;;  %3858 = vrot.lane.b32.xlu1 %v3036_v57, %s5564_s17 }
 0x565   : > { %v4123_v2 = vpop.permute.xlu0 %4122  ;;  %v3981_v0 = vpop.permute.xlu1 %3980 }
 0x566   : > { %v4468_v13 = vsel %vm2011_vm8, %v4432_v31, %v4123_v2  ;;  %v4433_v30 = vsel %vm1974_vm7, %v4397_v45, %v3981_v0  ;;  %v3003_v0 = vld [vmem:[#allocation3 + $0x10b] sm:$0xff] }
 0x567   : > { %3608 = vrot.lane.b32.xlu0 %v3000_v53, %s5562_s15  ;;  %4002 = vrot.lane.b32.xlu1 %v3072_v18, %s5565_s18  ;;  %v2880_v53 = vld [vmem:[#allocation3 + $0x90] sm:$0xff] }
 0x568   : > { %5497 = vmatprep.mubr.msk.f32.mxu1 %vm2057_vm9, %v4468_v13  ;;  %v3111_v18 = vld [vmem:[#allocation3 + $0x10e] sm:$0xff]  ;;  %v4220_v21 = vsel %vm338_vm0, %v2880_v53, %v9644_v1  ;;  %v9653_v53 = vld [vmem:[#allocation91_spill] sm:$0xff]  ;;  %v9654_v1 = vld [vmem:[#allocation178_spill] sm:$0xff] }
 0x569   : > { %v3729_v38 = vpop.permute.xlu0 %3728  ;;  %v3587_v37 = vpop.permute.xlu1 %3586  ;;  %v4256_v41 = vsel %vm1789_vm2, %v4220_v21, %v9645_v58  ;;  %v9655_v58 = vld [vmem:[#allocation70_spill] sm:$0xff] }
 0x56a   : > { %v4362_v52 = vsel %vm1900_vm5, %v4326_v10, %v3729_v38  ;;  %v4327_v11 = vsel %vm1863_vm4, %v4291_v46, %v3587_v37  ;;  %v4292_v6 = vsel %vm1826_vm3, %v4256_v41, %v9646_v20  ;;  %v3077_v10 = vld [vmem:[#allocation3 + $0x11d] sm:$0xff] }
 0x56b   : > { %4146 = vrot.lane.b32.xlu0 %v3108_v29, %s5566_s25  ;;  %4004 = vrot.lane.b32.xlu1 %v3073_v7, %s5565_s18  ;;  %v3041_v29 = vld [vmem:[#allocation3 + $0x11c] sm:$0xff]  ;;  %v3040_v7 = vld [vmem:[#allocation3 + $0x114] sm:$0xff] }
 0x56d   : > { %v3731_v26 = vpop.permute.xlu0 %3730  ;;  %v4125_v9 = vpop.permute.xlu1 %4124 }
 0x56e   : > { %v4469_v23 = vsel %vm2011_vm8, %v4433_v30, %v4125_v9 }
 0x56f   : > { %3752 = vrot.lane.b32.xlu0 %v3036_v57, %s5563_s16  ;;  %3610 = vrot.lane.b32.xlu1 %v3001_v47, %s5562_s15 }
 0x570   : > { %5498 = vmatmul.mubr.msk.f32.gmra.mxu1 %vm2057_vm9, %v4469_v23  ;;  %v2881_v23 = vld [vmem:[#allocation3 + $0x98] sm:$0xff] }
 0x571   : > { %v3841_v15 = vpop.permute.xlu0 %3840  ;;  %v3839_v55 = vpop.permute.xlu1 %3838 }
 0x572   : > { %v4398_v40 = vsel %vm1937_vm6, %v4362_v52, %v3839_v55  ;;  %v3076_v55 = vld [vmem:[#allocation3 + $0x115] sm:$0xff] }
 0x573   : > { %3754 = vrot.lane.b32.xlu0 %v3037_v35, %s5563_s16  ;;  %4148 = vrot.lane.b32.xlu1 %v3109_v62, %s5566_s25  ;;  %v4363_v35 = vsel %vm1900_vm5, %v4327_v11, %v3731_v26  ;;  %v4221_v62 = vsel %vm338_vm0, %v2881_v23, %v9647_v19  ;;  %v9656_v19 = vld [vmem:[#allocation30_spill] sm:$0xff] }
 0x574   : > { %v4399_v57 = vsel %vm1937_vm6, %v4363_v35, %v3841_v15  ;;  %v3004_v15 = vld [vmem:[#allocation3 + $0x113] sm:$0xff]  ;;  %v4257_v49 = vsel %vm1789_vm2, %v4221_v62, %v9648_v60 }
 0x575   : > { %v3589_v24 = vpop.permute.xlu0 %3588  ;;  %v3983_v28 = vpop.permute.xlu1 %3982  ;;  %v4293_v17 = vsel %vm1826_vm3, %v4257_v49, %v9649_v44  ;;  %v9657_v60 = vld [vmem:[#allocation177_spill] sm:$0xff]  ;;  %v3045_v44 = vld [vmem:[#allocation3 + $0x13c] sm:$0xff] }
 0x576   : > { %v4434_v56 = vsel %vm1974_vm7, %v4398_v40, %v3983_v28  ;;  %v4328_v48 = vsel %vm1863_vm4, %v4292_v6, %v3589_v24  ;;  %v3112_v28 = vld [vmem:[#allocation3 + $0x116] sm:$0xff] }
 0x577   : > { %3864 = vrot.lane.b32.xlu0 %v3039_v12, %s5564_s17  ;;  %3862 = vrot.lane.b32.xlu1 %v3038_v51, %s5564_s17 }
 0x579   : > { %v4127_v43 = vpop.permute.xlu0 %4126  ;;  %v3985_v4 = vpop.permute.xlu1 %3984 }
 0x57a   : > { %v4470_v34 = vsel %vm2011_vm8, %v4434_v56, %v4127_v43  ;;  %v4435_v5 = vsel %vm1974_vm7, %v4399_v57, %v3985_v4  ;;  %v3005_v4 = vld [vmem:[#allocation3 + $0x11b] sm:$0xff] }
 0x57b   : > { %3612 = vrot.lane.b32.xlu0 %v3002_v42, %s5562_s15  ;;  %4006 = vrot.lane.b32.xlu1 %v3074_v59, %s5565_s18  ;;  %v2882_v42 = vld [vmem:[#allocation3 + $0xa0] sm:$0xff] }
 0x57c   : > { %5500 = vmatprep.mubr.msk.f32.mxu1 %vm2057_vm9, %v4470_v34  ;;  %v3113_v59 = vld [vmem:[#allocation3 + $0x11e] sm:$0xff]  ;;  %v4222_v25 = vsel %vm338_vm0, %v2882_v42, %v9650_v14 }
 0x57d   : > { %v3733_v3 = vpop.permute.xlu0 %3732  ;;  %v3591_v16 = vpop.permute.xlu1 %3590  ;;  %v4258_v32 = vsel %vm1789_vm2, %v4222_v25, %v9651_v54  ;;  %v2885_v14 = vld [vmem:[#allocation3 + $0xb8] sm:$0xff] }
 0x57e   : > { %v4364_v50 = vsel %vm1900_vm5, %v4328_v48, %v3733_v3  ;;  %v4329_v24 = vsel %vm1863_vm4, %v4293_v17, %v3591_v16  ;;  %v4294_v46 = vsel %vm1826_vm3, %v4258_v32, %v9652_v27  ;;  %v3079_v48 = vld [vmem:[#allocation3 + $0x12d] sm:$0xff]  ;;  %v9659_v27 = vld [vmem:[#allocation31_spill] sm:$0xff] }
 0x57f   : > { %4150 = vrot.lane.b32.xlu0 %v3110_v8, %s5566_s25  ;;  %4008 = vrot.lane.b32.xlu1 %v3075_v61, %s5565_s18  ;;  %v3043_v8 = vld [vmem:[#allocation3 + $0x12c] sm:$0xff]  ;;  %v3042_v61 = vld [vmem:[#allocation3 + $0x124] sm:$0xff]  ;;  %v3044_v17 = vld [vmem:[#allocation3 + $0x134] sm:$0xff] }
 0x580   : > { %v4939_v25 = vld [vmem:[#allocation2 + $0x1b] sm:$0xff] }
 0x581   : > { %v3735_v63 = vpop.permute.xlu0 %3734  ;;  %v4129_v31 = vpop.permute.xlu1 %4128 }
 0x582   : > { %v4471_v2 = vsel %vm2011_vm8, %v4435_v5, %v4129_v31 }
 0x583   : > { %3756 = vrot.lane.b32.xlu0 %v3038_v51, %s5563_s16  ;;  %3614 = vrot.lane.b32.xlu1 %v3003_v0, %s5562_s15 }
 0x584   : > { %5501 = vmatmul.mubr.msk.f32.gmra.mxu1 %vm2057_vm9, %v4471_v2  ;;  %v2883_v2 = vld [vmem:[#allocation3 + $0xa8] sm:$0xff] }
 0x585   : > { %v3845_v33 = vpop.permute.xlu0 %3844  ;;  %v3843_v13 = vpop.permute.xlu1 %3842 }
 0x586   : > { %v4400_v45 = vsel %vm1937_vm6, %v4364_v50, %v3843_v13  ;;  %v3078_v13 = vld [vmem:[#allocation3 + $0x125] sm:$0xff] }
 0x587   : > { %3758 = vrot.lane.b32.xlu0 %v3039_v12, %s5563_s16  ;;  %4152 = vrot.lane.b32.xlu1 %v3111_v18, %s5566_s25  ;;  %v4365_v12 = vsel %vm1900_vm5, %v4329_v24, %v3735_v63  ;;  %v4223_v18 = vsel %vm338_vm0, %v2883_v2, %v9653_v53 }
 0x588   : > { %v4401_v51 = vsel %vm1937_vm6, %v4365_v12, %v3845_v33  ;;  %v3006_v33 = vld [vmem:[#allocation3 + $0x123] sm:$0xff]  ;;  %v4259_v21 = vsel %vm1789_vm2, %v4223_v18, %v9654_v1  ;;  %v8798_v12 = vld [vmem:[%s9149_s6] ss:$0 sm:$0xff] }
 0x589   : > { %v3593_v38 = vpop.permute.xlu0 %3592  ;;  %v3987_v37 = vpop.permute.xlu1 %3986  ;;  %v4295_v41 = vsel %vm1826_vm3, %v4259_v21, %v9655_v58 }
 0x58a   : > { %v4436_v30 = vsel %vm1974_vm7, %v4400_v45, %v3987_v37  ;;  %v4330_v11 = vsel %vm1863_vm4, %v4294_v46, %v3593_v38  ;;  %v3114_v37 = vld [vmem:[#allocation3 + $0x126] sm:$0xff]  ;;  %v4225_v46 = vsel %vm338_vm0, %v2885_v14, %v9659_v27 }
 0x58b   : > { %3868 = vrot.lane.b32.xlu0 %v3041_v29, %s5564_s17  ;;  %3866 = vrot.lane.b32.xlu1 %v3040_v7, %s5564_s17 }
 0x58d   : > { %v4131_v26 = vpop.permute.xlu0 %4130  ;;  %v3989_v9 = vpop.permute.xlu1 %3988 }
 0x58e   : > { %v4472_v47 = vsel %vm2011_vm8, %v4436_v30, %v4131_v26  ;;  %v4437_v52 = vsel %vm1974_vm7, %v4401_v51, %v3989_v9  ;;  %v3007_v9 = vld [vmem:[#allocation3 + $0x12b] sm:$0xff] }
 0x58f   : > { %3616 = vrot.lane.b32.xlu0 %v3004_v15, %s5562_s15  ;;  %4010 = vrot.lane.b32.xlu1 %v3076_v55, %s5565_s18  ;;  %v2884_v15 = vld [vmem:[#allocation3 + $0xb0] sm:$0xff] }
 0x590   : > { %5503 = vmatprep.mubr.msk.f32.mxu1 %vm2057_vm9, %v4472_v47  ;;  %v3115_v55 = vld [vmem:[#allocation3 + $0x12e] sm:$0xff]  ;;  %v4224_v62 = vsel %vm338_vm0, %v2884_v15, %v9656_v19 }
 0x591   : > { %v3737_v36 = vpop.permute.xlu0 %3736  ;;  %v3595_v39 = vpop.permute.xlu1 %3594  ;;  %v4260_v49 = vsel %vm1789_vm2, %v4224_v62, %v9657_v60  ;;  %v4941_v62 = vld [vmem:[#allocation2 + $0x2b] sm:$0xff] }
 0x592   : > { %v4366_v35 = vsel %vm1900_vm5, %v4330_v11, %v3737_v36  ;;  %v4331_v38 = vsel %vm1863_vm4, %v4295_v41, %v3595_v39  ;;  %v9658_v36 = vld [vmem:[#allocation69_spill] sm:$0xff]  ;;  %v9660_v11 = vld [vmem:[#allocation98_spill] sm:$0xff] }
 0x593   : > { %4154 = vrot.lane.b32.xlu0 %v3112_v28, %s5566_s25  ;;  %4012 = vrot.lane.b32.xlu1 %v3077_v10, %s5565_s18  ;;  %v4296_v39 = vsel %vm1826_vm3, %v4260_v49, %v9658_v36 }
 0x595   : > { %v3739_v40 = vpop.permute.xlu0 %3738  ;;  %v4133_v56 = vpop.permute.xlu1 %4132 }
 0x596   : > { %v4473_v43 = vsel %vm2011_vm8, %v4437_v52, %v4133_v56  ;;  %v8807_v56 = vld [vmem:[%s9150_s7] ss:$0 sm:$0xff] }
 0x597   : > { %3760 = vrot.lane.b32.xlu0 %v3040_v7, %s5563_s16  ;;  %3618 = vrot.lane.b32.xlu1 %v3005_v4, %s5562_s15  ;;  %v3080_v4 = vld [vmem:[#allocation3 + $0x135] sm:$0xff] }
 0x598   : > { %5504 = vmatmul.mubr.msk.f32.gmra.mxu1 %vm2057_vm9, %v4473_v43  ;;  %v3081_v43 = vld [vmem:[#allocation3 + $0x13d] sm:$0xff] }
 0x599   : > { %v3849_v22 = vpop.permute.xlu0 %3848  ;;  %v3847_v34 = vpop.permute.xlu1 %3846 }
 0x59a   : > { %v4402_v57 = vsel %vm1937_vm6, %v4366_v35, %v3847_v34  ;;  %v3117_v35 = vld [vmem:[#allocation3 + $0x13e] sm:$0xff] }
 0x59b   : > { %3762 = vrot.lane.b32.xlu0 %v3041_v29, %s5563_s16  ;;  %4156 = vrot.lane.b32.xlu1 %v3113_v59, %s5566_s25  ;;  %v4367_v29 = vsel %vm1900_vm5, %v4331_v38, %v3739_v40 }
 0x59c   : > { %v4403_v7 = vsel %vm1937_vm6, %v4367_v29, %v3849_v22  ;;  %v2886_v29 = vld [vmem:[#allocation3 + $0xc0] sm:$0xff] }
 0x59d   : > { %v3597_v3 = vpop.permute.xlu0 %3596  ;;  %v3991_v16 = vpop.permute.xlu1 %3990 }
 0x59e   : > { %v4438_v5 = vsel %vm1974_vm7, %v4402_v57, %v3991_v16  ;;  %v4332_v10 = vsel %vm1863_vm4, %v4296_v39, %v3597_v3  ;;  %v3116_v57 = vld [vmem:[#allocation3 + $0x136] sm:$0xff] }
 0x59f   : > { %3872 = vrot.lane.b32.xlu0 %v3043_v8, %s5564_s17  ;;  %3870 = vrot.lane.b32.xlu1 %v3042_v61, %s5564_s17  ;;  %v4940_v39 = vld [vmem:[#allocation2 + $0x23] sm:$0xff] }
 0x5a1   : > { %v4135_v63 = vpop.permute.xlu0 %4134  ;;  %v3993_v31 = vpop.permute.xlu1 %3992 }
 0x5a2   : > { %v4474_v0 = vsel %vm2011_vm8, %v4438_v5, %v4135_v63  ;;  %v4439_v50 = vsel %vm1974_vm7, %v4403_v7, %v3993_v31  ;;  %v9661_v5 = vld [vmem:[#allocation182_spill] sm:$0xff]  ;;  %v9662_v7 = vld [vmem:[#allocation61_spill] sm:$0xff] }
 0x5a3   : > { %3620 = vrot.lane.b32.xlu0 %v3006_v33, %s5562_s15  ;;  %4014 = vrot.lane.b32.xlu1 %v3078_v13, %s5565_s18 }
 0x5a4   : > { %5506 = vmatprep.mubr.msk.f32.mxu1 %vm2057_vm9, %v4474_v0 }
 0x5a5   : > { %v3741_v20 = vpop.permute.xlu0 %3740  ;;  %v8774_v6 = vpop.permute.xlu1 %3598 }
 0x5a6   : > { %v4368_v51 = vsel %vm1900_vm5, %v4332_v10, %v3741_v20 }
 0x5a7   : > { %4158 = vrot.lane.b32.xlu0 %v3114_v37, %s5566_s25  ;;  %4016 = vrot.lane.b32.xlu1 %v3079_v48, %s5565_s18 }
 0x5a9   : > { %v3743_v45 = vpop.permute.xlu0 %3742  ;;  %v4137_v30 = vpop.permute.xlu1 %4136 }
 0x5aa   : > { %v4475_v26 = vsel %vm2011_vm8, %v4439_v50, %v4137_v30  ;;  %v4226_v50 = vsel %vm338_vm0, %v2886_v29, %v9662_v7 }
 0x5ab   : > { %3764 = vrot.lane.b32.xlu0 %v3042_v61, %s5563_s16  ;;  %3622 = vrot.lane.b32.xlu1 %v3007_v9, %s5562_s15  ;;  %v4938_v61 = vld [vmem:[#allocation2 + $0x13] sm:$0xff] }
 0x5ac   : > { %5507 = vmatmul.mubr.msk.f32.gmra.mxu1 %vm2057_vm9, %v4475_v26  ;;  %v9664_v9 = vld [vmem:[#allocation181_spill] sm:$0xff] }
 0x5ad   : > { %v3853_v23 = vpop.permute.xlu0 %3852  ;;  %v3851_v47 = vpop.permute.xlu1 %3850 }
 0x5ae   : > { %v4404_v52 = vsel %vm1937_vm6, %v4368_v51, %v3851_v47 }
 0x5af   : > { %3766 = vrot.lane.b32.xlu0 %v3043_v8, %s5563_s16  ;;  %4160 = vrot.lane.b32.xlu1 %v3115_v55, %s5566_s25  ;;  %v4261_v8 = vsel %vm1789_vm2, %v4225_v46, %v9660_v11 }
 0x5b0   : > { %v4297_v63 = vsel %vm1826_vm3, %v4261_v8, %v9661_v5 }
 0x5b1   : > { %v3601_v24 = vpop.permute.xlu0 %3600  ;;  %v3995_v28 = vpop.permute.xlu1 %3994  ;;  %v4333_v13 = vsel %vm1863_vm4, %v4297_v63, %v8774_v6 }
 0x5b2   : > { %v4440_v22 = vsel %vm1974_vm7, %v4404_v52, %v3995_v28  ;;  %v4369_v53 = vsel %vm1900_vm5, %v4333_v13, %v3743_v45  ;;  %v9663_v45 = vld [vmem:[#allocation125_spill] sm:$0xff] }
 0x5b3   : > { %3876 = vrot.lane.b32.xlu0 %v3045_v44, %s5564_s17  ;;  %3874 = vrot.lane.b32.xlu1 %v3044_v17, %s5564_s17  ;;  %v4405_v21 = vsel %vm1937_vm6, %v4369_v53, %v3853_v23  ;;  %v4262_v30 = vsel %vm1789_vm2, %v4226_v50, %v9663_v45  ;;  %v9668_v53 = vld [vmem:[#allocation93_spill] sm:$0xff] }
 0x5b4   : > { %v5478_v40 = vpop.f32.mrf.mxu1  ;;  %v4298_v23 = vsel %vm1826_vm3, %v4262_v30, %v9664_v9 }
 0x5b5   : > { %v4860_v34 = vmul.f32 %v5478_v40, %v8798_v12  ;;  %v4139_v42 = vpop.permute.xlu0 %4138  ;;  %v3997_v59 = vpop.permute.xlu1 %3996  ;;  %v4334_v19 = vsel %vm1863_vm4, %v4298_v23, %v3601_v24  ;;  %v2887_v24 = vld [vmem:[#allocation3 + $0xc8] sm:$0xff] }
 0x5b6   : > { %v4476_v54 = vsel %vm2011_vm8, %v4440_v22, %v4139_v42  ;;  %v4673_v32 = vpop.f32.mrf.mxu1  ;;  %v4441_v41 = vsel %vm1974_vm7, %v4405_v21, %v3997_v59  ;;  %v9666_v59 = vld [vmem:[#allocation97_spill] sm:$0xff] }
 0x5b7   : > { %v4903_v3 = vadd.f32 %v8807_v56, %v4860_v34  ;;  %v4859_v16 = vmul.f32 %v8798_v12, %v4673_v32  ;;  %4020 = vrot.lane.b32.xlu0 %v3081_v43, %s5565_s18  ;;  %4018 = vrot.lane.b32.xlu1 %v3080_v4, %s5565_s18  ;;  %s8829_s18 = scalar_lea.vmem %s9151_s8, %s5294_s30  ;;  %v9665_v4 = vld [vmem:[#allocation62_spill] sm:$0xff] }
 0x5b8   : > { %5509 = vmatprep.mubr.msk.f32.mxu1 %vm2057_vm9, %v4476_v54  ;;  %v4227_v22 = vsel %vm338_vm0, %v2887_v24, %v9665_v4 }
 0x5b9   : > { %v4975_v31 = vadd.f32 %v4939_v25, %v4903_v3  ;;  %v4902_v2 = vadd.f32 %v8807_v56, %v4859_v16  ;;  %v3745_v0 = vpop.permute.xlu0 %3744  ;;  %v3603_v33 = vpop.permute.xlu1 %3602  ;;  %v4263_v14 = vsel %vm1789_vm2, %v4227_v22, %v9666_v59  ;;  %v9667_v25 = vld [vmem:[#allocation102_spill] sm:$0xff] }
 0x5ba   : > { %v4370_v49 = vsel %vm1900_vm5, %v4334_v19, %v3745_v0  ;;  %v4299_v54 = vsel %vm1826_vm3, %v4263_v14, %v9667_v25  ;;  %v2888_v0 = vld [vmem:[#allocation3 + $0xd0] sm:$0xff] }
 0x5bb   : > { %v5011_v18 = vmax.f32 %v4975_v31, 0.0  ;;  %v4974_v1 = vadd.f32 %v4938_v61, %v4902_v2  ;;  %4164 = vrot.lane.b32.xlu0 %v3117_v35, %s5566_s25  ;;  %4162 = vrot.lane.b32.xlu1 %v3116_v57, %s5566_s25  ;;  %v4335_v3 = vsel %vm1863_vm4, %v4299_v54, %v3603_v33  ;;  %v4943_v33 = vld [vmem:[#allocation2 + $0x3b] sm:$0xff] }
 0x5bd   : > { %5047 = vst.msk [vmem:[%s8829_s18 + $0x8] sm:$0xff] %vm338_vm0, %v5011_v18  ;;  %v5010_v58 = vmax.f32 %v4974_v1, 0.0  ;;  %v3747_v20 = vpop.permute.xlu0 %3746  ;;  %v4141_v38 = vpop.permute.xlu1 %4140  ;;  %v4228_v18 = vsel %vm338_vm0, %v2888_v0, %v9668_v53 }
 0x5be   : > { %v4477_v37 = vsel %vm2011_vm8, %v4441_v41, %v4141_v38  ;;  %v4371_v16 = vsel %vm1900_vm5, %v4335_v3, %v3747_v20  ;;  %v4942_v20 = vld [vmem:[#allocation2 + $0x33] sm:$0xff] }
 0x5bf   : > { %5046 = vst.msk [vmem:[%s8829_s18] sm:$0xff] %vm338_vm0, %v5010_v58  ;;  %5510 = vmatmul.mubr.msk.f32.gmra.mxu1 %vm2057_vm9, %v4477_v37  ;;  %v9669_v58 = vld [vmem:[#allocation37_spill] sm:$0xff] }
 0x5c0   : > { %v4264_v41 = vsel %vm1789_vm2, %v4228_v18, %v9669_v58  ;;  %v9670_v38 = vld [vmem:[#allocation129_spill] sm:$0xff] }
 0x5c1   : > { %v3857_v6 = vpop.permute.xlu0 %3856  ;;  %v3855_v48 = vpop.permute.xlu1 %3854  ;;  %v4300_v37 = vsel %vm1826_vm3, %v4264_v41, %v9670_v38 }
 0x5c2   : > { %v4406_v36 = vsel %vm1937_vm6, %v4370_v49, %v3855_v48  ;;  %v4407_v11 = vsel %vm1937_vm6, %v4371_v16, %v3857_v6 }
 0x5c4   : > { %v5481_v26 = vpop.f32.mrf.mxu1 }
 0x5c5   : > { %v4862_v47 = vmul.f32 %v5481_v26, %v8798_v12  ;;  %v3605_v15 = vpop.permute.xlu0 %3604  ;;  %v3999_v55 = vpop.permute.xlu1 %3998 }
 0x5c6   : > { %v4683_v60 = vpop.f32.mrf.mxu1  ;;  %v4442_v51 = vsel %vm1974_vm7, %v4406_v36, %v3999_v55  ;;  %v4336_v50 = vsel %vm1863_vm4, %v4300_v37, %v3605_v15  ;;  %v9671_v15 = vld [vmem:[#allocation94_spill] sm:$0xff]  ;;  %v9673_v36 = vld [vmem:[#allocation101_spill] sm:$0xff] }
 0x5c7   : > { %v4905_v44 = vadd.f32 %v8807_v56, %v4862_v47  ;;  %v4861_v17 = vmul.f32 %v8798_v12, %v4683_v60  ;;  %v9677_v37 = vld [vmem:[#allocation6_spill] sm:$0xff] }
 0x5c9   : > { %v4977_v28 = vadd.f32 %v4941_v62, %v4905_v44  ;;  %v4904_v10 = vadd.f32 %v8807_v56, %v4861_v17  ;;  %v4143_v52 = vpop.permute.xlu0 %4142  ;;  %v4001_v40 = vpop.permute.xlu1 %4000  ;;  %v2889_v62 = vld [vmem:[#allocation3 + $0xd8] sm:$0xff]  ;;  %v9672_v44 = vld [vmem:[#allocation8_spill] sm:$0xff] }
 0x5ca   : > { %v4478_v43 = vsel %vm2011_vm8, %v4442_v51, %v4143_v52  ;;  %v4443_v8 = vsel %vm1974_vm7, %v4407_v11, %v4001_v40  ;;  %v4229_v49 = vsel %vm338_vm0, %v2889_v62, %v9671_v15  ;;  %v2890_v11 = vld [vmem:[#allocation3 + $0xe0] sm:$0xff] }
 0x5cb   : > { %v5013_v34 = vmax.f32 %v4977_v28, 0.0  ;;  %v4976_v42 = vadd.f32 %v4940_v39, %v4904_v10  ;;  %5512 = vmatprep.mubr.msk.f32.mxu1 %vm2057_vm9, %v4478_v43  ;;  %v4265_v17 = vsel %vm1789_vm2, %v4229_v49, %v9672_v44  ;;  %v4946_v49 = vld [vmem:[#allocation2 + $0x53] sm:$0xff] }
 0x5cc   : > { %v4301_v39 = vsel %vm1826_vm3, %v4265_v17, %v9673_v36 }
 0x5cd   : > { %5251 = vst.msk [vmem:[%s8829_s18 + $0x16] sm:$0xff] %vm338_vm0, %v5013_v34  ;;  %v5012_v32 = vmax.f32 %v4976_v42, 0.0  ;;  %v3749_v27 = vpop.permute.xlu0 %3748  ;;  %v3607_v46 = vpop.permute.xlu1 %3606  ;;  %v4945_v42 = vld [vmem:[#allocation2 + $0x4b] sm:$0xff] }
 0x5ce   : > { %v4372_v45 = vsel %vm1900_vm5, %v4336_v50, %v3749_v27  ;;  %v4337_v51 = vsel %vm1863_vm4, %v4301_v39, %v3607_v46  ;;  %v9679_v50 = vld [vmem:[#allocation9_spill] sm:$0xff] }
 0x5cf   : > { %5250 = vst.msk [vmem:[%s8829_s18 + $0xe] sm:$0xfc] %vm5049_vm10, %v5012_v32  ;;  %v4944_v32 = vld [vmem:[#allocation2 + $0x43] sm:$0xff] }
 0x5d1   : > { %v3751_v61 = vpop.permute.xlu0 %3750  ;;  %v4145_v35 = vpop.permute.xlu1 %4144 }
 0x5d2   : > { %v4479_v57 = vsel %vm2011_vm8, %v4443_v8, %v4145_v35  ;;  %v4373_v52 = vsel %vm1900_vm5, %v4337_v51, %v3751_v61  ;;  %v9674_v8 = vld [vmem:[#allocation33_spill] sm:$0xff] }
 0x5d3   : > { %5513 = vmatmul.mubr.msk.f32.gmra.mxu1 %vm2057_vm9, %v4479_v57  ;;  %v4230_v61 = vsel %vm338_vm0, %v2890_v11, %v9674_v8 }
 0x5d4   : > { %v5484_v5 = vpop.f32.mrf.mxu1 }
 0x5d5   : > { %v4864_v63 = vmul.f32 %v5484_v5, %v8798_v12  ;;  %v3861_v31 = vpop.permute.xlu0 %3860  ;;  %v3859_v2 = vpop.permute.xlu1 %3858  ;;  %v9675_v5 = vld [vmem:[#allocation152_spill] sm:$0xff] }
 0x5d6   : > { %v4693_v13 = vpop.f32.mrf.mxu1  ;;  %v4408_v9 = vsel %vm1937_vm6, %v4372_v45, %v3859_v2  ;;  %v4409_v40 = vsel %vm1937_vm6, %v4373_v52, %v3861_v31  ;;  %v9676_v31 = vld [vmem:[#allocation41_spill] sm:$0xff] }
 0x5d7   : > { %v4907_v1 = vadd.f32 %v8807_v56, %v4864_v63  ;;  %v4863_v21 = vmul.f32 %v8798_v12, %v4693_v13  ;;  %v4266_v63 = vsel %vm1789_vm2, %v4230_v61, %v9675_v5  ;;  %v2893_v61 = vld [vmem:[#allocation3 + $0xf8] sm:$0xff] }
 0x5d8   : > { %v4302_v2 = vsel %vm1826_vm3, %v4266_v63, %v9676_v31  ;;  %v9684_v63 = vld [vmem:[#allocation36_spill] sm:$0xff] }
 0x5d9   : > { %v4979_v6 = vadd.f32 %v4943_v33, %v4907_v1  ;;  %v4906_v48 = vadd.f32 %v8807_v56, %v4863_v21  ;;  %v3609_v29 = vpop.permute.xlu0 %3608  ;;  %v4003_v7 = vpop.permute.xlu1 %4002 }
 0x5da   : > { %v4444_v47 = vsel %vm1974_vm7, %v4408_v9, %v4003_v7  ;;  %v4338_v53 = vsel %vm1863_vm4, %v4302_v2, %v3609_v29 }
 0x5db   : > { %v5015_v30 = vmax.f32 %v4979_v6, 0.0  ;;  %v4978_v26 = vadd.f32 %v4942_v20, %v4906_v48  ;;  %v2891_v20 = vld [vmem:[#allocation3 + $0xe8] sm:$0xff] }
 0x5dc   : > { %v4231_v6 = vsel %vm338_vm0, %v2891_v20, %v9677_v37  ;;  %v9678_v48 = vld [vmem:[#allocation124_spill] sm:$0xff] }
 0x5dd   : > { %5254 = vst.msk [vmem:[%s8829_s18 + $0x24] sm:$0xff] %vm338_vm0, %v5015_v30  ;;  %v5014_v23 = vmax.f32 %v4978_v26, 0.0  ;;  %v4147_v55 = vpop.permute.xlu0 %4146  ;;  %v4005_v19 = vpop.permute.xlu1 %4004  ;;  %v4267_v29 = vsel %vm1789_vm2, %v4231_v6, %v9678_v48  ;;  %v4948_v6 = vld [vmem:[#allocation2 + $0x63] sm:$0xff] }
 0x5de   : > { %v4480_v60 = vsel %vm2011_vm8, %v4444_v47, %v4147_v55  ;;  %v4445_v43 = vsel %vm1974_vm7, %v4409_v40, %v4005_v19  ;;  %v4303_v45 = vsel %vm1826_vm3, %v4267_v29, %v9679_v50  ;;  %v4947_v47 = vld [vmem:[#allocation2 + $0x5b] sm:$0xff] }
 0x5df   : > { %5252 = vst.msk [vmem:[%s8829_s18 + $0x1e] sm:$0x3] %vm5052_vm11, %v5014_v23  ;;  %5515 = vmatprep.mubr.msk.f32.mxu1 %vm2057_vm9, %v4480_v60 }
 0x5e0   : > { %5253 = vst.msk [vmem:[%s8829_s18 + $0x1c] sm:$0xf0] %vm5055_vm12, %v5014_v23 }
 0x5e1   : > { %v3753_v28 = vpop.permute.xlu0 %3752  ;;  %v3611_v10 = vpop.permute.xlu1 %3610 }
 0x5e2   : > { %v4374_v18 = vsel %vm1900_vm5, %v4338_v53, %v3753_v28  ;;  %v4339_v23 = vsel %vm1863_vm4, %v4303_v45, %v3611_v10 }
 0x5e4   : > { %v5487_v24 = vpop.f32.mrf.mxu1 }
 0x5e5   : > { %v4866_v4 = vmul.f32 %v5487_v24, %v8798_v12  ;;  %v3755_v22 = vpop.permute.xlu0 %3754  ;;  %v4149_v34 = vpop.permute.xlu1 %4148 }
 0x5e6   : > { %v4703_v59 = vpop.f32.mrf.mxu1  ;;  %v4481_v14 = vsel %vm2011_vm8, %v4445_v43, %v4149_v34  ;;  %v4375_v19 = vsel %vm1900_vm5, %v4339_v23, %v3755_v22  ;;  %v9680_v22 = vld [vmem:[#allocation64_spill] sm:$0xff] }
 0x5e7   : > { %v4909_v25 = vadd.f32 %v8807_v56, %v4866_v4  ;;  %v4865_v54 = vmul.f32 %v8798_v12, %v4703_v59  ;;  %5516 = vmatmul.mubr.msk.f32.gmra.mxu1 %vm2057_vm9, %v4481_v14  ;;  %v2892_v4 = vld [vmem:[#allocation3 + $0xf0] sm:$0xff]  ;;  %v9682_v14 = vld [vmem:[#allocation156_spill] sm:$0xff] }
 0x5e8   : > { %v4232_v34 = vsel %vm338_vm0, %v2892_v4, %v9680_v22  ;;  %v9689_v22 = vld [vmem:[#allocation63_spill] sm:$0xff] }
 0x5e9   : > { %v4981_v27 = vadd.f32 %v4945_v42, %v4909_v25  ;;  %v4908_v46 = vadd.f32 %v8807_v56, %v4865_v54  ;;  %v3865_v3 = vpop.permute.xlu0 %3864  ;;  %v3863_v16 = vpop.permute.xlu1 %3862  ;;  %v9681_v42 = vld [vmem:[#allocation68_spill] sm:$0xff] }
 0x5ea   : > { %v4410_v1 = vsel %vm1937_vm6, %v4374_v18, %v3863_v16  ;;  %v4411_v15 = vsel %vm1937_vm6, %v4375_v19, %v3865_v3  ;;  %v4268_v59 = vsel %vm1789_vm2, %v4232_v34, %v9681_v42  ;;  %v2894_v19 = vld [vmem:[#allocation3 + $0x100] sm:$0xff] }
 0x5eb   : > { %v5017_v35 = vmax.f32 %v4981_v27, 0.0  ;;  %v4980_v57 = vadd.f32 %v4944_v32, %v4908_v46  ;;  %v4304_v25 = vsel %vm1826_vm3, %v4268_v59, %v9682_v14  ;;  %v9690_v42 = vld [vmem:[#allocation151_spill] sm:$0xff] }
 0x5ed   : > { %5257 = vst.msk [vmem:[%s8829_s18 + $0x32] sm:$0xff] %vm338_vm0, %v5017_v35  ;;  %v5016_v0 = vmax.f32 %v4980_v57, 0.0  ;;  %v3613_v33 = vpop.permute.xlu0 %3612  ;;  %v4007_v13 = vpop.permute.xlu1 %4006  ;;  %v9683_v57 = vld [vmem:[#allocation32_spill] sm:$0xff] }
 0x5ee   : > { %v4446_v21 = vsel %vm1974_vm7, %v4410_v1, %v4007_v13  ;;  %v4340_v27 = vsel %vm1863_vm4, %v4304_v25, %v3613_v33  ;;  %v4233_v5 = vsel %vm338_vm0, %v2893_v61, %v9683_v57  ;;  %v9691_v25 = vld [vmem:[#allocation40_spill] sm:$0xff] }
 0x5ef   : > { %5255 = vst.msk [vmem:[%s8829_s18 + $0x2c] sm:$0xf] %vm5058_vm13, %v5016_v0  ;;  %v4269_v31 = vsel %vm1789_vm2, %v4233_v5, %v9684_v63  ;;  %v4950_v5 = vld [vmem:[#allocation2 + $0x73] sm:$0xff] }
 0x5f0   : > { %5256 = vst.msk [vmem:[%s8829_s18 + $0x2a] sm:$0xc0] %vm5061_vm14, %v5016_v0  ;;  %v9685_v0 = vld [vmem:[#allocation128_spill] sm:$0xff] }
 0x5f1   : > { %v4151_v58 = vpop.permute.xlu0 %4150  ;;  %v4009_v41 = vpop.permute.xlu1 %4008  ;;  %v4305_v33 = vsel %vm1826_vm3, %v4269_v31, %v9685_v0 }
 0x5f2   : > { %v4482_v38 = vsel %vm2011_vm8, %v4446_v21, %v4151_v58  ;;  %v4447_v44 = vsel %vm1974_vm7, %v4411_v15, %v4009_v41  ;;  %v4949_v21 = vld [vmem:[#allocation2 + $0x6b] sm:$0xff] }
 0x5f3   : > { %5518 = vmatprep.mubr.msk.f32.mxu1 %vm2057_vm9, %v4482_v38  ;;  %v9687_v15 = vld [vmem:[#allocation180_spill] sm:$0xff] }
 0x5f4   : > { %v5490_v7 = vpop.f32.mrf.mxu1 }
 0x5f5   : > { %v4868_v30 = vmul.f32 %v5490_v7, %v8798_v12  ;;  %v3757_v26 = vpop.permute.xlu0 %3756  ;;  %v3615_v9 = vpop.permute.xlu1 %3614 }
 0x5f6   : > { %v4713_v55 = vpop.f32.mrf.mxu1  ;;  %v4376_v46 = vsel %vm1900_vm5, %v4340_v27, %v3757_v26  ;;  %v4341_v1 = vsel %vm1863_vm4, %v4305_v33, %v3615_v9 }
 0x5f7   : > { %v4911_v62 = vadd.f32 %v8807_v56, %v4868_v30  ;;  %v4867_v60 = vmul.f32 %v8798_v12, %v4713_v55 }
 0x5f9   : > { %v4983_v17 = vadd.f32 %v4947_v47, %v4911_v62  ;;  %v4910_v36 = vadd.f32 %v8807_v56, %v4867_v60  ;;  %v3759_v39 = vpop.permute.xlu0 %3758  ;;  %v4153_v28 = vpop.permute.xlu1 %4152  ;;  %v9686_v62 = vld [vmem:[#allocation96_spill] sm:$0xff] }
 0x5fa   : > { %v4483_v10 = vsel %vm2011_vm8, %v4447_v44, %v4153_v28  ;;  %v4377_v41 = vsel %vm1900_vm5, %v4341_v1, %v3759_v39  ;;  %v4234_v60 = vsel %vm338_vm0, %v2894_v19, %v9686_v62  ;;  %v9688_v44 = vld [vmem:[#allocation72_spill] sm:$0xff] }
 0x5fb   : > { %v5019_v51 = vmax.f32 %v4983_v17, 0.0  ;;  %v4982_v52 = vadd.f32 %v4946_v49, %v4910_v36  ;;  %5519 = vmatmul.mubr.msk.f32.gmra.mxu1 %vm2057_vm9, %v4483_v10  ;;  %v4270_v49 = vsel %vm1789_vm2, %v4234_v60, %v9687_v15 }
 0x5fc   : > { %v4306_v17 = vsel %vm1826_vm3, %v4270_v49, %v9688_v44 }
 0x5fd   : > { %5259 = vst.msk [vmem:[%s8829_s18 + $0x40] sm:$0xff] %vm338_vm0, %v5019_v51  ;;  %v5018_v40 = vmax.f32 %v4982_v52, 0.0  ;;  %v3869_v24 = vpop.permute.xlu0 %3868  ;;  %v3867_v43 = vpop.permute.xlu1 %3866 }
 0x5fe   : > { %v4412_v3 = vsel %vm1937_vm6, %v4376_v46, %v3867_v43  ;;  %v4413_v37 = vsel %vm1937_vm6, %v4377_v41, %v3869_v24  ;;  %v2895_v43 = vld [vmem:[#allocation3 + $0x108] sm:$0xff]  ;;  %v2897_v41 = vld [vmem:[#allocation3 + $0x118] sm:$0xff] }
 0x5ff   : > { %5258 = vst.msk [vmem:[%s8829_s18 + $0x3a] sm:$0x3f] %vm379_vm1, %v5018_v40  ;;  %v4235_v34 = vsel %vm338_vm0, %v2895_v43, %v9689_v22 }
 0x600   : > { %v4271_v59 = vsel %vm1789_vm2, %v4235_v34, %v9690_v42  ;;  %v4952_v34 = vld [vmem:[#allocation2 + $0x83] sm:$0xff] }
 0x601   : > { %v3617_v54 = vpop.permute.xlu0 %3616  ;;  %v4011_v32 = vpop.permute.xlu1 %4010 }
 0x602   : > { %v4448_v16 = vsel %vm1974_vm7, %v4412_v3, %v4011_v32  ;;  %v4342_v28 = vsel %vm1863_vm4, %v4306_v17, %v3617_v54  ;;  %v4307_v54 = vsel %vm1826_vm3, %v4271_v59, %v9691_v25 }
 0x605   : > { %v4155_v11 = vpop.permute.xlu0 %4154  ;;  %v4013_v8 = vpop.permute.xlu1 %4012 }
 0x606   : > { %v4484_v35 = vsel %vm2011_vm8, %v4448_v16, %v4155_v11  ;;  %v4449_v48 = vsel %vm1974_vm7, %v4413_v37, %v4013_v8  ;;  %v4951_v16 = vld [vmem:[#allocation2 + $0x7b] sm:$0xff] }
 0x607   : > { %5521 = vmatprep.mubr.msk.f32.mxu1 %vm2057_vm9, %v4484_v35 }
 0x608   : > { %v5493_v2 = vpop.f32.mrf.mxu1 }
 0x609   : > { %v4870_v13 = vmul.f32 %v5493_v2, %v8798_v12  ;;  %v3761_v53 = vpop.permute.xlu0 %3760  ;;  %v3619_v18 = vpop.permute.xlu1 %3618 }
 0x60a   : > { %v4723_v58 = vpop.f32.mrf.mxu1  ;;  %v4378_v10 = vsel %vm1900_vm5, %v4342_v28, %v3761_v53  ;;  %v4343_v3 = vsel %vm1863_vm4, %v4307_v54, %v3619_v18 }
 0x60b   : > { %v4913_v20 = vadd.f32 %v8807_v56, %v4870_v13  ;;  %v4869_v38 = vmul.f32 %v8798_v12, %v4723_v58 }
 0x60d   : > { %v4985_v29 = vadd.f32 %v4949_v21, %v4913_v20  ;;  %v4912_v7 = vadd.f32 %v8807_v56, %v4869_v38  ;;  %v3763_v50 = vpop.permute.xlu0 %3762  ;;  %v4157_v45 = vpop.permute.xlu1 %4156  ;;  %v2896_v20 = vld [vmem:[#allocation3 + $0x110] sm:$0xff]  ;;  %v9692_v38 = vld [vmem:[#allocation176_spill] sm:$0xff] }
 0x60e   : > { %v4485_v30 = vsel %vm2011_vm8, %v4449_v48, %v4157_v45  ;;  %v4379_v8 = vsel %vm1900_vm5, %v4343_v3, %v3763_v50  ;;  %v4237_v37 = vsel %vm338_vm0, %v2897_v41, %v9692_v38  ;;  %v9695_v50 = vld [vmem:[#allocation100_spill] sm:$0xff] }
 0x60f   : > { %v5021_v26 = vmax.f32 %v4985_v29, 0.0  ;;  %v4984_v9 = vadd.f32 %v4948_v6, %v4912_v7  ;;  %5522 = vmatmul.mubr.msk.f32.gmra.mxu1 %vm2057_vm9, %v4485_v30  ;;  %v9693_v6 = vld [vmem:[#allocation95_spill] sm:$0xff] }
 0x610   : > { %v4236_v48 = vsel %vm338_vm0, %v2896_v20, %v9693_v6  ;;  %v9694_v29 = vld [vmem:[#allocation67_spill] sm:$0xff]  ;;  %v4959_v6 = vld [vmem:[#allocation2 + $0xbb] sm:$0xff] }
 0x611   : > { %5261 = vst.msk [vmem:[%s8829_s18 + $0x4e] sm:$0xfc] %vm5049_vm10, %v5021_v26  ;;  %v5020_v23 = vmax.f32 %v4984_v9, 0.0  ;;  %v3873_v47 = vpop.permute.xlu0 %3872  ;;  %v3871_v55 = vpop.permute.xlu1 %3870  ;;  %v4273_v7 = vsel %vm1789_vm2, %v4237_v37, %v9694_v29  ;;  %v4272_v45 = vsel %vm1789_vm2, %v4236_v48, %v9695_v50  ;;  %v9696_v30 = vld [vmem:[#allocation155_spill] sm:$0xff]  ;;  %v9697_v9 = vld [vmem:[#allocation184_spill] sm:$0xff] }
 0x612   : > { %v4414_v51 = vsel %vm1937_vm6, %v4378_v10, %v3871_v55  ;;  %v4415_v57 = vsel %vm1937_vm6, %v4379_v8, %v3873_v47  ;;  %v4309_v26 = vsel %vm1826_vm3, %v4273_v7, %v9696_v30  ;;  %v4954_v8 = vld [vmem:[#allocation2 + $0x93] sm:$0xff] }
 0x613   : > { %5260 = vst.msk [vmem:[%s8829_s18 + $0x48] sm:$0xff] %vm338_vm0, %v5020_v23  ;;  %v4308_v23 = vsel %vm1826_vm3, %v4272_v45, %v9697_v9  ;;  %v4958_v50 = vld [vmem:[#allocation2 + $0xb3] sm:$0xff] }
 0x615   : > { %v3621_v36 = vpop.permute.xlu0 %3620  ;;  %v4015_v39 = vpop.permute.xlu1 %4014 }
 0x616   : > { %v4450_v52 = vsel %vm1974_vm7, %v4414_v51, %v4015_v39  ;;  %v4344_v19 = vsel %vm1863_vm4, %v4308_v23, %v3621_v36 }
 0x619   : > { %v4159_v40 = vpop.permute.xlu0 %4158  ;;  %v4017_v24 = vpop.permute.xlu1 %4016 }
 0x61a   : > { %v4486_v4 = vsel %vm2011_vm8, %v4450_v52, %v4159_v40  ;;  %v4451_v63 = vsel %vm1974_vm7, %v4415_v57, %v4017_v24  ;;  %v4953_v24 = vld [vmem:[#allocation2 + $0x8b] sm:$0xff] }
 0x61b   : > { %5524 = vmatprep.mubr.msk.f32.mxu1 %vm2057_vm9, %v4486_v4 }
 0x61c   : > { %v5496_v14 = vpop.f32.mrf.mxu1 }
 0x61d   : > { %v4872_v32 = vmul.f32 %v5496_v14, %v8798_v12  ;;  %v3765_v27 = vpop.permute.xlu0 %3764  ;;  %v3623_v46 = vpop.permute.xlu1 %3622 }
 0x61e   : > { %v4733_v11 = vpop.f32.mrf.mxu1  ;;  %v4345_v62 = vsel %vm1863_vm4, %v4309_v26, %v3623_v46  ;;  %v4380_v60 = vsel %vm1900_vm5, %v4344_v19, %v3765_v27  ;;  %v4955_v46 = vld [vmem:[#allocation2 + $0x9b] sm:$0xff]  ;;  %v4961_v19 = vld [vmem:[#allocation2 + $0xcb] sm:$0xff] }
 0x61f   : > { %v4915_v61 = vadd.f32 %v8807_v56, %v4872_v32  ;;  %v4871_v35 = vmul.f32 %v8798_v12, %v4733_v11 }
 0x621   : > { %v4987_v31 = vadd.f32 %v4951_v16, %v4915_v61  ;;  %v4914_v2 = vadd.f32 %v8807_v56, %v4871_v35  ;;  %v3767_v0 = vpop.permute.xlu0 %3766  ;;  %v4161_v33 = vpop.permute.xlu1 %4160 }
 0x622   : > { %v4487_v13 = vsel %vm2011_vm8, %v4451_v63, %v4161_v33  ;;  %v4381_v15 = vsel %vm1900_vm5, %v4345_v62, %v3767_v0  ;;  %v4957_v0 = vld [vmem:[#allocation2 + $0xab] sm:$0xff] }
 0x623   : > { %v5023_v53 = vmax.f32 %v4987_v31, 0.0  ;;  %v4986_v18 = vadd.f32 %v4950_v5, %v4914_v2  ;;  %5525 = vmatmul.mubr.msk.f32.gmra.mxu1 %vm2057_vm9, %v4487_v13 }
 0x625   : > { %5263 = vst.msk [vmem:[%s8829_s18 + $0x5e] sm:$0x3] %vm5052_vm11, %v5023_v53  ;;  %v5022_v1 = vmax.f32 %v4986_v18, 0.0  ;;  %v3877_v21 = vpop.permute.xlu0 %3876  ;;  %v3875_v58 = vpop.permute.xlu1 %3874  ;;  %v4956_v18 = vld [vmem:[#allocation2 + $0xa3] sm:$0xff] }
 0x626   : > { %5264 = vst.msk [vmem:[%s8829_s18 + $0x5c] sm:$0xf0] %vm5055_vm12, %v5023_v53  ;;  %v4417_v49 = vsel %vm1937_vm6, %v4381_v15, %v3877_v21  ;;  %v4416_v44 = vsel %vm1937_vm6, %v4380_v60, %v3875_v58 }
 0x627   : > { %5262 = vst.msk [vmem:[%s8829_s18 + $0x56] sm:$0xff] %vm338_vm0, %v5022_v1 }
 0x629   : > { %v4021_v47 = vpop.permute.xlu0 %4020  ;;  %v4019_v55 = vpop.permute.xlu1 %4018 }
 0x62a   : > { %v4453_v17 = vsel %vm1974_vm7, %v4417_v49, %v4021_v47  ;;  %v4452_v39 = vsel %vm1974_vm7, %v4416_v44, %v4019_v55  ;;  %v4960_v49 = vld [vmem:[#allocation2 + $0xc3] sm:$0xff] }
 0x62d   : > { %v4165_v28 = vpop.permute.xlu0 %4164  ;;  %v4163_v10 = vpop.permute.xlu1 %4162 }
 0x62e   : > { %v4489_v51 = vsel %vm2011_vm8, %v4453_v17, %v4165_v28  ;;  %v4488_v36 = vsel %vm2011_vm8, %v4452_v39, %v4163_v10 }
 0x62f   : > { %5527 = vmatprep.mubr.msk.f32.mxu1 %vm2057_vm9, %v4488_v36 }
 0x630   : > { %v5499_v52 = vpop.f32.mrf.mxu1  ;;  %5528 = vmatmul.mubr.msk.f32.gmra.mxu1 %vm2057_vm9, %v4489_v51 }
 0x631   : > { %v4874_v40 = vmul.f32 %v5499_v52, %v8798_v12  ;;  %v4963_v52 = vld [vmem:[#allocation2 + $0xdb] sm:$0xff] }
 0x632   : > { %v4743_v43 = vpop.f32.mrf.mxu1 }
 0x633   : > { %v4917_v4 = vadd.f32 %v8807_v56, %v4874_v40  ;;  %v4873_v22 = vmul.f32 %v8798_v12, %v4743_v43 }
 0x635   : > { %v4989_v42 = vadd.f32 %v4953_v24, %v4917_v4  ;;  %v4916_v59 = vadd.f32 %v8807_v56, %v4873_v22  ;;  %v4962_v4 = vld [vmem:[#allocation2 + $0xd3] sm:$0xff] }
 0x637   : > { %v5025_v14 = vmax.f32 %v4989_v42, 0.0  ;;  %v4988_v25 = vadd.f32 %v4952_v34, %v4916_v59 }
 0x639   : > { %5266 = vst.msk [vmem:[%s8829_s18 + $0x6c] sm:$0xf] %vm5058_vm13, %v5025_v14  ;;  %v5024_v54 = vmax.f32 %v4988_v25, 0.0 }
 0x63a   : > { %5267 = vst.msk [vmem:[%s8829_s18 + $0x6a] sm:$0xc0] %vm5061_vm14, %v5025_v14 }
 0x63b   : > { %5265 = vst.msk [vmem:[%s8829_s18 + $0x64] sm:$0xff] %vm338_vm0, %v5024_v54 }
 0x644   : > { %v5502_v32 = vpop.f32.mrf.mxu1 }
 0x645   : > { %v4876_v27 = vmul.f32 %v5502_v32, %v8798_v12  ;;  %v4965_v32 = vld [vmem:[#allocation2 + $0xeb] sm:$0xff] }
 0x646   : > { %v4753_v3 = vpop.f32.mrf.mxu1 }
 0x647   : > { %v4919_v16 = vadd.f32 %v8807_v56, %v4876_v27  ;;  %v4875_v11 = vmul.f32 %v8798_v12, %v4753_v3 }
 0x649   : > { %v4991_v61 = vadd.f32 %v4955_v46, %v4919_v16  ;;  %v4918_v35 = vadd.f32 %v8807_v56, %v4875_v11  ;;  %v4964_v16 = vld [vmem:[#allocation2 + $0xe3] sm:$0xff] }
 0x64b   : > { %v5027_v57 = vmax.f32 %v4991_v61, 0.0  ;;  %v4990_v5 = vadd.f32 %v4954_v8, %v4918_v35 }
 0x64d   : > { %5269 = vst.msk [vmem:[%s8829_s18 + $0x7a] sm:$0x3f] %vm379_vm1, %v5027_v57  ;;  %v5026_v63 = vmax.f32 %v4990_v5, 0.0 }
 0x64f   : > { %5268 = vst.msk [vmem:[%s8829_s18 + $0x72] sm:$0xff] %vm338_vm0, %v5026_v63 }
 0x658   : > { %v5505_v31 = vpop.f32.mrf.mxu1 }
 0x659   : > { %v4878_v2 = vmul.f32 %v5505_v31, %v8798_v12  ;;  %v4967_v31 = vld [vmem:[#allocation2 + $0xfb] sm:$0xff] }
 0x65a   : > { %v4763_v33 = vpop.f32.mrf.mxu1 }
 0x65b   : > { %v4921_v13 = vadd.f32 %v8807_v56, %v4878_v2  ;;  %v4877_v53 = vmul.f32 %v8798_v12, %v4763_v33 }
 0x65d   : > { %v4993_v1 = vadd.f32 %v4957_v0, %v4921_v13  ;;  %v4920_v21 = vadd.f32 %v8807_v56, %v4877_v53  ;;  %v4966_v13 = vld [vmem:[#allocation2 + $0xf3] sm:$0xff] }
 0x65f   : > { %v5029_v58 = vmax.f32 %v4993_v1, 0.0  ;;  %v4992_v41 = vadd.f32 %v4956_v18, %v4920_v21 }
 0x661   : > { %5271 = vst.msk [vmem:[%s8829_s18 + $0x88] sm:$0xff] %vm338_vm0, %v5029_v58  ;;  %v5028_v20 = vmax.f32 %v4992_v41, 0.0 }
 0x663   : > { %5270 = vst.msk [vmem:[%s8829_s18 + $0x80] sm:$0xff] %vm338_vm0, %v5028_v20 }
 0x66c   : > { %v5508_v38 = vpop.f32.mrf.mxu1 }
 0x66d   : > { %v4880_v37 = vmul.f32 %v5508_v38, %v8798_v12  ;;  %v4969_v38 = vld [vmem:[#allocation2 + $0x10b] sm:$0xff] }
 0x66e   : > { %v4773_v48 = vpop.f32.mrf.mxu1 }
 0x66f   : > { %v4923_v29 = vadd.f32 %v8807_v56, %v4880_v37  ;;  %v4879_v7 = vmul.f32 %v8798_v12, %v4773_v48 }
 0x671   : > { %v4995_v45 = vadd.f32 %v4959_v6, %v4923_v29  ;;  %v4922_v30 = vadd.f32 %v8807_v56, %v4879_v7  ;;  %v4968_v29 = vld [vmem:[#allocation2 + $0x103] sm:$0xff] }
 0x673   : > { %v5031_v26 = vmax.f32 %v4995_v45, 0.0  ;;  %v4994_v9 = vadd.f32 %v4958_v50, %v4922_v30 }
 0x675   : > { %5273 = vst.msk [vmem:[%s8829_s18 + $0x96] sm:$0xff] %vm338_vm0, %v5031_v26  ;;  %v5030_v23 = vmax.f32 %v4994_v9, 0.0 }
 0x677   : > { %5272 = vst.msk [vmem:[%s8829_s18 + $0x8e] sm:$0xfc] %vm5049_vm10, %v5030_v23 }
 0x67f   : > { %v5511_v47 = vpop.f32.mrf.mxu1 }
 0x680   : > { %v4882_v55 = vmul.f32 %v5511_v47, %v8798_v12  ;;  %v4971_v47 = vld [vmem:[#allocation2 + $0x11b] sm:$0xff] }
 0x681   : > { %v4783_v62 = vpop.f32.mrf.mxu1 }
 0x682   : > { %v4925_v60 = vadd.f32 %v8807_v56, %v4882_v55  ;;  %v4881_v15 = vmul.f32 %v8798_v12, %v4783_v62 }
 0x684   : > { %v4997_v44 = vadd.f32 %v4961_v19, %v4925_v60  ;;  %v4924_v17 = vadd.f32 %v8807_v56, %v4881_v15  ;;  %v4970_v60 = vld [vmem:[#allocation2 + $0x113] sm:$0xff] }
 0x686   : > { %v5033_v39 = vmax.f32 %v4997_v44, 0.0  ;;  %v4996_v28 = vadd.f32 %v4960_v49, %v4924_v17 }
 0x688   : > { %5276 = vst.msk [vmem:[%s8829_s18 + $0xa4] sm:$0xff] %vm338_vm0, %v5033_v39  ;;  %v5032_v10 = vmax.f32 %v4996_v28, 0.0 }
 0x68a   : > { %5274 = vst.msk [vmem:[%s8829_s18 + $0x9e] sm:$0x3] %vm5052_vm11, %v5032_v10 }
 0x68b   : > { %5275 = vst.msk [vmem:[%s8829_s18 + $0x9c] sm:$0xf0] %vm5055_vm12, %v5032_v10 }
 0x693   : > { %v5514_v51 = vpop.f32.mrf.mxu1 }
 0x694   : > { %v4884_v36 = vmul.f32 %v5514_v51, %v8798_v12  ;;  %v4973_v51 = vld [vmem:[#allocation2 + $0x12b] sm:$0xff] }
 0x695   : > { %v4793_v40 = vpop.f32.mrf.mxu1 }
 0x696   : > { %v4927_v24 = vadd.f32 %v8807_v56, %v4884_v36  ;;  %v4883_v43 = vmul.f32 %v8798_v12, %v4793_v40 }
 0x698   : > { %v4999_v22 = vadd.f32 %v4963_v52, %v4927_v24  ;;  %v4926_v34 = vadd.f32 %v8807_v56, %v4883_v43  ;;  %v4972_v24 = vld [vmem:[#allocation2 + $0x123] sm:$0xff] }
 0x69a   : > { %v5035_v42 = vmax.f32 %v4999_v22, 0.0  ;;  %v4998_v59 = vadd.f32 %v4962_v4, %v4926_v34 }
 0x69c   : > { %5279 = vst.msk [vmem:[%s8829_s18 + $0xb2] sm:$0xff] %vm338_vm0, %v5035_v42  ;;  %v5034_v14 = vmax.f32 %v4998_v59, 0.0 }
 0x69e   : > { %5277 = vst.msk [vmem:[%s8829_s18 + $0xac] sm:$0xf] %vm5058_vm13, %v5034_v14 }
 0x69f   : > { %5278 = vst.msk [vmem:[%s8829_s18 + $0xaa] sm:$0xc0] %vm5061_vm14, %v5034_v14 }
 0x6a7   : > { %v5517_v25 = vpop.f32.mrf.mxu1 }
 0x6a8   : > { %v4886_v54 = vmul.f32 %v5517_v25, %v8798_v12 }
 0x6a9   : > { %v4803_v27 = vpop.f32.mrf.mxu1 }
 0x6aa   : > { %v4929_v46 = vadd.f32 %v8807_v56, %v4886_v54  ;;  %v4885_v3 = vmul.f32 %v8798_v12, %v4803_v27 }
 0x6ac   : > { %v5001_v11 = vadd.f32 %v4965_v32, %v4929_v46  ;;  %v4928_v8 = vadd.f32 %v8807_v56, %v4885_v3 }
 0x6ae   : > { %v5037_v61 = vmax.f32 %v5001_v11, 0.0  ;;  %v5000_v35 = vadd.f32 %v4964_v16, %v4928_v8 }
 0x6b0   : > { %5281 = vst.msk [vmem:[%s8829_s18 + $0xc0] sm:$0xff] %vm338_vm0, %v5037_v61  ;;  %v5036_v57 = vmax.f32 %v5000_v35, 0.0 }
 0x6b2   : > { %5280 = vst.msk [vmem:[%s8829_s18 + $0xba] sm:$0x3f] %vm379_vm1, %v5036_v57 }
 0x6bb   : > { %v5520_v5 = vpop.f32.mrf.mxu1 }
 0x6bc   : > { %v4888_v63 = vmul.f32 %v5520_v5, %v8798_v12 }
 0x6bd   : > { %v4813_v2 = vpop.f32.mrf.mxu1 }
 0x6be   : > { %v4931_v0 = vadd.f32 %v8807_v56, %v4888_v63  ;;  %v4887_v33 = vmul.f32 %v8798_v12, %v4813_v2 }
 0x6c0   : > { %v5003_v53 = vadd.f32 %v4967_v31, %v4931_v0  ;;  %v4930_v18 = vadd.f32 %v8807_v56, %v4887_v33 }
 0x6c2   : > { %v5039_v1 = vmax.f32 %v5003_v53, 0.0  ;;  %v5002_v21 = vadd.f32 %v4966_v13, %v4930_v18 }
 0x6c4   : > { %5283 = vst.msk [vmem:[%s8829_s18 + $0xce] sm:$0xfc] %vm5049_vm10, %v5039_v1  ;;  %v5038_v58 = vmax.f32 %v5002_v21, 0.0 }
 0x6c6   : > { %5282 = vst.msk [vmem:[%s8829_s18 + $0xc8] sm:$0xff] %vm338_vm0, %v5038_v58 }
 0x6cf   : > { %v5523_v41 = vpop.f32.mrf.mxu1 }
 0x6d0   : > { %v4890_v20 = vmul.f32 %v5523_v41, %v8798_v12 }
 0x6d1   : > { %v4823_v37 = vpop.f32.mrf.mxu1 }
 0x6d2   : > { %v4933_v6 = vadd.f32 %v8807_v56, %v4890_v20  ;;  %v4889_v48 = vmul.f32 %v8798_v12, %v4823_v37 }
 0x6d4   : > { %v5005_v7 = vadd.f32 %v4969_v38, %v4933_v6  ;;  %v4932_v50 = vadd.f32 %v8807_v56, %v4889_v48 }
 0x6d6   : > { %v5041_v45 = vmax.f32 %v5005_v7, 0.0  ;;  %v5004_v30 = vadd.f32 %v4968_v29, %v4932_v50 }
 0x6d8   : > { %5285 = vst.msk [vmem:[%s8829_s18 + $0xde] sm:$0x3] %vm5052_vm11, %v5041_v45  ;;  %v5040_v26 = vmax.f32 %v5004_v30, 0.0 }
 0x6d9   : > { %5286 = vst.msk [vmem:[%s8829_s18 + $0xdc] sm:$0xf0] %vm5055_vm12, %v5041_v45 }
 0x6da   : > { %5284 = vst.msk [vmem:[%s8829_s18 + $0xd6] sm:$0xff] %vm338_vm0, %v5040_v26 }
 0x6e3   : > { %v5526_v9 = vpop.f32.mrf.mxu1 }
 0x6e4   : > { %v4892_v23 = vmul.f32 %v5526_v9, %v8798_v12 }
 0x6e5   : > { %v4833_v55 = vpop.f32.mrf.mxu1 }
 0x6e6   : > { %v4935_v19 = vadd.f32 %v8807_v56, %v4892_v23  ;;  %v4891_v62 = vmul.f32 %v8798_v12, %v4833_v55 }
 0x6e8   : > { %v5007_v15 = vadd.f32 %v4971_v47, %v4935_v19  ;;  %v4934_v49 = vadd.f32 %v8807_v56, %v4891_v62 }
 0x6ea   : > { %v5043_v44 = vmax.f32 %v5007_v15, 0.0  ;;  %v5006_v17 = vadd.f32 %v4970_v60, %v4934_v49 }
 0x6ec   : > { %5288 = vst.msk [vmem:[%s8829_s18 + $0xec] sm:$0xf] %vm5058_vm13, %v5043_v44  ;;  %v5042_v39 = vmax.f32 %v5006_v17, 0.0 }
 0x6ed   : > { %5289 = vst.msk [vmem:[%s8829_s18 + $0xea] sm:$0xc0] %vm5061_vm14, %v5043_v44 }
 0x6ee   : > { %5287 = vst.msk [vmem:[%s8829_s18 + $0xe4] sm:$0xff] %vm338_vm0, %v5042_v39 }
 0x6f0   : > { %v5529_v28 = vpop.f32.mrf.mxu1 }
 0x6f1   : > { %v4894_v10 = vmul.f32 %v5529_v28, %v8798_v12 }
 0x6f2   : > { %v4843_v36 = vpop.f32.mrf.mxu1 }
 0x6f3   : > { %v4937_v52 = vadd.f32 %v8807_v56, %v4894_v10  ;;  %v4893_v40 = vmul.f32 %v8798_v12, %v4843_v36 }
 0x6f5   : > { %v5009_v43 = vadd.f32 %v4973_v51, %v4937_v52  ;;  %v4936_v4 = vadd.f32 %v8807_v56, %v4893_v40 }
 0x6f7   : > { %v5045_v22 = vmax.f32 %v5009_v43, 0.0  ;;  %v5008_v34 = vadd.f32 %v4972_v24, %v4936_v4 }
 0x6f9   : > { %5291 = vst.msk [vmem:[%s8829_s18 + $0xfa] sm:$0x3f] %vm379_vm1, %v5045_v22  ;;  %v5044_v42 = vmax.f32 %v5008_v34, 0.0 }
 0x6fb   : > { %5290 = vst.msk [vmem:[%s8829_s18 + $0xf2] sm:$0xff] %vm338_vm0, %v5044_v42 }
 0x6fc PF: > { %s18_s27 = sadd.s32 1, %s5556_s27  }
 0x6fd   : > { %p15_p4 = scmp.ge.s32.totalorder %s18_s27, 4  }
 0x6ff   :  { %17 = sbr.rel (!%p15_p4) target bundleno = 1 (0x1), region = 97 }

</bundles_post_ra>
